<compile_context>
chip_gen: v7x
topology: tpu7x:2x2x1
jax: 0.10.0
libtpu: 0.0.40
codegen_flags: <defaults>
</compile_context>

<pallas_src>
import jax
import jax.numpy as jnp
from jax.experimental import pallas as pl
from jax.experimental.pallas import tpu as pltpu


# ---------------------------------------------------------------------------
# Fused conv3x3 + bias + ReLU + maxpool(2,2) kernel (one image per grid step)
# ---------------------------------------------------------------------------
def _make_conv_relu_pool_kernel(H, W, Cin, Cout, Ho, Wo):
    """The image arrives flattened: row r = h*Wp + w of the zero-padded image
    (1 top / 2 bottom guard rows, 1 left/right column), Wp = W + 2.  Tap (dh,dw)
    of the conv is then a *contiguous* row slice [dh*Wp+dw, dh*Wp+dw + H*Wp) of
    that matrix, so the conv is 9 shifted matmuls accumulated in f32.  Columns
    w in {W, W+1} of the flat conv output are wrap-around garbage and are never
    read by the pooling stage (floor mode)."""
    Wp = W + 2
    M = H * Wp

    def kernel(x_ref, w_ref, b_ref, o_ref, y_ref):
        # x_ref: (1, (H+3)*Wp, Cin) f32   flattened padded image
        # w_ref: (3, 3, Cin, Cout)  bf16
        # b_ref: (1, Cout)          f32
        # o_ref: (1, Ho, Wo, Cout)  f32   pooled NHWC output
        # y_ref: VMEM scratch (M, Cout) f32   full-width conv output
        x = x_ref[0]                                        # [(H+3)*Wp, Cin]
        acc = jnp.zeros((M, Cout), jnp.float32)
        for dh in range(3):
            for dw in range(3):
                off = dh * Wp + dw
                patch = x[off:off + M, :]                   # [M, Cin]
                w_tap = w_ref[dh, dw]                       # [Cin, Cout] bf16
                if Cin == 1:
                    # Degenerate K=1 contraction: keep it on the VPU in f32.
                    acc = acc + patch * w_tap.astype(jnp.float32)
                else:
                    acc = acc + jnp.dot(patch.astype(jnp.bfloat16), w_tap,
                                        preferred_element_type=jnp.float32)
        y_ref[...] = jnp.maximum(acc + b_ref[...], 0.0)      # bias + ReLU (f32)

        # 2x2 max pool via strided reads of the flat conv output.
        for ho in range(Ho):
            r0 = (2 * ho) * Wp
            r1 = r0 + Wp
            p00 = y_ref[pl.ds(r0, Wo, 2), :]
            p01 = y_ref[pl.ds(r0 + 1, Wo, 2), :]
            p10 = y_ref[pl.ds(r1, Wo, 2), :]
            p11 = y_ref[pl.ds(r1 + 1, Wo, 2), :]
            o_ref[0, ho] = jnp.maximum(jnp.maximum(p00, p01),
                                       jnp.maximum(p10, p11))

    return kernel


def conv3x3_relu_pool(x_nhwc, w, b):
    """x_nhwc: [N,H,W,Cin] f32; w: [3,3,Cin,Cout] bf16; b: [1,Cout] f32."""
    n, h, wd, cin = x_nhwc.shape
    cout = w.shape[-1]
    ho, wo = h // 2, wd // 2
    wp = wd + 2
    rows = (h + 3) * wp

    # Zero halo (+2 guard rows so every tap slice stays in bounds), then a
    # contiguous (data-movement-free) flatten of the spatial dims.
    xp = jnp.pad(x_nhwc, ((0, 0), (1, 2), (1, 1), (0, 0)))
    xf = xp.reshape(n, rows, cin)

    kernel = _make_conv_relu_pool_kernel(h, wd, cin, cout, ho, wo)
    flops = 2 * n * h * wd * 9 * cin * cout
    bytes_accessed = (xf.size * 4 + w.size * 2 + b.size * 4
                      + n * ho * wo * cout * 4)
    return pl.pallas_call(
        kernel,
        out_shape=jax.ShapeDtypeStruct((n, ho, wo, cout), jnp.float32),
        grid=(n,),
        in_specs=[
            pl.BlockSpec((1, rows, cin), lambda i: (i, 0, 0)),
            pl.BlockSpec((3, 3, cin, cout), lambda i: (0, 0, 0, 0)),
            pl.BlockSpec((1, cout), lambda i: (0, 0)),
        ],
        out_specs=pl.BlockSpec((1, ho, wo, cout), lambda i: (i, 0, 0, 0)),
        scratch_shapes=[pltpu.VMEM((h * wp, cout), jnp.float32)],
        compiler_params=pltpu.CompilerParams(
            dimension_semantics=("parallel",)),
        cost_estimate=pl.CostEstimate(
            flops=flops, transcendentals=0, bytes_accessed=bytes_accessed),
    )(xf, w, b)


# ---------------------------------------------------------------------------
# Fused fc1(+ReLU) + fc2 kernel (fc2 padded to 128 lanes for unmasked stores)
# ---------------------------------------------------------------------------
def _fc_fused_kernel(x_ref, w1_ref, b1_ref, w2_ref, b2_ref, o_ref):
    h = jnp.dot(x_ref[...].astype(jnp.bfloat16), w1_ref[...],
                preferred_element_type=jnp.float32)
    h = jnp.maximum(h + b1_ref[...], 0.0)
    o_ref[...] = jnp.dot(h.astype(jnp.bfloat16), w2_ref[...],
                         preferred_element_type=jnp.float32) + b2_ref[...]


def fc_fused(x, w1, b1, w2, b2):
    n = x.shape[0]
    return pl.pallas_call(
        _fc_fused_kernel,
        out_shape=jax.ShapeDtypeStruct((n, w2.shape[1]), jnp.float32),
    )(x, w1, b1, w2, b2)


# ---------------------------------------------------------------------------
# Parameters: deterministic torch-convention init + one-time kernel-layout prep
# ---------------------------------------------------------------------------
def init_params(key):
    ks = jax.random.split(key, 10)

    def conv_init(kw, kb, cout, cin):
        bound = 1.0 / jnp.sqrt(cin * 9.0)
        w = jax.random.uniform(kw, (cout, cin, 3, 3), jnp.float32, -bound, bound)
        b = jax.random.uniform(kb, (cout,), jnp.float32, -bound, bound)
        return w, b

    def fc_init(kw, kb, fout, fin):
        bound = 1.0 / jnp.sqrt(float(fin))
        w = jax.random.uniform(kw, (fout, fin), jnp.float32, -bound, bound)
        b = jax.random.uniform(kb, (fout,), jnp.float32, -bound, bound)
        return w, b

    p = {}
    p["w1"], p["b1"] = conv_init(ks[0], ks[1], 32, 1)
    p["w2"], p["b2"] = conv_init(ks[2], ks[3], 64, 32)
    p["w3"], p["b3"] = conv_init(ks[4], ks[5], 128, 64)
    p["fc1_w"], p["fc1_b"] = fc_init(ks[6], ks[7], 625, 3 * 3 * 128)
    p["fc2_w"], p["fc2_b"] = fc_init(ks[8], ks[9], 10, 625)
    return p


def prepare_params(p):
    """Torch layouts -> kernel layouts (bf16 weights, NHWC conv, padded fc2)."""
    def prep_conv(w, b):
        wk = jnp.transpose(w, (2, 3, 1, 0)).astype(jnp.bfloat16)  # [3,3,Cin,Cout]
        return wk, b.reshape(1, -1).astype(jnp.float32)

    out = {}
    out["w1"], out["b1"] = prep_conv(p["w1"], p["b1"])
    out["w2"], out["b2"] = prep_conv(p["w2"], p["b2"])
    out["w3"], out["b3"] = prep_conv(p["w3"], p["b3"])

    # fc1: torch weight [625, 1152] with in-features in CHW order (c*9+h*3+w).
    # The kernel flattens activations in HWC order, so permute the rows once.
    w1t = p["fc1_w"].T                                   # [1152, 625], CHW rows
    w1t = w1t.reshape(128, 3, 3, 625).transpose(1, 2, 0, 3).reshape(1152, 625)
    out["fc1_w"] = w1t.astype(jnp.bfloat16)
    out["fc1_b"] = p["fc1_b"].reshape(1, -1).astype(jnp.float32)

    # fc2: transpose and zero-pad the 10 output columns to 128 lanes.
    w2t = p["fc2_w"].T                                   # [625, 10]
    out["fc2_w"] = jnp.zeros((625, 128), jnp.float32).at[:, :10].set(
        w2t).astype(jnp.bfloat16)
    out["fc2_b"] = jnp.zeros((1, 128), jnp.float32).at[0, :10].set(p["fc2_b"])
    return out


# ---------------------------------------------------------------------------
# Forward pass (matches torch CNN.forward semantics)
# ---------------------------------------------------------------------------
@jax.jit
def cnn_forward(x_nchw, params):
    x = jnp.transpose(x_nchw, (0, 2, 3, 1))                      # NHWC
    x = conv3x3_relu_pool(x, params["w1"], params["b1"])         # [N,14,14, 32]
    x = conv3x3_relu_pool(x, params["w2"], params["b2"])         # [N, 7, 7, 64]
    x = conv3x3_relu_pool(x, params["w3"], params["b3"])         # [N, 3, 3,128]
    x = x.reshape(x.shape[0], -1)                                # [N,1152] (HWC)
    logits_padded = fc_fused(x, params["fc1_w"], params["fc1_b"],
                             params["fc2_w"], params["fc2_b"])   # [N,128]
    return logits_padded[:, :10]


if __name__ == "__main__":
    key = jax.random.PRNGKey(0)
    k_x, k_p = jax.random.split(key)
    # 28x28 input is required by the 3*3*128 -> 625 linear layer.
    x = jax.random.normal(k_x, (2, 1, 28, 28), dtype=jnp.float32)
    params = prepare_params(init_params(k_p))

    logits = cnn_forward(x, params)
    jax.block_until_ready(logits)
    assert logits.shape == (2, 10), logits.shape
    print("KERNEL_OK")
</pallas_src>

<mosaic_0001>
module attributes {stable_mosaic.version = 11 : i64} {
  func.func @kernel(%arg0: i32, %arg1: memref<1x930x1xf32, #tpu.memory_space<vmem>>, %arg2: memref<3x3x1x32xbf16, #tpu.memory_space<vmem>>, %arg3: memref<1x32xf32, #tpu.memory_space<vmem>>, %arg4: memref<1x14x14x32xf32, #tpu.memory_space<vmem>>, %arg5: memref<840x32xf32, #tpu.memory_space<vmem>>) attributes {dimension_semantics = [#tpu.dimension_semantics<parallel>], iteration_bounds = array<i64: 2>, scalar_prefetch = 0 : i64, scratch_operands = 1 : i64, tpu.core_type = #tpu.core_type<tc>, window_params = [{transform_indices = @transform_0, window_bounds = array<i64: 1, 930, 1>}, {pipeline_mode = #tpu.pipeline_mode<synchronous>, transform_indices = @transform_1, window_bounds = array<i64: 3, 3, 1, 32>}, {pipeline_mode = #tpu.pipeline_mode<synchronous>, transform_indices = @transform_2, window_bounds = array<i64: 1, 32>}, {transform_indices = @transform_3, window_bounds = array<i64: 1, 14, 14, 32>}]} {
    %c0 = arith.constant 0 : index
    %c0_0 = arith.constant 0 : index
    %c0_1 = arith.constant 0 : index
    %0 = vector.load %arg1[%c0, %c0_0, %c0_1] : memref<1x930x1xf32, #tpu.memory_space<vmem>>, vector<1x930x1xf32>
    %1 = vector.shape_cast %0 : vector<1x930x1xf32> to vector<930x1xf32>
    %cst = arith.constant 0.000000e+00 : f32
    %2 = vector.broadcast %cst : f32 to vector<840x32xf32>
    %3 = vector.extract_strided_slice %1 {offsets = [0, 0], sizes = [840, 1], strides = [1, 1]} : vector<930x1xf32> to vector<840x1xf32>
    %c0_2 = arith.constant 0 : index
    %c0_3 = arith.constant 0 : index
    %c0_4 = arith.constant 0 : index
    %c0_5 = arith.constant 0 : index
    %4 = vector.load %arg2[%c0_2, %c0_3, %c0_4, %c0_5] : memref<3x3x1x32xbf16, #tpu.memory_space<vmem>>, vector<1x1x1x32xbf16>
    %5 = vector.shape_cast %4 : vector<1x1x1x32xbf16> to vector<1x32xbf16>
    %6 = arith.extf %5 : vector<1x32xbf16> to vector<1x32xf32>
    %7 = vector.broadcast %3 : vector<840x1xf32> to vector<840x32xf32>
    %8 = vector.broadcast %6 : vector<1x32xf32> to vector<840x32xf32>
    %9 = arith.mulf %7, %8 : vector<840x32xf32>
    %10 = arith.addf %2, %9 : vector<840x32xf32>
    %11 = vector.extract_strided_slice %1 {offsets = [1, 0], sizes = [840, 1], strides = [1, 1]} : vector<930x1xf32> to vector<840x1xf32>
    %c0_6 = arith.constant 0 : index
    %c1 = arith.constant 1 : index
    %c0_7 = arith.constant 0 : index
    %c0_8 = arith.constant 0 : index
    %12 = vector.load %arg2[%c0_6, %c1, %c0_7, %c0_8] : memref<3x3x1x32xbf16, #tpu.memory_space<vmem>>, vector<1x1x1x32xbf16>
    %13 = vector.shape_cast %12 : vector<1x1x1x32xbf16> to vector<1x32xbf16>
    %14 = arith.extf %13 : vector<1x32xbf16> to vector<1x32xf32>
    %15 = vector.broadcast %11 : vector<840x1xf32> to vector<840x32xf32>
    %16 = vector.broadcast %14 : vector<1x32xf32> to vector<840x32xf32>
    %17 = arith.mulf %15, %16 : vector<840x32xf32>
    %18 = arith.addf %10, %17 : vector<840x32xf32>
    %19 = vector.extract_strided_slice %1 {offsets = [2, 0], sizes = [840, 1], strides = [1, 1]} : vector<930x1xf32> to vector<840x1xf32>
    %c0_9 = arith.constant 0 : index
    %c2 = arith.constant 2 : index
    %c0_10 = arith.constant 0 : index
    %c0_11 = arith.constant 0 : index
    %20 = vector.load %arg2[%c0_9, %c2, %c0_10, %c0_11] : memref<3x3x1x32xbf16, #tpu.memory_space<vmem>>, vector<1x1x1x32xbf16>
    %21 = vector.shape_cast %20 : vector<1x1x1x32xbf16> to vector<1x32xbf16>
    %22 = arith.extf %21 : vector<1x32xbf16> to vector<1x32xf32>
    %23 = vector.broadcast %19 : vector<840x1xf32> to vector<840x32xf32>
    %24 = vector.broadcast %22 : vector<1x32xf32> to vector<840x32xf32>
    %25 = arith.mulf %23, %24 : vector<840x32xf32>
    %26 = arith.addf %18, %25 : vector<840x32xf32>
    %27 = vector.extract_strided_slice %1 {offsets = [30, 0], sizes = [840, 1], strides = [1, 1]} : vector<930x1xf32> to vector<840x1xf32>
    %c1_12 = arith.constant 1 : index
    %c0_13 = arith.constant 0 : index
    %c0_14 = arith.constant 0 : index
    %c0_15 = arith.constant 0 : index
    %28 = vector.load %arg2[%c1_12, %c0_13, %c0_14, %c0_15] : memref<3x3x1x32xbf16, #tpu.memory_space<vmem>>, vector<1x1x1x32xbf16>
    %29 = vector.shape_cast %28 : vector<1x1x1x32xbf16> to vector<1x32xbf16>
    %30 = arith.extf %29 : vector<1x32xbf16> to vector<1x32xf32>
    %31 = vector.broadcast %27 : vector<840x1xf32> to vector<840x32xf32>
    %32 = vector.broadcast %30 : vector<1x32xf32> to vector<840x32xf32>
    %33 = arith.mulf %31, %32 : vector<840x32xf32>
    %34 = arith.addf %26, %33 : vector<840x32xf32>
    %35 = vector.extract_strided_slice %1 {offsets = [31, 0], sizes = [840, 1], strides = [1, 1]} : vector<930x1xf32> to vector<840x1xf32>
    %c1_16 = arith.constant 1 : index
    %c1_17 = arith.constant 1 : index
    %c0_18 = arith.constant 0 : index
    %c0_19 = arith.constant 0 : index
    %36 = vector.load %arg2[%c1_16, %c1_17, %c0_18, %c0_19] : memref<3x3x1x32xbf16, #tpu.memory_space<vmem>>, vector<1x1x1x32xbf16>
    %37 = vector.shape_cast %36 : vector<1x1x1x32xbf16> to vector<1x32xbf16>
    %38 = arith.extf %37 : vector<1x32xbf16> to vector<1x32xf32>
    %39 = vector.broadcast %35 : vector<840x1xf32> to vector<840x32xf32>
    %40 = vector.broadcast %38 : vector<1x32xf32> to vector<840x32xf32>
    %41 = arith.mulf %39, %40 : vector<840x32xf32>
    %42 = arith.addf %34, %41 : vector<840x32xf32>
    %43 = vector.extract_strided_slice %1 {offsets = [32, 0], sizes = [840, 1], strides = [1, 1]} : vector<930x1xf32> to vector<840x1xf32>
    %c1_20 = arith.constant 1 : index
    %c2_21 = arith.constant 2 : index
    %c0_22 = arith.constant 0 : index
    %c0_23 = arith.constant 0 : index
    %44 = vector.load %arg2[%c1_20, %c2_21, %c0_22, %c0_23] : memref<3x3x1x32xbf16, #tpu.memory_space<vmem>>, vector<1x1x1x32xbf16>
    %45 = vector.shape_cast %44 : vector<1x1x1x32xbf16> to vector<1x32xbf16>
    %46 = arith.extf %45 : vector<1x32xbf16> to vector<1x32xf32>
    %47 = vector.broadcast %43 : vector<840x1xf32> to vector<840x32xf32>
    %48 = vector.broadcast %46 : vector<1x32xf32> to vector<840x32xf32>
    %49 = arith.mulf %47, %48 : vector<840x32xf32>
    %50 = arith.addf %42, %49 : vector<840x32xf32>
    %51 = vector.extract_strided_slice %1 {offsets = [60, 0], sizes = [840, 1], strides = [1, 1]} : vector<930x1xf32> to vector<840x1xf32>
    %c2_24 = arith.constant 2 : index
    %c0_25 = arith.constant 0 : index
    %c0_26 = arith.constant 0 : index
    %c0_27 = arith.constant 0 : index
    %52 = vector.load %arg2[%c2_24, %c0_25, %c0_26, %c0_27] : memref<3x3x1x32xbf16, #tpu.memory_space<vmem>>, vector<1x1x1x32xbf16>
    %53 = vector.shape_cast %52 : vector<1x1x1x32xbf16> to vector<1x32xbf16>
    %54 = arith.extf %53 : vector<1x32xbf16> to vector<1x32xf32>
    %55 = vector.broadcast %51 : vector<840x1xf32> to vector<840x32xf32>
    %56 = vector.broadcast %54 : vector<1x32xf32> to vector<840x32xf32>
    %57 = arith.mulf %55, %56 : vector<840x32xf32>
    %58 = arith.addf %50, %57 : vector<840x32xf32>
    %59 = vector.extract_strided_slice %1 {offsets = [61, 0], sizes = [840, 1], strides = [1, 1]} : vector<930x1xf32> to vector<840x1xf32>
    %c2_28 = arith.constant 2 : index
    %c1_29 = arith.constant 1 : index
    %c0_30 = arith.constant 0 : index
    %c0_31 = arith.constant 0 : index
    %60 = vector.load %arg2[%c2_28, %c1_29, %c0_30, %c0_31] : memref<3x3x1x32xbf16, #tpu.memory_space<vmem>>, vector<1x1x1x32xbf16>
    %61 = vector.shape_cast %60 : vector<1x1x1x32xbf16> to vector<1x32xbf16>
    %62 = arith.extf %61 : vector<1x32xbf16> to vector<1x32xf32>
    %63 = vector.broadcast %59 : vector<840x1xf32> to vector<840x32xf32>
    %64 = vector.broadcast %62 : vector<1x32xf32> to vector<840x32xf32>
    %65 = arith.mulf %63, %64 : vector<840x32xf32>
    %66 = arith.addf %58, %65 : vector<840x32xf32>
    %67 = vector.extract_strided_slice %1 {offsets = [62, 0], sizes = [840, 1], strides = [1, 1]} : vector<930x1xf32> to vector<840x1xf32>
    %c2_32 = arith.constant 2 : index
    %c2_33 = arith.constant 2 : index
    %c0_34 = arith.constant 0 : index
    %c0_35 = arith.constant 0 : index
    %68 = vector.load %arg2[%c2_32, %c2_33, %c0_34, %c0_35] : memref<3x3x1x32xbf16, #tpu.memory_space<vmem>>, vector<1x1x1x32xbf16>
    %69 = vector.shape_cast %68 : vector<1x1x1x32xbf16> to vector<1x32xbf16>
    %70 = arith.extf %69 : vector<1x32xbf16> to vector<1x32xf32>
    %71 = vector.broadcast %67 : vector<840x1xf32> to vector<840x32xf32>
    %72 = vector.broadcast %70 : vector<1x32xf32> to vector<840x32xf32>
    %73 = arith.mulf %71, %72 : vector<840x32xf32>
    %74 = arith.addf %66, %73 : vector<840x32xf32>
    %c0_36 = arith.constant 0 : index
    %c0_37 = arith.constant 0 : index
    %75 = vector.load %arg3[%c0_36, %c0_37] : memref<1x32xf32, #tpu.memory_space<vmem>>, vector<1x32xf32>
    %76 = vector.broadcast %75 : vector<1x32xf32> to vector<840x32xf32>
    %77 = arith.addf %74, %76 : vector<840x32xf32>
    %cst_38 = arith.constant 0.000000e+00 : f32
    %78 = vector.broadcast %cst_38 : f32 to vector<840x32xf32>
    %79 = arith.maximumf %77, %78 : vector<840x32xf32>
    %c0_39 = arith.constant 0 : index
    %c0_40 = arith.constant 0 : index
    %80 = vector.load %arg5[%c0_39, %c0_40] : memref<840x32xf32, #tpu.memory_space<vmem>>, vector<840x32xf32>
    tpu.vector_store %arg5[%c0_39, %c0_40], %79 {strides = array<i32>} : memref<840x32xf32, #tpu.memory_space<vmem>>, vector<840x32xf32>,
    %c0_41 = arith.constant 0 : index
    %c0_42 = arith.constant 0 : index
    %81 = tpu.strided_load %arg5[%c0_41, %c0_42] {strides = array<i32: 2, 1>} : memref<840x32xf32, #tpu.memory_space<vmem>>, vector<14x32xf32>
    %c1_43 = arith.constant 1 : index
    %c0_44 = arith.constant 0 : index
    %82 = tpu.strided_load %arg5[%c1_43, %c0_44] {strides = array<i32: 2, 1>} : memref<840x32xf32, #tpu.memory_space<vmem>>, vector<14x32xf32>
    %c30 = arith.constant 30 : index
    %c0_45 = arith.constant 0 : index
    %83 = tpu.strided_load %arg5[%c30, %c0_45] {strides = array<i32: 2, 1>} : memref<840x32xf32, #tpu.memory_space<vmem>>, vector<14x32xf32>
    %c31 = arith.constant 31 : index
    %c0_46 = arith.constant 0 : index
    %84 = tpu.strided_load %arg5[%c31, %c0_46] {strides = array<i32: 2, 1>} : memref<840x32xf32, #tpu.memory_space<vmem>>, vector<14x32xf32>
    %85 = arith.maximumf %81, %82 : vector<14x32xf32>
    %86 = arith.maximumf %83, %84 : vector<14x32xf32>
    %87 = arith.maximumf %85, %86 : vector<14x32xf32>
    %c0_47 = arith.constant 0 : index
    %c0_48 = arith.constant 0 : index
    %c0_49 = arith.constant 0 : index
    %c0_50 = arith.constant 0 : index
    %88 = vector.load %arg4[%c0_47, %c0_48, %c0_49, %c0_50] : memref<1x14x14x32xf32, #tpu.memory_space<vmem>>, vector<1x1x14x32xf32>
    %89 = vector.shape_cast %88 : vector<1x1x14x32xf32> to vector<14x32xf32>
    %90 = vector.shape_cast %87 : vector<14x32xf32> to vector<1x1x14x32xf32>
    tpu.vector_store %arg4[%c0_47, %c0_48, %c0_49, %c0_50], %90 {strides = array<i32>} : memref<1x14x14x32xf32, #tpu.memory_space<vmem>>, vector<1x1x14x32xf32>,
    %c60 = arith.constant 60 : index
    %c0_51 = arith.constant 0 : index
    %91 = tpu.strided_load %arg5[%c60, %c0_51] {strides = array<i32: 2, 1>} : memref<840x32xf32, #tpu.memory_space<vmem>>, vector<14x32xf32>
    %c61 = arith.constant 61 : index
    %c0_52 = arith.constant 0 : index
    %92 = tpu.strided_load %arg5[%c61, %c0_52] {strides = array<i32: 2, 1>} : memref<840x32xf32, #tpu.memory_space<vmem>>, vector<14x32xf32>
    %c90 = arith.constant 90 : index
    %c0_53 = arith.constant 0 : index
    %93 = tpu.strided_load %arg5[%c90, %c0_53] {strides = array<i32: 2, 1>} : memref<840x32xf32, #tpu.memory_space<vmem>>, vector<14x32xf32>
    %c91 = arith.constant 91 : index
    %c0_54 = arith.constant 0 : index
    %94 = tpu.strided_load %arg5[%c91, %c0_54] {strides = array<i32: 2, 1>} : memref<840x32xf32, #tpu.memory_space<vmem>>, vector<14x32xf32>
    %95 = arith.maximumf %91, %92 : vector<14x32xf32>
    %96 = arith.maximumf %93, %94 : vector<14x32xf32>
    %97 = arith.maximumf %95, %96 : vector<14x32xf32>
    %c0_55 = arith.constant 0 : index
    %c1_56 = arith.constant 1 : index
    %c0_57 = arith.constant 0 : index
    %c0_58 = arith.constant 0 : index
    %98 = vector.load %arg4[%c0_55, %c1_56, %c0_57, %c0_58] : memref<1x14x14x32xf32, #tpu.memory_space<vmem>>, vector<1x1x14x32xf32>
    %99 = vector.shape_cast %98 : vector<1x1x14x32xf32> to vector<14x32xf32>
    %100 = vector.shape_cast %97 : vector<14x32xf32> to vector<1x1x14x32xf32>
    tpu.vector_store %arg4[%c0_55, %c1_56, %c0_57, %c0_58], %100 {strides = array<i32>} : memref<1x14x14x32xf32, #tpu.memory_space<vmem>>, vector<1x1x14x32xf32>,
    %c120 = arith.constant 120 : index
    %c0_59 = arith.constant 0 : index
    %101 = tpu.strided_load %arg5[%c120, %c0_59] {strides = array<i32: 2, 1>} : memref<840x32xf32, #tpu.memory_space<vmem>>, vector<14x32xf32>
    %c121 = arith.constant 121 : index
    %c0_60 = arith.constant 0 : index
    %102 = tpu.strided_load %arg5[%c121, %c0_60] {strides = array<i32: 2, 1>} : memref<840x32xf32, #tpu.memory_space<vmem>>, vector<14x32xf32>
    %c150 = arith.constant 150 : index
    %c0_61 = arith.constant 0 : index
    %103 = tpu.strided_load %arg5[%c150, %c0_61] {strides = array<i32: 2, 1>} : memref<840x32xf32, #tpu.memory_space<vmem>>, vector<14x32xf32>
    %c151 = arith.constant 151 : index
    %c0_62 = arith.constant 0 : index
    %104 = tpu.strided_load %arg5[%c151, %c0_62] {strides = array<i32: 2, 1>} : memref<840x32xf32, #tpu.memory_space<vmem>>, vector<14x32xf32>
    %105 = arith.maximumf %101, %102 : vector<14x32xf32>
    %106 = arith.maximumf %103, %104 : vector<14x32xf32>
    %107 = arith.maximumf %105, %106 : vector<14x32xf32>
    %c0_63 = arith.constant 0 : index
    %c2_64 = arith.constant 2 : index
    %c0_65 = arith.constant 0 : index
    %c0_66 = arith.constant 0 : index
    %108 = vector.load %arg4[%c0_63, %c2_64, %c0_65, %c0_66] : memref<1x14x14x32xf32, #tpu.memory_space<vmem>>, vector<1x1x14x32xf32>
    %109 = vector.shape_cast %108 : vector<1x1x14x32xf32> to vector<14x32xf32>
    %110 = vector.shape_cast %107 : vector<14x32xf32> to vector<1x1x14x32xf32>
    tpu.vector_store %arg4[%c0_63, %c2_64, %c0_65, %c0_66], %110 {strides = array<i32>} : memref<1x14x14x32xf32, #tpu.memory_space<vmem>>, vector<1x1x14x32xf32>,
    %c180 = arith.constant 180 : index
    %c0_67 = arith.constant 0 : index
    %111 = tpu.strided_load %arg5[%c180, %c0_67] {strides = array<i32: 2, 1>} : memref<840x32xf32, #tpu.memory_space<vmem>>, vector<14x32xf32>
    %c181 = arith.constant 181 : index
    %c0_68 = arith.constant 0 : index
    %112 = tpu.strided_load %arg5[%c181, %c0_68] {strides = array<i32: 2, 1>} : memref<840x32xf32, #tpu.memory_space<vmem>>, vector<14x32xf32>
    %c210 = arith.constant 210 : index
    %c0_69 = arith.constant 0 : index
    %113 = tpu.strided_load %arg5[%c210, %c0_69] {strides = array<i32: 2, 1>} : memref<840x32xf32, #tpu.memory_space<vmem>>, vector<14x32xf32>
    %c211 = arith.constant 211 : index
    %c0_70 = arith.constant 0 : index
    %114 = tpu.strided_load %arg5[%c211, %c0_70] {strides = array<i32: 2, 1>} : memref<840x32xf32, #tpu.memory_space<vmem>>, vector<14x32xf32>
    %115 = arith.maximumf %111, %112 : vector<14x32xf32>
    %116 = arith.maximumf %113, %114 : vector<14x32xf32>
    %117 = arith.maximumf %115, %116 : vector<14x32xf32>
    %c0_71 = arith.constant 0 : index
    %c3 = arith.constant 3 : index
    %c0_72 = arith.constant 0 : index
    %c0_73 = arith.constant 0 : index
    %118 = vector.load %arg4[%c0_71, %c3, %c0_72, %c0_73] : memref<1x14x14x32xf32, #tpu.memory_space<vmem>>, vector<1x1x14x32xf32>
    %119 = vector.shape_cast %118 : vector<1x1x14x32xf32> to vector<14x32xf32>
    %120 = vector.shape_cast %117 : vector<14x32xf32> to vector<1x1x14x32xf32>
    tpu.vector_store %arg4[%c0_71, %c3, %c0_72, %c0_73], %120 {strides = array<i32>} : memref<1x14x14x32xf32, #tpu.memory_space<vmem>>, vector<1x1x14x32xf32>,
    %c240 = arith.constant 240 : index
    %c0_74 = arith.constant 0 : index
    %121 = tpu.strided_load %arg5[%c240, %c0_74] {strides = array<i32: 2, 1>} : memref<840x32xf32, #tpu.memory_space<vmem>>, vector<14x32xf32>
    %c241 = arith.constant 241 : index
    %c0_75 = arith.constant 0 : index
    %122 = tpu.strided_load %arg5[%c241, %c0_75] {strides = array<i32: 2, 1>} : memref<840x32xf32, #tpu.memory_space<vmem>>, vector<14x32xf32>
    %c270 = arith.constant 270 : index
    %c0_76 = arith.constant 0 : index
    %123 = tpu.strided_load %arg5[%c270, %c0_76] {strides = array<i32: 2, 1>} : memref<840x32xf32, #tpu.memory_space<vmem>>, vector<14x32xf32>
    %c271 = arith.constant 271 : index
    %c0_77 = arith.constant 0 : index
    %124 = tpu.strided_load %arg5[%c271, %c0_77] {strides = array<i32: 2, 1>} : memref<840x32xf32, #tpu.memory_space<vmem>>, vector<14x32xf32>
    %125 = arith.maximumf %121, %122 : vector<14x32xf32>
    %126 = arith.maximumf %123, %124 : vector<14x32xf32>
    %127 = arith.maximumf %125, %126 : vector<14x32xf32>
    %c0_78 = arith.constant 0 : index
    %c4 = arith.constant 4 : index
    %c0_79 = arith.constant 0 : index
    %c0_80 = arith.constant 0 : index
    %128 = vector.load %arg4[%c0_78, %c4, %c0_79, %c0_80] : memref<1x14x14x32xf32, #tpu.memory_space<vmem>>, vector<1x1x14x32xf32>
    %129 = vector.shape_cast %128 : vector<1x1x14x32xf32> to vector<14x32xf32>
    %130 = vector.shape_cast %127 : vector<14x32xf32> to vector<1x1x14x32xf32>
    tpu.vector_store %arg4[%c0_78, %c4, %c0_79, %c0_80], %130 {strides = array<i32>} : memref<1x14x14x32xf32, #tpu.memory_space<vmem>>, vector<1x1x14x32xf32>,
    %c300 = arith.constant 300 : index
    %c0_81 = arith.constant 0 : index
    %131 = tpu.strided_load %arg5[%c300, %c0_81] {strides = array<i32: 2, 1>} : memref<840x32xf32, #tpu.memory_space<vmem>>, vector<14x32xf32>
    %c301 = arith.constant 301 : index
    %c0_82 = arith.constant 0 : index
    %132 = tpu.strided_load %arg5[%c301, %c0_82] {strides = array<i32: 2, 1>} : memref<840x32xf32, #tpu.memory_space<vmem>>, vector<14x32xf32>
    %c330 = arith.constant 330 : index
    %c0_83 = arith.constant 0 : index
    %133 = tpu.strided_load %arg5[%c330, %c0_83] {strides = array<i32: 2, 1>} : memref<840x32xf32, #tpu.memory_space<vmem>>, vector<14x32xf32>
    %c331 = arith.constant 331 : index
    %c0_84 = arith.constant 0 : index
    %134 = tpu.strided_load %arg5[%c331, %c0_84] {strides = array<i32: 2, 1>} : memref<840x32xf32, #tpu.memory_space<vmem>>, vector<14x32xf32>
    %135 = arith.maximumf %131, %132 : vector<14x32xf32>
    %136 = arith.maximumf %133, %134 : vector<14x32xf32>
    %137 = arith.maximumf %135, %136 : vector<14x32xf32>
    %c0_85 = arith.constant 0 : index
    %c5 = arith.constant 5 : index
    %c0_86 = arith.constant 0 : index
    %c0_87 = arith.constant 0 : index
    %138 = vector.load %arg4[%c0_85, %c5, %c0_86, %c0_87] : memref<1x14x14x32xf32, #tpu.memory_space<vmem>>, vector<1x1x14x32xf32>
    %139 = vector.shape_cast %138 : vector<1x1x14x32xf32> to vector<14x32xf32>
    %140 = vector.shape_cast %137 : vector<14x32xf32> to vector<1x1x14x32xf32>
    tpu.vector_store %arg4[%c0_85, %c5, %c0_86, %c0_87], %140 {strides = array<i32>} : memref<1x14x14x32xf32, #tpu.memory_space<vmem>>, vector<1x1x14x32xf32>,
    %c360 = arith.constant 360 : index
    %c0_88 = arith.constant 0 : index
    %141 = tpu.strided_load %arg5[%c360, %c0_88] {strides = array<i32: 2, 1>} : memref<840x32xf32, #tpu.memory_space<vmem>>, vector<14x32xf32>
    %c361 = arith.constant 361 : index
    %c0_89 = arith.constant 0 : index
    %142 = tpu.strided_load %arg5[%c361, %c0_89] {strides = array<i32: 2, 1>} : memref<840x32xf32, #tpu.memory_space<vmem>>, vector<14x32xf32>
    %c390 = arith.constant 390 : index
    %c0_90 = arith.constant 0 : index
    %143 = tpu.strided_load %arg5[%c390, %c0_90] {strides = array<i32: 2, 1>} : memref<840x32xf32, #tpu.memory_space<vmem>>, vector<14x32xf32>
    %c391 = arith.constant 391 : index
    %c0_91 = arith.constant 0 : index
    %144 = tpu.strided_load %arg5[%c391, %c0_91] {strides = array<i32: 2, 1>} : memref<840x32xf32, #tpu.memory_space<vmem>>, vector<14x32xf32>
    %145 = arith.maximumf %141, %142 : vector<14x32xf32>
    %146 = arith.maximumf %143, %144 : vector<14x32xf32>
    %147 = arith.maximumf %145, %146 : vector<14x32xf32>
    %c0_92 = arith.constant 0 : index
    %c6 = arith.constant 6 : index
    %c0_93 = arith.constant 0 : index
    %c0_94 = arith.constant 0 : index
    %148 = vector.load %arg4[%c0_92, %c6, %c0_93, %c0_94] : memref<1x14x14x32xf32, #tpu.memory_space<vmem>>, vector<1x1x14x32xf32>
    %149 = vector.shape_cast %148 : vector<1x1x14x32xf32> to vector<14x32xf32>
    %150 = vector.shape_cast %147 : vector<14x32xf32> to vector<1x1x14x32xf32>
    tpu.vector_store %arg4[%c0_92, %c6, %c0_93, %c0_94], %150 {strides = array<i32>} : memref<1x14x14x32xf32, #tpu.memory_space<vmem>>, vector<1x1x14x32xf32>,
    %c420 = arith.constant 420 : index
    %c0_95 = arith.constant 0 : index
    %151 = tpu.strided_load %arg5[%c420, %c0_95] {strides = array<i32: 2, 1>} : memref<840x32xf32, #tpu.memory_space<vmem>>, vector<14x32xf32>
    %c421 = arith.constant 421 : index
    %c0_96 = arith.constant 0 : index
    %152 = tpu.strided_load %arg5[%c421, %c0_96] {strides = array<i32: 2, 1>} : memref<840x32xf32, #tpu.memory_space<vmem>>, vector<14x32xf32>
    %c450 = arith.constant 450 : index
    %c0_97 = arith.constant 0 : index
    %153 = tpu.strided_load %arg5[%c450, %c0_97] {strides = array<i32: 2, 1>} : memref<840x32xf32, #tpu.memory_space<vmem>>, vector<14x32xf32>
    %c451 = arith.constant 451 : index
    %c0_98 = arith.constant 0 : index
    %154 = tpu.strided_load %arg5[%c451, %c0_98] {strides = array<i32: 2, 1>} : memref<840x32xf32, #tpu.memory_space<vmem>>, vector<14x32xf32>
    %155 = arith.maximumf %151, %152 : vector<14x32xf32>
    %156 = arith.maximumf %153, %154 : vector<14x32xf32>
    %157 = arith.maximumf %155, %156 : vector<14x32xf32>
    %c0_99 = arith.constant 0 : index
    %c7 = arith.constant 7 : index
    %c0_100 = arith.constant 0 : index
    %c0_101 = arith.constant 0 : index
    %158 = vector.load %arg4[%c0_99, %c7, %c0_100, %c0_101] : memref<1x14x14x32xf32, #tpu.memory_space<vmem>>, vector<1x1x14x32xf32>
    %159 = vector.shape_cast %158 : vector<1x1x14x32xf32> to vector<14x32xf32>
    %160 = vector.shape_cast %157 : vector<14x32xf32> to vector<1x1x14x32xf32>
    tpu.vector_store %arg4[%c0_99, %c7, %c0_100, %c0_101], %160 {strides = array<i32>} : memref<1x14x14x32xf32, #tpu.memory_space<vmem>>, vector<1x1x14x32xf32>,
    %c480 = arith.constant 480 : index
    %c0_102 = arith.constant 0 : index
    %161 = tpu.strided_load %arg5[%c480, %c0_102] {strides = array<i32: 2, 1>} : memref<840x32xf32, #tpu.memory_space<vmem>>, vector<14x32xf32>
    %c481 = arith.constant 481 : index
    %c0_103 = arith.constant 0 : index
    %162 = tpu.strided_load %arg5[%c481, %c0_103] {strides = array<i32: 2, 1>} : memref<840x32xf32, #tpu.memory_space<vmem>>, vector<14x32xf32>
    %c510 = arith.constant 510 : index
    %c0_104 = arith.constant 0 : index
    %163 = tpu.strided_load %arg5[%c510, %c0_104] {strides = array<i32: 2, 1>} : memref<840x32xf32, #tpu.memory_space<vmem>>, vector<14x32xf32>
    %c511 = arith.constant 511 : index
    %c0_105 = arith.constant 0 : index
    %164 = tpu.strided_load %arg5[%c511, %c0_105] {strides = array<i32: 2, 1>} : memref<840x32xf32, #tpu.memory_space<vmem>>, vector<14x32xf32>
    %165 = arith.maximumf %161, %162 : vector<14x32xf32>
    %166 = arith.maximumf %163, %164 : vector<14x32xf32>
    %167 = arith.maximumf %165, %166 : vector<14x32xf32>
    %c0_106 = arith.constant 0 : index
    %c8 = arith.constant 8 : index
    %c0_107 = arith.constant 0 : index
    %c0_108 = arith.constant 0 : index
    %168 = vector.load %arg4[%c0_106, %c8, %c0_107, %c0_108] : memref<1x14x14x32xf32, #tpu.memory_space<vmem>>, vector<1x1x14x32xf32>
    %169 = vector.shape_cast %168 : vector<1x1x14x32xf32> to vector<14x32xf32>
    %170 = vector.shape_cast %167 : vector<14x32xf32> to vector<1x1x14x32xf32>
    tpu.vector_store %arg4[%c0_106, %c8, %c0_107, %c0_108], %170 {strides = array<i32>} : memref<1x14x14x32xf32, #tpu.memory_space<vmem>>, vector<1x1x14x32xf32>,
    %c540 = arith.constant 540 : index
    %c0_109 = arith.constant 0 : index
    %171 = tpu.strided_load %arg5[%c540, %c0_109] {strides = array<i32: 2, 1>} : memref<840x32xf32, #tpu.memory_space<vmem>>, vector<14x32xf32>
    %c541 = arith.constant 541 : index
    %c0_110 = arith.constant 0 : index
    %172 = tpu.strided_load %arg5[%c541, %c0_110] {strides = array<i32: 2, 1>} : memref<840x32xf32, #tpu.memory_space<vmem>>, vector<14x32xf32>
    %c570 = arith.constant 570 : index
    %c0_111 = arith.constant 0 : index
    %173 = tpu.strided_load %arg5[%c570, %c0_111] {strides = array<i32: 2, 1>} : memref<840x32xf32, #tpu.memory_space<vmem>>, vector<14x32xf32>
    %c571 = arith.constant 571 : index
    %c0_112 = arith.constant 0 : index
    %174 = tpu.strided_load %arg5[%c571, %c0_112] {strides = array<i32: 2, 1>} : memref<840x32xf32, #tpu.memory_space<vmem>>, vector<14x32xf32>
    %175 = arith.maximumf %171, %172 : vector<14x32xf32>
    %176 = arith.maximumf %173, %174 : vector<14x32xf32>
    %177 = arith.maximumf %175, %176 : vector<14x32xf32>
    %c0_113 = arith.constant 0 : index
    %c9 = arith.constant 9 : index
    %c0_114 = arith.constant 0 : index
    %c0_115 = arith.constant 0 : index
    %178 = vector.load %arg4[%c0_113, %c9, %c0_114, %c0_115] : memref<1x14x14x32xf32, #tpu.memory_space<vmem>>, vector<1x1x14x32xf32>
    %179 = vector.shape_cast %178 : vector<1x1x14x32xf32> to vector<14x32xf32>
    %180 = vector.shape_cast %177 : vector<14x32xf32> to vector<1x1x14x32xf32>
    tpu.vector_store %arg4[%c0_113, %c9, %c0_114, %c0_115], %180 {strides = array<i32>} : memref<1x14x14x32xf32, #tpu.memory_space<vmem>>, vector<1x1x14x32xf32>,
    %c600 = arith.constant 600 : index
    %c0_116 = arith.constant 0 : index
    %181 = tpu.strided_load %arg5[%c600, %c0_116] {strides = array<i32: 2, 1>} : memref<840x32xf32, #tpu.memory_space<vmem>>, vector<14x32xf32>
    %c601 = arith.constant 601 : index
    %c0_117 = arith.constant 0 : index
    %182 = tpu.strided_load %arg5[%c601, %c0_117] {strides = array<i32: 2, 1>} : memref<840x32xf32, #tpu.memory_space<vmem>>, vector<14x32xf32>
    %c630 = arith.constant 630 : index
    %c0_118 = arith.constant 0 : index
    %183 = tpu.strided_load %arg5[%c630, %c0_118] {strides = array<i32: 2, 1>} : memref<840x32xf32, #tpu.memory_space<vmem>>, vector<14x32xf32>
    %c631 = arith.constant 631 : index
    %c0_119 = arith.constant 0 : index
    %184 = tpu.strided_load %arg5[%c631, %c0_119] {strides = array<i32: 2, 1>} : memref<840x32xf32, #tpu.memory_space<vmem>>, vector<14x32xf32>
    %185 = arith.maximumf %181, %182 : vector<14x32xf32>
    %186 = arith.maximumf %183, %184 : vector<14x32xf32>
    %187 = arith.maximumf %185, %186 : vector<14x32xf32>
    %c0_120 = arith.constant 0 : index
    %c10 = arith.constant 10 : index
    %c0_121 = arith.constant 0 : index
    %c0_122 = arith.constant 0 : index
    %188 = vector.load %arg4[%c0_120, %c10, %c0_121, %c0_122] : memref<1x14x14x32xf32, #tpu.memory_space<vmem>>, vector<1x1x14x32xf32>
    %189 = vector.shape_cast %188 : vector<1x1x14x32xf32> to vector<14x32xf32>
    %190 = vector.shape_cast %187 : vector<14x32xf32> to vector<1x1x14x32xf32>
    tpu.vector_store %arg4[%c0_120, %c10, %c0_121, %c0_122], %190 {strides = array<i32>} : memref<1x14x14x32xf32, #tpu.memory_space<vmem>>, vector<1x1x14x32xf32>,
    %c660 = arith.constant 660 : index
    %c0_123 = arith.constant 0 : index
    %191 = tpu.strided_load %arg5[%c660, %c0_123] {strides = array<i32: 2, 1>} : memref<840x32xf32, #tpu.memory_space<vmem>>, vector<14x32xf32>
    %c661 = arith.constant 661 : index
    %c0_124 = arith.constant 0 : index
    %192 = tpu.strided_load %arg5[%c661, %c0_124] {strides = array<i32: 2, 1>} : memref<840x32xf32, #tpu.memory_space<vmem>>, vector<14x32xf32>
    %c690 = arith.constant 690 : index
    %c0_125 = arith.constant 0 : index
    %193 = tpu.strided_load %arg5[%c690, %c0_125] {strides = array<i32: 2, 1>} : memref<840x32xf32, #tpu.memory_space<vmem>>, vector<14x32xf32>
    %c691 = arith.constant 691 : index
    %c0_126 = arith.constant 0 : index
    %194 = tpu.strided_load %arg5[%c691, %c0_126] {strides = array<i32: 2, 1>} : memref<840x32xf32, #tpu.memory_space<vmem>>, vector<14x32xf32>
    %195 = arith.maximumf %191, %192 : vector<14x32xf32>
    %196 = arith.maximumf %193, %194 : vector<14x32xf32>
    %197 = arith.maximumf %195, %196 : vector<14x32xf32>
    %c0_127 = arith.constant 0 : index
    %c11 = arith.constant 11 : index
    %c0_128 = arith.constant 0 : index
    %c0_129 = arith.constant 0 : index
    %198 = vector.load %arg4[%c0_127, %c11, %c0_128, %c0_129] : memref<1x14x14x32xf32, #tpu.memory_space<vmem>>, vector<1x1x14x32xf32>
    %199 = vector.shape_cast %198 : vector<1x1x14x32xf32> to vector<14x32xf32>
    %200 = vector.shape_cast %197 : vector<14x32xf32> to vector<1x1x14x32xf32>
    tpu.vector_store %arg4[%c0_127, %c11, %c0_128, %c0_129], %200 {strides = array<i32>} : memref<1x14x14x32xf32, #tpu.memory_space<vmem>>, vector<1x1x14x32xf32>,
    %c720 = arith.constant 720 : index
    %c0_130 = arith.constant 0 : index
    %201 = tpu.strided_load %arg5[%c720, %c0_130] {strides = array<i32: 2, 1>} : memref<840x32xf32, #tpu.memory_space<vmem>>, vector<14x32xf32>
    %c721 = arith.constant 721 : index
    %c0_131 = arith.constant 0 : index
    %202 = tpu.strided_load %arg5[%c721, %c0_131] {strides = array<i32: 2, 1>} : memref<840x32xf32, #tpu.memory_space<vmem>>, vector<14x32xf32>
    %c750 = arith.constant 750 : index
    %c0_132 = arith.constant 0 : index
    %203 = tpu.strided_load %arg5[%c750, %c0_132] {strides = array<i32: 2, 1>} : memref<840x32xf32, #tpu.memory_space<vmem>>, vector<14x32xf32>
    %c751 = arith.constant 751 : index
    %c0_133 = arith.constant 0 : index
    %204 = tpu.strided_load %arg5[%c751, %c0_133] {strides = array<i32: 2, 1>} : memref<840x32xf32, #tpu.memory_space<vmem>>, vector<14x32xf32>
    %205 = arith.maximumf %201, %202 : vector<14x32xf32>
    %206 = arith.maximumf %203, %204 : vector<14x32xf32>
    %207 = arith.maximumf %205, %206 : vector<14x32xf32>
    %c0_134 = arith.constant 0 : index
    %c12 = arith.constant 12 : index
    %c0_135 = arith.constant 0 : index
    %c0_136 = arith.constant 0 : index
    %208 = vector.load %arg4[%c0_134, %c12, %c0_135, %c0_136] : memref<1x14x14x32xf32, #tpu.memory_space<vmem>>, vector<1x1x14x32xf32>
    %209 = vector.shape_cast %208 : vector<1x1x14x32xf32> to vector<14x32xf32>
    %210 = vector.shape_cast %207 : vector<14x32xf32> to vector<1x1x14x32xf32>
    tpu.vector_store %arg4[%c0_134, %c12, %c0_135, %c0_136], %210 {strides = array<i32>} : memref<1x14x14x32xf32, #tpu.memory_space<vmem>>, vector<1x1x14x32xf32>,
    %c780 = arith.constant 780 : index
    %c0_137 = arith.constant 0 : index
    %211 = tpu.strided_load %arg5[%c780, %c0_137] {strides = array<i32: 2, 1>} : memref<840x32xf32, #tpu.memory_space<vmem>>, vector<14x32xf32>
    %c781 = arith.constant 781 : index
    %c0_138 = arith.constant 0 : index
    %212 = tpu.strided_load %arg5[%c781, %c0_138] {strides = array<i32: 2, 1>} : memref<840x32xf32, #tpu.memory_space<vmem>>, vector<14x32xf32>
    %c810 = arith.constant 810 : index
    %c0_139 = arith.constant 0 : index
    %213 = tpu.strided_load %arg5[%c810, %c0_139] {strides = array<i32: 2, 1>} : memref<840x32xf32, #tpu.memory_space<vmem>>, vector<14x32xf32>
    %c811 = arith.constant 811 : index
    %c0_140 = arith.constant 0 : index
    %214 = tpu.strided_load %arg5[%c811, %c0_140] {strides = array<i32: 2, 1>} : memref<840x32xf32, #tpu.memory_space<vmem>>, vector<14x32xf32>
    %215 = arith.maximumf %211, %212 : vector<14x32xf32>
    %216 = arith.maximumf %213, %214 : vector<14x32xf32>
    %217 = arith.maximumf %215, %216 : vector<14x32xf32>
    %c0_141 = arith.constant 0 : index
    %c13 = arith.constant 13 : index
    %c0_142 = arith.constant 0 : index
    %c0_143 = arith.constant 0 : index
    %218 = vector.load %arg4[%c0_141, %c13, %c0_142, %c0_143] : memref<1x14x14x32xf32, #tpu.memory_space<vmem>>, vector<1x1x14x32xf32>
    %219 = vector.shape_cast %218 : vector<1x1x14x32xf32> to vector<14x32xf32>
    %220 = vector.shape_cast %217 : vector<14x32xf32> to vector<1x1x14x32xf32>
    tpu.vector_store %arg4[%c0_141, %c13, %c0_142, %c0_143], %220 {strides = array<i32>} : memref<1x14x14x32xf32, #tpu.memory_space<vmem>>, vector<1x1x14x32xf32>,
    return
  }
  func.func @transform_0(%arg0: i32) -> (i32, i32, i32) {
    %c0_i32 = arith.constant 0 : i32
    %c0_i32_0 = arith.constant 0 : i32
    %c0_i32_1 = arith.constant 0 : i32
    return %arg0, %c0_i32, %c0_i32_0 : i32, i32, i32
  }
  func.func @transform_1(%arg0: i32) -> (i32, i32, i32, i32) {
    %c0_i32 = arith.constant 0 : i32
    %c0_i32_0 = arith.constant 0 : i32
    %c0_i32_1 = arith.constant 0 : i32
    %c0_i32_2 = arith.constant 0 : i32
    %c0_i32_3 = arith.constant 0 : i32
    return %c0_i32, %c0_i32_0, %c0_i32_1, %c0_i32_2 : i32, i32, i32, i32
  }
  func.func @transform_2(%arg0: i32) -> (i32, i32) {
    %c0_i32 = arith.constant 0 : i32
    %c0_i32_0 = arith.constant 0 : i32
    %c0_i32_1 = arith.constant 0 : i32
    return %c0_i32, %c0_i32_0 : i32, i32
  }
  func.func @transform_3(%arg0: i32) -> (i32, i32, i32, i32) {
    %c0_i32 = arith.constant 0 : i32
    %c0_i32_0 = arith.constant 0 : i32
    %c0_i32_1 = arith.constant 0 : i32
    %c0_i32_2 = arith.constant 0 : i32
    return %arg0, %c0_i32, %c0_i32_0, %c0_i32_1 : i32, i32, i32, i32
  }
}

module attributes {stable_mosaic.version = 11 : i64} {
  func.func @kernel(%arg0: i32, %arg1: memref<1x272x32xf32, #tpu.memory_space<vmem>>, %arg2: memref<3x3x32x64xbf16, #tpu.memory_space<vmem>>, %arg3: memref<1x64xf32, #tpu.memory_space<vmem>>, %arg4: memref<1x7x7x64xf32, #tpu.memory_space<vmem>>, %arg5: memref<224x64xf32, #tpu.memory_space<vmem>>) attributes {dimension_semantics = [#tpu.dimension_semantics<parallel>], iteration_bounds = array<i64: 2>, scalar_prefetch = 0 : i64, scratch_operands = 1 : i64, tpu.core_type = #tpu.core_type<tc>, window_params = [{transform_indices = @transform_0, window_bounds = array<i64: 1, 272, 32>}, {pipeline_mode = #tpu.pipeline_mode<synchronous>, transform_indices = @transform_1, window_bounds = array<i64: 3, 3, 32, 64>}, {pipeline_mode = #tpu.pipeline_mode<synchronous>, transform_indices = @transform_2, window_bounds = array<i64: 1, 64>}, {transform_indices = @transform_3, window_bounds = array<i64: 1, 7, 7, 64>}]} {
    %c0 = arith.constant 0 : index
    %c0_0 = arith.constant 0 : index
    %c0_1 = arith.constant 0 : index
    %0 = vector.load %arg1[%c0, %c0_0, %c0_1] : memref<1x272x32xf32, #tpu.memory_space<vmem>>, vector<1x272x32xf32>
    %1 = vector.shape_cast %0 : vector<1x272x32xf32> to vector<272x32xf32>
    %cst = arith.constant 0.000000e+00 : f32
    %2 = vector.broadcast %cst : f32 to vector<224x64xf32>
    %3 = vector.extract_strided_slice %1 {offsets = [0, 0], sizes = [224, 32], strides = [1, 1]} : vector<272x32xf32> to vector<224x32xf32>
    %c0_2 = arith.constant 0 : index
    %c0_3 = arith.constant 0 : index
    %c0_4 = arith.constant 0 : index
    %c0_5 = arith.constant 0 : index
    %4 = vector.load %arg2[%c0_2, %c0_3, %c0_4, %c0_5] : memref<3x3x32x64xbf16, #tpu.memory_space<vmem>>, vector<1x1x32x64xbf16>
    %5 = vector.shape_cast %4 : vector<1x1x32x64xbf16> to vector<32x64xbf16>
    %6 = arith.truncf %3 : vector<224x32xf32> to vector<224x32xbf16>
    %cst_6 = arith.constant dense<0.000000e+00> : vector<224x64xf32>
    %7 = tpu.matmul %6, %5, %cst_6 {dimension_numbers = #tpu.dot_dimension_numbers<[1], [0], [0], [1], [0, 0, 1, 1], [], []>} : vector<224x32xbf16>, vector<32x64xbf16>, vector<224x64xf32> -> vector<224x64xf32>
    %8 = arith.addf %2, %7 : vector<224x64xf32>
    %9 = vector.extract_strided_slice %1 {offsets = [1, 0], sizes = [224, 32], strides = [1, 1]} : vector<272x32xf32> to vector<224x32xf32>
    %c0_7 = arith.constant 0 : index
    %c1 = arith.constant 1 : index
    %c0_8 = arith.constant 0 : index
    %c0_9 = arith.constant 0 : index
    %10 = vector.load %arg2[%c0_7, %c1, %c0_8, %c0_9] : memref<3x3x32x64xbf16, #tpu.memory_space<vmem>>, vector<1x1x32x64xbf16>
    %11 = vector.shape_cast %10 : vector<1x1x32x64xbf16> to vector<32x64xbf16>
    %12 = arith.truncf %9 : vector<224x32xf32> to vector<224x32xbf16>
    %cst_10 = arith.constant dense<0.000000e+00> : vector<224x64xf32>
    %13 = tpu.matmul %12, %11, %cst_10 {dimension_numbers = #tpu.dot_dimension_numbers<[1], [0], [0], [1], [0, 0, 1, 1], [], []>} : vector<224x32xbf16>, vector<32x64xbf16>, vector<224x64xf32> -> vector<224x64xf32>
    %14 = arith.addf %8, %13 : vector<224x64xf32>
    %15 = vector.extract_strided_slice %1 {offsets = [2, 0], sizes = [224, 32], strides = [1, 1]} : vector<272x32xf32> to vector<224x32xf32>
    %c0_11 = arith.constant 0 : index
    %c2 = arith.constant 2 : index
    %c0_12 = arith.constant 0 : index
    %c0_13 = arith.constant 0 : index
    %16 = vector.load %arg2[%c0_11, %c2, %c0_12, %c0_13] : memref<3x3x32x64xbf16, #tpu.memory_space<vmem>>, vector<1x1x32x64xbf16>
    %17 = vector.shape_cast %16 : vector<1x1x32x64xbf16> to vector<32x64xbf16>
    %18 = arith.truncf %15 : vector<224x32xf32> to vector<224x32xbf16>
    %cst_14 = arith.constant dense<0.000000e+00> : vector<224x64xf32>
    %19 = tpu.matmul %18, %17, %cst_14 {dimension_numbers = #tpu.dot_dimension_numbers<[1], [0], [0], [1], [0, 0, 1, 1], [], []>} : vector<224x32xbf16>, vector<32x64xbf16>, vector<224x64xf32> -> vector<224x64xf32>
    %20 = arith.addf %14, %19 : vector<224x64xf32>
    %21 = vector.extract_strided_slice %1 {offsets = [16, 0], sizes = [224, 32], strides = [1, 1]} : vector<272x32xf32> to vector<224x32xf32>
    %c1_15 = arith.constant 1 : index
    %c0_16 = arith.constant 0 : index
    %c0_17 = arith.constant 0 : index
    %c0_18 = arith.constant 0 : index
    %22 = vector.load %arg2[%c1_15, %c0_16, %c0_17, %c0_18] : memref<3x3x32x64xbf16, #tpu.memory_space<vmem>>, vector<1x1x32x64xbf16>
    %23 = vector.shape_cast %22 : vector<1x1x32x64xbf16> to vector<32x64xbf16>
    %24 = arith.truncf %21 : vector<224x32xf32> to vector<224x32xbf16>
    %cst_19 = arith.constant dense<0.000000e+00> : vector<224x64xf32>
    %25 = tpu.matmul %24, %23, %cst_19 {dimension_numbers = #tpu.dot_dimension_numbers<[1], [0], [0], [1], [0, 0, 1, 1], [], []>} : vector<224x32xbf16>, vector<32x64xbf16>, vector<224x64xf32> -> vector<224x64xf32>
    %26 = arith.addf %20, %25 : vector<224x64xf32>
    %27 = vector.extract_strided_slice %1 {offsets = [17, 0], sizes = [224, 32], strides = [1, 1]} : vector<272x32xf32> to vector<224x32xf32>
    %c1_20 = arith.constant 1 : index
    %c1_21 = arith.constant 1 : index
    %c0_22 = arith.constant 0 : index
    %c0_23 = arith.constant 0 : index
    %28 = vector.load %arg2[%c1_20, %c1_21, %c0_22, %c0_23] : memref<3x3x32x64xbf16, #tpu.memory_space<vmem>>, vector<1x1x32x64xbf16>
    %29 = vector.shape_cast %28 : vector<1x1x32x64xbf16> to vector<32x64xbf16>
    %30 = arith.truncf %27 : vector<224x32xf32> to vector<224x32xbf16>
    %cst_24 = arith.constant dense<0.000000e+00> : vector<224x64xf32>
    %31 = tpu.matmul %30, %29, %cst_24 {dimension_numbers = #tpu.dot_dimension_numbers<[1], [0], [0], [1], [0, 0, 1, 1], [], []>} : vector<224x32xbf16>, vector<32x64xbf16>, vector<224x64xf32> -> vector<224x64xf32>
    %32 = arith.addf %26, %31 : vector<224x64xf32>
    %33 = vector.extract_strided_slice %1 {offsets = [18, 0], sizes = [224, 32], strides = [1, 1]} : vector<272x32xf32> to vector<224x32xf32>
    %c1_25 = arith.constant 1 : index
    %c2_26 = arith.constant 2 : index
    %c0_27 = arith.constant 0 : index
    %c0_28 = arith.constant 0 : index
    %34 = vector.load %arg2[%c1_25, %c2_26, %c0_27, %c0_28] : memref<3x3x32x64xbf16, #tpu.memory_space<vmem>>, vector<1x1x32x64xbf16>
    %35 = vector.shape_cast %34 : vector<1x1x32x64xbf16> to vector<32x64xbf16>
    %36 = arith.truncf %33 : vector<224x32xf32> to vector<224x32xbf16>
    %cst_29 = arith.constant dense<0.000000e+00> : vector<224x64xf32>
    %37 = tpu.matmul %36, %35, %cst_29 {dimension_numbers = #tpu.dot_dimension_numbers<[1], [0], [0], [1], [0, 0, 1, 1], [], []>} : vector<224x32xbf16>, vector<32x64xbf16>, vector<224x64xf32> -> vector<224x64xf32>
    %38 = arith.addf %32, %37 : vector<224x64xf32>
    %39 = vector.extract_strided_slice %1 {offsets = [32, 0], sizes = [224, 32], strides = [1, 1]} : vector<272x32xf32> to vector<224x32xf32>
    %c2_30 = arith.constant 2 : index
    %c0_31 = arith.constant 0 : index
    %c0_32 = arith.constant 0 : index
    %c0_33 = arith.constant 0 : index
    %40 = vector.load %arg2[%c2_30, %c0_31, %c0_32, %c0_33] : memref<3x3x32x64xbf16, #tpu.memory_space<vmem>>, vector<1x1x32x64xbf16>
    %41 = vector.shape_cast %40 : vector<1x1x32x64xbf16> to vector<32x64xbf16>
    %42 = arith.truncf %39 : vector<224x32xf32> to vector<224x32xbf16>
    %cst_34 = arith.constant dense<0.000000e+00> : vector<224x64xf32>
    %43 = tpu.matmul %42, %41, %cst_34 {dimension_numbers = #tpu.dot_dimension_numbers<[1], [0], [0], [1], [0, 0, 1, 1], [], []>} : vector<224x32xbf16>, vector<32x64xbf16>, vector<224x64xf32> -> vector<224x64xf32>
    %44 = arith.addf %38, %43 : vector<224x64xf32>
    %45 = vector.extract_strided_slice %1 {offsets = [33, 0], sizes = [224, 32], strides = [1, 1]} : vector<272x32xf32> to vector<224x32xf32>
    %c2_35 = arith.constant 2 : index
    %c1_36 = arith.constant 1 : index
    %c0_37 = arith.constant 0 : index
    %c0_38 = arith.constant 0 : index
    %46 = vector.load %arg2[%c2_35, %c1_36, %c0_37, %c0_38] : memref<3x3x32x64xbf16, #tpu.memory_space<vmem>>, vector<1x1x32x64xbf16>
    %47 = vector.shape_cast %46 : vector<1x1x32x64xbf16> to vector<32x64xbf16>
    %48 = arith.truncf %45 : vector<224x32xf32> to vector<224x32xbf16>
    %cst_39 = arith.constant dense<0.000000e+00> : vector<224x64xf32>
    %49 = tpu.matmul %48, %47, %cst_39 {dimension_numbers = #tpu.dot_dimension_numbers<[1], [0], [0], [1], [0, 0, 1, 1], [], []>} : vector<224x32xbf16>, vector<32x64xbf16>, vector<224x64xf32> -> vector<224x64xf32>
    %50 = arith.addf %44, %49 : vector<224x64xf32>
    %51 = vector.extract_strided_slice %1 {offsets = [34, 0], sizes = [224, 32], strides = [1, 1]} : vector<272x32xf32> to vector<224x32xf32>
    %c2_40 = arith.constant 2 : index
    %c2_41 = arith.constant 2 : index
    %c0_42 = arith.constant 0 : index
    %c0_43 = arith.constant 0 : index
    %52 = vector.load %arg2[%c2_40, %c2_41, %c0_42, %c0_43] : memref<3x3x32x64xbf16, #tpu.memory_space<vmem>>, vector<1x1x32x64xbf16>
    %53 = vector.shape_cast %52 : vector<1x1x32x64xbf16> to vector<32x64xbf16>
    %54 = arith.truncf %51 : vector<224x32xf32> to vector<224x32xbf16>
    %cst_44 = arith.constant dense<0.000000e+00> : vector<224x64xf32>
    %55 = tpu.matmul %54, %53, %cst_44 {dimension_numbers = #tpu.dot_dimension_numbers<[1], [0], [0], [1], [0, 0, 1, 1], [], []>} : vector<224x32xbf16>, vector<32x64xbf16>, vector<224x64xf32> -> vector<224x64xf32>
    %56 = arith.addf %50, %55 : vector<224x64xf32>
    %c0_45 = arith.constant 0 : index
    %c0_46 = arith.constant 0 : index
    %57 = vector.load %arg3[%c0_45, %c0_46] : memref<1x64xf32, #tpu.memory_space<vmem>>, vector<1x64xf32>
    %58 = vector.broadcast %57 : vector<1x64xf32> to vector<224x64xf32>
    %59 = arith.addf %56, %58 : vector<224x64xf32>
    %cst_47 = arith.constant 0.000000e+00 : f32
    %60 = vector.broadcast %cst_47 : f32 to vector<224x64xf32>
    %61 = arith.maximumf %59, %60 : vector<224x64xf32>
    %c0_48 = arith.constant 0 : index
    %c0_49 = arith.constant 0 : index
    %62 = vector.load %arg5[%c0_48, %c0_49] : memref<224x64xf32, #tpu.memory_space<vmem>>, vector<224x64xf32>
    tpu.vector_store %arg5[%c0_48, %c0_49], %61 {strides = array<i32>} : memref<224x64xf32, #tpu.memory_space<vmem>>, vector<224x64xf32>,
    %c0_50 = arith.constant 0 : index
    %c0_51 = arith.constant 0 : index
    %63 = tpu.strided_load %arg5[%c0_50, %c0_51] {strides = array<i32: 2, 1>} : memref<224x64xf32, #tpu.memory_space<vmem>>, vector<7x64xf32>
    %c1_52 = arith.constant 1 : index
    %c0_53 = arith.constant 0 : index
    %64 = tpu.strided_load %arg5[%c1_52, %c0_53] {strides = array<i32: 2, 1>} : memref<224x64xf32, #tpu.memory_space<vmem>>, vector<7x64xf32>
    %c16 = arith.constant 16 : index
    %c0_54 = arith.constant 0 : index
    %65 = tpu.strided_load %arg5[%c16, %c0_54] {strides = array<i32: 2, 1>} : memref<224x64xf32, #tpu.memory_space<vmem>>, vector<7x64xf32>
    %c17 = arith.constant 17 : index
    %c0_55 = arith.constant 0 : index
    %66 = tpu.strided_load %arg5[%c17, %c0_55] {strides = array<i32: 2, 1>} : memref<224x64xf32, #tpu.memory_space<vmem>>, vector<7x64xf32>
    %67 = arith.maximumf %63, %64 : vector<7x64xf32>
    %68 = arith.maximumf %65, %66 : vector<7x64xf32>
    %69 = arith.maximumf %67, %68 : vector<7x64xf32>
    %c0_56 = arith.constant 0 : index
    %c0_57 = arith.constant 0 : index
    %c0_58 = arith.constant 0 : index
    %c0_59 = arith.constant 0 : index
    %70 = vector.load %arg4[%c0_56, %c0_57, %c0_58, %c0_59] : memref<1x7x7x64xf32, #tpu.memory_space<vmem>>, vector<1x1x7x64xf32>
    %71 = vector.shape_cast %70 : vector<1x1x7x64xf32> to vector<7x64xf32>
    %72 = vector.shape_cast %69 : vector<7x64xf32> to vector<1x1x7x64xf32>
    tpu.vector_store %arg4[%c0_56, %c0_57, %c0_58, %c0_59], %72 {strides = array<i32>} : memref<1x7x7x64xf32, #tpu.memory_space<vmem>>, vector<1x1x7x64xf32>,
    %c32 = arith.constant 32 : index
    %c0_60 = arith.constant 0 : index
    %73 = tpu.strided_load %arg5[%c32, %c0_60] {strides = array<i32: 2, 1>} : memref<224x64xf32, #tpu.memory_space<vmem>>, vector<7x64xf32>
    %c33 = arith.constant 33 : index
    %c0_61 = arith.constant 0 : index
    %74 = tpu.strided_load %arg5[%c33, %c0_61] {strides = array<i32: 2, 1>} : memref<224x64xf32, #tpu.memory_space<vmem>>, vector<7x64xf32>
    %c48 = arith.constant 48 : index
    %c0_62 = arith.constant 0 : index
    %75 = tpu.strided_load %arg5[%c48, %c0_62] {strides = array<i32: 2, 1>} : memref<224x64xf32, #tpu.memory_space<vmem>>, vector<7x64xf32>
    %c49 = arith.constant 49 : index
    %c0_63 = arith.constant 0 : index
    %76 = tpu.strided_load %arg5[%c49, %c0_63] {strides = array<i32: 2, 1>} : memref<224x64xf32, #tpu.memory_space<vmem>>, vector<7x64xf32>
    %77 = arith.maximumf %73, %74 : vector<7x64xf32>
    %78 = arith.maximumf %75, %76 : vector<7x64xf32>
    %79 = arith.maximumf %77, %78 : vector<7x64xf32>
    %c0_64 = arith.constant 0 : index
    %c1_65 = arith.constant 1 : index
    %c0_66 = arith.constant 0 : index
    %c0_67 = arith.constant 0 : index
    %80 = vector.load %arg4[%c0_64, %c1_65, %c0_66, %c0_67] : memref<1x7x7x64xf32, #tpu.memory_space<vmem>>, vector<1x1x7x64xf32>
    %81 = vector.shape_cast %80 : vector<1x1x7x64xf32> to vector<7x64xf32>
    %82 = vector.shape_cast %79 : vector<7x64xf32> to vector<1x1x7x64xf32>
    tpu.vector_store %arg4[%c0_64, %c1_65, %c0_66, %c0_67], %82 {strides = array<i32>} : memref<1x7x7x64xf32, #tpu.memory_space<vmem>>, vector<1x1x7x64xf32>,
    %c64 = arith.constant 64 : index
    %c0_68 = arith.constant 0 : index
    %83 = tpu.strided_load %arg5[%c64, %c0_68] {strides = array<i32: 2, 1>} : memref<224x64xf32, #tpu.memory_space<vmem>>, vector<7x64xf32>
    %c65 = arith.constant 65 : index
    %c0_69 = arith.constant 0 : index
    %84 = tpu.strided_load %arg5[%c65, %c0_69] {strides = array<i32: 2, 1>} : memref<224x64xf32, #tpu.memory_space<vmem>>, vector<7x64xf32>
    %c80 = arith.constant 80 : index
    %c0_70 = arith.constant 0 : index
    %85 = tpu.strided_load %arg5[%c80, %c0_70] {strides = array<i32: 2, 1>} : memref<224x64xf32, #tpu.memory_space<vmem>>, vector<7x64xf32>
    %c81 = arith.constant 81 : index
    %c0_71 = arith.constant 0 : index
    %86 = tpu.strided_load %arg5[%c81, %c0_71] {strides = array<i32: 2, 1>} : memref<224x64xf32, #tpu.memory_space<vmem>>, vector<7x64xf32>
    %87 = arith.maximumf %83, %84 : vector<7x64xf32>
    %88 = arith.maximumf %85, %86 : vector<7x64xf32>
    %89 = arith.maximumf %87, %88 : vector<7x64xf32>
    %c0_72 = arith.constant 0 : index
    %c2_73 = arith.constant 2 : index
    %c0_74 = arith.constant 0 : index
    %c0_75 = arith.constant 0 : index
    %90 = vector.load %arg4[%c0_72, %c2_73, %c0_74, %c0_75] : memref<1x7x7x64xf32, #tpu.memory_space<vmem>>, vector<1x1x7x64xf32>
    %91 = vector.shape_cast %90 : vector<1x1x7x64xf32> to vector<7x64xf32>
    %92 = vector.shape_cast %89 : vector<7x64xf32> to vector<1x1x7x64xf32>
    tpu.vector_store %arg4[%c0_72, %c2_73, %c0_74, %c0_75], %92 {strides = array<i32>} : memref<1x7x7x64xf32, #tpu.memory_space<vmem>>, vector<1x1x7x64xf32>,
    %c96 = arith.constant 96 : index
    %c0_76 = arith.constant 0 : index
    %93 = tpu.strided_load %arg5[%c96, %c0_76] {strides = array<i32: 2, 1>} : memref<224x64xf32, #tpu.memory_space<vmem>>, vector<7x64xf32>
    %c97 = arith.constant 97 : index
    %c0_77 = arith.constant 0 : index
    %94 = tpu.strided_load %arg5[%c97, %c0_77] {strides = array<i32: 2, 1>} : memref<224x64xf32, #tpu.memory_space<vmem>>, vector<7x64xf32>
    %c112 = arith.constant 112 : index
    %c0_78 = arith.constant 0 : index
    %95 = tpu.strided_load %arg5[%c112, %c0_78] {strides = array<i32: 2, 1>} : memref<224x64xf32, #tpu.memory_space<vmem>>, vector<7x64xf32>
    %c113 = arith.constant 113 : index
    %c0_79 = arith.constant 0 : index
    %96 = tpu.strided_load %arg5[%c113, %c0_79] {strides = array<i32: 2, 1>} : memref<224x64xf32, #tpu.memory_space<vmem>>, vector<7x64xf32>
    %97 = arith.maximumf %93, %94 : vector<7x64xf32>
    %98 = arith.maximumf %95, %96 : vector<7x64xf32>
    %99 = arith.maximumf %97, %98 : vector<7x64xf32>
    %c0_80 = arith.constant 0 : index
    %c3 = arith.constant 3 : index
    %c0_81 = arith.constant 0 : index
    %c0_82 = arith.constant 0 : index
    %100 = vector.load %arg4[%c0_80, %c3, %c0_81, %c0_82] : memref<1x7x7x64xf32, #tpu.memory_space<vmem>>, vector<1x1x7x64xf32>
    %101 = vector.shape_cast %100 : vector<1x1x7x64xf32> to vector<7x64xf32>
    %102 = vector.shape_cast %99 : vector<7x64xf32> to vector<1x1x7x64xf32>
    tpu.vector_store %arg4[%c0_80, %c3, %c0_81, %c0_82], %102 {strides = array<i32>} : memref<1x7x7x64xf32, #tpu.memory_space<vmem>>, vector<1x1x7x64xf32>,
    %c128 = arith.constant 128 : index
    %c0_83 = arith.constant 0 : index
    %103 = tpu.strided_load %arg5[%c128, %c0_83] {strides = array<i32: 2, 1>} : memref<224x64xf32, #tpu.memory_space<vmem>>, vector<7x64xf32>
    %c129 = arith.constant 129 : index
    %c0_84 = arith.constant 0 : index
    %104 = tpu.strided_load %arg5[%c129, %c0_84] {strides = array<i32: 2, 1>} : memref<224x64xf32, #tpu.memory_space<vmem>>, vector<7x64xf32>
    %c144 = arith.constant 144 : index
    %c0_85 = arith.constant 0 : index
    %105 = tpu.strided_load %arg5[%c144, %c0_85] {strides = array<i32: 2, 1>} : memref<224x64xf32, #tpu.memory_space<vmem>>, vector<7x64xf32>
    %c145 = arith.constant 145 : index
    %c0_86 = arith.constant 0 : index
    %106 = tpu.strided_load %arg5[%c145, %c0_86] {strides = array<i32: 2, 1>} : memref<224x64xf32, #tpu.memory_space<vmem>>, vector<7x64xf32>
    %107 = arith.maximumf %103, %104 : vector<7x64xf32>
    %108 = arith.maximumf %105, %106 : vector<7x64xf32>
    %109 = arith.maximumf %107, %108 : vector<7x64xf32>
    %c0_87 = arith.constant 0 : index
    %c4 = arith.constant 4 : index
    %c0_88 = arith.constant 0 : index
    %c0_89 = arith.constant 0 : index
    %110 = vector.load %arg4[%c0_87, %c4, %c0_88, %c0_89] : memref<1x7x7x64xf32, #tpu.memory_space<vmem>>, vector<1x1x7x64xf32>
    %111 = vector.shape_cast %110 : vector<1x1x7x64xf32> to vector<7x64xf32>
    %112 = vector.shape_cast %109 : vector<7x64xf32> to vector<1x1x7x64xf32>
    tpu.vector_store %arg4[%c0_87, %c4, %c0_88, %c0_89], %112 {strides = array<i32>} : memref<1x7x7x64xf32, #tpu.memory_space<vmem>>, vector<1x1x7x64xf32>,
    %c160 = arith.constant 160 : index
    %c0_90 = arith.constant 0 : index
    %113 = tpu.strided_load %arg5[%c160, %c0_90] {strides = array<i32: 2, 1>} : memref<224x64xf32, #tpu.memory_space<vmem>>, vector<7x64xf32>
    %c161 = arith.constant 161 : index
    %c0_91 = arith.constant 0 : index
    %114 = tpu.strided_load %arg5[%c161, %c0_91] {strides = array<i32: 2, 1>} : memref<224x64xf32, #tpu.memory_space<vmem>>, vector<7x64xf32>
    %c176 = arith.constant 176 : index
    %c0_92 = arith.constant 0 : index
    %115 = tpu.strided_load %arg5[%c176, %c0_92] {strides = array<i32: 2, 1>} : memref<224x64xf32, #tpu.memory_space<vmem>>, vector<7x64xf32>
    %c177 = arith.constant 177 : index
    %c0_93 = arith.constant 0 : index
    %116 = tpu.strided_load %arg5[%c177, %c0_93] {strides = array<i32: 2, 1>} : memref<224x64xf32, #tpu.memory_space<vmem>>, vector<7x64xf32>
    %117 = arith.maximumf %113, %114 : vector<7x64xf32>
    %118 = arith.maximumf %115, %116 : vector<7x64xf32>
    %119 = arith.maximumf %117, %118 : vector<7x64xf32>
    %c0_94 = arith.constant 0 : index
    %c5 = arith.constant 5 : index
    %c0_95 = arith.constant 0 : index
    %c0_96 = arith.constant 0 : index
    %120 = vector.load %arg4[%c0_94, %c5, %c0_95, %c0_96] : memref<1x7x7x64xf32, #tpu.memory_space<vmem>>, vector<1x1x7x64xf32>
    %121 = vector.shape_cast %120 : vector<1x1x7x64xf32> to vector<7x64xf32>
    %122 = vector.shape_cast %119 : vector<7x64xf32> to vector<1x1x7x64xf32>
    tpu.vector_store %arg4[%c0_94, %c5, %c0_95, %c0_96], %122 {strides = array<i32>} : memref<1x7x7x64xf32, #tpu.memory_space<vmem>>, vector<1x1x7x64xf32>,
    %c192 = arith.constant 192 : index
    %c0_97 = arith.constant 0 : index
    %123 = tpu.strided_load %arg5[%c192, %c0_97] {strides = array<i32: 2, 1>} : memref<224x64xf32, #tpu.memory_space<vmem>>, vector<7x64xf32>
    %c193 = arith.constant 193 : index
    %c0_98 = arith.constant 0 : index
    %124 = tpu.strided_load %arg5[%c193, %c0_98] {strides = array<i32: 2, 1>} : memref<224x64xf32, #tpu.memory_space<vmem>>, vector<7x64xf32>
    %c208 = arith.constant 208 : index
    %c0_99 = arith.constant 0 : index
    %125 = tpu.strided_load %arg5[%c208, %c0_99] {strides = array<i32: 2, 1>} : memref<224x64xf32, #tpu.memory_space<vmem>>, vector<7x64xf32>
    %c209 = arith.constant 209 : index
    %c0_100 = arith.constant 0 : index
    %126 = tpu.strided_load %arg5[%c209, %c0_100] {strides = array<i32: 2, 1>} : memref<224x64xf32, #tpu.memory_space<vmem>>, vector<7x64xf32>
    %127 = arith.maximumf %123, %124 : vector<7x64xf32>
    %128 = arith.maximumf %125, %126 : vector<7x64xf32>
    %129 = arith.maximumf %127, %128 : vector<7x64xf32>
    %c0_101 = arith.constant 0 : index
    %c6 = arith.constant 6 : index
    %c0_102 = arith.constant 0 : index
    %c0_103 = arith.constant 0 : index
    %130 = vector.load %arg4[%c0_101, %c6, %c0_102, %c0_103] : memref<1x7x7x64xf32, #tpu.memory_space<vmem>>, vector<1x1x7x64xf32>
    %131 = vector.shape_cast %130 : vector<1x1x7x64xf32> to vector<7x64xf32>
    %132 = vector.shape_cast %129 : vector<7x64xf32> to vector<1x1x7x64xf32>
    tpu.vector_store %arg4[%c0_101, %c6, %c0_102, %c0_103], %132 {strides = array<i32>} : memref<1x7x7x64xf32, #tpu.memory_space<vmem>>, vector<1x1x7x64xf32>,
    return
  }
  func.func @transform_0(%arg0: i32) -> (i32, i32, i32) {
    %c0_i32 = arith.constant 0 : i32
    %c0_i32_0 = arith.constant 0 : i32
    %c0_i32_1 = arith.constant 0 : i32
    return %arg0, %c0_i32, %c0_i32_0 : i32, i32, i32
  }
  func.func @transform_1(%arg0: i32) -> (i32, i32, i32, i32) {
    %c0_i32 = arith.constant 0 : i32
    %c0_i32_0 = arith.constant 0 : i32
    %c0_i32_1 = arith.constant 0 : i32
    %c0_i32_2 = arith.constant 0 : i32
    %c0_i32_3 = arith.constant 0 : i32
    return %c0_i32, %c0_i32_0, %c0_i32_1, %c0_i32_2 : i32, i32, i32, i32
  }
  func.func @transform_2(%arg0: i32) -> (i32, i32) {
    %c0_i32 = arith.constant 0 : i32
    %c0_i32_0 = arith.constant 0 : i32
    %c0_i32_1 = arith.constant 0 : i32
    return %c0_i32, %c0_i32_0 : i32, i32
  }
  func.func @transform_3(%arg0: i32) -> (i32, i32, i32, i32) {
    %c0_i32 = arith.constant 0 : i32
    %c0_i32_0 = arith.constant 0 : i32
    %c0_i32_1 = arith.constant 0 : i32
    %c0_i32_2 = arith.constant 0 : i32
    return %arg0, %c0_i32, %c0_i32_0, %c0_i32_1 : i32, i32, i32, i32
  }
}

module attributes {stable_mosaic.version = 11 : i64} {
  func.func @kernel(%arg0: i32, %arg1: memref<1x90x64xf32, #tpu.memory_space<vmem>>, %arg2: memref<3x3x64x128xbf16, #tpu.memory_space<vmem>>, %arg3: memref<1x128xf32, #tpu.memory_space<vmem>>, %arg4: memref<1x3x3x128xf32, #tpu.memory_space<vmem>>, %arg5: memref<63x128xf32, #tpu.memory_space<vmem>>) attributes {dimension_semantics = [#tpu.dimension_semantics<parallel>], iteration_bounds = array<i64: 2>, scalar_prefetch = 0 : i64, scratch_operands = 1 : i64, tpu.core_type = #tpu.core_type<tc>, window_params = [{transform_indices = @transform_0, window_bounds = array<i64: 1, 90, 64>}, {pipeline_mode = #tpu.pipeline_mode<synchronous>, transform_indices = @transform_1, window_bounds = array<i64: 3, 3, 64, 128>}, {pipeline_mode = #tpu.pipeline_mode<synchronous>, transform_indices = @transform_2, window_bounds = array<i64: 1, 128>}, {transform_indices = @transform_3, window_bounds = array<i64: 1, 3, 3, 128>}]} {
    %c0 = arith.constant 0 : index
    %c0_0 = arith.constant 0 : index
    %c0_1 = arith.constant 0 : index
    %0 = vector.load %arg1[%c0, %c0_0, %c0_1] : memref<1x90x64xf32, #tpu.memory_space<vmem>>, vector<1x90x64xf32>
    %1 = vector.shape_cast %0 : vector<1x90x64xf32> to vector<90x64xf32>
    %cst = arith.constant 0.000000e+00 : f32
    %2 = vector.broadcast %cst : f32 to vector<63x128xf32>
    %3 = vector.extract_strided_slice %1 {offsets = [0, 0], sizes = [63, 64], strides = [1, 1]} : vector<90x64xf32> to vector<63x64xf32>
    %c0_2 = arith.constant 0 : index
    %c0_3 = arith.constant 0 : index
    %c0_4 = arith.constant 0 : index
    %c0_5 = arith.constant 0 : index
    %4 = vector.load %arg2[%c0_2, %c0_3, %c0_4, %c0_5] : memref<3x3x64x128xbf16, #tpu.memory_space<vmem>>, vector<1x1x64x128xbf16>
    %5 = vector.shape_cast %4 : vector<1x1x64x128xbf16> to vector<64x128xbf16>
    %6 = arith.truncf %3 : vector<63x64xf32> to vector<63x64xbf16>
    %cst_6 = arith.constant dense<0.000000e+00> : vector<63x128xf32>
    %7 = tpu.matmul %6, %5, %cst_6 {dimension_numbers = #tpu.dot_dimension_numbers<[1], [0], [0], [1], [0, 0, 1, 1], [], []>} : vector<63x64xbf16>, vector<64x128xbf16>, vector<63x128xf32> -> vector<63x128xf32>
    %8 = arith.addf %2, %7 : vector<63x128xf32>
    %9 = vector.extract_strided_slice %1 {offsets = [1, 0], sizes = [63, 64], strides = [1, 1]} : vector<90x64xf32> to vector<63x64xf32>
    %c0_7 = arith.constant 0 : index
    %c1 = arith.constant 1 : index
    %c0_8 = arith.constant 0 : index
    %c0_9 = arith.constant 0 : index
    %10 = vector.load %arg2[%c0_7, %c1, %c0_8, %c0_9] : memref<3x3x64x128xbf16, #tpu.memory_space<vmem>>, vector<1x1x64x128xbf16>
    %11 = vector.shape_cast %10 : vector<1x1x64x128xbf16> to vector<64x128xbf16>
    %12 = arith.truncf %9 : vector<63x64xf32> to vector<63x64xbf16>
    %cst_10 = arith.constant dense<0.000000e+00> : vector<63x128xf32>
    %13 = tpu.matmul %12, %11, %cst_10 {dimension_numbers = #tpu.dot_dimension_numbers<[1], [0], [0], [1], [0, 0, 1, 1], [], []>} : vector<63x64xbf16>, vector<64x128xbf16>, vector<63x128xf32> -> vector<63x128xf32>
    %14 = arith.addf %8, %13 : vector<63x128xf32>
    %15 = vector.extract_strided_slice %1 {offsets = [2, 0], sizes = [63, 64], strides = [1, 1]} : vector<90x64xf32> to vector<63x64xf32>
    %c0_11 = arith.constant 0 : index
    %c2 = arith.constant 2 : index
    %c0_12 = arith.constant 0 : index
    %c0_13 = arith.constant 0 : index
    %16 = vector.load %arg2[%c0_11, %c2, %c0_12, %c0_13] : memref<3x3x64x128xbf16, #tpu.memory_space<vmem>>, vector<1x1x64x128xbf16>
    %17 = vector.shape_cast %16 : vector<1x1x64x128xbf16> to vector<64x128xbf16>
    %18 = arith.truncf %15 : vector<63x64xf32> to vector<63x64xbf16>
    %cst_14 = arith.constant dense<0.000000e+00> : vector<63x128xf32>
    %19 = tpu.matmul %18, %17, %cst_14 {dimension_numbers = #tpu.dot_dimension_numbers<[1], [0], [0], [1], [0, 0, 1, 1], [], []>} : vector<63x64xbf16>, vector<64x128xbf16>, vector<63x128xf32> -> vector<63x128xf32>
    %20 = arith.addf %14, %19 : vector<63x128xf32>
    %21 = vector.extract_strided_slice %1 {offsets = [9, 0], sizes = [63, 64], strides = [1, 1]} : vector<90x64xf32> to vector<63x64xf32>
    %c1_15 = arith.constant 1 : index
    %c0_16 = arith.constant 0 : index
    %c0_17 = arith.constant 0 : index
    %c0_18 = arith.constant 0 : index
    %22 = vector.load %arg2[%c1_15, %c0_16, %c0_17, %c0_18] : memref<3x3x64x128xbf16, #tpu.memory_space<vmem>>, vector<1x1x64x128xbf16>
    %23 = vector.shape_cast %22 : vector<1x1x64x128xbf16> to vector<64x128xbf16>
    %24 = arith.truncf %21 : vector<63x64xf32> to vector<63x64xbf16>
    %cst_19 = arith.constant dense<0.000000e+00> : vector<63x128xf32>
    %25 = tpu.matmul %24, %23, %cst_19 {dimension_numbers = #tpu.dot_dimension_numbers<[1], [0], [0], [1], [0, 0, 1, 1], [], []>} : vector<63x64xbf16>, vector<64x128xbf16>, vector<63x128xf32> -> vector<63x128xf32>
    %26 = arith.addf %20, %25 : vector<63x128xf32>
    %27 = vector.extract_strided_slice %1 {offsets = [10, 0], sizes = [63, 64], strides = [1, 1]} : vector<90x64xf32> to vector<63x64xf32>
    %c1_20 = arith.constant 1 : index
    %c1_21 = arith.constant 1 : index
    %c0_22 = arith.constant 0 : index
    %c0_23 = arith.constant 0 : index
    %28 = vector.load %arg2[%c1_20, %c1_21, %c0_22, %c0_23] : memref<3x3x64x128xbf16, #tpu.memory_space<vmem>>, vector<1x1x64x128xbf16>
    %29 = vector.shape_cast %28 : vector<1x1x64x128xbf16> to vector<64x128xbf16>
    %30 = arith.truncf %27 : vector<63x64xf32> to vector<63x64xbf16>
    %cst_24 = arith.constant dense<0.000000e+00> : vector<63x128xf32>
    %31 = tpu.matmul %30, %29, %cst_24 {dimension_numbers = #tpu.dot_dimension_numbers<[1], [0], [0], [1], [0, 0, 1, 1], [], []>} : vector<63x64xbf16>, vector<64x128xbf16>, vector<63x128xf32> -> vector<63x128xf32>
    %32 = arith.addf %26, %31 : vector<63x128xf32>
    %33 = vector.extract_strided_slice %1 {offsets = [11, 0], sizes = [63, 64], strides = [1, 1]} : vector<90x64xf32> to vector<63x64xf32>
    %c1_25 = arith.constant 1 : index
    %c2_26 = arith.constant 2 : index
    %c0_27 = arith.constant 0 : index
    %c0_28 = arith.constant 0 : index
    %34 = vector.load %arg2[%c1_25, %c2_26, %c0_27, %c0_28] : memref<3x3x64x128xbf16, #tpu.memory_space<vmem>>, vector<1x1x64x128xbf16>
    %35 = vector.shape_cast %34 : vector<1x1x64x128xbf16> to vector<64x128xbf16>
    %36 = arith.truncf %33 : vector<63x64xf32> to vector<63x64xbf16>
    %cst_29 = arith.constant dense<0.000000e+00> : vector<63x128xf32>
    %37 = tpu.matmul %36, %35, %cst_29 {dimension_numbers = #tpu.dot_dimension_numbers<[1], [0], [0], [1], [0, 0, 1, 1], [], []>} : vector<63x64xbf16>, vector<64x128xbf16>, vector<63x128xf32> -> vector<63x128xf32>
    %38 = arith.addf %32, %37 : vector<63x128xf32>
    %39 = vector.extract_strided_slice %1 {offsets = [18, 0], sizes = [63, 64], strides = [1, 1]} : vector<90x64xf32> to vector<63x64xf32>
    %c2_30 = arith.constant 2 : index
    %c0_31 = arith.constant 0 : index
    %c0_32 = arith.constant 0 : index
    %c0_33 = arith.constant 0 : index
    %40 = vector.load %arg2[%c2_30, %c0_31, %c0_32, %c0_33] : memref<3x3x64x128xbf16, #tpu.memory_space<vmem>>, vector<1x1x64x128xbf16>
    %41 = vector.shape_cast %40 : vector<1x1x64x128xbf16> to vector<64x128xbf16>
    %42 = arith.truncf %39 : vector<63x64xf32> to vector<63x64xbf16>
    %cst_34 = arith.constant dense<0.000000e+00> : vector<63x128xf32>
    %43 = tpu.matmul %42, %41, %cst_34 {dimension_numbers = #tpu.dot_dimension_numbers<[1], [0], [0], [1], [0, 0, 1, 1], [], []>} : vector<63x64xbf16>, vector<64x128xbf16>, vector<63x128xf32> -> vector<63x128xf32>
    %44 = arith.addf %38, %43 : vector<63x128xf32>
    %45 = vector.extract_strided_slice %1 {offsets = [19, 0], sizes = [63, 64], strides = [1, 1]} : vector<90x64xf32> to vector<63x64xf32>
    %c2_35 = arith.constant 2 : index
    %c1_36 = arith.constant 1 : index
    %c0_37 = arith.constant 0 : index
    %c0_38 = arith.constant 0 : index
    %46 = vector.load %arg2[%c2_35, %c1_36, %c0_37, %c0_38] : memref<3x3x64x128xbf16, #tpu.memory_space<vmem>>, vector<1x1x64x128xbf16>
    %47 = vector.shape_cast %46 : vector<1x1x64x128xbf16> to vector<64x128xbf16>
    %48 = arith.truncf %45 : vector<63x64xf32> to vector<63x64xbf16>
    %cst_39 = arith.constant dense<0.000000e+00> : vector<63x128xf32>
    %49 = tpu.matmul %48, %47, %cst_39 {dimension_numbers = #tpu.dot_dimension_numbers<[1], [0], [0], [1], [0, 0, 1, 1], [], []>} : vector<63x64xbf16>, vector<64x128xbf16>, vector<63x128xf32> -> vector<63x128xf32>
    %50 = arith.addf %44, %49 : vector<63x128xf32>
    %51 = vector.extract_strided_slice %1 {offsets = [20, 0], sizes = [63, 64], strides = [1, 1]} : vector<90x64xf32> to vector<63x64xf32>
    %c2_40 = arith.constant 2 : index
    %c2_41 = arith.constant 2 : index
    %c0_42 = arith.constant 0 : index
    %c0_43 = arith.constant 0 : index
    %52 = vector.load %arg2[%c2_40, %c2_41, %c0_42, %c0_43] : memref<3x3x64x128xbf16, #tpu.memory_space<vmem>>, vector<1x1x64x128xbf16>
    %53 = vector.shape_cast %52 : vector<1x1x64x128xbf16> to vector<64x128xbf16>
    %54 = arith.truncf %51 : vector<63x64xf32> to vector<63x64xbf16>
    %cst_44 = arith.constant dense<0.000000e+00> : vector<63x128xf32>
    %55 = tpu.matmul %54, %53, %cst_44 {dimension_numbers = #tpu.dot_dimension_numbers<[1], [0], [0], [1], [0, 0, 1, 1], [], []>} : vector<63x64xbf16>, vector<64x128xbf16>, vector<63x128xf32> -> vector<63x128xf32>
    %56 = arith.addf %50, %55 : vector<63x128xf32>
    %c0_45 = arith.constant 0 : index
    %c0_46 = arith.constant 0 : index
    %57 = vector.load %arg3[%c0_45, %c0_46] : memref<1x128xf32, #tpu.memory_space<vmem>>, vector<1x128xf32>
    %58 = vector.broadcast %57 : vector<1x128xf32> to vector<63x128xf32>
    %59 = arith.addf %56, %58 : vector<63x128xf32>
    %cst_47 = arith.constant 0.000000e+00 : f32
    %60 = vector.broadcast %cst_47 : f32 to vector<63x128xf32>
    %61 = arith.maximumf %59, %60 : vector<63x128xf32>
    %c0_48 = arith.constant 0 : index
    %c0_49 = arith.constant 0 : index
    %62 = vector.load %arg5[%c0_48, %c0_49] : memref<63x128xf32, #tpu.memory_space<vmem>>, vector<63x128xf32>
    tpu.vector_store %arg5[%c0_48, %c0_49], %61 {strides = array<i32>} : memref<63x128xf32, #tpu.memory_space<vmem>>, vector<63x128xf32>,
    %c0_50 = arith.constant 0 : index
    %c0_51 = arith.constant 0 : index
    %63 = tpu.strided_load %arg5[%c0_50, %c0_51] {strides = array<i32: 2, 1>} : memref<63x128xf32, #tpu.memory_space<vmem>>, vector<3x128xf32>
    %c1_52 = arith.constant 1 : index
    %c0_53 = arith.constant 0 : index
    %64 = tpu.strided_load %arg5[%c1_52, %c0_53] {strides = array<i32: 2, 1>} : memref<63x128xf32, #tpu.memory_space<vmem>>, vector<3x128xf32>
    %c9 = arith.constant 9 : index
    %c0_54 = arith.constant 0 : index
    %65 = tpu.strided_load %arg5[%c9, %c0_54] {strides = array<i32: 2, 1>} : memref<63x128xf32, #tpu.memory_space<vmem>>, vector<3x128xf32>
    %c10 = arith.constant 10 : index
    %c0_55 = arith.constant 0 : index
    %66 = tpu.strided_load %arg5[%c10, %c0_55] {strides = array<i32: 2, 1>} : memref<63x128xf32, #tpu.memory_space<vmem>>, vector<3x128xf32>
    %67 = arith.maximumf %63, %64 : vector<3x128xf32>
    %68 = arith.maximumf %65, %66 : vector<3x128xf32>
    %69 = arith.maximumf %67, %68 : vector<3x128xf32>
    %c0_56 = arith.constant 0 : index
    %c0_57 = arith.constant 0 : index
    %c0_58 = arith.constant 0 : index
    %c0_59 = arith.constant 0 : index
    %70 = vector.load %arg4[%c0_56, %c0_57, %c0_58, %c0_59] : memref<1x3x3x128xf32, #tpu.memory_space<vmem>>, vector<1x1x3x128xf32>
    %71 = vector.shape_cast %70 : vector<1x1x3x128xf32> to vector<3x128xf32>
    %72 = vector.shape_cast %69 : vector<3x128xf32> to vector<1x1x3x128xf32>
    tpu.vector_store %arg4[%c0_56, %c0_57, %c0_58, %c0_59], %72 {strides = array<i32>} : memref<1x3x3x128xf32, #tpu.memory_space<vmem>>, vector<1x1x3x128xf32>,
    %c18 = arith.constant 18 : index
    %c0_60 = arith.constant 0 : index
    %73 = tpu.strided_load %arg5[%c18, %c0_60] {strides = array<i32: 2, 1>} : memref<63x128xf32, #tpu.memory_space<vmem>>, vector<3x128xf32>
    %c19 = arith.constant 19 : index
    %c0_61 = arith.constant 0 : index
    %74 = tpu.strided_load %arg5[%c19, %c0_61] {strides = array<i32: 2, 1>} : memref<63x128xf32, #tpu.memory_space<vmem>>, vector<3x128xf32>
    %c27 = arith.constant 27 : index
    %c0_62 = arith.constant 0 : index
    %75 = tpu.strided_load %arg5[%c27, %c0_62] {strides = array<i32: 2, 1>} : memref<63x128xf32, #tpu.memory_space<vmem>>, vector<3x128xf32>
    %c28 = arith.constant 28 : index
    %c0_63 = arith.constant 0 : index
    %76 = tpu.strided_load %arg5[%c28, %c0_63] {strides = array<i32: 2, 1>} : memref<63x128xf32, #tpu.memory_space<vmem>>, vector<3x128xf32>
    %77 = arith.maximumf %73, %74 : vector<3x128xf32>
    %78 = arith.maximumf %75, %76 : vector<3x128xf32>
    %79 = arith.maximumf %77, %78 : vector<3x128xf32>
    %c0_64 = arith.constant 0 : index
    %c1_65 = arith.constant 1 : index
    %c0_66 = arith.constant 0 : index
    %c0_67 = arith.constant 0 : index
    %80 = vector.load %arg4[%c0_64, %c1_65, %c0_66, %c0_67] : memref<1x3x3x128xf32, #tpu.memory_space<vmem>>, vector<1x1x3x128xf32>
    %81 = vector.shape_cast %80 : vector<1x1x3x128xf32> to vector<3x128xf32>
    %82 = vector.shape_cast %79 : vector<3x128xf32> to vector<1x1x3x128xf32>
    tpu.vector_store %arg4[%c0_64, %c1_65, %c0_66, %c0_67], %82 {strides = array<i32>} : memref<1x3x3x128xf32, #tpu.memory_space<vmem>>, vector<1x1x3x128xf32>,
    %c36 = arith.constant 36 : index
    %c0_68 = arith.constant 0 : index
    %83 = tpu.strided_load %arg5[%c36, %c0_68] {strides = array<i32: 2, 1>} : memref<63x128xf32, #tpu.memory_space<vmem>>, vector<3x128xf32>
    %c37 = arith.constant 37 : index
    %c0_69 = arith.constant 0 : index
    %84 = tpu.strided_load %arg5[%c37, %c0_69] {strides = array<i32: 2, 1>} : memref<63x128xf32, #tpu.memory_space<vmem>>, vector<3x128xf32>
    %c45 = arith.constant 45 : index
    %c0_70 = arith.constant 0 : index
    %85 = tpu.strided_load %arg5[%c45, %c0_70] {strides = array<i32: 2, 1>} : memref<63x128xf32, #tpu.memory_space<vmem>>, vector<3x128xf32>
    %c46 = arith.constant 46 : index
    %c0_71 = arith.constant 0 : index
    %86 = tpu.strided_load %arg5[%c46, %c0_71] {strides = array<i32: 2, 1>} : memref<63x128xf32, #tpu.memory_space<vmem>>, vector<3x128xf32>
    %87 = arith.maximumf %83, %84 : vector<3x128xf32>
    %88 = arith.maximumf %85, %86 : vector<3x128xf32>
    %89 = arith.maximumf %87, %88 : vector<3x128xf32>
    %c0_72 = arith.constant 0 : index
    %c2_73 = arith.constant 2 : index
    %c0_74 = arith.constant 0 : index
    %c0_75 = arith.constant 0 : index
    %90 = vector.load %arg4[%c0_72, %c2_73, %c0_74, %c0_75] : memref<1x3x3x128xf32, #tpu.memory_space<vmem>>, vector<1x1x3x128xf32>
    %91 = vector.shape_cast %90 : vector<1x1x3x128xf32> to vector<3x128xf32>
    %92 = vector.shape_cast %89 : vector<3x128xf32> to vector<1x1x3x128xf32>
    tpu.vector_store %arg4[%c0_72, %c2_73, %c0_74, %c0_75], %92 {strides = array<i32>} : memref<1x3x3x128xf32, #tpu.memory_space<vmem>>, vector<1x1x3x128xf32>,
    return
  }
  func.func @transform_0(%arg0: i32) -> (i32, i32, i32) {
    %c0_i32 = arith.constant 0 : i32
    %c0_i32_0 = arith.constant 0 : i32
    %c0_i32_1 = arith.constant 0 : i32
    return %arg0, %c0_i32, %c0_i32_0 : i32, i32, i32
  }
  func.func @transform_1(%arg0: i32) -> (i32, i32, i32, i32) {
    %c0_i32 = arith.constant 0 : i32
    %c0_i32_0 = arith.constant 0 : i32
    %c0_i32_1 = arith.constant 0 : i32
    %c0_i32_2 = arith.constant 0 : i32
    %c0_i32_3 = arith.constant 0 : i32
    return %c0_i32, %c0_i32_0, %c0_i32_1, %c0_i32_2 : i32, i32, i32, i32
  }
  func.func @transform_2(%arg0: i32) -> (i32, i32) {
    %c0_i32 = arith.constant 0 : i32
    %c0_i32_0 = arith.constant 0 : i32
    %c0_i32_1 = arith.constant 0 : i32
    return %c0_i32, %c0_i32_0 : i32, i32
  }
  func.func @transform_3(%arg0: i32) -> (i32, i32, i32, i32) {
    %c0_i32 = arith.constant 0 : i32
    %c0_i32_0 = arith.constant 0 : i32
    %c0_i32_1 = arith.constant 0 : i32
    %c0_i32_2 = arith.constant 0 : i32
    return %arg0, %c0_i32, %c0_i32_0, %c0_i32_1 : i32, i32, i32, i32
  }
}

module attributes {stable_mosaic.version = 11 : i64} {
  func.func @_fc_fused_kernel(%arg0: memref<2x1152xf32, #tpu.memory_space<vmem>>, %arg1: memref<1152x625xbf16, #tpu.memory_space<vmem>>, %arg2: memref<1x625xf32, #tpu.memory_space<vmem>>, %arg3: memref<625x128xbf16, #tpu.memory_space<vmem>>, %arg4: memref<1x128xf32, #tpu.memory_space<vmem>>, %arg5: memref<2x128xf32, #tpu.memory_space<vmem>>) attributes {dimension_semantics = [], scalar_prefetch = 0 : i64, scratch_operands = 0 : i64, tpu.core_type = #tpu.core_type<tc>} {
    %c0 = arith.constant 0 : index
    %c0_0 = arith.constant 0 : index
    %0 = vector.load %arg0[%c0, %c0_0] : memref<2x1152xf32, #tpu.memory_space<vmem>>, vector<2x1152xf32>
    %1 = arith.truncf %0 : vector<2x1152xf32> to vector<2x1152xbf16>
    %c0_1 = arith.constant 0 : index
    %c0_2 = arith.constant 0 : index
    %2 = vector.load %arg1[%c0_1, %c0_2] : memref<1152x625xbf16, #tpu.memory_space<vmem>>, vector<1152x625xbf16>
    %cst = arith.constant dense<0.000000e+00> : vector<2x625xf32>
    %3 = tpu.matmul %1, %2, %cst {dimension_numbers = #tpu.dot_dimension_numbers<[1], [0], [0], [1], [0, 0, 1, 1], [], []>} : vector<2x1152xbf16>, vector<1152x625xbf16>, vector<2x625xf32> -> vector<2x625xf32>
    %c0_3 = arith.constant 0 : index
    %c0_4 = arith.constant 0 : index
    %4 = vector.load %arg2[%c0_3, %c0_4] : memref<1x625xf32, #tpu.memory_space<vmem>>, vector<1x625xf32>
    %5 = vector.broadcast %4 : vector<1x625xf32> to vector<2x625xf32>
    %6 = arith.addf %3, %5 : vector<2x625xf32>
    %cst_5 = arith.constant 0.000000e+00 : f32
    %7 = vector.broadcast %cst_5 : f32 to vector<2x625xf32>
    %8 = arith.maximumf %6, %7 : vector<2x625xf32>
    %9 = arith.truncf %8 : vector<2x625xf32> to vector<2x625xbf16>
    %c0_6 = arith.constant 0 : index
    %c0_7 = arith.constant 0 : index
    %10 = vector.load %arg3[%c0_6, %c0_7] : memref<625x128xbf16, #tpu.memory_space<vmem>>, vector<625x128xbf16>
    %cst_8 = arith.constant dense<0.000000e+00> : vector<2x128xf32>
    %11 = tpu.matmul %9, %10, %cst_8 {dimension_numbers = #tpu.dot_dimension_numbers<[1], [0], [0], [1], [0, 0, 1, 1], [], []>} : vector<2x625xbf16>, vector<625x128xbf16>, vector<2x128xf32> -> vector<2x128xf32>
    %c0_9 = arith.constant 0 : index
    %c0_10 = arith.constant 0 : index
    %12 = vector.load %arg4[%c0_9, %c0_10] : memref<1x128xf32, #tpu.memory_space<vmem>>, vector<1x128xf32>
    %13 = vector.broadcast %12 : vector<1x128xf32> to vector<2x128xf32>
    %14 = arith.addf %11, %13 : vector<2x128xf32>
    %c0_11 = arith.constant 0 : index
    %c0_12 = arith.constant 0 : index
    %15 = vector.load %arg5[%c0_11, %c0_12] : memref<2x128xf32, #tpu.memory_space<vmem>>, vector<2x128xf32>
    tpu.vector_store %arg5[%c0_11, %c0_12], %14 {strides = array<i32>} : memref<2x128xf32, #tpu.memory_space<vmem>>, vector<2x128xf32>,
    return
  }
}

</mosaic_0001>

<bundles_post_ra>
// kernel: cnn_forward.5
= control target key start
LH: loop header
LB: loop body
LE: loop exit
PB: predicated region body
PF: predicated region fallthrough
CT: control target
= control target key end

     0   :  { %s3363_s12 = smov 0   ;;  %s4031_s0 = inlined_call_operand.vmem [shape: f32[2,272,32], index: 0, kind: input, shape index: {}]   ;;  %s4032_s1 = inlined_call_operand.vmem [shape: bf16[3,3,32,64], index: 1, kind: input, shape index: {}]   ;;  %s4033_s2 = inlined_call_operand.vmem [shape: f32[1,64], index: 2, kind: input, shape index: {}]   ;;  %s4034_s3 = inlined_call_operand.vmem [shape: f32[2,7,7,64], index: 3, kind: output, shape index: {}]  }
   0x1 LB: > { %s2455_s13 = sadd.s32 4294967295, %s3341_s12   ;;  %p2459_p0 = scmp.ge.s32.totalorder %s3341_s12, 1  ;;  %s3341_s12 = sphi %s3363_s12, %s13_s12  }
   0x2   : > { %p137_p1 = scmp.lt.s32.totalorder %s3341_s12, 3 }
   0x4   : > { %p138_p2 = pnand %p2459_p0, %p137_p1 }
   0x5   : > { %v3374_v0 = vld [vmem:[%s4032_s1 + $0x40] sm:$0xff] (!%p138_p2)   ;;  %p161_p3 = scmp.lt.s32.totalorder (!%p138_p2), %s2455_s13, 1  ;;  %v3318_v1 = vld [vmem:[%s4032_s1 + $0x10] sm:$0xff] (!%p138_p2)   ;;  %v3383_v2 = vld [vmem:[%s4032_s1 + $0x48] sm:$0xff] (!%p138_p2)   ;;  %vm229_vm0 = vsmask.f32 (!%p138_p2), 7424 }
   0x6   : > { %141 = sbr.rel (%p138_p2) target bundleno = 513 (0x201), region = 32  ;;  %2919 = vmatprep.subr.bf16.mxu0 (!%p138_p2), %v3374_v0  ;;  %2791 = vmatprep.subr.bf16.mxu1 (!%p138_p2), %v3318_v1  ;;  %v3320_v3 = vld [vmem:[%s4032_s1 + $0x18] sm:$0xff] (!%p138_p2)   ;;  %v3396_v4 = vld [vmem:[%s4032_s1 + $0x50] sm:$0xff] (!%p138_p2)   ;;  %v3406_v5 = vld [vmem:[%s4032_s1] sm:$0xff] (!%p138_p2)   ;;  %vm358_vm1 = vcmask (!%p138_p2), 261120   ;;  %vm751_vm2 = vcmask (!%p138_p2), 1046528  }
   0x7   : > { %2920 = vmatpush3.bf16.msra.mxu0 (!%p138_p2), %v3374_v0  ;;  %2792 = vmatpush3.bf16.msra.mxu1 (!%p138_p2), %v3318_v1  ;;  %v3323_v54 = vld [vmem:[%s4032_s1 + $0x58] sm:$0xff] (!%p138_p2)   ;;  %v3325_v58 = vld [vmem:[%s4032_s1 + $0x8] sm:$0xff] (!%p138_p2)   ;;  %vm2281_vm3 = vcmask (!%p138_p2), 523264   ;;  %vm2320_vm4 = vcmask (!%p138_p2), 522240  }
   0x8   : > { %2921 = vmatprep.subr.bf16.mxu0 (!%p138_p2), %v3383_v2  ;;  %2793 = vmatprep.subr.bf16.mxu1 (!%p138_p2), %v3320_v3 }
   0xb   : > { %2922 = vmatpush3.bf16.msra.mxu0 (!%p138_p2), %v3383_v2  ;;  %2794 = vmatpush3.bf16.msra.mxu1 (!%p138_p2), %v3320_v3  ;;  %v3488_v3 = vld [vmem:[%s4032_s1 + $0x60] sm:$0xff] (!%p138_p2)  }
   0xc   : > { %2951 = vmatprep.subr.bf16.mxu0 (!%p138_p2), %v3396_v4  ;;  %2823 = vmatprep.subr.bf16.mxu1 (!%p138_p2), %v3406_v5 }
   0xd   : > { %s4036_s13 = smov (!%p161_p3, %s2455_s13), 1 }
   0xe   : > { %s3307_s22 = smul.u32 272, %s4036_s13 }
   0xf   : > { %s3308_s4 = smul.u32 56, %s4036_s13 }
  0x10   : > { %s3401_s27 = scalar_lea.vmem %s4031_s0, %s3307_s22 }
  0x11   : > { %v172_v6 = vld [vmem:[%s3401_s27] sm:$0xff]  ;;  %v173_v7 = vld [vmem:[%s3401_s27 + $0x8] sm:$0xff]  ;;  %v174_v8 = vld [vmem:[%s3401_s27 + $0x10] sm:$0xff]  ;;  %s3965_s7 = scalar_lea.vmem %s4034_s3, %s3308_s4 }
  0x12   : > { %v175_v9 = vld [vmem:[%s3401_s27 + $0x18] sm:$0xff]  ;;  %v3413_v10 = vpack.c.bf16 %v173_v7, %v172_v6  ;;  %v176_v11 = vld [vmem:[%s3401_s27 + $0x20] sm:$0xff]  ;;  %v177_v12 = vld [vmem:[%s3401_s27 + $0x28] sm:$0xff] }
  0x13   : > { %v3418_v13 = vpack.c.bf16 %v175_v9, %v174_v8  ;;  %v3420_v14 = vpack.c.bf16 %v177_v12, %v176_v11  ;;  %v178_v15 = vld [vmem:[%s3401_s27 + $0x30] sm:$0xff]  ;;  %v179_v16 = vld [vmem:[%s3401_s27 + $0x38] sm:$0xff]  ;;  %v180_v17 = vld [vmem:[%s3401_s27 + $0x40] sm:$0xff] }
  0x14   : > { %v231_v18 = vshrl.u32 %v3413_v10, 16  ;;  %v233_v19 = vshll.u32 %v3413_v10, 16  ;;  %v3428_v20 = vpack.c.bf16 %v179_v16, %v178_v15  ;;  %v181_v21 = vld [vmem:[%s3401_s27 + $0x48] sm:$0xff]  ;;  %v182_v22 = vld [vmem:[%s3401_s27 + $0x50] sm:$0xff]  ;;  %v183_v23 = vld [vmem:[%s3401_s27 + $0x58] sm:$0xff] }
  0x15   : > { %v238_v24 = vshll.u32 %v3418_v13, 16  ;;  %v242_v25 = vshrl.u32 %v3418_v13, 16  ;;  %v246_v26 = vshll.u32 %v3420_v14, 16  ;;  %v250_v27 = vshrl.u32 %v3420_v14, 16  ;;  %v184_v28 = vld [vmem:[%s3401_s27 + $0x60] sm:$0xff]  ;;  %v185_v29 = vld [vmem:[%s3401_s27 + $0x68] sm:$0xff] }
  0x16   : > { %v235_v30 = vrot.slane %v233_v19, 1  ;;  %v254_v31 = vshll.u32 %v3428_v20, 16  ;;  %v3440_v32 = vpack.c.bf16 %v181_v21, %v180_v17  ;;  %v258_v33 = vshrl.u32 %v3428_v20, 16  ;;  %v186_v48 = vld [vmem:[%s3401_s27 + $0x70] sm:$0xff]  ;;  %v187_v49 = vld [vmem:[%s3401_s27 + $0x78] sm:$0xff]  ;;  %v188_v56 = vld [vmem:[%s3401_s27 + $0x80] sm:$0xff] }
  0x17   : > { %v240_v34 = vrot.slane %v238_v24, 1  ;;  %v248_v35 = vrot.slane %v246_v26, 1  ;;  %v3443_v36 = vpack.c.bf16 %v183_v23, %v182_v22  ;;  %v3445_v37 = vpack.c.bf16 %v185_v29, %v184_v28  ;;  %v189_v57 = vld [vmem:[%s3401_s27 + $0x88] sm:$0xff]  ;;  %v190_v8 = vld [vmem:[%s3401_s27 + $0x90] sm:$0xff]  ;;  %v191_v9 = vld [vmem:[%s3401_s27 + $0x98] sm:$0xff] }
  0x18   : > { %v236_v38 = vor.u32 %v235_v30, %v231_v18  ;;  %v256_v39 = vrot.slane %v254_v31, 1  ;;  %v262_v40 = vshll.u32 %v3440_v32, 16  ;;  %v266_v47 = vshrl.u32 %v3440_v32, 16  ;;  %v192_v22 = vld [vmem:[%s3401_s27 + $0xa0] sm:$0xff]  ;;  %v193_v23 = vld [vmem:[%s3401_s27 + $0xa8] sm:$0xff]  ;;  %v194_v28 = vld [vmem:[%s3401_s27 + $0xb0] sm:$0xff] }
  0x19   : > { %v244_v41 = vor.u32 %v242_v25, %v240_v34  ;;  %v252_v42 = vor.u32 %v250_v27, %v248_v35  ;;  %v270_v43 = vshll.u32 %v3443_v36, 16  ;;  %v274_v52 = vshrl.u32 %v3443_v36, 16  ;;  %v195_v29 = vld [vmem:[%s3401_s27 + $0xb8] sm:$0xff] }
  0x1a   : > { %v241_v44 = vsel %vm229_vm0, %v236_v38, %v240_v34  ;;  %v260_v45 = vor.u32 %v258_v33, %v256_v39  ;;  %v264_v46 = vrot.slane %v262_v40, 1  ;;  %v278_v53 = vshll.u32 %v3445_v37, 16 }
  0x1b   : > { %2795 = vmatprep.mubr.msk.bf16.mxu1 %vm358_vm1, %v241_v44  ;;  %v249_v50 = vsel %vm229_vm0, %v244_v41, %v248_v35  ;;  %v3456_v51 = vsel %vm229_vm0, %v252_v42, %v256_v39  ;;  %v272_v59 = vrot.slane %v270_v43, 1  ;;  %v3477_v60 = vpack.c.bf16 %v187_v49, %v186_v48  ;;  %v196_v42 = vld [vmem:[%s3401_s27 + $0xc0] sm:$0xff]  ;;  %v197_v43 = vld [vmem:[%s3401_s27 + $0xc8] sm:$0xff] }
  0x1c   : > { %2923 = vmatprep.mubr.msk.bf16.mxu0 %vm358_vm1, %v249_v50  ;;  %2796 = vmatmul.mubr.msk.bf16.vlgmr.msra.gmra.mrb[0].mxu1 %vm358_vm1, %v249_v50  ;;  %v3466_v55 = vsel %vm229_vm0, %v260_v45, %v264_v46  ;;  %v268_v61 = vor.u32 %v266_v47, %v264_v46  ;;  %v280_v63 = vrot.slane %v278_v53, 1  ;;  %v3483_v1 = vpack.c.bf16 %v189_v57, %v188_v56  ;;  %v198_v45 = vld [vmem:[%s3401_s27 + $0xd0] sm:$0xff]  ;;  %v199_v46 = vld [vmem:[%s3401_s27 + $0xd8] sm:$0xff]  ;;  %v3556_v47 = vld [vmem:[%s3401_s27 + $0xe0] sm:$0xff] }
  0x1d   : > { %2924 = vmatmul.mubr.msk.bf16.vlgmr.msra.gmra.mrb[0].mxu0 %vm358_vm1, %v3456_v51  ;;  %2799 = vmatprep.mubr.msk.bf16.mxu1 %vm358_vm1, %v3456_v51  ;;  %v276_v62 = vor.u32 %v274_v52, %v272_v59  ;;  %v286_v6 = vshll.u32 %v3477_v60, 16  ;;  %v282_v7 = vshrl.u32 %v3445_v37, 16  ;;  %v290_v12 = vshrl.u32 %v3477_v60, 16 }
  0x1e   : > { %2952 = vmatpush3.bf16.msra.mxu0 %v3396_v4  ;;  %2927 = vmatprep.mubr.msk.bf16.mxu0 %vm358_vm1, %v3466_v55  ;;  %v3493_v4 = vld [vmem:[%s4032_s1 + $0x20] sm:$0xff]   ;;  %v294_v15 = vshll.u32 %v3483_v1, 16  ;;  %v3517_v18 = vpack.c.bf16 %v191_v9, %v190_v8  ;;  %v298_v25 = vshrl.u32 %v3483_v1, 16  ;;  %v752_v30 = vrot.slane %v3413_v10, 1 }
  0x1f   : > { %2824 = vmatpush3.bf16.msra.mxu1 %v3406_v5  ;;  %2953 = vmatprep.subr.bf16.mxu0 %v3323_v54  ;;  %v3497_v5 = vsel %vm229_vm0, %v268_v61, %v272_v59  ;;  %v3503_v11 = vsel %vm229_vm0, %v276_v62, %v280_v63  ;;  %v288_v16 = vrot.slane %v286_v6, 1  ;;  %v284_v17 = vor.u32 %v282_v7, %v280_v63 }
  0x20   : > { %2825 = vmatprep.subr.bf16.mxu1 %v3325_v58  ;;  %v296_v21 = vrot.slane %v294_v15, 1  ;;  %v302_v26 = vshll.u32 %v3517_v18, 16  ;;  %v3534_v31 = vpack.c.bf16 %v193_v23, %v192_v22  ;;  %v753_v33 = vrot.slane %v3418_v13, 1  ;;  %v3326_v23 = vld [vmem:[%s4032_s1 + $0x68] sm:$0xff]  }
  0x21   : > { %v292_v19 = vor.u32 %v290_v12, %v288_v16  ;;  %v3522_v24 = vsel %vm229_vm0, %v284_v17, %v288_v16  ;;  %v3543_v38 = vpack.c.bf16 %v195_v29, %v194_v28  ;;  %v755_v39 = vrot.slane %v3420_v14, 1 }
  0x22   : > { %2954 = vmatpush3.bf16.msra.mxu0 %v3323_v54  ;;  %v300_v34 = vor.u32 %v298_v25, %v296_v21  ;;  %v304_v35 = vrot.slane %v302_v26, 1  ;;  %v3547_v40 = vsel %vm751_vm2, %v752_v30, %v753_v33  ;;  %v310_v41 = vshll.u32 %v3534_v31, 16 }
  0x23   : > { %2983 = vmatprep.subr.bf16.mxu0 %v3488_v3  ;;  %2826 = vmatpush3.bf16.msra.mxu1 %v3325_v58  ;;  %v3527_v27 = vsel %vm229_vm0, %v292_v19, %v296_v21  ;;  %v306_v44 = vshrl.u32 %v3517_v18, 16  ;;  %v314_v49 = vshrl.u32 %v3534_v31, 16  ;;  %v318_v50 = vshll.u32 %v3543_v38, 16 }
  0x24   : > { %2800 = vmatmul.mubr.msk.bf16.gmra.mrb[4].mxu1 %vm358_vm1, %v3466_v55  ;;  %2855 = vmatprep.subr.bf16.mxu1 %v3493_v4  ;;  %v3559_v48 = vsel %vm229_vm0, %v300_v34, %v304_v35  ;;  %v3564_v52 = vsel %vm751_vm2, %v753_v33, %v755_v39  ;;  %v312_v53 = vrot.slane %v310_v41, 1  ;;  %v3568_v54 = vpack.c.bf16 %v197_v43, %v196_v42  ;;  %v3622_v34 = vld [vmem:[%s4032_s1 + $0x70] sm:$0xff]  }
  0x25   : > { %2928 = vmatmul.mubr.msk.bf16.gmra.mrb[4].mxu0 %vm358_vm1, %v3497_v5  ;;  %2803 = vmatprep.mubr.msk.bf16.mxu1 %vm358_vm1, %v3497_v5  ;;  %v3570_v56 = vpack.c.bf16 %v199_v46, %v198_v45  ;;  %v228_v57 = vpack.c.bf16 %v3556_v47, %v3556_v47  ;;  %v308_v58 = vor.u32 %v306_v44, %v304_v35  ;;  %v757_v59 = vrot.slane %v3428_v20, 1 }
  0x26   : > { %2931 = vmatprep.mubr.msk.bf16.mxu0 %vm358_vm1, %v3503_v11  ;;  %v316_v61 = vor.u32 %v314_v49, %v312_v53  ;;  %v320_v62 = vrot.slane %v318_v50, 1  ;;  %v759_v7 = vrot.slane %v3440_v32, 1  ;;  %v326_v8 = vshll.u32 %v3568_v54, 16 }
  0x27   : > { %v3582_v63 = vrot.slane %v3570_v56, 1  ;;  %v779_v6 = vrot.slane %v228_v57, 1  ;;  %v3591_v12 = vsel %vm229_vm0, %v308_v58, %v312_v53  ;;  %v322_v15 = vshrl.u32 %v3543_v38, 16 }
  0x28   : > { %v3595_v16 = vsel %vm751_vm2, %v755_v39, %v757_v59  ;;  %v3598_v17 = vsel %vm229_vm0, %v316_v61, %v320_v62  ;;  %v330_v19 = vshrl.u32 %v3568_v54, 16  ;;  %v334_v21 = vshll.u32 %v3570_v56, 16 }
  0x29   : > { %v3588_v9 = vsel %vm751_vm2, %v3582_v63, %v779_v6  ;;  %v3603_v22 = vsel %vm751_vm2, %v757_v59, %v759_v7  ;;  %v328_v25 = vrot.slane %v326_v8, 1  ;;  %v324_v26 = vor.u32 %v322_v15, %v320_v62  ;;  %v3329_v6 = vld [vmem:[%s4032_s1 + $0x28] sm:$0xff]   ;;  %v3331_v8 = vld [vmem:[%s4032_s1 + $0x30] sm:$0xff]  }
  0x2a   : > { %v761_v28 = vrot.slane %v3443_v36, 1  ;;  %v336_v30 = vrot.slane %v334_v21, 1  ;;  %v763_v33 = vrot.slane %v3445_v37, 1  ;;  %v342_v39 = vshll.u32 %v228_v57, 16  ;;  %v201_v15 = vld [vmem:[%s3401_s27 + $0xe8] sm:$0xff] }
  0x2b   : > { %v332_v29 = vor.u32 %v330_v19, %v328_v25  ;;  %v3625_v35 = vsel %vm229_vm0, %v324_v26, %v328_v25  ;;  %v765_v46 = vrot.slane %v3477_v60, 1  ;;  %v767_v49 = vrot.slane %v3483_v1, 1 }
  0x2c   : > { %2804 = vmatmul.mubr.msk.bf16.gmra.mrb[8].mxu1 %vm358_vm1, %v3503_v11  ;;  %v3629_v41 = vsel %vm751_vm2, %v759_v7, %v761_v28  ;;  %v3635_v43 = vsel %vm751_vm2, %v761_v28, %v763_v33  ;;  %v344_v45 = vrot.slane %v342_v39, 1  ;;  %v769_v58 = vrot.slane %v3517_v18, 1 }
  0x2d   : > { %2932 = vmatmul.mubr.msk.bf16.gmra.mrb[8].mxu0 %vm358_vm1, %v3522_v24  ;;  %2807 = vmatprep.mubr.msk.bf16.mxu1 %vm358_vm1, %v3522_v24  ;;  %v3632_v42 = vsel %vm229_vm0, %v332_v29, %v336_v30  ;;  %v3653_v53 = vsel %vm751_vm2, %v763_v33, %v765_v46  ;;  %v3656_v57 = vsel %vm751_vm2, %v765_v46, %v767_v49  ;;  %v771_v59 = vrot.slane %v3534_v31, 1  ;;  %v3332_v33 = vld [vmem:[%s4032_s1 + $0x80] sm:$0xff]  }
  0x2e   : > { %2935 = vmatprep.mubr.msk.bf16.mxu0 %vm358_vm1, %v3527_v27  ;;  %v3668_v61 = vsel %vm751_vm2, %v767_v49, %v769_v58  ;;  %v775_v7 = vrot.slane %v3568_v54, 1  ;;  %v3695_v21 = vpack.c.bf16 %v201_v15, %v3556_v47  ;;  %v202_v47 = vld [vmem:[%s3401_s27 + $0xf0] sm:$0xff] }
  0x2f   : > { %v3671_v62 = vsel %vm751_vm2, %v769_v58, %v771_v59  ;;  %v3716_v26 = vpack.c.bf16 %v202_v47, %v202_v47  ;;  %v3944_v58 = vld [vmem:[%s4033_s2] ss:$0 sm:$0xff] }
  0x30   : > { %v3714_v25 = vsel %vm751_vm2, %v775_v7, %v3582_v63 }
  0x31   : > { %v1420_v29 = vrot.slane %v3716_v26, 1 }
  0x34   : > { %2808 = vmatmul.mubr.msk.bf16.gmra.mrb[12].mxu1 %vm358_vm1, %v3527_v27 }
  0x35   : > { %2936 = vmatmul.mubr.msk.bf16.gmra.mrb[12].mxu0 %vm358_vm1, %v3559_v48  ;;  %2811 = vmatprep.mubr.msk.bf16.mxu1 %vm358_vm1, %v3559_v48 }
  0x36   : > { %2955 = vmatprep.mubr.msk.bf16.mxu0 %vm358_vm1, %v3564_v52 }
  0x3c   : > { %2812 = vmatmul.mubr.msk.bf16.gmra.mrb[16].mxu1 %vm358_vm1, %v3591_v12 }
  0x3d   : > { %2956 = vmatmul.mubr.msk.bf16.vlgmr.msra.gmra.mrb[0].mxu0 %vm358_vm1, %v3595_v16  ;;  %2815 = vmatprep.mubr.msk.bf16.mxu1 %vm358_vm1, %v3598_v17 }
  0x3e   : > { %2984 = vmatpush3.bf16.msra.mxu0 %v3488_v3  ;;  %2959 = vmatprep.mubr.msk.bf16.mxu0 %vm358_vm1, %v3603_v22  ;;  %v338_v3 = vshrl.u32 %v3570_v56, 16 }
  0x3f   : > { %2985 = vmatprep.subr.bf16.mxu0 %v3326_v23 }
  0x40   : > { %v3644_v44 = vor.u32 %v338_v3, %v336_v30  ;;  %v3334_v3 = vld [vmem:[%s4032_s1 + $0x88] sm:$0xff]  }
  0x42   : > { %2986 = vmatpush3.bf16.msra.mxu0 %v3326_v23  ;;  %v345_v50 = vsel %vm229_vm0, %v3644_v44, %v344_v45  ;;  %v3709_v23 = vrot.slane %v3695_v21, 1 }
  0x43   : > { %3015 = vmatprep.subr.bf16.mxu0 %v3622_v34 }
  0x44   : > { %2816 = vmatmul.mubr.msk.bf16.gmra.mrb[20].mxu1 %vm358_vm1, %v3625_v35  ;;  %v3721_v28 = vsel %vm751_vm2, %v3582_v63, %v3709_v23  ;;  %v1421_v30 = vsel %vm751_vm2, %v3709_v23, %v1420_v29  ;;  %v3330_v63 = vld [vmem:[%s4032_s1 + $0x78] sm:$0xff]  }
  0x45   : > { %2960 = vmatmul.mubr.msk.bf16.gmra.mrb[4].mxu0 %vm358_vm1, %v3629_v41  ;;  %2819 = vmatprep.mubr.msk.bf16.mxu1 %vm358_vm1, %v3632_v42 }
  0x46   : > { %2963 = vmatprep.mubr.msk.bf16.mxu0 %vm358_vm1, %v3635_v43 }
  0x4c   : > { %2820 = vmatmul.mubr.msk.bf16.gmra.mrb[24].mxu1 %vm358_vm1, %v345_v50 }
  0x4d   : > { %2964 = vmatmul.mubr.msk.bf16.gmra.mrb[8].mxu0 %vm358_vm1, %v3653_v53  ;;  %2827 = vmatprep.mubr.msk.bf16.mxu1 %vm358_vm1, %v3413_v10  ;;  %v773_v10 = vrot.slane %v3543_v38, 1 }
  0x4e   : > { %2967 = vmatprep.mubr.msk.bf16.mxu0 %vm358_vm1, %v3656_v57 }
  0x4f   : > { %v3692_v19 = vsel %vm751_vm2, %v771_v59, %v773_v10 }
  0x54   : > { %2828 = vmatmul.mubr.msk.bf16.vlgmr.msra.gmra.mrb[0].mxu1 %vm358_vm1, %v3418_v13 }
  0x55   : > { %2968 = vmatmul.mubr.msk.bf16.gmra.mrb[12].mxu0 %vm358_vm1, %v3668_v61  ;;  %2831 = vmatprep.mubr.msk.bf16.mxu1 %vm358_vm1, %v3420_v14 }
  0x56   : > { %2971 = vmatprep.mubr.msk.bf16.mxu0 %vm358_vm1, %v3671_v62  ;;  %2856 = vmatpush3.bf16.msra.mxu1 %v3493_v4  ;;  %v3698_v4 = vsel %vm751_vm2, %v773_v10, %v775_v7 }
  0x57   : > { %2857 = vmatprep.subr.bf16.mxu1 %v3329_v6 }
  0x5a   : > { %2858 = vmatpush3.bf16.msra.mxu1 %v3329_v6 }
  0x5b   : > { %2887 = vmatprep.subr.bf16.mxu1 %v3331_v8 }
  0x5c   : > { %2832 = vmatmul.mubr.msk.bf16.gmra.mrb[4].mxu1 %vm358_vm1, %v3428_v20 }
  0x5d   : > { %2972 = vmatmul.mubr.msk.bf16.gmra.mrb[16].mxu0 %vm358_vm1, %v3692_v19  ;;  %2835 = vmatprep.mubr.msk.bf16.mxu1 %vm358_vm1, %v3440_v32 }
  0x5e   : > { %2975 = vmatprep.mubr.msk.bf16.mxu0 %vm358_vm1, %v3698_v4 }
  0x64   : > { %2836 = vmatmul.mubr.msk.bf16.gmra.mrb[8].mxu1 %vm358_vm1, %v3443_v36 }
  0x65   : > { %2976 = vmatmul.mubr.msk.bf16.gmra.mrb[20].mxu0 %vm358_vm1, %v3714_v25  ;;  %2839 = vmatprep.mubr.msk.bf16.mxu1 %vm358_vm1, %v3445_v37 }
  0x66   : > { %2979 = vmatprep.mubr.msk.bf16.mxu0 %vm358_vm1, %v3721_v28 }
  0x6c   : > { %2840 = vmatmul.mubr.msk.bf16.gmra.mrb[12].mxu1 %vm358_vm1, %v3477_v60 }
  0x6d   : > { %2980 = vmatmul.mubr.msk.bf16.gmra.mrb[24].mxu0 %vm358_vm1, %v1421_v30  ;;  %2843 = vmatprep.mubr.msk.bf16.mxu1 %vm358_vm1, %v3483_v1 }
  0x6e   : > { %2987 = vmatprep.mubr.msk.bf16.mxu0 %vm358_vm1, %v3420_v14 }
  0x74   : > { %2844 = vmatmul.mubr.msk.bf16.gmra.mrb[16].mxu1 %vm358_vm1, %v3517_v18 }
  0x75   : > { %2988 = vmatmul.mubr.msk.bf16.vlgmr.msra.gmra.mrb[0].mxu0 %vm358_vm1, %v3428_v20  ;;  %2847 = vmatprep.mubr.msk.bf16.mxu1 %vm358_vm1, %v3534_v31 }
  0x76   : > { %3016 = vmatpush3.bf16.msra.mxu0 %v3622_v34  ;;  %2991 = vmatprep.mubr.msk.bf16.mxu0 %vm358_vm1, %v3440_v32  ;;  %v3333_v34 = vld [vmem:[%s4032_s1 + $0x38] sm:$0xff]  }
  0x77   : > { %3017 = vmatprep.subr.bf16.mxu0 %v3330_v63 }
  0x7a   : > { %3018 = vmatpush3.bf16.msra.mxu0 %v3330_v63 }
  0x7b   : > { %3047 = vmatprep.subr.bf16.mxu0 %v3332_v33 }
  0x7c   : > { %2848 = vmatmul.mubr.msk.bf16.gmra.mrb[20].mxu1 %vm358_vm1, %v3543_v38 }
  0x7d   : > { %2992 = vmatmul.mubr.msk.bf16.gmra.mrb[4].mxu0 %vm358_vm1, %v3443_v36  ;;  %2851 = vmatprep.mubr.msk.bf16.mxu1 %vm358_vm1, %v3568_v54 }
  0x7e   : > { %2995 = vmatprep.mubr.msk.bf16.mxu0 %vm358_vm1, %v3445_v37 }
  0x84   : > { %2852 = vmatmul.mubr.msk.bf16.gmra.mrb[24].mxu1 %vm358_vm1, %v3570_v56 }
  0x85   : > { %2996 = vmatmul.mubr.msk.bf16.gmra.mrb[8].mxu0 %vm358_vm1, %v3477_v60  ;;  %2859 = vmatprep.mubr.msk.bf16.mxu1 %vm358_vm1, %v3547_v40  ;;  %v203_v40 = vld [vmem:[%s3401_s27 + $0xf8] sm:$0xff] }
  0x86   : > { %2999 = vmatprep.mubr.msk.bf16.mxu0 %vm358_vm1, %v3483_v1 }
  0x8c   : > { %2860 = vmatmul.mubr.msk.bf16.vlgmr.msra.gmra.mrb[0].mxu1 %vm358_vm1, %v3564_v52  ;;  %v3801_v52 = vpack.c.bf16 %v203_v40, %v202_v47 }
  0x8d   : > { %3000 = vmatmul.mubr.msk.bf16.gmra.mrb[12].mxu0 %vm358_vm1, %v3517_v18  ;;  %2863 = vmatprep.mubr.msk.bf16.mxu1 %vm358_vm1, %v3595_v16 }
  0x8e   : > { %3003 = vmatprep.mubr.msk.bf16.mxu0 %vm358_vm1, %v3534_v31  ;;  %2888 = vmatpush3.bf16.msra.mxu1 %v3331_v8 }
  0x8f   : > { %2889 = vmatprep.subr.bf16.mxu1 %v3333_v34 }
  0x92   : > { %2890 = vmatpush3.bf16.msra.mxu1 %v3333_v34 }
  0x93   : > { %3079 = vmatprep.subr.bf16.mxu1 %v3374_v0 }
  0x94   : > { %2864 = vmatmul.mubr.msk.bf16.gmra.mrb[4].mxu1 %vm358_vm1, %v3603_v22 }
  0x95   : > { %3004 = vmatmul.mubr.msk.bf16.gmra.mrb[16].mxu0 %vm358_vm1, %v3543_v38  ;;  %2867 = vmatprep.mubr.msk.bf16.mxu1 %vm358_vm1, %v3629_v41 }
  0x96   : > { %3007 = vmatprep.mubr.msk.bf16.mxu0 %vm358_vm1, %v3568_v54 }
  0x9c   : > { %2868 = vmatmul.mubr.msk.bf16.gmra.mrb[8].mxu1 %vm358_vm1, %v3635_v43 }
  0x9d   : > { %3008 = vmatmul.mubr.msk.bf16.gmra.mrb[20].mxu0 %vm358_vm1, %v3570_v56  ;;  %2871 = vmatprep.mubr.msk.bf16.mxu1 %vm358_vm1, %v3653_v53 }
  0x9e   : > { %3011 = vmatprep.mubr.msk.bf16.mxu0 %vm358_vm1, %v3695_v21 }
  0xa4   : > { %2872 = vmatmul.mubr.msk.bf16.gmra.mrb[12].mxu1 %vm358_vm1, %v3656_v57 }
  0xa5   : > { %3012 = vmatmul.mubr.msk.bf16.gmra.mrb[24].mxu0 %vm358_vm1, %v3801_v52  ;;  %2875 = vmatprep.mubr.msk.bf16.mxu1 %vm358_vm1, %v3668_v61 }
  0xa6   : > { %3019 = vmatprep.mubr.msk.bf16.mxu0 %vm358_vm1, %v3456_v51  ;;  %v1212_v51 = vshrl.u32 %v3695_v21, 16 }
  0xac   : > { %2876 = vmatmul.mubr.msk.bf16.gmra.mrb[16].mxu1 %vm358_vm1, %v3671_v62 }
  0xad   : > { %3020 = vmatmul.mubr.msk.bf16.vlgmr.msra.gmra.mrb[0].mxu0 %vm358_vm1, %v3466_v55  ;;  %2879 = vmatprep.mubr.msk.bf16.mxu1 %vm358_vm1, %v3692_v19  ;;  %v204_v55 = vld [vmem:[%s3401_s27 + $0x100] sm:$0xff] }
  0xae   : > { %3048 = vmatpush3.bf16.msra.mxu0 %v3332_v33  ;;  %3023 = vmatprep.mubr.msk.bf16.mxu0 %vm358_vm1, %v3497_v5 }
  0xaf   : > { %3049 = vmatprep.subr.bf16.mxu0 %v3334_v3 }
  0xb2   : > { %3050 = vmatpush3.bf16.msra.mxu0 %v3334_v3 }
  0xb4   : > { %2880 = vmatmul.mubr.msk.bf16.gmra.mrb[20].mxu1 %vm358_vm1, %v3698_v4 }
  0xb5   : > { %3024 = vmatmul.mubr.msk.bf16.gmra.mrb[4].mxu0 %vm358_vm1, %v3503_v11  ;;  %2883 = vmatprep.mubr.msk.bf16.mxu1 %vm358_vm1, %v3714_v25 }
  0xb6   : > { %3027 = vmatprep.mubr.msk.bf16.mxu0 %vm358_vm1, %v3522_v24  ;;  %v1817_v24 = vshrl.u32 %v3801_v52, 16 }
  0xbc   : > { %2884 = vmatmul.mubr.msk.bf16.gmra.mrb[24].mxu1 %vm358_vm1, %v3588_v9 }
  0xbd   : > { %3028 = vmatmul.mubr.msk.bf16.gmra.mrb[8].mxu0 %vm358_vm1, %v3527_v27  ;;  %2891 = vmatprep.mubr.msk.bf16.mxu1 %vm358_vm1, %v3418_v13  ;;  %v1208_v13 = vshll.u32 %v3695_v21, 16 }
  0xbe   : > { %3031 = vmatprep.mubr.msk.bf16.mxu0 %vm358_vm1, %v3559_v48 }
  0xc4   : > { %2892 = vmatmul.mubr.msk.bf16.vlgmr.msra.gmra.mrb[0].mxu1 %vm358_vm1, %v3420_v14  ;;  %v1813_v14 = vshll.u32 %v3801_v52, 16 }
  0xc5   : > { %3032 = vmatmul.mubr.msk.bf16.gmra.mrb[12].mxu0 %vm358_vm1, %v3591_v12  ;;  %2895 = vmatprep.mubr.msk.bf16.mxu1 %vm358_vm1, %v3428_v20  ;;  %v1812_v20 = vpack.c.bf16 %v204_v55, %v204_v55 }
  0xc6   : > { %3035 = vmatprep.mubr.msk.bf16.mxu0 %vm358_vm1, %v3598_v17  ;;  %3081 = vmatpush3.bf16.msra.mxu1 %v3374_v0  ;;  %v1210_v0 = vrot.slane %v1208_v13, 1  ;;  %v1815_v5 = vrot.slane %v1813_v14, 1 }
  0xc7   : > { %3080 = vmatprep.subr.bf16.mxu1 %v3383_v2  ;;  %v1821_v27 = vshll.u32 %v1812_v20, 16 }
  0xc8   : > { %v1211_v11 = vsel %vm229_vm0, %v3644_v44, %v1210_v0 }
  0xc9   : > { %v1823_v48 = vrot.slane %v1821_v27, 1 }
  0xca   : > { %3082 = vmatpush3.bf16.msra.mxu1 %v3383_v2  ;;  %v1214_v2 = vor.u32 %v1212_v51, %v1210_v0 }
  0xcc   : > { %2896 = vmatmul.mubr.msk.bf16.gmra.mrb[4].mxu1 %vm358_vm1, %v3440_v32  ;;  %v1816_v32 = vsel %vm229_vm0, %v1214_v2, %v1815_v5 }
  0xcd   : > { %3036 = vmatmul.mubr.msk.bf16.gmra.mrb[16].mxu0 %vm358_vm1, %v3625_v35  ;;  %2899 = vmatprep.mubr.msk.bf16.mxu1 %vm358_vm1, %v3443_v36  ;;  %v1819_v36 = vor.u32 %v1817_v24, %v1815_v5 }
  0xce   : > { %3039 = vmatprep.mubr.msk.bf16.mxu0 %vm358_vm1, %v3632_v42 }
  0xcf   : > { %v1824_v9 = vsel %vm229_vm0, %v1819_v36, %v1823_v48 }
  0xd4   : > { %2900 = vmatmul.mubr.msk.bf16.gmra.mrb[8].mxu1 %vm358_vm1, %v3445_v37  ;;  %v1216_v37 = vshll.u32 %v3716_v26, 16 }
  0xd5   : > { %3040 = vmatmul.mubr.msk.bf16.gmra.mrb[20].mxu0 %vm358_vm1, %v1211_v11  ;;  %2903 = vmatprep.mubr.msk.bf16.mxu1 %vm358_vm1, %v3477_v60 }
  0xd6   : > { %3043 = vmatprep.mubr.msk.bf16.mxu0 %vm358_vm1, %v1816_v32  ;;  %v1218_v60 = vrot.slane %v1216_v37, 1 }
  0xdc   : > { %2904 = vmatmul.mubr.msk.bf16.gmra.mrb[12].mxu1 %vm358_vm1, %v3483_v1  ;;  %v2023_v1 = vrot.slane %v3801_v52, 1 }
  0xdd   : > { %3044 = vmatmul.mubr.msk.bf16.gmra.mrb[24].mxu0 %vm358_vm1, %v1824_v9  ;;  %2907 = vmatprep.mubr.msk.bf16.mxu1 %vm358_vm1, %v3517_v18  ;;  %v1219_v18 = vsel %vm229_vm0, %v1214_v2, %v1218_v60 }
  0xde   : > { %3051 = vmatprep.mubr.msk.bf16.mxu0 %vm358_vm1, %v3595_v16 }
  0xe4   : > { %2908 = vmatmul.mubr.msk.bf16.gmra.mrb[16].mxu1 %vm358_vm1, %v3534_v31  ;;  %v2024_v31 = vsel %vm751_vm2, %v3709_v23, %v2023_v1 }
  0xe5   : > { %3052 = vmatmul.mubr.msk.bf16.vlgmr.msra.gmra.mrb[0].mxu0 %vm358_vm1, %v3603_v22  ;;  %2911 = vmatprep.mubr.msk.bf16.mxu1 %vm358_vm1, %v3543_v38  ;;  %v2025_v38 = vrot.slane %v1812_v20, 1 }
  0xe6   : > { %3055 = vmatprep.mubr.msk.bf16.mxu0 %vm358_vm1, %v3629_v41 }
  0xec   : > { %2912 = vmatmul.mubr.msk.bf16.gmra.mrb[20].mxu1 %vm358_vm1, %v3568_v54  ;;  %v2026_v54 = vsel %vm751_vm2, %v2023_v1, %v2025_v38 }
  0xed   : > { %3056 = vmatmul.mubr.msk.bf16.gmra.mrb[4].mxu0 %vm358_vm1, %v3635_v43  ;;  %2915 = vmatprep.mubr.msk.bf16.mxu1 %vm358_vm1, %v3570_v56 }
  0xee   : > { %3059 = vmatprep.mubr.msk.bf16.mxu0 %vm358_vm1, %v3653_v53 }
  0xf4   : > { %2916 = vmatmul.mubr.msk.bf16.gmra.mrb[24].mxu1 %vm358_vm1, %v3695_v21 }
  0xf5   : > { %3060 = vmatmul.mubr.msk.bf16.gmra.mrb[8].mxu0 %vm358_vm1, %v3656_v57  ;;  %2939 = vmatprep.mubr.msk.bf16.mxu1 %vm358_vm1, %v3591_v12 }
  0xf6   : > { %3063 = vmatprep.mubr.msk.bf16.mxu0 %vm358_vm1, %v3668_v61 }
  0xfc   : > { %2940 = vmatmul.mubr.msk.bf16.vlgmr.msra.gmra.mrb[16].mxu1 %vm358_vm1, %v3598_v17 }
  0xfd   : > { %3064 = vmatmul.mubr.msk.bf16.gmra.mrb[12].mxu0 %vm358_vm1, %v3671_v62  ;;  %2943 = vmatprep.mubr.msk.bf16.mxu1 %vm358_vm1, %v3625_v35 }
  0xfe   : > { %3067 = vmatprep.mubr.msk.bf16.mxu0 %vm358_vm1, %v3692_v19 }
 0x104   : > { %2944 = vmatmul.mubr.msk.bf16.gmra.mrb[20].mxu1 %vm358_vm1, %v3632_v42 }
 0x105   : > { %3068 = vmatmul.mubr.msk.bf16.gmra.mrb[16].mxu0 %vm358_vm1, %v3698_v4  ;;  %2947 = vmatprep.mubr.msk.bf16.mxu1 %vm358_vm1, %v1211_v11 }
 0x106   : > { %3071 = vmatprep.mubr.msk.bf16.mxu0 %vm358_vm1, %v3714_v25 }
 0x10c   : > { %2948 = vmatmul.mubr.msk.bf16.gmra.mrb[24].mxu1 %vm358_vm1, %v1219_v18 }
 0x10d   : > { %3072 = vmatmul.mubr.msk.bf16.gmra.mrb[20].mxu0 %vm358_vm1, %v3721_v28 }
 0x10e   : > { %3075 = vmatprep.mubr.msk.bf16.mxu0 %vm358_vm1, %v2024_v31 }
 0x115   : > { %3076 = vmatmul.mubr.msk.bf16.gmra.mrb[24].mxu0 %vm358_vm1, %v2026_v54 }
 0x197   : > { %v2893_v56 = vpop.f32.mrb[0].mxu1 }
 0x198   : > { %v1063_v12 = vpop.f32.mrb[1].mxu1 }
 0x199   : > { %v2894_v16 = vpop.f32.mrb[2].mxu1 }
 0x19a   : > { %v1066_v17 = vpop.f32.mrb[3].mxu1 }
 0x19f   : > { %v2897_v22 = vpop.f32.mrb[4].mxu1 }
 0x1a0   : > { %v1079_v35 = vpop.f32.mrb[5].mxu1 }
 0x1a1   : > { %v2898_v39 = vpop.f32.mrb[6].mxu1 }
 0x1a2   : > { %v1082_v41 = vpop.f32.mrb[7].mxu1 }
 0x1a7   : > { %v2901_v42 = vpop.f32.mrb[8].mxu1 }
 0x1a8   : > { %v1095_v43 = vpop.f32.mrb[9].mxu1 }
 0x1a9   : > { %v3929_v44 = vpop.f32.mrb[10].mxu1 }
 0x1aa   : > { %v3931_v45 = vpop.f32.mrb[11].mxu1 }
 0x1af   : > { %v3933_v46 = vpop.f32.mrb[12].mxu1 }
 0x1b0   : > { %v3935_v49 = vpop.f32.mrb[13].mxu1 }
 0x1b1   : > { %v3937_v50 = vpop.f32.mrb[14].mxu1 }
 0x1b2   : > { %v3939_v53 = vpop.f32.mrb[15].mxu1 }
 0x1b8   : > { %v3053_v57 = vpop.f32.mrb[0].mxu0 }
 0x1b9   : > { %v3083_v59 = vadd.f32 %v3053_v57, %v2893_v56  ;;  %v2079_v61 = vpop.f32.mrb[1].mxu0 }
 0x1ba   : > { %v3084_v62 = vadd.f32 %v2079_v61, %v1063_v12  ;;  %v3054_v6 = vpop.f32.mrb[2].mxu0 }
 0x1bb   : > { %v2227_v10 = vadd.f32 %v3083_v59, %v3944_v58  ;;  %v3085_v7 = vadd.f32 %v3054_v6, %v2894_v16  ;;  %v2082_v8 = vpop.f32.mrb[3].mxu0 }
 0x1bc   : > { %v2225_v15 = vadd.f32 %v3084_v62, %v3944_v58  ;;  %v3086_v19 = vadd.f32 %v2082_v8, %v1066_v17 }
 0x1bd   : > { %v2255_v21 = vmax.f32 %v2227_v10, 0.0  ;;  %v2228_v4 = vadd.f32 %v3085_v7, %v3944_v58 }
 0x1be   : > { %v2253_v23 = vmax.f32 %v2225_v15, 0.0  ;;  %v2226_v47 = vadd.f32 %v3086_v19, %v3944_v58 }
 0x1bf   : > { %2284 = vst.msk [vmem:[#allocation2 + $0x10] sm:$0xff] %vm2281_vm3, %v2255_v21  ;;  %v2256_v25 = vmax.f32 %v2228_v4, 0.0 }
 0x1c0   : > { %2282 = vst.msk [vmem:[#allocation2] sm:$0xff] %vm2281_vm3, %v2253_v23  ;;  %v2254_v26 = vmax.f32 %v2226_v47, 0.0  ;;  %v3057_v28 = vpop.f32.mrb[4].mxu0 }
 0x1c1   : > { %2285 = vst.msk [vmem:[#allocation2 + $0x18] sm:$0xff] %vm2281_vm3, %v2256_v25  ;;  %v3087_v29 = vadd.f32 %v3057_v28, %v2897_v22  ;;  %v2095_v30 = vpop.f32.mrb[5].mxu0 }
 0x1c2   : > { %2283 = vst.msk [vmem:[#allocation2 + $0x8] sm:$0xff] %vm2281_vm3, %v2254_v26  ;;  %v3088_v63 = vadd.f32 %v2095_v30, %v1079_v35  ;;  %v3058_v33 = vpop.f32.mrb[6].mxu0 }
 0x1c3   : > { %v2231_v34 = vadd.f32 %v3087_v29, %v3944_v58  ;;  %v3089_v40 = vadd.f32 %v3058_v33, %v2898_v39  ;;  %v2098_v52 = vpop.f32.mrb[7].mxu0 }
 0x1c4   : > { %v2229_v3 = vadd.f32 %v3088_v63, %v3944_v58  ;;  %v3090_v13 = vadd.f32 %v2098_v52, %v1082_v41 }
 0x1c5   : > { %v2259_v51 = vmax.f32 %v2231_v34, 0.0  ;;  %v2232_v14 = vadd.f32 %v3089_v40, %v3944_v58 }
 0x1c6   : > { %v2257_v55 = vmax.f32 %v2229_v3, 0.0  ;;  %v2230_v0 = vadd.f32 %v3090_v13, %v3944_v58 }
 0x1c7   : > { %2288 = vst.msk [vmem:[#allocation2 + $0x30] sm:$0xff] %vm2281_vm3, %v2259_v51  ;;  %v2260_v20 = vmax.f32 %v2232_v14, 0.0 }
 0x1c8   : > { %v2314_v2 = vld [vmem:[#allocation2 + $0x10] ss:$2 sm:$0x7f]  ;;  %v2316_v5 = vld [vmem:[#allocation2 + $0x11] ss:$2 sm:$0x7f] }
 0x1c9   : > { %2286 = vst.msk [vmem:[#allocation2 + $0x20] sm:$0xff] %vm2281_vm3, %v2257_v55  ;;  %v2318_v11 = vmax.f32 %v2314_v2, %v2316_v5  ;;  %v2310_v24 = vld [vmem:[#allocation2] ss:$2 sm:$0x7f]  ;;  %2289 = vst.msk [vmem:[#allocation2 + $0x38] sm:$0xff] %vm2281_vm3, %v2260_v20  ;;  %v2258_v36 = vmax.f32 %v2230_v0, 0.0 }
 0x1ca   : > { %v2312_v27 = vld [vmem:[#allocation2 + $0x1] ss:$2 sm:$0x7f]  ;;  %v3061_v48 = vpop.f32.mrb[8].mxu0 }
 0x1cb   : > { %v2317_v32 = vmax.f32 %v2310_v24, %v2312_v27  ;;  %v3091_v9 = vadd.f32 %v3061_v48, %v2901_v42  ;;  %v2111_v37 = vpop.f32.mrb[9].mxu0  ;;  %2287 = vst.msk [vmem:[#allocation2 + $0x28] sm:$0xff] %vm2281_vm3, %v2258_v36 }
 0x1cc   : > { %v3092_v1 = vadd.f32 %v2111_v37, %v1095_v43  ;;  %v3062_v18 = vpop.f32.mrb[10].mxu0 }
 0x1cd   : > { %v2319_v60 = vmax.f32 %v2317_v32, %v2318_v11  ;;  %v2235_v31 = vadd.f32 %v3091_v9, %v3944_v58  ;;  %v3093_v38 = vadd.f32 %v3062_v18, %v3929_v44  ;;  %v2114_v54 = vpop.f32.mrb[11].mxu0 }
 0x1ce   : > { %v2233_v56 = vadd.f32 %v3092_v1, %v3944_v58  ;;  %v3094_v12 = vadd.f32 %v2114_v54, %v3931_v45 }
 0x1cf   : > { %2321 = vst.msk [vmem:[%s3965_s7] sm:$0x7f] %vm2320_vm4, %v2319_v60  ;;  %v2263_v16 = vmax.f32 %v2235_v31, 0.0  ;;  %v2236_v17 = vadd.f32 %v3093_v38, %v3944_v58  ;;  %v2941_v22 = vpop.f32.mrb[16].mxu1 }
 0x1d0   : > { %v2327_v35 = vld [vmem:[#allocation2 + $0x30] ss:$2 sm:$0x7f]  ;;  %v2329_v39 = vld [vmem:[#allocation2 + $0x31] ss:$2 sm:$0x7f]  ;;  %v2234_v41 = vadd.f32 %v3094_v12, %v3944_v58 }
 0x1d1   : > { %2292 = vst.msk [vmem:[#allocation2 + $0x50] sm:$0xff] %vm2281_vm3, %v2263_v16  ;;  %v2261_v42 = vmax.f32 %v2233_v56, 0.0  ;;  %v2264_v43 = vmax.f32 %v2236_v17, 0.0  ;;  %v3065_v44 = vpop.f32.mrb[12].mxu0  ;;  %v1336_v57 = vpop.f32.mrb[17].mxu1  ;;  %v2331_v59 = vmax.f32 %v2327_v35, %v2329_v39 }
 0x1d2   : > { %v2262_v61 = vmax.f32 %v2234_v41, 0.0  ;;  %v3095_v62 = vadd.f32 %v3065_v44, %v3933_v46  ;;  %v2127_v6 = vpop.f32.mrb[13].mxu0  ;;  %v2942_v45 = vpop.f32.mrb[18].mxu1  ;;  %v2323_v10 = vld [vmem:[#allocation2 + $0x20] ss:$2 sm:$0x7f] }
 0x1d3   : > { %v2325_v7 = vld [vmem:[#allocation2 + $0x21] ss:$2 sm:$0x7f]  ;;  %2290 = vst.msk [vmem:[#allocation2 + $0x40] sm:$0xff] %vm2281_vm3, %v2261_v42  ;;  %2293 = vst.msk [vmem:[#allocation2 + $0x58] sm:$0xff] %vm2281_vm3, %v2264_v43  ;;  %v3096_v8 = vadd.f32 %v2127_v6, %v3935_v49  ;;  %v3066_v21 = vpop.f32.mrb[14].mxu0 }
 0x1d4   : > { %v2330_v15 = vmax.f32 %v2323_v10, %v2325_v7  ;;  %2291 = vst.msk [vmem:[#allocation2 + $0x48] sm:$0xff] %vm2281_vm3, %v2262_v61  ;;  %v2239_v19 = vadd.f32 %v3095_v62, %v3944_v58  ;;  %v1339_v4 = vpop.f32.mrb[19].mxu1  ;;  %v3097_v23 = vadd.f32 %v3066_v21, %v3937_v50  ;;  %v2130_v47 = vpop.f32.mrb[15].mxu0 }
 0x1d5   : > { %v2237_v46 = vadd.f32 %v3096_v8, %v3944_v58  ;;  %v3098_v28 = vadd.f32 %v2130_v47, %v3939_v53 }
 0x1d6   : > { %v2332_v25 = vmax.f32 %v2330_v15, %v2331_v59  ;;  %v2267_v26 = vmax.f32 %v2239_v19, 0.0  ;;  %v2240_v30 = vadd.f32 %v3097_v23, %v3944_v58 }
 0x1d7   : > { %v2265_v29 = vmax.f32 %v2237_v46, 0.0  ;;  %v2945_v49 = vpop.f32.mrb[20].mxu1  ;;  %v2238_v63 = vadd.f32 %v3098_v28, %v3944_v58 }
 0x1d8   : > { %2639 = vst.msk [vmem:[%s3965_s7 + $0x8] sm:$0x7f] %vm2320_vm4, %v2332_v25  ;;  %v3069_v33 = vpop.f32.mrb[16].mxu0  ;;  %v1352_v34 = vpop.f32.mrb[21].mxu1  ;;  %v2268_v50 = vmax.f32 %v2240_v30, 0.0 }
 0x1d9   : > { %2296 = vst.msk [vmem:[#allocation2 + $0x70] sm:$0xff] %vm2281_vm3, %v2267_v26  ;;  %2294 = vst.msk [vmem:[#allocation2 + $0x60] sm:$0xff] %vm2281_vm3, %v2265_v29  ;;  %v3099_v40 = vadd.f32 %v3069_v33, %v2941_v22  ;;  %v2143_v52 = vpop.f32.mrb[17].mxu0  ;;  %v2946_v3 = vpop.f32.mrb[22].mxu1  ;;  %v2266_v5 = vmax.f32 %v2238_v63, 0.0 }
 0x1da   : > { %v2340_v13 = vld [vmem:[#allocation2 + $0x50] ss:$2 sm:$0x7f]  ;;  %v2342_v53 = vld [vmem:[#allocation2 + $0x51] ss:$2 sm:$0x7f]  ;;  %v3100_v51 = vadd.f32 %v2143_v52, %v1336_v57 }
 0x1db   : > { %v2344_v14 = vmax.f32 %v2340_v13, %v2342_v53  ;;  %v2336_v55 = vld [vmem:[#allocation2 + $0x40] ss:$2 sm:$0x7f]  ;;  %v2338_v0 = vld [vmem:[#allocation2 + $0x41] ss:$2 sm:$0x7f]  ;;  %v2243_v20 = vadd.f32 %v3099_v40, %v3944_v58 }
 0x1dc   : > { %2297 = vst.msk [vmem:[#allocation2 + $0x78] sm:$0xff] %vm2281_vm3, %v2268_v50  ;;  %v2343_v2 = vmax.f32 %v2336_v55, %v2338_v0  ;;  %v2241_v11 = vadd.f32 %v3100_v51, %v3944_v58  ;;  %v3070_v24 = vpop.f32.mrb[18].mxu0  ;;  %v1355_v27 = vpop.f32.mrb[23].mxu1  ;;  %2295 = vst.msk [vmem:[#allocation2 + $0x68] sm:$0xff] %vm2281_vm3, %v2266_v5 }
 0x1dd   : > { %v2271_v32 = vmax.f32 %v2243_v20, 0.0  ;;  %v3101_v36 = vadd.f32 %v3070_v24, %v2942_v45  ;;  %v2146_v48 = vpop.f32.mrb[19].mxu0 }
 0x1de   : > { %v2345_v9 = vmax.f32 %v2343_v2, %v2344_v14  ;;  %v2269_v37 = vmax.f32 %v2241_v11, 0.0  ;;  %v3102_v60 = vadd.f32 %v2146_v48, %v1339_v4 }
 0x1df   : > { %2300 = vst.msk [vmem:[#allocation2 + $0x90] sm:$0xff] %vm2281_vm3, %v2271_v32  ;;  %v2244_v1 = vadd.f32 %v3101_v36, %v3944_v58  ;;  %v2949_v18 = vpop.f32.mrb[24].mxu1 }
 0x1e0   : > { %2640 = vst.msk [vmem:[%s3965_s7 + $0x10] sm:$0x7f] %vm2320_vm4, %v2345_v9  ;;  %v2242_v31 = vadd.f32 %v3102_v60, %v3944_v58  ;;  %v3073_v38 = vpop.f32.mrb[20].mxu0  ;;  %v1368_v54 = vpop.f32.mrb[25].mxu1 }
 0x1e1   : > { %2298 = vst.msk [vmem:[#allocation2 + $0x80] sm:$0xff] %vm2281_vm3, %v2269_v37  ;;  %v2272_v56 = vmax.f32 %v2244_v1, 0.0  ;;  %v3103_v12 = vadd.f32 %v3073_v38, %v2945_v49  ;;  %v2159_v16 = vpop.f32.mrb[21].mxu0  ;;  %v2950_v17 = vpop.f32.mrb[26].mxu1 }
 0x1e2   : > { %v3104_v39 = vadd.f32 %v2159_v16, %v1352_v34  ;;  %v2270_v41 = vmax.f32 %v2242_v31, 0.0  ;;  %v3074_v43 = vpop.f32.mrb[22].mxu0  ;;  %v1371_v44 = vpop.f32.mrb[27].mxu1 }
 0x1e3   : > { %v2353_v22 = vld [vmem:[#allocation2 + $0x70] ss:$2 sm:$0x7f]  ;;  %v2355_v35 = vld [vmem:[#allocation2 + $0x71] ss:$2 sm:$0x7f]  ;;  %v2247_v42 = vadd.f32 %v3103_v12, %v3944_v58  ;;  %v3105_v61 = vadd.f32 %v3074_v43, %v2946_v3 }
 0x1e4   : > { %2301 = vst.msk [vmem:[#allocation2 + $0x98] sm:$0xff] %vm2281_vm3, %v2272_v56  ;;  %v2357_v57 = vmax.f32 %v2353_v22, %v2355_v35  ;;  %v2245_v59 = vadd.f32 %v3104_v39, %v3944_v58  ;;  %v2162_v62 = vpop.f32.mrb[23].mxu0  ;;  %v2349_v6 = vld [vmem:[#allocation2 + $0x60] ss:$2 sm:$0x7f]  ;;  %2299 = vst.msk [vmem:[#allocation2 + $0x88] sm:$0xff] %vm2281_vm3, %v2270_v41 }
 0x1e5   : > { %v2351_v45 = vld [vmem:[#allocation2 + $0x61] ss:$2 sm:$0x7f]  ;;  %v3106_v10 = vadd.f32 %v2162_v62, %v1355_v27  ;;  %v2275_v8 = vmax.f32 %v2247_v42, 0.0  ;;  %v2248_v19 = vadd.f32 %v3105_v61, %v3944_v58 }
 0x1e6   : > { %v2356_v7 = vmax.f32 %v2349_v6, %v2351_v45  ;;  %v2273_v15 = vmax.f32 %v2245_v59, 0.0 }
 0x1e7   : > { %v2246_v21 = vadd.f32 %v3106_v10, %v3944_v58  ;;  %2304 = vst.msk [vmem:[#allocation2 + $0xb0] sm:$0xff] %vm2281_vm3, %v2275_v8  ;;  %v2276_v46 = vmax.f32 %v2248_v19, 0.0 }
 0x1e8   : > { %v2358_v4 = vmax.f32 %v2356_v7, %v2357_v57  ;;  %2302 = vst.msk [vmem:[#allocation2 + $0xa0] sm:$0xff] %vm2281_vm3, %v2273_v15  ;;  %v3077_v23 = vpop.f32.mrb[24].mxu0 }
 0x1e9   : > { %v2274_v47 = vmax.f32 %v2246_v21, 0.0  ;;  %v3107_v25 = vadd.f32 %v3077_v23, %v2949_v18  ;;  %v2175_v26 = vpop.f32.mrb[25].mxu0  ;;  %2305 = vst.msk [vmem:[#allocation2 + $0xb8] sm:$0xff] %vm2281_vm3, %v2276_v46 }
 0x1ea   : > { %2641 = vst.msk [vmem:[%s3965_s7 + $0x18] sm:$0x7f] %vm2320_vm4, %v2358_v4  ;;  %v3108_v30 = vadd.f32 %v2175_v26, %v1368_v54  ;;  %v3078_v33 = vpop.f32.mrb[26].mxu0 }
 0x1eb   : > { %v2366_v28 = vld [vmem:[#allocation2 + $0x90] ss:$2 sm:$0x7f]  ;;  %v2368_v29 = vld [vmem:[#allocation2 + $0x91] ss:$2 sm:$0x7f]  ;;  %v2251_v63 = vadd.f32 %v3107_v25, %v3944_v58  ;;  %v3109_v52 = vadd.f32 %v3078_v33, %v2950_v17 }
 0x1ec   : > { %v2370_v49 = vmax.f32 %v2366_v28, %v2368_v29  ;;  %2303 = vst.msk [vmem:[#allocation2 + $0xa8] sm:$0xff] %vm2281_vm3, %v2274_v47  ;;  %v2362_v34 = vld [vmem:[#allocation2 + $0x80] ss:$2 sm:$0x7f]  ;;  %v2249_v40 = vadd.f32 %v3108_v30, %v3944_v58  ;;  %v2178_v53 = vpop.f32.mrb[27].mxu0 }
 0x1ed   : > { %v2364_v50 = vld [vmem:[#allocation2 + $0x81] ss:$2 sm:$0x7f]  ;;  %v2279_v13 = vmax.f32 %v2251_v63, 0.0  ;;  %v2252_v14 = vadd.f32 %v3109_v52, %v3944_v58  ;;  %v3110_v55 = vadd.f32 %v2178_v53, %v1371_v44 }
 0x1ee   : > { %v2369_v3 = vmax.f32 %v2362_v34, %v2364_v50  ;;  %v2277_v51 = vmax.f32 %v2249_v40, 0.0 }
 0x1ef   : > { %2308 = vst.msk [vmem:[#allocation2 + $0xd0] sm:$0xff] %vm2281_vm3, %v2279_v13  ;;  %v2280_v20 = vmax.f32 %v2252_v14, 0.0  ;;  %v2250_v2 = vadd.f32 %v3110_v55, %v3944_v58 }
 0x1f0   : > { %v2371_v0 = vmax.f32 %v2369_v3, %v2370_v49  ;;  %2306 = vst.msk [vmem:[#allocation2 + $0xc0] sm:$0xff] %vm2281_vm3, %v2277_v51  ;;  %v2379_v5 = vld [vmem:[#allocation2 + $0xb0] ss:$2 sm:$0x7f] }
 0x1f1   : > { %v2381_v11 = vld [vmem:[#allocation2 + $0xb1] ss:$2 sm:$0x7f]  ;;  %2309 = vst.msk [vmem:[#allocation2 + $0xd8] sm:$0xff] %vm2281_vm3, %v2280_v20  ;;  %v2278_v48 = vmax.f32 %v2250_v2, 0.0 }
 0x1f2   : > { %2642 = vst.msk [vmem:[%s3965_s7 + $0x20] sm:$0x7f] %vm2320_vm4, %v2371_v0  ;;  %v2383_v24 = vmax.f32 %v2379_v5, %v2381_v11 }
 0x1f3   : > { %v2375_v27 = vld [vmem:[#allocation2 + $0xa0] ss:$2 sm:$0x7f]  ;;  %v2377_v32 = vld [vmem:[#allocation2 + $0xa1] ss:$2 sm:$0x7f] }
 0x1f4   : > { %v2382_v36 = vmax.f32 %v2375_v27, %v2377_v32  ;;  %2307 = vst.msk [vmem:[#allocation2 + $0xc8] sm:$0xff] %vm2281_vm3, %v2278_v48 }
 0x1f6   : > { %v2384_v9 = vmax.f32 %v2382_v36, %v2383_v24 }
 0x1f8   : > { %2643 = vst.msk [vmem:[%s3965_s7 + $0x28] sm:$0x7f] %vm2320_vm4, %v2384_v9  ;;  %v2392_v37 = vld [vmem:[#allocation2 + $0xd0] ss:$2 sm:$0x7f] }
 0x1f9   : > { %v2394_v60 = vld [vmem:[#allocation2 + $0xd1] ss:$2 sm:$0x7f] }
 0x1fa   : > { %v2396_v58 = vmax.f32 %v2392_v37, %v2394_v60 }
 0x1fb   : > { %v2388_v1 = vld [vmem:[#allocation2 + $0xc0] ss:$2 sm:$0x7f]  ;;  %v2390_v18 = vld [vmem:[#allocation2 + $0xc1] ss:$2 sm:$0x7f] }
 0x1fc   : > { %v2395_v31 = vmax.f32 %v2388_v1, %v2390_v18 }
 0x1fe   : > { %v2397_v38 = vmax.f32 %v2395_v31, %v2396_v58 }
 0x200   : > { %2644 = vst.msk [vmem:[%s3965_s7 + $0x30] sm:$0x7f] %vm2320_vm4, %v2397_v38 }
 0x201 PF: > { %s13_s12 = sadd.s32 1, %s3341_s12  }
 0x202   : > { %p10_p4 = scmp.ge.s32.totalorder %s13_s12, 4  }
 0x204   :  { %12 = sbr.rel (!%p10_p4) target bundleno = 1 (0x1), region = 103 }

// kernel: cnn_forward.6
= control target key start
LH: loop header
LB: loop body
LE: loop exit
PB: predicated region body
PF: predicated region fallthrough
CT: control target
= control target key end

     0   :  { %s2026_s12 = smov 0   ;;  %s2361_s0 = inlined_call_operand.vmem [shape: f32[2,90,64], index: 0, kind: input, shape index: {}]   ;;  %s2362_s1 = inlined_call_operand.vmem [shape: bf16[3,3,64,128], index: 1, kind: input, shape index: {}]   ;;  %s2363_s2 = inlined_call_operand.vmem [shape: f32[1,128], index: 2, kind: input, shape index: {}]   ;;  %s2364_s3 = inlined_call_operand.vmem [shape: f32[2,3,3,128], index: 3, kind: output, shape index: {}]  }
   0x1 LB: > { %s1516_s13 = sadd.s32 4294967295, %s2004_s12   ;;  %p1520_p0 = scmp.ge.s32.totalorder %s2004_s12, 1  ;;  %s2004_s12 = sphi %s2026_s12, %s13_s12  }
   0x2   : > { %p137_p1 = scmp.lt.s32.totalorder %s2004_s12, 3 }
   0x4   : > { %p138_p2 = pnand %p1520_p0, %p137_p1 }
   0x5   : > { %v1962_v0 = vld [vmem:[%s2362_s1 + $0x20] sm:$0xff] (!%p138_p2)   ;;  %p161_p3 = scmp.lt.s32.totalorder (!%p138_p2), %s1516_s13, 1  ;;  %v1964_v2 = vld [vmem:[%s2362_s1 + $0x28] sm:$0xff] (!%p138_p2)   ;;  %v1966_v4 = vld [vmem:[%s2362_s1 + $0x30] sm:$0xff] (!%p138_p2)   ;;  %vm260_vm0 = vcmask (!%p138_p2), 523264   ;;  %vm450_vm1 = vcmask (!%p138_p2), 1046528  }
   0x6   : > { %141 = sbr.rel (%p138_p2) target bundleno = 327 (0x147), region = 32  ;;  %v1963_v1 = vld [vmem:[%s2362_s1 + $0x80] sm:$0xff] (!%p138_p2)   ;;  %1736 = vmatprep.subr.bf16.mxu1 (!%p138_p2), %v1962_v0  ;;  %v1965_v3 = vld [vmem:[%s2362_s1 + $0x88] sm:$0xff] (!%p138_p2)   ;;  %v1967_v5 = vld [vmem:[%s2362_s1 + $0x90] sm:$0xff] (!%p138_p2)   ;;  %vm204_vm2 = vsmask.f32 (!%p138_p2), 7424 }
   0x7   : > { %1800 = vmatprep.subr.bf16.mxu0 (!%p138_p2), %v1963_v1  ;;  %1737 = vmatpush3.bf16.msra.mxu1 (!%p138_p2), %v1962_v0  ;;  %v1968_v6 = vld [vmem:[%s2362_s1 + $0x38] sm:$0xff] (!%p138_p2)   ;;  %v1970_v22 = vld [vmem:[%s2362_s1] sm:$0xff] (!%p138_p2)   ;;  %v1972_v38 = vld [vmem:[%s2362_s1 + $0x8] sm:$0xff] (!%p138_p2)   ;;  %vm864_vm3 = vsmask.f32 (!%p138_p2), 6400  ;;  %vm1274_vm4 = vcmask (!%p138_p2), 1045504  }
   0x8   : > { %1801 = vmatpush3.bf16.msra.mxu0 (!%p138_p2), %v1963_v1  ;;  %1738 = vmatprep.subr.bf16.mxu1 (!%p138_p2), %v1964_v2  ;;  %v1969_v7 = vld [vmem:[%s2362_s1 + $0x98] sm:$0xff] (!%p138_p2)   ;;  %v1971_v32 = vld [vmem:[%s2362_s1 + $0xa0] sm:$0xff] (!%p138_p2)   ;;  %v1973_v41 = vld [vmem:[%s2362_s1 + $0xa8] sm:$0xff] (!%p138_p2)  }
   0x9   : > { %1802 = vmatprep.subr.bf16.mxu0 (!%p138_p2), %v1965_v3  ;;  %v1974_v55 = vld [vmem:[%s2362_s1 + $0x10] sm:$0xff] (!%p138_p2)  }
   0xa   : > { %v1975_v59 = vld [vmem:[%s2362_s1 + $0xb0] sm:$0xff] (!%p138_p2)  }
   0xb   : > { %1739 = vmatpush3.bf16.msra.mxu1 (!%p138_p2), %v1964_v2 }
   0xc   : > { %1803 = vmatpush3.bf16.msra.mxu0 (!%p138_p2), %v1965_v3  ;;  %1740 = vmatprep.subr.bf16.mxu1 (!%p138_p2), %v1966_v4 }
   0xd   : > { %s2366_s13 = smov (!%p161_p3, %s1516_s13), 1  ;;  %1804 = vmatprep.subr.bf16.mxu0 %v1967_v5 }
   0xe   : > { %s1952_s24 = smul.u32 96, %s2366_s13 }
   0xf   : > { %1741 = vmatpush3.bf16.msra.mxu1 %v1966_v4  ;;  %s1953_s18 = smul.u32 12, %s2366_s13 }
  0x10   : > { %s2061_s4 = scalar_lea.vmem %s2361_s0, %s1952_s24  ;;  %1805 = vmatpush3.bf16.msra.mxu0 %v1967_v5  ;;  %1742 = vmatprep.subr.bf16.mxu1 %v1968_v6 }
  0x11   : > { %v172_v8 = vld [vmem:[%s2061_s4] sm:$0xff]  ;;  %v173_v9 = vld [vmem:[%s2061_s4 + $0x8] sm:$0xff]  ;;  %v174_v10 = vld [vmem:[%s2061_s4 + $0x10] sm:$0xff]  ;;  %1806 = vmatprep.subr.bf16.mxu0 %v1969_v7  ;;  %s170_s21 = scalar_lea.vmem %s2364_s3, %s1953_s18 }
  0x12   : > { %v175_v11 = vld [vmem:[%s2061_s4 + $0x18] sm:$0xff]  ;;  %v2070_v12 = vpack.c.bf16 %v173_v9, %v172_v8  ;;  %v176_v13 = vld [vmem:[%s2061_s4 + $0x20] sm:$0xff]  ;;  %v177_v14 = vld [vmem:[%s2061_s4 + $0x28] sm:$0xff]  ;;  %v2074_v15 = vpack.c.bf16 %v174_v10, %v173_v9 }
  0x13   : > { %v2076_v16 = vpack.c.bf16 %v175_v11, %v174_v10  ;;  %v2078_v17 = vpack.c.bf16 %v177_v14, %v176_v13  ;;  %v2080_v18 = vpack.c.bf16 %v176_v13, %v175_v11  ;;  %v178_v23 = vld [vmem:[%s2061_s4 + $0x30] sm:$0xff]  ;;  %v179_v24 = vld [vmem:[%s2061_s4 + $0x38] sm:$0xff]  ;;  %1743 = vmatpush3.bf16.msra.mxu1 %v1968_v6  ;;  %v2119_v43 = vld [vmem:[%s2061_s4 + $0x40] sm:$0xff] }
  0x14   : > { %v206_v19 = vshrl.u32 %v2070_v12, 16  ;;  %v208_v20 = vshll.u32 %v2070_v12, 16  ;;  %v737_v21 = vrot.slane %v2074_v15, 1  ;;  %v2094_v30 = vpack.c.bf16 %v179_v24, %v178_v23  ;;  %1807 = vmatpush3.bf16.msra.mxu0 %v1969_v7  ;;  %1752 = vmatprep.subr.bf16.mxu1 %v1970_v22  ;;  %v2129_v48 = vld [vmem:[%s2061_s4 + $0x48] sm:$0xff]  ;;  %v1976_v6 = vld [vmem:[%s2362_s1 + $0x18] sm:$0xff]  }
  0x15   : > { %v213_v25 = vshll.u32 %v2076_v16, 16  ;;  %v217_v26 = vshrl.u32 %v2076_v16, 16  ;;  %v738_v27 = vrot.slane %v2080_v18, 1  ;;  %v221_v28 = vshll.u32 %v2078_v17, 16  ;;  %1816 = vmatprep.subr.bf16.mxu0 %v1971_v32  ;;  %v1977_v10 = vld [vmem:[%s2362_s1 + $0xb8] sm:$0xff]  }
  0x16   : > { %v210_v29 = vrot.slane %v208_v20, 1  ;;  %v2096_v31 = vpack.c.bf16 %v178_v23, %v177_v14  ;;  %v225_v39 = vshrl.u32 %v2078_v17, 16  ;;  %v229_v42 = vshll.u32 %v2094_v30, 16  ;;  %v1978_v20 = vld [vmem:[%s2362_s1 + $0x40] sm:$0xff]  }
  0x17   : > { %v215_v33 = vrot.slane %v213_v25, 1  ;;  %v739_v34 = vsel %vm450_vm1, %v737_v21, %v738_v27  ;;  %v223_v35 = vrot.slane %v221_v28, 1  ;;  %v2126_v47 = vpack.c.bf16 %v2119_v43, %v179_v24 }
  0x18   : > { %v211_v36 = vor.u32 %v210_v29, %v206_v19  ;;  %1808 = vmatprep.mubr.msk.bf16.mxu0 %vm260_vm0, %v739_v34  ;;  %v740_v37 = vrot.slane %v2096_v31, 1  ;;  %v231_v50 = vrot.slane %v229_v42, 1  ;;  %v233_v52 = vshrl.u32 %v2094_v30, 16  ;;  %v1981_v34 = vld [vmem:[%s2362_s1 + $0xc8] sm:$0xff]  }
  0x19   : > { %v219_v40 = vor.u32 %v217_v26, %v215_v33  ;;  %v227_v46 = vor.u32 %v225_v39, %v223_v35  ;;  %v742_v51 = vrot.slane %v2126_v47, 1  ;;  %v731_v53 = vpack.c.bf16 %v2129_v48, %v2129_v48 }
  0x1a   : > { %v216_v44 = vsel %vm204_vm2, %v211_v36, %v215_v33  ;;  %v741_v45 = vsel %vm450_vm1, %v738_v27, %v740_v37  ;;  %v583_v56 = vshrl.u32 %v2074_v15, 16  ;;  %v585_v60 = vshll.u32 %v2074_v15, 16  ;;  %v1980_v33 = vld [vmem:[%s2362_s1 + $0x48] sm:$0xff]   ;;  %v1992_v15 = vld [vmem:[%s2362_s1 + $0x78] sm:$0xff]  }
  0x1b   : > { %1744 = vmatprep.mubr.msk.bf16.mxu1 %vm260_vm0, %v216_v44  ;;  %v224_v49 = vsel %vm204_vm2, %v219_v40, %v223_v35  ;;  %1809 = vmatmul.mubr.msk.bf16.vlgmr.msra.gmra.mrb[0].mxu0 %vm260_vm0, %v741_v45  ;;  %v232_v54 = vsel %vm204_vm2, %v227_v46, %v231_v50  ;;  %v743_v57 = vsel %vm450_vm1, %v740_v37, %v742_v51  ;;  %v744_v58 = vrot.slane %v731_v53, 1  ;;  %v1983_v45 = vld [vmem:[%s2362_s1 + $0xd0] sm:$0xff]  }
  0x1c   : > { %1745 = vmatmul.mubr.msk.bf16.vlgmr.msra.gmra.mrb[0].mxu1 %vm260_vm0, %v224_v49  ;;  %1817 = vmatpush3.bf16.msra.mxu0 %v1971_v32  ;;  %v590_v61 = vshll.u32 %v2080_v18, 16  ;;  %v594_v62 = vshrl.u32 %v2080_v18, 16  ;;  %v865_v63 = vrot.slane %v583_v56, 1  ;;  %v598_v0 = vshll.u32 %v2096_v31, 16  ;;  %v1979_v32 = vld [vmem:[%s2362_s1 + $0xc0] sm:$0xff]  }
  0x1d   : > { %1753 = vmatpush3.bf16.msra.mxu1 %v1970_v22  ;;  %1818 = vmatprep.subr.bf16.mxu0 %v1973_v41  ;;  %v602_v1 = vshrl.u32 %v2096_v31, 16  ;;  %v235_v2 = vor.u32 %v233_v52, %v231_v50  ;;  %v866_v3 = vrot.slane %v585_v60, 2  ;;  %v745_v5 = vsel %vm450_vm1, %v742_v51, %v744_v58 }
  0x1e   : > { %1754 = vmatprep.subr.bf16.mxu1 %v1972_v38  ;;  %1748 = vmatprep.mubr.msk.bf16.mxu1 %vm260_vm0, %v232_v54  ;;  %v869_v4 = vrot.slane %v590_v61, 2  ;;  %v868_v7 = vrot.slane %v594_v62, 1  ;;  %v873_v9 = vrot.slane %v598_v0, 2  ;;  %v606_v13 = vshll.u32 %v2126_v47, 16  ;;  %v1985_v54 = vld [vmem:[%s2362_s1 + $0xd8] sm:$0xff]  }
  0x1f   : > { %1812 = vmatprep.mubr.msk.bf16.mxu0 %vm260_vm0, %v743_v57  ;;  %v872_v8 = vrot.slane %v602_v1, 1  ;;  %v867_v11 = vor.u32 %v866_v3, %v865_v63  ;;  %v610_v19 = vshrl.u32 %v2126_v47, 16  ;;  %v881_v22 = vshrl.u32 %v731_v53, 16  ;;  %v182_v63 = vld [vmem:[%s2061_s4 + $0x50] sm:$0xff]  ;;  %v1997_v47 = vld [vmem:[%s2362_s1 + $0x118] sm:$0xff]  }
  0x20   : > { %1819 = vmatpush3.bf16.msra.mxu0 %v1973_v41  ;;  %v870_v14 = vor.u32 %v869_v4, %v868_v7  ;;  %v877_v21 = vrot.slane %v606_v13, 2  ;;  %v884_v29 = vshll.u32 %v731_v53, 16  ;;  %v1982_v41 = vld [vmem:[%s2362_s1 + $0x50] sm:$0xff]   ;;  %v451_v46 = vrot.slane %v2070_v12, 1  ;;  %v1984_v53 = vld [vmem:[%s2362_s1 + $0x58] sm:$0xff]   ;;  %v1989_v7 = vld [vmem:[%s2362_s1 + $0xe8] sm:$0xff]  }
  0x21   : > { %1755 = vmatpush3.bf16.msra.mxu1 %v1972_v38  ;;  %1820 = vmatprep.subr.bf16.mxu0 %v1975_v59  ;;  %v874_v24 = vor.u32 %v873_v9, %v872_v8  ;;  %v876_v27 = vrot.slane %v610_v19, 1  ;;  %v883_v37 = vrot.slane %v881_v22, 1  ;;  %v452_v49 = vrot.slane %v2076_v16, 1 }
  0x22   : > { %1756 = vmatprep.subr.bf16.mxu1 %v1974_v55  ;;  %v871_v23 = vsel %vm864_vm3, %v867_v11, %v870_v14  ;;  %v886_v38 = vrot.slane %v884_v29, 2  ;;  %v454_v50 = vrot.slane %v2078_v17, 1  ;;  %v456_v58 = vrot.slane %v2094_v30, 1 }
  0x23   : > { %1813 = vmatmul.mubr.msk.bf16.gmra.mrb[4].mxu0 %vm260_vm0, %v745_v5  ;;  %v878_v35 = vor.u32 %v877_v21, %v876_v27  ;;  %v875_v36 = vsel %vm864_vm3, %v870_v14, %v874_v24  ;;  %v444_v4 = vpack.c.bf16 %v2119_v43, %v2119_v43  ;;  %v2249_v5 = vpack.c.bf16 %v182_v63, %v182_v63 }
  0x24   : > { %1749 = vmatmul.mubr.msk.bf16.gmra.mrb[4].mxu1 %vm260_vm0, %v235_v2  ;;  %1821 = vmatpush3.bf16.msra.mxu0 %v1975_v59  ;;  %v887_v44 = vor.u32 %v886_v38, %v883_v37  ;;  %v455_v57 = vsel %vm450_vm1, %v452_v49, %v454_v50  ;;  %v1987_v59 = vld [vmem:[%s2362_s1 + $0xe0] sm:$0xff]   ;;  %v457_v3 = vsel %vm450_vm1, %v454_v50, %v456_v58  ;;  %v1128_v8 = vrot.slane %v213_v25, 2  ;;  %v1995_v50 = vld [vmem:[%s2362_s1 + $0x108] sm:$0xff]  }
  0x25   : > { %1757 = vmatpush3.bf16.msra.mxu1 %v1974_v55  ;;  %1822 = vmatprep.subr.bf16.mxu0 %v1977_v10  ;;  %v879_v40 = vsel %vm864_vm3, %v874_v24, %v878_v35  ;;  %v453_v55 = vsel %vm450_vm1, %v451_v46, %v452_v49  ;;  %v587_v9 = vrot.slane %v585_v60, 1  ;;  %v1130_v11 = vrot.slane %v225_v39, 1 }
  0x26   : > { %1758 = vmatprep.subr.bf16.mxu1 %v1976_v6  ;;  %1760 = vmatprep.mubr.msk.bf16.mxu1 %vm260_vm0, %v2070_v12  ;;  %v888_v51 = vsel %vm864_vm3, %v878_v35, %v887_v44  ;;  %v2228_v12 = vpack.c.bf16 %v2129_v48, %v2119_v43  ;;  %v1986_v48 = vld [vmem:[%s2362_s1 + $0x60] sm:$0xff]   ;;  %v1131_v14 = vrot.slane %v221_v28, 2  ;;  %v458_v25 = vrot.slane %v444_v4, 1 }
  0x27   : > { %1824 = vmatprep.mubr.msk.bf16.mxu0 %vm260_vm0, %v871_v23  ;;  %v1013_v60 = vrot.slane %v2249_v5, 1  ;;  %v1135_v39 = vrot.slane %v229_v42, 2  ;;  %v1134_v28 = vrot.slane %v233_v52, 1  ;;  %v588_v21 = vor.u32 %v587_v9, %v583_v56  ;;  %v1993_v56 = vld [vmem:[%s2362_s1 + $0xf8] sm:$0xff]  }
  0x28   : > { %1823 = vmatpush3.bf16.msra.mxu0 %v1977_v10  ;;  %v1011_v2 = vrot.slane %v2228_v12, 1  ;;  %v1127_v10 = vrot.slane %v217_v26, 1  ;;  %v1991_v26 = vld [vmem:[%s2362_s1 + $0xf0] sm:$0xff]   ;;  %v592_v22 = vrot.slane %v590_v61, 1  ;;  %v1132_v24 = vor.u32 %v1131_v14, %v1130_v11 }
  0x29   : > { %1759 = vmatpush3.bf16.msra.mxu1 %v1976_v6  ;;  %1832 = vmatprep.subr.bf16.mxu0 %v1979_v32  ;;  %v1988_v6 = vld [vmem:[%s2362_s1 + $0x68] sm:$0xff]   ;;  %v1139_v27 = vshrl.u32 %v2228_v12, 16  ;;  %v1142_v29 = vshll.u32 %v2228_v12, 16  ;;  %v459_v42 = vsel %vm450_vm1, %v456_v58, %v458_v25  ;;  %v1136_v61 = vor.u32 %v1135_v39, %v1134_v28 }
  0x2a   : > { %1768 = vmatprep.subr.bf16.mxu1 %v1978_v20  ;;  %v1012_v43 = vsel %vm450_vm1, %v456_v58, %v1011_v2  ;;  %v1129_v23 = vor.u32 %v1128_v8, %v1127_v10  ;;  %v1014_v52 = vsel %vm450_vm1, %v1011_v2, %v1013_v60  ;;  %v600_v37 = vrot.slane %v598_v0, 1 }
  0x2b   : > { %1825 = vmatmul.mubr.msk.bf16.vlgmr.msra.gmra.mrb[0].mxu0 %vm260_vm0, %v875_v36  ;;  %v1144_v35 = vrot.slane %v1142_v29, 2  ;;  %v596_v36 = vor.u32 %v594_v62, %v592_v22  ;;  %v1148_v38 = vshrl.u32 %v2249_v5, 16  ;;  %v608_v62 = vrot.slane %v606_v13, 1 }
  0x2c   : > { %1761 = vmatmul.mubr.msk.bf16.vlgmr.msra.gmra.mrb[0].mxu1 %vm260_vm0, %v2076_v16  ;;  %1833 = vmatpush3.bf16.msra.mxu0 %v1979_v32  ;;  %v593_v32 = vsel %vm204_vm2, %v588_v21, %v592_v22  ;;  %v604_v18 = vor.u32 %v602_v1, %v600_v37  ;;  %v1280_v58 = vrot.slane %v2228_v12, 2 }
  0x2d   : > { %1769 = vmatpush3.bf16.msra.mxu1 %v1978_v20  ;;  %1834 = vmatprep.subr.bf16.mxu0 %v1981_v34  ;;  %v1990_v20 = vld [vmem:[%s2362_s1 + $0x70] sm:$0xff]   ;;  %v601_v44 = vsel %vm204_vm2, %v596_v36, %v600_v37  ;;  %v1150_v46 = vrot.slane %v1148_v38, 1 }
  0x2e   : > { %1770 = vmatprep.subr.bf16.mxu1 %v1980_v33  ;;  %1764 = vmatprep.mubr.msk.bf16.mxu1 %vm260_vm0, %v2078_v17  ;;  %v609_v31 = vsel %vm204_vm2, %v604_v18, %v608_v62 }
  0x2f   : > { %1828 = vmatprep.mubr.msk.bf16.mxu0 %vm260_vm0, %v879_v40  ;;  %v1151_v40 = vshll.u32 %v2249_v5, 16 }
  0x30   : > { %1835 = vmatpush3.bf16.msra.mxu0 %v1981_v34  ;;  %v1141_v34 = vrot.slane %v1139_v27, 1 }
  0x31   : > { %1771 = vmatpush3.bf16.msra.mxu1 %v1980_v33  ;;  %1836 = vmatprep.subr.bf16.mxu0 %v1983_v45  ;;  %v1133_v33 = vsel %vm864_vm3, %v1129_v23, %v1132_v24  ;;  %v1153_v49 = vrot.slane %v1151_v40, 2 }
  0x32   : > { %1772 = vmatprep.subr.bf16.mxu1 %v1982_v41  ;;  %v1145_v0 = vor.u32 %v1144_v35, %v1141_v34 }
  0x33   : > { %1829 = vmatmul.mubr.msk.bf16.gmra.mrb[4].mxu0 %vm260_vm0, %v888_v51  ;;  %v1154_v13 = vor.u32 %v1153_v49, %v1150_v46  ;;  %v1996_v51 = vld [vmem:[%s2362_s1 + $0x110] sm:$0xff]  }
  0x34   : > { %1765 = vmatmul.mubr.msk.bf16.gmra.mrb[4].mxu1 %vm260_vm0, %v2094_v30  ;;  %1837 = vmatpush3.bf16.msra.mxu0 %v1983_v45  ;;  %v1137_v45 = vsel %vm864_vm3, %v1132_v24, %v1136_v61  ;;  %v1146_v1 = vsel %vm864_vm3, %v1136_v61, %v1145_v0 }
  0x35   : > { %1773 = vmatpush3.bf16.msra.mxu1 %v1982_v41  ;;  %1838 = vmatprep.subr.bf16.mxu0 %v1985_v54  ;;  %v1994_v41 = vld [vmem:[%s2362_s1 + $0x100] sm:$0xff]  }
  0x36   : > { %1774 = vmatprep.subr.bf16.mxu1 %v1984_v53  ;;  %1776 = vmatprep.mubr.msk.bf16.mxu1 %vm260_vm0, %v453_v55  ;;  %v1276_v55 = vrot.slane %v2078_v17, 2 }
  0x37   : > { %1840 = vmatprep.mubr.msk.bf16.mxu0 %vm260_vm0, %v455_v57 }
  0x38   : > { %1839 = vmatpush3.bf16.msra.mxu0 %v1985_v54  ;;  %v1275_v54 = vrot.slane %v2076_v16, 2 }
  0x39   : > { %1775 = vmatpush3.bf16.msra.mxu1 %v1984_v53  ;;  %1848 = vmatprep.subr.bf16.mxu0 %v1987_v59  ;;  %v612_v53 = vor.u32 %v610_v19, %v608_v62 }
  0x3a   : > { %1784 = vmatprep.subr.bf16.mxu1 %v1986_v48  ;;  %v1277_v16 = vsel %vm1274_vm4, %v1275_v54, %v1276_v55 }
  0x3b   : > { %1841 = vmatmul.mubr.msk.bf16.vlgmr.msra.gmra.mrb[0].mxu0 %vm260_vm0, %v457_v3 }
  0x3c   : > { %1777 = vmatmul.mubr.msk.bf16.vlgmr.msra.gmra.mrb[0].mxu1 %vm260_vm0, %v455_v57  ;;  %1849 = vmatpush3.bf16.msra.mxu0 %v1987_v59  ;;  %v1278_v57 = vrot.slane %v2094_v30, 2  ;;  %v1282_v30 = vrot.slane %v2249_v5, 2 }
  0x3d   : > { %1785 = vmatpush3.bf16.msra.mxu1 %v1986_v48  ;;  %1850 = vmatprep.subr.bf16.mxu0 %v1989_v7  ;;  %v1155_v48 = vsel %vm864_vm3, %v1145_v0, %v1154_v13 }
  0x3e   : > { %1786 = vmatprep.subr.bf16.mxu1 %v1988_v6  ;;  %1780 = vmatprep.mubr.msk.bf16.mxu1 %vm260_vm0, %v457_v3  ;;  %v1281_v17 = vsel %vm1274_vm4, %v1278_v57, %v1280_v58  ;;  %v1279_v19 = vsel %vm1274_vm4, %v1276_v55, %v1278_v57  ;;  %v1283_v12 = vsel %vm1274_vm4, %v1280_v58, %v1282_v30 }
  0x3f   : > { %1844 = vmatprep.mubr.msk.bf16.mxu0 %vm260_vm0, %v1012_v43 }
  0x40   : > { %1851 = vmatpush3.bf16.msra.mxu0 %v1989_v7 }
  0x41   : > { %1787 = vmatpush3.bf16.msra.mxu1 %v1988_v6  ;;  %1852 = vmatprep.subr.bf16.mxu0 %v1991_v26 }
  0x42   : > { %1788 = vmatprep.subr.bf16.mxu1 %v1990_v20 }
  0x43   : > { %1845 = vmatmul.mubr.msk.bf16.gmra.mrb[4].mxu0 %vm260_vm0, %v1014_v52 }
  0x44   : > { %1781 = vmatmul.mubr.msk.bf16.gmra.mrb[4].mxu1 %vm260_vm0, %v459_v42  ;;  %1853 = vmatpush3.bf16.msra.mxu0 %v1991_v26 }
  0x45   : > { %1789 = vmatpush3.bf16.msra.mxu1 %v1990_v20  ;;  %1854 = vmatprep.subr.bf16.mxu0 %v1993_v56  ;;  %v1659_v20 = vld [vmem:[%s2363_s2] ss:$0 sm:$0xff] }
  0x46   : > { %1790 = vmatprep.subr.bf16.mxu1 %v1992_v15  ;;  %1792 = vmatprep.mubr.msk.bf16.mxu1 %vm260_vm0, %v593_v32 }
  0x47   : > { %1856 = vmatprep.mubr.msk.bf16.mxu0 %vm260_vm0, %v1133_v33 }
  0x48   : > { %1855 = vmatpush3.bf16.msra.mxu0 %v1993_v56 }
  0x49   : > { %1791 = vmatpush3.bf16.msra.mxu1 %v1992_v15  ;;  %1864 = vmatprep.subr.bf16.mxu0 %v1994_v41 }
  0x4a   : > { %1880 = vmatprep.subr.bf16.mxu1 %v1994_v41 }
  0x4b   : > { %1857 = vmatmul.mubr.msk.bf16.vlgmr.msra.gmra.mrb[0].mxu0 %vm260_vm0, %v1137_v45 }
  0x4c   : > { %1793 = vmatmul.mubr.msk.bf16.vlgmr.msra.gmra.mrb[0].mxu1 %vm260_vm0, %v601_v44  ;;  %1865 = vmatpush3.bf16.msra.mxu0 %v1994_v41 }
  0x4d   : > { %1884 = vmatpush3.bf16.msra.mxu1 %v1994_v41  ;;  %1866 = vmatprep.subr.bf16.mxu0 %v1995_v50 }
  0x4e   : > { %1881 = vmatprep.subr.bf16.mxu1 %v1995_v50  ;;  %1796 = vmatprep.mubr.msk.bf16.mxu1 %vm260_vm0, %v609_v31 }
  0x4f   : > { %1860 = vmatprep.mubr.msk.bf16.mxu0 %vm260_vm0, %v1146_v1 }
  0x50   : > { %1867 = vmatpush3.bf16.msra.mxu0 %v1995_v50 }
  0x51   : > { %1885 = vmatpush3.bf16.msra.mxu1 %v1995_v50  ;;  %1868 = vmatprep.subr.bf16.mxu0 %v1996_v51 }
  0x52   : > { %1882 = vmatprep.subr.bf16.mxu1 %v1996_v51 }
  0x53   : > { %1861 = vmatmul.mubr.msk.bf16.gmra.mrb[4].mxu0 %vm260_vm0, %v1155_v48 }
  0x54   : > { %1797 = vmatmul.mubr.msk.bf16.gmra.mrb[4].mxu1 %vm260_vm0, %v612_v53  ;;  %1869 = vmatpush3.bf16.msra.mxu0 %v1996_v51 }
  0x55   : > { %1886 = vmatpush3.bf16.msra.mxu1 %v1996_v51  ;;  %1870 = vmatprep.subr.bf16.mxu0 %v1997_v47 }
  0x56   : > { %1883 = vmatprep.subr.bf16.mxu1 %v1997_v47  ;;  %1872 = vmatprep.mubr.msk.bf16.mxu0 %vm260_vm0, %v1277_v16 }
  0x57   : > { %1876 = vmatprep.mubr.msk.bf16.mxu1 %vm260_vm0, %v1281_v17 }
  0x58   : > { %1871 = vmatpush3.bf16.msra.mxu0 %v1997_v47 }
  0x59   : > { %1887 = vmatpush3.bf16.msra.mxu1 %v1997_v47 }
  0x5b   : > { %1873 = vmatmul.mubr.msk.bf16.vlgmr.msra.gmra.mrb[0].mxu0 %vm260_vm0, %v1279_v19 }
  0x5c   : > { %1877 = vmatmul.mubr.msk.bf16.vlgmr.msra.gmra.mrb[8].mxu1 %vm260_vm0, %v1283_v12 }
 0x11f   : > { %v1794_v59 = vpop.f32.mrb[0].mxu1 }
 0x120   : > { %v683_v63 = vpop.f32.mrb[1].mxu1 }
 0x121   : > { %v1795_v2 = vpop.f32.mrb[2].mxu1 }
 0x122   : > { %v686_v3 = vpop.f32.mrb[3].mxu1 }
 0x126   : > { %v1862_v5 = vpop.f32.mrb[4].mxu0 }
 0x127   : > { %v1798_v4 = vpop.f32.mrb[4].mxu1  ;;  %v1242_v8 = vpop.f32.mrb[5].mxu0 }
 0x128   : > { %v1892_v6 = vadd.f32 %v1862_v5, %v1798_v4  ;;  %v699_v7 = vpop.f32.mrb[5].mxu1  ;;  %v1863_v10 = vpop.f32.mrb[6].mxu0 }
 0x129   : > { %v1894_v9 = vadd.f32 %v1242_v8, %v699_v7  ;;  %v1799_v43 = vpop.f32.mrb[6].mxu1  ;;  %v1245_v14 = vpop.f32.mrb[7].mxu0 }
 0x12a   : > { %v702_v11 = vpop.f32.mrb[7].mxu1 }
 0x12b   : > { %v1898_v25 = vadd.f32 %v1245_v14, %v702_v11 }
 0x12e   : > { %v1874_v60 = vpop.f32.mrb[0].mxu0 }
 0x12f   : > { %v1878_v26 = vpop.f32.mrb[8].mxu1  ;;  %v1888_v39 = vadd.f32 %v1874_v60, %v1794_v59  ;;  %v1354_v21 = vpop.f32.mrb[1].mxu0 }
 0x130   : > { %v1893_v28 = vadd.f32 %v1892_v6, %v1878_v26  ;;  %v1370_v22 = vpop.f32.mrb[9].mxu1  ;;  %v1889_v23 = vadd.f32 %v1354_v21, %v683_v63  ;;  %v1875_v27 = vpop.f32.mrb[2].mxu0 }
 0x131   : > { %v1895_v24 = vadd.f32 %v1894_v9, %v1370_v22  ;;  %v1879_v29 = vpop.f32.mrb[10].mxu1  ;;  %v1402_v42 = vadd.f32 %v1888_v39, %v1659_v20  ;;  %v1890_v15 = vadd.f32 %v1875_v27, %v1795_v2  ;;  %v1357_v56 = vpop.f32.mrb[3].mxu0 }
 0x132   : > { %v1406_v52 = vadd.f32 %v1893_v28, %v1659_v20  ;;  %v1373_v61 = vpop.f32.mrb[11].mxu1  ;;  %v1400_v32 = vadd.f32 %v1889_v23, %v1659_v20  ;;  %v1891_v34 = vadd.f32 %v1357_v56, %v686_v3 }
 0x133   : > { %v1404_v33 = vadd.f32 %v1895_v24, %v1659_v20  ;;  %v1899_v35 = vadd.f32 %v1898_v25, %v1373_v61  ;;  %v1410_v36 = vmax.f32 %v1402_v42, 0.0  ;;  %v1403_v38 = vadd.f32 %v1890_v15, %v1659_v20 }
 0x134   : > { %v1414_v37 = vmax.f32 %v1406_v52, 0.0  ;;  %v1408_v40 = vmax.f32 %v1400_v32, 0.0  ;;  %v1401_v18 = vadd.f32 %v1891_v34, %v1659_v20 }
 0x135   : > { %v1412_v41 = vmax.f32 %v1404_v33, 0.0  ;;  %v1405_v62 = vadd.f32 %v1899_v35, %v1659_v20  ;;  %1418 = vst [vmem:[#allocation2 + $0x10] sm:$0xff] %v1410_v36  ;;  %v1411_v0 = vmax.f32 %v1403_v38, 0.0 }
 0x136   : > { %1422 = vst [vmem:[#allocation2 + $0x30] sm:$0xff] %v1414_v37  ;;  %1416 = vst [vmem:[#allocation2] sm:$0xff] %v1408_v40  ;;  %v1409_v44 = vmax.f32 %v1401_v18, 0.0 }
 0x137   : > { %1420 = vst [vmem:[#allocation2 + $0x20] sm:$0xff] %v1412_v41  ;;  %v1413_v45 = vmax.f32 %v1405_v62, 0.0  ;;  %1419 = vst [vmem:[#allocation2 + $0x18] sm:$0xff] %v1411_v0 }
 0x138   : > { %1417 = vst [vmem:[#allocation2 + $0x8] sm:$0xff] %v1409_v44 }
 0x139   : > { %1421 = vst [vmem:[#allocation2 + $0x28] sm:$0xff] %v1413_v45 }
 0x13c   : > { %v1436_v46 = vld [vmem:[#allocation2 + $0x12] ss:$2 sm:$0x7]  ;;  %v1438_v49 = vld [vmem:[#allocation2 + $0x13] ss:$2 sm:$0x7] }
 0x13d   : > { %v1424_v50 = vld [vmem:[#allocation2] ss:$2 sm:$0x7]  ;;  %v1426_v31 = vld [vmem:[#allocation2 + $0x1] ss:$2 sm:$0x7]  ;;  %v1443_v51 = vmax.f32 %v1436_v46, %v1438_v49 }
 0x13e   : > { %v1440_v1 = vld [vmem:[#allocation2 + $0x1b] ss:$2 sm:$0x7]  ;;  %v1442_v13 = vld [vmem:[#allocation2 + $0x1c] ss:$2 sm:$0x7]  ;;  %v1431_v57 = vmax.f32 %v1424_v50, %v1426_v31 }
 0x13f   : > { %v1444_v53 = vmax.f32 %v1440_v1, %v1442_v13  ;;  %v1428_v54 = vld [vmem:[#allocation2 + $0x9] ss:$2 sm:$0x7]  ;;  %v1430_v55 = vld [vmem:[#allocation2 + $0xa] ss:$2 sm:$0x7] }
 0x140   : > { %v1432_v58 = vmax.f32 %v1428_v54, %v1430_v55  ;;  %v1449_v48 = vld [vmem:[#allocation2 + $0x24] ss:$2 sm:$0x7]  ;;  %v1451_v47 = vld [vmem:[#allocation2 + $0x25] ss:$2 sm:$0x7] }
 0x141   : > { %v1445_v16 = vmax.f32 %v1443_v51, %v1444_v53  ;;  %v1453_v17 = vld [vmem:[#allocation2 + $0x2d] ss:$2 sm:$0x7]  ;;  %v1455_v30 = vld [vmem:[#allocation2 + $0x2e] ss:$2 sm:$0x7]  ;;  %v1456_v19 = vmax.f32 %v1449_v48, %v1451_v47 }
 0x142   : > { %v1433_v12 = vmax.f32 %v1431_v57, %v1432_v58  ;;  %v1457_v59 = vmax.f32 %v1453_v17, %v1455_v30 }
 0x143   : > { %1660 = vst [vmem:[%s170_s21 + $0x4] sm:$0x7] %v1445_v16 }
 0x144   : > { %1434 = vst [vmem:[%s170_s21] sm:$0x7] %v1433_v12  ;;  %v1458_v63 = vmax.f32 %v1456_v19, %v1457_v59 }
 0x146   : > { %1661 = vst [vmem:[%s170_s21 + $0x8] sm:$0x7] %v1458_v63 }
 0x147 PF: > { %s13_s12 = sadd.s32 1, %s2004_s12  }
 0x148   : > { %p10_p4 = scmp.ge.s32.totalorder %s13_s12, 4  }
 0x14a   :  { %12 = sbr.rel (!%p10_p4) target bundleno = 1 (0x1), region = 83 }

// kernel: cnn_forward.4
= control target key start
LH: loop header
LB: loop body
LE: loop exit
PB: predicated region body
PF: predicated region fallthrough
CT: control target
= control target key end

     0   :  { %8 = vsyncpa [#allocation4], 0  ;;  %s6659_s12 = smov 0   ;;  %s12648_s0 = inlined_call_operand.vmem [shape: f32[2,930,1], index: 0, kind: input, shape index: {}]   ;;  %s12649_s1 = inlined_call_operand.vmem [shape: bf16[3,3,1,32], index: 1, kind: input, shape index: {}]   ;;  %s12650_s2 = inlined_call_operand.hbm [shape: f32[1,32], index: 2, kind: input, shape index: {}]   ;;  %s12651_s3 = inlined_call_operand.vmem [shape: f32[2,14,14,32], index: 3, kind: output, shape index: {}]  }
   0x1 LB: > { %s6665_s13 = sadd.s32 4294967295, %s6635_s12   ;;  %p6522_p0 = scmp.ge.s32.totalorder %s6635_s12, 1  ;;  %s6635_s12 = sphi %s6659_s12, %s14_s12  }
   0x2   : > { %p113_p1 = scmp.lt.s32.totalorder %s6635_s12, 3  ;;  %p12652_p3 = scmp.eq.s32.totalorder %s6665_s13, 0 }
   0x3   : > { %s6637_s15 = smov [#allocation3]   ;;  %s6597_s20 = scalar_lea.hbm %s12650_s2, 16 }
   0x4   : > { %p6669_p2 = pnand %p6522_p0, %p113_p1  ;;  %s129_s16 = sshll.u32 %s6637_s15, 4  ;;  %s130_s16 = int_to_ptr.vmem [resolvable:$true] %s129_s16 }
   0x5   : > { %p6598_p6 = scmp.ne.s32.totalorder %s12650_s2, %s6597_s20  ;;  %p6604_p10 = scmp.lt.u32.totalorder %s6597_s20, %s12650_s2 }
   0x6   : > { %s12742_s14 = scalar_select %p6669_p2, 1, 0 }
   0x7   : > { %p6572_p4 = pneg %p6669_p2 }
   0x9   : > { %p6678_p5 = pnand %p12652_p3, %p6572_p4 }
   0xb   : > { %p6599_p7 = pneg %p6678_p5 }
   0xd   : > { %p6600_p8 = pnand %p6599_p7, %p6598_p6 }
   0xf   : > { %p6601_p9 = pneg %p6600_p8 }
  0x11   : > { %p6606_p11 = pnand %p6604_p10, %p6601_p9 }
  0x13   : > { %6609 = shalt.err (!%p6606_p11)
}
  0x14   : > { %s6610_s25 = scalar_lea.vmem %s130_s16, 16  ;;  %s6617_s26 = scalar_lea.vmem %s130_s16, 32 }
  0x15   : > { %p6611_p12 = scmp.ne.s32.totalorder %s130_s16, %s6610_s25  ;;  %p6618_p1 = scmp.lt.s32.totalorder %s130_s16, %s130_s16 }
  0x16   : > { %p6619_p4 = scmp.lt.s32.totalorder %s6617_s26, %s6610_s25 }
  0x17   : > { %p6613_p13 = pnand %p6611_p12, %p6599_p7 }
  0x18   : > { %p6620_p3 = por %p6619_p4, %p6618_p1 }
  0x19   : > { %p6614_p0 = pneg %p6613_p13 }
  0x1b   : > { %p6621_p2 = pnand %p6620_p3, %p6614_p0 }
  0x1d   : > { %6624 = shalt.err (!%p6621_p2)
}
  0x1e   : > { %6575 = dma.hbm_to_vmem [thread:$0]  (!%p6678_p5), %s12650_s2, 16, %s130_s16, [#allocation4]  }
  0x1f   : > { %p12744_p6 = scmp.ne.s32.totalorder %s12742_s14, 0 }
  0x21   : > { %150 = sbr.rel (%p12744_p6) target bundleno = 1130 (0x46a), region = 32 }
  0x28   : > { %p12745_p8 = scmp.eq.s32.totalorder %s6665_s13, 0 }
  0x2a   : > { %6630 = dma.done.wait (%p12745_p8), [#allocation4], 16   ;;  %p12746_p7 = pmov %p12745_p8 }
  0x2b   : > { %p174_p9 = scmp.lt.s32.totalorder %s6665_s13, 1  ;;  %v6638_v0 = vmov 0   ;;  %v824_v61 = vlaneseq  ;;  %vm1262_vm0 = vcmask 1046528   ;;  %vm1903_vm1 = vcmask 1045504  }
  0x2c   : > { %6632 = vsyncadd (%p12746_p7), [#allocation4], 4294967280  ;;  %6589 = vset.pattern.permute.xlu1 %v6638_v0  ;;  %6588 = vset.pattern.permute.xlu0 %v6638_v0  ;;  %vm2559_vm2 = vcmask 1041408   ;;  %vm3200_vm3 = vcmask 1040384   ;;  %vm4078_vm4 = vcmask 1043456   ;;  %vm4719_vm5 = vcmask 1042432  }
  0x2d   : > { %s12997_s13 = smov (!%p174_p9, %s6665_s13), 1  ;;  %v825_v0 = vshrl.u32 %v824_v61, 7  ;;  %vm5998_vm6 = vcmask 261120   ;;  %vm6126_vm7 = vcmask 259072  }
  0x2e   : > { %s6566_s29 = smul.u32 936, %s12997_s13 }
  0x2f   : > { %s6567_s26 = smul.u32 224, %s12997_s13 }
  0x30   : > { %s6712_s5 = scalar_lea.vmem %s12648_s0, %s6566_s29 }
  0x31   : > { %v186_v1 = vld [vmem:[%s6712_s5 + $0x10] sm:$0xff]  ;;  %v184_v2 = vld [vmem:[%s6712_s5] sm:$0xff]  ;;  %v187_v3 = vld [vmem:[%s6712_s5 + $0x18] sm:$0xff]  ;;  %s7456_s28 = scalar_lea.vmem %s12651_s3, %s6567_s26 }
  0x32   : > { %311 = vperm.xlu1 %6589, %v186_v1   ;;  %301 = vperm.xlu0 %6588, %v184_v2   ;;  %v185_v4 = vld [vmem:[%s6712_s5 + $0x8] sm:$0xff]  ;;  %v188_v6 = vld [vmem:[%s6712_s5 + $0x20] sm:$0xff]  ;;  %v191_v7 = vld [vmem:[%s6712_s5 + $0x38] sm:$0xff] }
  0x33   : > { %v189_v5 = vld [vmem:[%s6712_s5 + $0x28] sm:$0xff]  ;;  %v190_v8 = vld [vmem:[%s6712_s5 + $0x30] sm:$0xff]  ;;  %v192_v10 = vld [vmem:[%s6712_s5 + $0x40] sm:$0xff] }
  0x34   : > { %v193_v9 = vld [vmem:[%s6712_s5 + $0x48] sm:$0xff]  ;;  %v195_v11 = vld [vmem:[%s6712_s5 + $0x58] sm:$0xff]  ;;  %v194_v12 = vld [vmem:[%s6712_s5 + $0x50] sm:$0xff] }
  0x35   : > { %v197_v13 = vld [vmem:[%s6712_s5 + $0x68] sm:$0xff]  ;;  %v196_v14 = vld [vmem:[%s6712_s5 + $0x60] sm:$0xff]  ;;  %v199_v15 = vld [vmem:[%s6712_s5 + $0x78] sm:$0xff] }
  0x36   : > { %316 = vperm.xlu1 %6589, %v187_v3   ;;  %306 = vperm.xlu0 %6588, %v185_v4   ;;  %v198_v16 = vld [vmem:[%s6712_s5 + $0x70] sm:$0xff]  ;;  %v201_v17 = vld [vmem:[%s6712_s5 + $0x88] sm:$0xff]  ;;  %v200_v18 = vld [vmem:[%s6712_s5 + $0x80] sm:$0xff] }
  0x37   : > { %v203_v19 = vld [vmem:[%s6712_s5 + $0x98] sm:$0xff]  ;;  %v202_v20 = vld [vmem:[%s6712_s5 + $0x90] sm:$0xff]  ;;  %v205_v21 = vld [vmem:[%s6712_s5 + $0xa8] sm:$0xff] }
  0x38   : > { %v204_v22 = vld [vmem:[%s6712_s5 + $0xa0] sm:$0xff]  ;;  %v207_v23 = vld [vmem:[%s6712_s5 + $0xb8] sm:$0xff]  ;;  %v206_v24 = vld [vmem:[%s6712_s5 + $0xb0] sm:$0xff] }
  0x39   : > { %v209_v25 = vld [vmem:[%s6712_s5 + $0xc8] sm:$0xff]  ;;  %v208_v26 = vld [vmem:[%s6712_s5 + $0xc0] sm:$0xff]  ;;  %v211_v27 = vld [vmem:[%s6712_s5 + $0xd8] sm:$0xff] }
  0x3a   : > { %326 = vperm.xlu1 %6589, %v189_v5   ;;  %321 = vperm.xlu0 %6588, %v188_v6   ;;  %v210_v28 = vld [vmem:[%s6712_s5 + $0xd0] sm:$0xff]  ;;  %v213_v29 = vld [vmem:[%s6712_s5 + $0xe8] sm:$0xff]  ;;  %v212_v30 = vld [vmem:[%s6712_s5 + $0xe0] sm:$0xff]  ;;  %v826_v6 = vsub.s32 0, %v825_v0 }
  0x3b   : > { %v215_v31 = vld [vmem:[%s6712_s5 + $0xf8] sm:$0xff]  ;;  %v214_v32 = vld [vmem:[%s6712_s5 + $0xf0] sm:$0xff]  ;;  %v217_v33 = vld [vmem:[%s6712_s5 + $0x108] sm:$0xff] }
  0x3c   : > { %v216_v34 = vld [vmem:[%s6712_s5 + $0x100] sm:$0xff]  ;;  %v219_v35 = vld [vmem:[%s6712_s5 + $0x118] sm:$0xff]  ;;  %v218_v36 = vld [vmem:[%s6712_s5 + $0x110] sm:$0xff] }
  0x3d   : > { %v221_v37 = vld [vmem:[%s6712_s5 + $0x128] sm:$0xff]  ;;  %v220_v38 = vld [vmem:[%s6712_s5 + $0x120] sm:$0xff]  ;;  %v223_v39 = vld [vmem:[%s6712_s5 + $0x138] sm:$0xff] }
  0x3e   : > { %336 = vperm.xlu1 %6589, %v191_v7   ;;  %331 = vperm.xlu0 %6588, %v190_v8   ;;  %v222_v40 = vld [vmem:[%s6712_s5 + $0x130] sm:$0xff]  ;;  %v225_v41 = vld [vmem:[%s6712_s5 + $0x148] sm:$0xff]  ;;  %v224_v42 = vld [vmem:[%s6712_s5 + $0x140] sm:$0xff] }
  0x3f   : > { %v227_v43 = vld [vmem:[%s6712_s5 + $0x158] sm:$0xff]  ;;  %v226_v44 = vld [vmem:[%s6712_s5 + $0x150] sm:$0xff]  ;;  %v229_v45 = vld [vmem:[%s6712_s5 + $0x168] sm:$0xff] }
  0x40   : > { %v228_v46 = vld [vmem:[%s6712_s5 + $0x160] sm:$0xff]  ;;  %v231_v47 = vld [vmem:[%s6712_s5 + $0x178] sm:$0xff]  ;;  %v230_v48 = vld [vmem:[%s6712_s5 + $0x170] sm:$0xff] }
  0x41   : > { %v233_v49 = vld [vmem:[%s6712_s5 + $0x188] sm:$0xff]  ;;  %v232_v50 = vld [vmem:[%s6712_s5 + $0x180] sm:$0xff]  ;;  %v235_v51 = vld [vmem:[%s6712_s5 + $0x198] sm:$0xff] }
  0x42   : > { %346 = vperm.xlu1 %6589, %v193_v9   ;;  %341 = vperm.xlu0 %6588, %v192_v10   ;;  %v234_v52 = vld [vmem:[%s6712_s5 + $0x190] sm:$0xff]  ;;  %v237_v53 = vld [vmem:[%s6712_s5 + $0x1a8] sm:$0xff]  ;;  %v236_v54 = vld [vmem:[%s6712_s5 + $0x1a0] sm:$0xff] }
  0x43   : > { %v239_v55 = vld [vmem:[%s6712_s5 + $0x1b8] sm:$0xff]  ;;  %v238_v56 = vld [vmem:[%s6712_s5 + $0x1b0] sm:$0xff]  ;;  %v241_v57 = vld [vmem:[%s6712_s5 + $0x1c8] sm:$0xff] }
  0x44   : > { %v240_v58 = vld [vmem:[%s6712_s5 + $0x1c0] sm:$0xff]  ;;  %v243_v59 = vld [vmem:[%s6712_s5 + $0x1d8] sm:$0xff]  ;;  %v242_v60 = vld [vmem:[%s6712_s5 + $0x1d0] sm:$0xff] }
  0x45   : > { %v245_v62 = vld [vmem:[%s6712_s5 + $0x1e8] sm:$0xff]  ;;  %v244_v63 = vld [vmem:[%s6712_s5 + $0x1e0] sm:$0xff]  ;;  %v247_v3 = vld [vmem:[%s6712_s5 + $0x1f8] sm:$0xff] }
  0x46   : > { %356 = vperm.xlu1 %6589, %v195_v11   ;;  %351 = vperm.xlu0 %6588, %v194_v12   ;;  %v6529_v1 = vld [vmem:[%s12649_s1 + $0x1] sm:$0x1]  ;;  %v6530_v2 = vld [vmem:[%s12649_s1 + $0x2] sm:$0x1]  ;;  %v246_v4 = vld [vmem:[%s6712_s5 + $0x1f0] sm:$0xff] }
  0x47   : > { %v297_v5 = vld [vmem:[%s12649_s1] sm:$0x1]  ;;  %v1040_v7 = vunpack.c.l.bf16 %v6529_v1  ;;  %v6531_v8 = vld [vmem:[%s12649_s1 + $0x3] sm:$0x1]  ;;  %v1686_v9 = vunpack.c.l.bf16 %v6530_v2  ;;  %v6532_v10 = vld [vmem:[%s12649_s1 + $0x4] sm:$0x1] }
  0x48   : > { %v6533_v11 = vld [vmem:[%s12649_s1 + $0x5] sm:$0x1]  ;;  %v6534_v12 = vld [vmem:[%s12649_s1 + $0x6] sm:$0x1] }
  0x4a   : > { %366 = vperm.xlu1 %6589, %v197_v13   ;;  %361 = vperm.xlu0 %6588, %v196_v14   ;;  %v6535_v13 = vld [vmem:[%s12649_s1 + $0x7] sm:$0x1]  ;;  %v6536_v14 = vld [vmem:[%s12649_s1 + $0x8] sm:$0x1] }
  0x4e   : > { %376 = vperm.xlu1 %6589, %v199_v15   ;;  %371 = vperm.xlu0 %6588, %v198_v16   ;;  %v298_v15 = vunpack.c.l.bf16 %v297_v5  ;;  %v249_v16 = vld [vmem:[%s6712_s5 + $0x208] sm:$0xff] }
  0x52   : > { %386 = vperm.xlu1 %6589, %v201_v17   ;;  %381 = vperm.xlu0 %6588, %v200_v18   ;;  %v2327_v17 = vunpack.c.l.bf16 %v6531_v8  ;;  %v6806_v18 = vrot.slane %v1040_v7, %v826_v6 }
  0x56   : > { %396 = vperm.xlu1 %6589, %v203_v19   ;;  %391 = vperm.xlu0 %6588, %v202_v20   ;;  %v248_v19 = vld [vmem:[%s6712_s5 + $0x200] sm:$0xff]  ;;  %v2983_v20 = vunpack.c.l.bf16 %v6532_v10 }
  0x5a   : > { %406 = vperm.xlu1 %6589, %v205_v21   ;;  %401 = vperm.xlu0 %6588, %v204_v22   ;;  %v3624_v21 = vunpack.c.l.bf16 %v6533_v11  ;;  %v3841_v22 = vunpack.c.l.bf16 %v6534_v12  ;;  %v254_v12 = vld [vmem:[%s6712_s5 + $0x230] sm:$0xff] }
  0x5e   : > { %416 = vperm.xlu1 %6589, %v207_v23   ;;  %411 = vperm.xlu0 %6588, %v206_v24   ;;  %v6809_v23 = vrot.slane %v1686_v9, %v826_v6 }
  0x62   : > { %426 = vperm.xlu1 %6589, %v209_v25   ;;  %421 = vperm.xlu0 %6588, %v208_v26   ;;  %v4502_v26 = vunpack.c.l.bf16 %v6535_v13 }
  0x66   : > { %436 = vperm.xlu1 %6589, %v211_v27   ;;  %431 = vperm.xlu0 %6588, %v210_v28   ;;  %v5143_v27 = vunpack.c.l.bf16 %v6536_v14 }
  0x6a   : > { %446 = vperm.xlu1 %6589, %v213_v29   ;;  %441 = vperm.xlu0 %6588, %v212_v30   ;;  %v6812_v29 = vrot.slane %v298_v15, %v826_v6  ;;  %v6814_v30 = vrot.slane %v2327_v17, %v826_v6 }
  0x6c   : > { %12747 = vst [vmem:[#allocation6_spill] sm:$0xff] %v6812_v29 }
  0x6e   : > { %456 = vperm.xlu1 %6589, %v215_v31   ;;  %451 = vperm.xlu0 %6588, %v214_v32   ;;  %v251_v31 = vld [vmem:[%s6712_s5 + $0x218] sm:$0xff] }
  0x72   : > { %466 = vperm.xlu1 %6589, %v217_v33   ;;  %461 = vperm.xlu0 %6588, %v216_v34   ;;  %v6818_v33 = vrot.slane %v2983_v20, %v826_v6  ;;  %v250_v34 = vld [vmem:[%s6712_s5 + $0x210] sm:$0xff] }
  0x76   : > { %476 = vperm.xlu1 %6589, %v219_v35   ;;  %471 = vperm.xlu0 %6588, %v218_v36   ;;  %v6821_v35 = vrot.slane %v3624_v21, %v826_v6  ;;  %v6823_v36 = vrot.slane %v3841_v22, %v826_v6 }
  0x7a   : > { %486 = vperm.xlu1 %6589, %v221_v37   ;;  %481 = vperm.xlu0 %6588, %v220_v38  }
  0x7e   : > { %496 = vperm.xlu1 %6589, %v223_v39   ;;  %491 = vperm.xlu0 %6588, %v222_v40  }
  0x82   : > { %506 = vperm.xlu1 %6589, %v225_v41   ;;  %501 = vperm.xlu0 %6588, %v224_v42   ;;  %v6827_v41 = vrot.slane %v4502_v26, %v826_v6  ;;  %v6829_v42 = vrot.slane %v5143_v27, %v826_v6  ;;  %v255_v6 = vld [vmem:[%s6712_s5 + $0x238] sm:$0xff] }
  0x86   : > { %516 = vperm.xlu1 %6589, %v227_v43   ;;  %511 = vperm.xlu0 %6588, %v226_v44  }
  0x8a   : > { %526 = vperm.xlu1 %6589, %v229_v45   ;;  %521 = vperm.xlu0 %6588, %v228_v46  }
  0x8e   : > { %536 = vperm.xlu1 %6589, %v231_v47   ;;  %531 = vperm.xlu0 %6588, %v230_v48  }
  0x92   : > { %546 = vperm.xlu1 %6589, %v233_v49   ;;  %541 = vperm.xlu0 %6588, %v232_v50  }
  0x96   : > { %556 = vperm.xlu1 %6589, %v235_v51   ;;  %551 = vperm.xlu0 %6588, %v234_v52   ;;  %v253_v51 = vld [vmem:[%s6712_s5 + $0x228] sm:$0xff] }
  0x9a   : > { %566 = vperm.xlu1 %6589, %v237_v53   ;;  %561 = vperm.xlu0 %6588, %v236_v54  }
  0x9e   : > { %576 = vperm.xlu1 %6589, %v239_v55   ;;  %571 = vperm.xlu0 %6588, %v238_v56   ;;  %v252_v56 = vld [vmem:[%s6712_s5 + $0x220] sm:$0xff] }
  0xa2   : > { %586 = vperm.xlu1 %6589, %v241_v57   ;;  %581 = vperm.xlu0 %6588, %v240_v58  }
  0xa6   : > { %596 = vperm.xlu1 %6589, %v243_v59   ;;  %591 = vperm.xlu0 %6588, %v242_v60  }
  0xaa   : > { %606 = vperm.xlu1 %6589, %v245_v62   ;;  %601 = vperm.xlu0 %6588, %v244_v63  }
  0xae   : > { %616 = vperm.xlu1 %6589, %v247_v3   ;;  %611 = vperm.xlu0 %6588, %v246_v4  }
  0xb1   : > { %v312_v24 = vpop.permute.xlu1 %311  ;;  %v302_v25 = vpop.permute.xlu0 %301 }
  0xb2   : > { %v1052_v28 = vmul.f32 %v6806_v18, %v312_v24  ;;  %626 = vperm.xlu1 %6589, %v249_v16   ;;  %621 = vperm.xlu0 %6588, %v248_v19   ;;  %v1693_v32 = vmul.f32 %v6809_v23, %v312_v24  ;;  %v1050_v37 = vmul.f32 %v6806_v18, %v302_v25 }
  0xb3   : > { %v1691_v38 = vmul.f32 %v6809_v23, %v302_v25  ;;  %v830_v43 = vmul.f32 %v6812_v29, %v312_v24  ;;  %v828_v47 = vmul.f32 %v6812_v29, %v302_v25 }
  0xb4   : > { %v1266_v44 = vrot.slane %v1052_v28, 1  ;;  %v1907_v52 = vrot.slane %v1693_v32, 2  ;;  %v1263_v57 = vrot.slane %v1050_v37, 1  ;;  %v257_v28 = vld [vmem:[%s6712_s5 + $0x248] sm:$0xff] }
  0xb5   : > { %v317_v39 = vpop.permute.xlu1 %316  ;;  %v307_v40 = vpop.permute.xlu0 %306  ;;  %v1904_v58 = vrot.slane %v1691_v38, 2  ;;  %v256_v38 = vld [vmem:[%s6712_s5 + $0x240] sm:$0xff] }
  0xb6   : > { %v6833_v45 = vmul.f32 %v6806_v18, %v317_v39  ;;  %v6836_v46 = vmul.f32 %v6809_v23, %v317_v39  ;;  %636 = vperm.xlu1 %6589, %v251_v31   ;;  %v6840_v48 = vmul.f32 %v6814_v30, %v317_v39  ;;  %v1051_v49 = vmul.f32 %v6806_v18, %v307_v40 }
  0xb7   : > { %v1692_v50 = vmul.f32 %v6809_v23, %v307_v40  ;;  %631 = vperm.xlu0 %6588, %v250_v34   ;;  %v6848_v55 = vmul.f32 %v6818_v33, %v317_v39  ;;  %v831_v62 = vmul.f32 %v6812_v29, %v317_v39  ;;  %v829_v0 = vmul.f32 %v6812_v29, %v307_v40 }
  0xb8   : > { %v1268_v53 = vrot.slane %v6833_v45, 1  ;;  %v1909_v54 = vrot.slane %v6836_v46, 2  ;;  %v1264_v59 = vrot.slane %v1051_v49, 1  ;;  %v2560_v3 = vrot.slane %v6840_v48, 6 }
  0xb9   : > { %v1905_v60 = vrot.slane %v1692_v50, 2  ;;  %v327_v61 = vpop.permute.xlu1 %326  ;;  %v3201_v8 = vrot.slane %v6848_v55, 7  ;;  %v322_v11 = vpop.permute.xlu0 %321 }
  0xba   : > { %v1269_v63 = vsel %vm1262_vm0, %v1266_v44, %v1268_v53  ;;  %v6855_v1 = vmul.f32 %v6806_v18, %v327_v61  ;;  %646 = vperm.xlu1 %6589, %v253_v51   ;;  %v1265_v4 = vsel %vm1262_vm0, %v1263_v57, %v1264_v59  ;;  %v1267_v5 = vsel %vm1262_vm0, %v1264_v59, %v1266_v44 }
  0xbb   : > { %v1581_v2 = vadd.f32 %v1269_v63, %v830_v43  ;;  %641 = vperm.xlu0 %6588, %v252_v56   ;;  %v1910_v7 = vsel %vm1903_vm1, %v1907_v52, %v1909_v54  ;;  %v1579_v9 = vadd.f32 %v1265_v4, %v828_v47  ;;  %v1580_v10 = vadd.f32 %v1267_v5, %v829_v0  ;;  %v259_v56 = vld [vmem:[%s6712_s5 + $0x258] sm:$0xff] }
  0xbc   : > { %v1906_v13 = vsel %vm1903_vm1, %v1904_v58, %v1905_v60  ;;  %v1908_v14 = vsel %vm1903_vm1, %v1905_v60, %v1907_v52  ;;  %v6869_v15 = vmul.f32 %v6812_v29, %v327_v61  ;;  %v6872_v16 = vmul.f32 %v6814_v30, %v327_v61 }
  0xbd   : > { %v6874_v17 = vadd.f32 %v1910_v7, %v1581_v2  ;;  %v1272_v19 = vrot.slane %v6855_v1, 1  ;;  %v6878_v20 = vmul.f32 %v6809_v23, %v327_v61  ;;  %v6881_v21 = vmul.f32 %v6818_v33, %v327_v61  ;;  %v337_v22 = vpop.permute.xlu1 %336 }
  0xbe   : > { %656 = vperm.xlu1 %6589, %v255_v6   ;;  %v2220_v24 = vadd.f32 %v1906_v13, %v1579_v9  ;;  %v2221_v25 = vadd.f32 %v1908_v14, %v1580_v10  ;;  %v6884_v26 = vmul.f32 %v6821_v35, %v327_v61  ;;  %v1054_v27 = vmul.f32 %v6806_v18, %v322_v11  ;;  %v258_v61 = vld [vmem:[%s6712_s5 + $0x250] sm:$0xff]  ;;  %v261_v10 = vld [vmem:[%s6712_s5 + $0x268] sm:$0xff]  ;;  %v260_v14 = vld [vmem:[%s6712_s5 + $0x260] sm:$0xff] }
  0xbf   : > { %651 = vperm.xlu0 %6588, %v254_v12   ;;  %v832_v31 = vmul.f32 %v6812_v29, %v322_v11  ;;  %v1695_v32 = vmul.f32 %v6809_v23, %v322_v11  ;;  %v2348_v34 = vmul.f32 %v6814_v30, %v322_v11  ;;  %v2989_v37 = vmul.f32 %v6818_v33, %v322_v11 }
  0xc0   : > { %v2563_v39 = vrot.slane %v6872_v16, 6  ;;  %v1270_v40 = vrot.slane %v1054_v27, 1  ;;  %v6895_v43 = vmul.f32 %v6823_v36, %v337_v22  ;;  %v6898_v44 = vmul.f32 %v6827_v41, %v337_v22 }
  0xc1   : > { %v1913_v45 = vrot.slane %v6878_v20, 2  ;;  %v3204_v47 = vrot.slane %v6881_v21, 7  ;;  %v1911_v48 = vrot.slane %v1695_v32, 2  ;;  %v2561_v49 = vrot.slane %v2348_v34, 6  ;;  %v267_v21 = vld [vmem:[%s6712_s5 + $0x298] sm:$0xff] }
  0xc2   : > { %666 = vperm.xlu1 %6589, %v257_v28   ;;  %v1271_v50 = vsel %vm1262_vm0, %v1268_v53, %v1270_v40  ;;  %v1273_v51 = vsel %vm1262_vm0, %v1270_v40, %v1272_v19  ;;  %v3202_v52 = vrot.slane %v2989_v37, 7  ;;  %v3629_v55 = vmul.f32 %v6821_v35, %v322_v11 }
  0xc3   : > { %661 = vperm.xlu0 %6588, %v256_v38   ;;  %v1582_v57 = vadd.f32 %v1271_v50, %v831_v62  ;;  %v1583_v58 = vadd.f32 %v1273_v51, %v832_v31  ;;  %v6909_v59 = vmul.f32 %v6812_v29, %v337_v22  ;;  %v6912_v60 = vmul.f32 %v6829_v42, %v337_v22  ;;  %v347_v31 = vpop.permute.xlu1 %346  ;;  %v263_v50 = vld [vmem:[%s6712_s5 + $0x278] sm:$0xff] }
  0xc4   : > { %v2562_v53 = vsel %vm2559_vm2, %v2560_v3, %v2561_v49  ;;  %v2564_v63 = vsel %vm2559_vm2, %v2561_v49, %v2563_v39  ;;  %v4079_v0 = vrot.slane %v6895_v43, 4  ;;  %v4720_v2 = vrot.slane %v6898_v44, 5  ;;  %v7117_v44 = vld [vmem:[#allocation3] ss:$0 sm:$0xff] }
  0xc5   : > { %v1912_v62 = vsel %vm1903_vm1, %v1909_v54, %v1911_v48  ;;  %v1914_v4 = vsel %vm1903_vm1, %v1911_v48, %v1913_v45  ;;  %v2876_v5 = vadd.f32 %v2562_v53, %v2220_v24  ;;  %v2877_v6 = vadd.f32 %v2564_v63, %v2221_v25  ;;  %v332_v54 = vpop.permute.xlu0 %331 }
  0xc6   : > { %676 = vperm.xlu1 %6589, %v259_v56   ;;  %v3203_v3 = vsel %vm3200_vm3, %v3201_v8, %v3202_v52  ;;  %v6929_v7 = vmul.f32 %v6806_v18, %v337_v22  ;;  %v6932_v9 = vmul.f32 %v6809_v23, %v337_v22  ;;  %v6935_v46 = vmul.f32 %v6814_v30, %v337_v22 }
  0xc7   : > { %671 = vperm.xlu0 %6588, %v258_v61   ;;  %v2223_v11 = vadd.f32 %v1912_v62, %v1582_v57  ;;  %v6938_v12 = vadd.f32 %v1914_v4, %v1583_v58  ;;  %v3205_v13 = vsel %vm3200_vm3, %v3202_v52, %v3204_v47  ;;  %v3517_v8 = vadd.f32 %v3203_v3, %v2876_v5  ;;  %v262_v58 = vld [vmem:[%s6712_s5 + $0x270] sm:$0xff] }
  0xc8   : > { %v3518_v24 = vadd.f32 %v3205_v13, %v2877_v6  ;;  %v5360_v25 = vrot.slane %v6912_v60, 6  ;;  %v6946_v27 = vmul.f32 %v6818_v33, %v337_v22  ;;  %v6949_v28 = vmul.f32 %v6821_v35, %v337_v22 }
  0xc9   : > { %v1276_v32 = vrot.slane %v6929_v7, 1  ;;  %v1917_v34 = vrot.slane %v6932_v9, 2  ;;  %v2567_v37 = vrot.slane %v6935_v46, 6  ;;  %v1056_v38 = vmul.f32 %v6806_v18, %v332_v54  ;;  %v357_v46 = vpop.permute.xlu1 %356 }
  0xca   : > { %686 = vperm.xlu1 %6589, %v261_v10   ;;  %v834_v40 = vmul.f32 %v6812_v29, %v332_v54  ;;  %v1697_v48 = vmul.f32 %v6809_v23, %v332_v54  ;;  %v2350_v49 = vmul.f32 %v6814_v30, %v332_v54  ;;  %v2991_v22 = vmul.f32 %v6818_v33, %v332_v54 }
  0xcb   : > { %681 = vperm.xlu0 %6588, %v260_v14   ;;  %v6960_v51 = vadd.f32 %v3629_v55, %v3517_v8  ;;  %v1274_v52 = vrot.slane %v1056_v38, 1  ;;  %v6963_v56 = vmul.f32 %v6806_v18, %v347_v31  ;;  %v6966_v57 = vmul.f32 %v6809_v23, %v347_v31  ;;  %v264_v14 = vld [vmem:[%s6712_s5 + $0x280] sm:$0xff] }
  0xcc   : > { %v6970_v61 = vadd.f32 %v6884_v26, %v3518_v24  ;;  %v3208_v53 = vrot.slane %v6946_v27, 7  ;;  %v1915_v63 = vrot.slane %v1697_v48, 2  ;;  %v2565_v62 = vrot.slane %v2350_v49, 6 }
  0xcd   : > { %v1275_v55 = vsel %vm1262_vm0, %v1272_v19, %v1274_v52  ;;  %v1277_v4 = vsel %vm1262_vm0, %v1274_v52, %v1276_v32  ;;  %v3206_v5 = vrot.slane %v2991_v22, 7  ;;  %v3631_v6 = vmul.f32 %v6821_v35, %v332_v54  ;;  %v265_v19 = vld [vmem:[%s6712_s5 + $0x288] sm:$0xff] }
  0xce   : > { %696 = vperm.xlu1 %6589, %v263_v50   ;;  %v1584_v26 = vadd.f32 %v1275_v55, %v6869_v15  ;;  %v6982_v3 = vmul.f32 %v6812_v29, %v347_v31  ;;  %v1280_v10 = vrot.slane %v6963_v56, 1  ;;  %v6986_v1 = vmul.f32 %v6814_v30, %v347_v31 }
  0xcf   : > { %691 = vperm.xlu0 %6588, %v262_v58   ;;  %v1585_v13 = vadd.f32 %v1277_v4, %v834_v40  ;;  %v2566_v8 = vsel %vm2559_vm2, %v2563_v39, %v2565_v62  ;;  %v2568_v54 = vsel %vm2559_vm2, %v2565_v62, %v2567_v37  ;;  %v1921_v15 = vrot.slane %v6966_v57, 2  ;;  %v342_v39 = vpop.permute.xlu0 %341  ;;  %v266_v62 = vld [vmem:[%s6712_s5 + $0x290] sm:$0xff] }
  0xd0   : > { %v1916_v24 = vsel %vm1903_vm1, %v1913_v45, %v1915_v63  ;;  %v1918_v38 = vsel %vm1903_vm1, %v1915_v63, %v1917_v34  ;;  %v2878_v16 = vadd.f32 %v2566_v8, %v6874_v17  ;;  %v2879_v40 = vadd.f32 %v2568_v54, %v2223_v11 }
  0xd1   : > { %v3207_v48 = vsel %vm3200_vm3, %v3204_v47, %v3206_v5  ;;  %v3209_v20 = vsel %vm3200_vm3, %v3206_v5, %v3208_v53  ;;  %v7011_v45 = vmul.f32 %v6818_v33, %v347_v31  ;;  %v7014_v49 = vmul.f32 %v6823_v36, %v347_v31 }
  0xd2   : > { %706 = vperm.xlu1 %6589, %v265_v19   ;;  %v2225_v17 = vadd.f32 %v1916_v24, %v1584_v26  ;;  %v3519_v11 = vadd.f32 %v3207_v48, %v2878_v16  ;;  %v3520_v22 = vadd.f32 %v3209_v20, %v2879_v40  ;;  %v7017_v50 = vmul.f32 %v6827_v41, %v347_v31  ;;  %v269_v16 = vld [vmem:[%s6712_s5 + $0x2a8] sm:$0xff] }
  0xd3   : > { %701 = vperm.xlu0 %6588, %v264_v14   ;;  %v7020_v47 = vadd.f32 %v1918_v38, %v1585_v13  ;;  %v2571_v52 = vrot.slane %v6986_v1, 6  ;;  %v7024_v58 = vmul.f32 %v6821_v35, %v347_v31  ;;  %v1058_v63 = vmul.f32 %v6806_v18, %v342_v39 }
  0xd4   : > { %v3212_v55 = vrot.slane %v7011_v45, 7  ;;  %v4082_v4 = vrot.slane %v7014_v49, 4  ;;  %v7031_v5 = vmul.f32 %v6829_v42, %v347_v31  ;;  %v836_v26 = vmul.f32 %v6812_v29, %v342_v39 }
  0xd5   : > { %v1278_v19 = vrot.slane %v1058_v63, 1  ;;  %v1699_v13 = vmul.f32 %v6809_v23, %v342_v39  ;;  %v2352_v8 = vmul.f32 %v6814_v30, %v342_v39  ;;  %v2993_v54 = vmul.f32 %v6818_v33, %v342_v39 }
  0xd6   : > { %716 = vperm.xlu1 %6589, %v267_v21   ;;  %v7037_v14 = vadd.f32 %v3631_v6, %v3519_v11  ;;  %v7040_v24 = vadd.f32 %v6949_v28, %v3520_v22  ;;  %v4723_v31 = vrot.slane %v7017_v50, 5  ;;  %v3867_v38 = vmul.f32 %v6823_v36, %v342_v39  ;;  %v268_v11 = vld [vmem:[%s6712_s5 + $0x2a0] sm:$0xff] }
  0xd7   : > { %711 = vperm.xlu0 %6588, %v266_v62   ;;  %v1279_v40 = vsel %vm1262_vm0, %v1276_v32, %v1278_v19  ;;  %v1281_v48 = vsel %vm1262_vm0, %v1278_v19, %v1280_v10  ;;  %v1919_v20 = vrot.slane %v1699_v13, 2  ;;  %v2569_v6 = vrot.slane %v2352_v8, 6 }
  0xd8   : > { %v12654_v28 = vrot.slane %v7031_v5, 6  ;;  %v3210_v22 = vrot.slane %v2993_v54, 7  ;;  %v4080_v21 = vrot.slane %v3867_v38, 4  ;;  %v4508_v63 = vmul.f32 %v6827_v41, %v342_v39  ;;  %v271_v38 = vld [vmem:[%s6712_s5 + $0x2b8] sm:$0xff] }
  0xd9   : > { %v1586_v62 = vadd.f32 %v1279_v40, %v6909_v59  ;;  %v2570_v7 = vsel %vm2559_vm2, %v2567_v37, %v2569_v6  ;;  %v2572_v32 = vsel %vm2559_vm2, %v2569_v6, %v2571_v52  ;;  %v5149_v19 = vmul.f32 %v6829_v42, %v342_v39 }
  0xda   : > { %726 = vperm.xlu1 %6589, %v269_v16   ;;  %v1587_v13 = vadd.f32 %v1281_v48, %v836_v26  ;;  %v1920_v8 = vsel %vm1903_vm1, %v1917_v34, %v1919_v20  ;;  %v2880_v54 = vadd.f32 %v2570_v7, %v6938_v12  ;;  %v3633_v59 = vmul.f32 %v6821_v35, %v342_v39  ;;  %v270_v34 = vld [vmem:[%s6712_s5 + $0x2b0] sm:$0xff] }
  0xdb   : > { %721 = vperm.xlu0 %6588, %v268_v11   ;;  %v2881_v37 = vadd.f32 %v2572_v32, %v2225_v17  ;;  %v3211_v40 = vsel %vm3200_vm3, %v3208_v53, %v3210_v22  ;;  %v4081_v26 = vsel %vm4078_vm4, %v4079_v0, %v4080_v21  ;;  %v4083_v9 = vsel %vm4078_vm4, %v4080_v21, %v4082_v4 }
  0xdc   : > { %v1922_v12 = vsel %vm1903_vm1, %v1919_v20, %v1921_v15  ;;  %v3521_v39 = vadd.f32 %v3211_v40, %v2880_v54  ;;  %v4395_v17 = vadd.f32 %v4081_v26, %v6960_v51  ;;  %v4396_v27 = vadd.f32 %v4083_v9, %v6970_v61 }
  0xdd   : > { %v7083_v53 = vadd.f32 %v1920_v8, %v1586_v62  ;;  %v4721_v43 = vrot.slane %v4508_v63, 5  ;;  %v5361_v16 = vrot.slane %v5149_v19, 6  ;;  %v7086_v0 = vmul.f32 %v6806_v18, %v357_v46  ;;  %v352_v19 = vpop.permute.xlu0 %351  ;;  %v272_v8 = vld [vmem:[%s6712_s5 + $0x2c0] sm:$0xff] }
  0xde   : > { %736 = vperm.xlu1 %6589, %v271_v38   ;;  %v7088_v48 = vadd.f32 %v1922_v12, %v1587_v13  ;;  %v3213_v20 = vsel %vm3200_vm3, %v3210_v22, %v3212_v55  ;;  %v7094_v51 = vmul.f32 %v6809_v23, %v357_v46  ;;  %v7097_v61 = vmul.f32 %v6814_v30, %v357_v46  ;;  %v273_v13 = vld [vmem:[%s6712_s5 + $0x2c8] sm:$0xff] }
  0xdf   : > { %731 = vperm.xlu0 %6588, %v270_v34   ;;  %v7099_v6 = vadd.f32 %v3213_v20, %v2881_v37  ;;  %v4722_v11 = vsel %vm4719_vm5, %v4720_v2, %v4721_v43  ;;  %v4724_v21 = vsel %vm4719_vm5, %v4721_v43, %v4723_v31  ;;  %v7108_v63 = vmul.f32 %v6812_v29, %v357_v46 }
  0xe0   : > { %v7110_v22 = vadd.f32 %v3633_v59, %v3521_v39  ;;  %v5036_v62 = vadd.f32 %v4722_v11, %v4395_v17  ;;  %v5037_v7 = vadd.f32 %v4724_v21, %v4396_v27  ;;  %v7113_v32 = vmul.f32 %v6818_v33, %v357_v46 }
  0xe1   : > { %v5362_v2 = vsel %vm2559_vm2, %v5360_v25, %v5361_v16  ;;  %v5364_v54 = vsel %vm2559_vm2, %v5361_v16, %v12654_v28  ;;  %v1284_v59 = vrot.slane %v7086_v0, 1  ;;  %v7127_v38 = vmul.f32 %v6823_v36, %v357_v46 }
  0xe2   : > { %746 = vperm.xlu1 %6589, %v273_v13   ;;  %v5676_v37 = vadd.f32 %v5362_v2, %v5036_v62  ;;  %v5677_v40 = vadd.f32 %v5364_v54, %v5037_v7  ;;  %v1925_v26 = vrot.slane %v7094_v51, 2  ;;  %v2575_v9 = vrot.slane %v7097_v61, 6 }
  0xe3   : > { %741 = vperm.xlu0 %6588, %v272_v8   ;;  %v7132_v60 = vmul.f32 %v6827_v41, %v357_v46  ;;  %v7135_v25 = vmul.f32 %v6829_v42, %v357_v46  ;;  %v1060_v34 = vmul.f32 %v6806_v18, %v352_v19  ;;  %v1701_v12 = vmul.f32 %v6809_v23, %v352_v19 }
  0xe4   : > { %v5788_v39 = vadd.f32 %v7117_v44, %v5676_v37  ;;  %v5789_v17 = vadd.f32 %v7117_v44, %v5677_v40  ;;  %v3216_v27 = vrot.slane %v7113_v32, 7  ;;  %v7143_v43 = vmul.f32 %v6821_v35, %v357_v46 }
  0xe5   : > { %v4086_v16 = vrot.slane %v7127_v38, 4  ;;  %v1282_v20 = vrot.slane %v1060_v34, 1  ;;  %v2354_v11 = vmul.f32 %v6814_v30, %v352_v19  ;;  %v2995_v21 = vmul.f32 %v6818_v33, %v352_v19 }
  0xe6   : > { %v5893_v62 = vmax.f32 %v5788_v39, 0.0  ;;  %v5894_v7 = vmax.f32 %v5789_v17, 0.0  ;;  %v1923_v13 = vrot.slane %v1701_v12, 2  ;;  %v3869_v8 = vmul.f32 %v6823_v36, %v352_v19  ;;  %v367_v17 = vpop.permute.xlu1 %366 }
  0xe7   : > { %v4727_v2 = vrot.slane %v7132_v60, 5  ;;  %v838_v37 = vmul.f32 %v6812_v29, %v352_v19  ;;  %v1283_v46 = vsel %vm1262_vm0, %v1280_v10, %v1282_v20  ;;  %v1285_v40 = vsel %vm1262_vm0, %v1282_v20, %v1284_v59 }
  0xe8   : > { %5999 = vst.msk [vmem:[#allocation2] sm:$0xff] %vm5998_vm6, %v5893_v62  ;;  %6000 = vst.msk [vmem:[#allocation2 + $0x8] sm:$0xff] %vm5998_vm6, %v5894_v7  ;;  %v1588_v34 = vadd.f32 %v1283_v46, %v6982_v3  ;;  %v2573_v12 = vrot.slane %v2354_v11, 6  ;;  %v3635_v39 = vmul.f32 %v6821_v35, %v352_v19  ;;  %v3214_v54 = vrot.slane %v2995_v21, 7 }
  0xe9   : > { %v4084_v28 = vrot.slane %v3869_v8, 4  ;;  %v4510_v56 = vmul.f32 %v6827_v41, %v352_v19  ;;  %v5151_v10 = vmul.f32 %v6829_v42, %v352_v19  ;;  %v1924_v62 = vsel %vm1903_vm1, %v1921_v15, %v1923_v13 }
  0xea   : > { %v1926_v20 = vsel %vm1903_vm1, %v1923_v13, %v1925_v26  ;;  %v2574_v3 = vsel %vm2559_vm2, %v2571_v52, %v2573_v12  ;;  %v2576_v11 = vsel %vm2559_vm2, %v2573_v12, %v2575_v9  ;;  %v1589_v21 = vadd.f32 %v1285_v40, %v838_v37  ;;  %v377_v61 = vpop.permute.xlu1 %376 }
  0xeb   : > { %v7176_v7 = vadd.f32 %v1924_v62, %v1588_v34  ;;  %v2882_v19 = vadd.f32 %v2574_v3, %v7020_v47  ;;  %v7180_v57 = vmul.f32 %v6812_v29, %v367_v17  ;;  %v4085_v15 = vsel %vm4078_vm4, %v4082_v4, %v4084_v28 }
  0xec   : > { %v4087_v1 = vsel %vm4078_vm4, %v4084_v28, %v4086_v16  ;;  %v4725_v52 = vrot.slane %v4510_v56, 5  ;;  %v5365_v13 = vrot.slane %v5151_v10, 6  ;;  %v2883_v8 = vadd.f32 %v2576_v11, %v7083_v53 }
  0xed   : > { %v3215_v37 = vsel %vm3200_vm3, %v3212_v55, %v3214_v54  ;;  %v4397_v47 = vadd.f32 %v4085_v15, %v7037_v14  ;;  %v4398_v46 = vadd.f32 %v4087_v1, %v7040_v24  ;;  %v3217_v49 = vsel %vm3200_vm3, %v3214_v54, %v3216_v27 }
  0xee   : > { %v3523_v4 = vadd.f32 %v3215_v37, %v2882_v19  ;;  %v4726_v28 = vsel %vm4719_vm5, %v4723_v31, %v4725_v52  ;;  %v4728_v53 = vsel %vm4719_vm5, %v4725_v52, %v4727_v2  ;;  %v12748_v24 = vrot.slane %v7031_v5, 6  ;;  %v362_v19 = vpop.permute.xlu0 %361  ;;  %v275_v37 = vld [vmem:[%s6712_s5 + $0x2d8] sm:$0xff] }
  0xef   : > { %v7203_v45 = vld [vmem:[#allocation2] ss:$2 sm:$0xff]  ;;  %v7205_v55 = vld [vmem:[#allocation2 + $0x1] ss:$2 sm:$0xff]  ;;  %v5038_v14 = vadd.f32 %v4726_v28, %v4397_v47  ;;  %v5039_v40 = vadd.f32 %v4728_v53, %v4398_v46  ;;  %v7211_v50 = vmul.f32 %v6806_v18, %v367_v17  ;;  %v12749_v31 = vrot.slane %v7135_v25, 6  ;;  %v274_v47 = vld [vmem:[%s6712_s5 + $0x2d0] sm:$0xff]  ;;  %756 = vperm.xlu1 %6589, %v275_v37  }
  0xf0   : > { %v5366_v54 = vsel %vm2559_vm2, %v12748_v24, %v5365_v13  ;;  %v7217_v12 = vmul.f32 %v6809_v23, %v367_v17  ;;  %v7220_v56 = vmul.f32 %v6814_v30, %v367_v17  ;;  %v7223_v10 = vmul.f32 %v6818_v33, %v367_v17  ;;  %751 = vperm.xlu0 %6588, %v274_v47  }
  0xf1   : > { %v5368_v34 = vsel %vm2559_vm2, %v5365_v13, %v12749_v31  ;;  %v7225_v5 = vadd.f32 %v1926_v20, %v1589_v21  ;;  %v7227_v62 = vadd.f32 %v3217_v49, %v2883_v8  ;;  %v5678_v3 = vadd.f32 %v5366_v54, %v5038_v14 }
  0xf2   : > { %v5679_v11 = vadd.f32 %v5368_v34, %v5039_v40  ;;  %v7231_v1 = vadd.f32 %v3635_v39, %v3523_v4  ;;  %v12655_v52 = vrot.slane %v7211_v50, 1  ;;  %v7235_v13 = vmul.f32 %v6823_v36, %v367_v17 }
  0xf3   : > { %v5790_v20 = vadd.f32 %v7117_v44, %v5678_v3  ;;  %v7243_v46 = vmul.f32 %v6821_v35, %v367_v17  ;;  %v2579_v39 = vrot.slane %v7220_v56, 6  ;;  %v7248_v4 = vmul.f32 %v6827_v41, %v367_v17 }
  0xf4   : > { %v5791_v21 = vadd.f32 %v7117_v44, %v5679_v11  ;;  %v1062_v28 = vmul.f32 %v6806_v18, %v362_v19  ;;  %v4090_v40 = vrot.slane %v7235_v13, 4  ;;  %v7253_v24 = vmul.f32 %v6829_v42, %v367_v17 }
  0xf5   : > { %v5895_v53 = vmax.f32 %v5790_v20, 0.0  ;;  %v7256_v31 = vmul.f32 %v6809_v23, %v362_v19  ;;  %v2356_v34 = vmul.f32 %v6814_v30, %v362_v19  ;;  %v2997_v3 = vmul.f32 %v6818_v33, %v362_v19 }
  0xf6   : > { %v5896_v14 = vmax.f32 %v5791_v21, 0.0  ;;  %v1286_v54 = vrot.slane %v1062_v28, 1  ;;  %v3739_v11 = vadd.f32 %v7024_v58, %v7099_v6  ;;  %v840_v37 = vmul.f32 %v6812_v29, %v362_v19 }
  0xf7   : > { %6001 = vst.msk [vmem:[#allocation2 + $0x10] sm:$0xff] %vm5998_vm6, %v5895_v53  ;;  %v3871_v17 = vmul.f32 %v6823_v36, %v362_v19  ;;  %v4512_v47 = vmul.f32 %v6827_v41, %v362_v19  ;;  %v12656_v28 = vrot.slane %v7256_v31, 2  ;;  %v2577_v53 = vrot.slane %v2356_v34, 6 }
  0xf8   : > { %6002 = vst.msk [vmem:[#allocation2 + $0x18] sm:$0xff] %vm5998_vm6, %v5896_v14  ;;  %v1287_v20 = vsel %vm1262_vm0, %v1284_v59, %v1286_v54  ;;  %v1289_v21 = vsel %vm1262_vm0, %v1286_v54, %v12655_v52  ;;  %v4731_v14 = vrot.slane %v7248_v4, 5  ;;  %v12657_v58 = vrot.slane %v7253_v24, 6 }
  0xf9   : > { %v3218_v6 = vrot.slane %v2997_v3, 7  ;;  %v4088_v8 = vrot.slane %v3871_v17, 4  ;;  %v2578_v15 = vsel %vm2559_vm2, %v2575_v9, %v2577_v53  ;;  %v3637_v0 = vmul.f32 %v6821_v35, %v362_v19 }
  0xfa   : > { %v4729_v59 = vrot.slane %v4512_v47, 5  ;;  %v5153_v49 = vmul.f32 %v6829_v42, %v362_v19  ;;  %v1590_v54 = vadd.f32 %v1287_v20, %v7108_v63  ;;  %v7282_v52 = vadd.f32 %v1289_v21, %v840_v37 }
  0xfb   : > { %v1928_v34 = vsel %vm1903_vm1, %v1925_v26, %v12656_v28  ;;  %v2884_v3 = vadd.f32 %v2578_v15, %v7088_v48  ;;  %v2580_v9 = vsel %vm2559_vm2, %v2577_v53, %v2579_v39  ;;  %v3219_v19 = vsel %vm3200_vm3, %v3216_v27, %v3218_v6 }
  0xfc   : > { %v4089_v63 = vsel %vm4078_vm4, %v4086_v16, %v4088_v8  ;;  %v4091_v51 = vsel %vm4078_vm4, %v4088_v8, %v4090_v40  ;;  %v4730_v37 = vsel %vm4719_vm5, %v4727_v2, %v4729_v59  ;;  %v4732_v38 = vsel %vm4719_vm5, %v4729_v59, %v4731_v14 }
  0xfd   : > { %v3525_v26 = vadd.f32 %v3219_v19, %v2884_v3  ;;  %v4399_v48 = vadd.f32 %v4089_v63, %v7110_v22  ;;  %v4400_v15 = vadd.f32 %v4091_v51, %v3739_v11  ;;  %v7314_v27 = vmul.f32 %v6806_v18, %v377_v61 }
  0xfe   : > { %v7317_v16 = vmul.f32 %v6809_v23, %v377_v61  ;;  %v7320_v22 = vmul.f32 %v6814_v30, %v377_v61  ;;  %v7322_v60 = vadd.f32 %v1928_v34, %v1590_v54  ;;  %v7325_v2 = vadd.f32 %v2580_v9, %v7176_v7  ;;  %v372_v9 = vpop.permute.xlu0 %371 }
  0xff   : > { %v7306_v17 = vld [vmem:[#allocation2 + $0x10] ss:$2 sm:$0x3f]  ;;  %v7308_v32 = vld [vmem:[#allocation2 + $0x11] ss:$2 sm:$0x3f]  ;;  %v5040_v8 = vadd.f32 %v4730_v37, %v4399_v48  ;;  %v5041_v11 = vadd.f32 %v4732_v38, %v4400_v15  ;;  %v7335_v59 = vmul.f32 %v6812_v29, %v377_v61  ;;  %v7337_v54 = vadd.f32 %v3637_v0, %v3525_v26 }
 0x100   : > { %v12750_v20 = vrot.slane %v7223_v10, 7  ;;  %v5369_v53 = vrot.slane %v5153_v49, 6  ;;  %v12658_v7 = vrot.slane %v7314_v27, 1  ;;  %v7341_v34 = vmul.f32 %v6818_v33, %v377_v61  ;;  %v277_v37 = vld [vmem:[%s6712_s5 + $0x2e8] sm:$0xff] }
 0x101   : > { %v7344_v3 = vmul.f32 %v6823_v36, %v377_v61  ;;  %v2583_v63 = vrot.slane %v7320_v22, 6  ;;  %v7355_v48 = vmul.f32 %v6821_v35, %v377_v61  ;;  %v7358_v15 = vmul.f32 %v6827_v41, %v377_v61  ;;  %766 = vperm.xlu1 %6589, %v277_v37  }
 0x102   : > { %v7332_v21 = vsel %vm3200_vm3, %v3218_v6, %v12750_v20  ;;  %v12751_v6 = vrot.slane %v7135_v25, 6  ;;  %v5372_v49 = vsel %vm2559_vm2, %v5369_v53, %v12657_v58  ;;  %v276_v25 = vld [vmem:[%s6712_s5 + $0x2e0] sm:$0xff]  ;;  %v7364_v20 = vmul.f32 %v6829_v42, %v377_v61 }
 0x103   : > { %v5681_v26 = vadd.f32 %v5372_v49, %v5041_v11  ;;  %761 = vperm.xlu0 %6588, %v276_v25   ;;  %v2358_v49 = vmul.f32 %v6814_v30, %v372_v9  ;;  %v7374_v0 = vmul.f32 %v6809_v23, %v372_v9  ;;  %v2999_v61 = vmul.f32 %v6818_v33, %v372_v9 }
 0x104   : > { %v5370_v19 = vsel %vm2559_vm2, %v12751_v6, %v5369_v53  ;;  %v3741_v53 = vadd.f32 %v7143_v43, %v7227_v62  ;;  %v1064_v6 = vmul.f32 %v6806_v18, %v372_v9  ;;  %v3873_v43 = vmul.f32 %v6823_v36, %v372_v9 }
 0x105   : > { %v5680_v51 = vadd.f32 %v5370_v19, %v5040_v8  ;;  %v5793_v11 = vadd.f32 %v7117_v44, %v5681_v26  ;;  %v12660_v19 = vrot.slane %v7344_v3, 4  ;;  %v12659_v37 = vrot.slane %v7358_v15, 5 }
 0x106   : > { %v1290_v47 = vrot.slane %v1064_v6, 1  ;;  %v2581_v25 = vrot.slane %v2358_v49, 6  ;;  %v842_v26 = vmul.f32 %v6812_v29, %v372_v9  ;;  %v3222_v38 = vrot.slane %v2999_v61, 7 }
 0x107   : > { %v5792_v8 = vadd.f32 %v7117_v44, %v5680_v51  ;;  %v5898_v28 = vmax.f32 %v5793_v11, 0.0  ;;  %v4092_v58 = vrot.slane %v3873_v43, 4  ;;  %v3639_v11 = vmul.f32 %v6821_v35, %v372_v9 }
 0x108   : > { %v1293_v6 = vsel %vm1262_vm0, %v1290_v47, %v12658_v7  ;;  %v4514_v49 = vmul.f32 %v6827_v41, %v372_v9  ;;  %v12752_v51 = vrot.slane %v7211_v50, 1  ;;  %v12753_v43 = vrot.slane %v7223_v10, 7 }
 0x109   : > { %v5897_v62 = vmax.f32 %v5792_v8, 0.0  ;;  %6004 = vst.msk [vmem:[#allocation2 + $0x28] sm:$0xff] %vm5998_vm6, %v5898_v28  ;;  %v2582_v8 = vsel %vm2559_vm2, %v2579_v39, %v2581_v25  ;;  %v2584_v28 = vsel %vm2559_vm2, %v2581_v25, %v2583_v63  ;;  %v4093_v56 = vsel %vm4078_vm4, %v4090_v40, %v4092_v58 }
 0x10a   : > { %v1291_v61 = vsel %vm1262_vm0, %v12752_v51, %v1290_v47  ;;  %v4095_v39 = vsel %vm4078_vm4, %v4092_v58, %v12660_v19  ;;  %v4733_v50 = vrot.slane %v4514_v49, 5  ;;  %v5155_v47 = vmul.f32 %v6829_v42, %v372_v9  ;;  %v387_v51 = vpop.permute.xlu1 %386 }
 0x10b   : > { %6003 = vst.msk [vmem:[#allocation2 + $0x20] sm:$0xff] %vm5998_vm6, %v5897_v62  ;;  %v2886_v62 = vadd.f32 %v2582_v8, %v7225_v5  ;;  %v7406_v7 = vadd.f32 %v1293_v6, %v842_v26  ;;  %v3223_v25 = vsel %vm3200_vm3, %v12753_v43, %v3222_v38  ;;  %v4401_v5 = vadd.f32 %v4093_v56, %v7231_v1 }
 0x10c   : > { %v4402_v8 = vadd.f32 %v4095_v39, %v3741_v53  ;;  %v4734_v40 = vsel %vm4719_vm5, %v4731_v14, %v4733_v50  ;;  %v4736_v58 = vsel %vm4719_vm5, %v4733_v50, %v12659_v37  ;;  %v5373_v9 = vrot.slane %v5155_v47, 6 }
 0x10d   : > { %v3527_v13 = vadd.f32 %v3223_v25, %v2886_v62  ;;  %v7420_v26 = vadd.f32 %v2584_v28, %v7322_v60  ;;  %v5042_v10 = vadd.f32 %v4734_v40, %v4401_v5  ;;  %v7423_v49 = vmul.f32 %v6806_v18, %v387_v51 }
 0x10e   : > { %v5043_v6 = vadd.f32 %v4736_v58, %v4402_v8  ;;  %v12754_v1 = vrot.slane %v7253_v24, 6  ;;  %v12755_v14 = vrot.slane %v7364_v20, 6  ;;  %v7432_v43 = vmul.f32 %v6809_v23, %v387_v51 }
 0x10f   : > { %v7435_v62 = vmul.f32 %v6814_v30, %v387_v51  ;;  %v12756_v56 = vrot.slane %v7341_v34, 7  ;;  %v7443_v47 = vmul.f32 %v6812_v29, %v387_v51  ;;  %v7445_v5 = vadd.f32 %v3639_v11, %v3527_v13 }
 0x110   : > { %v5374_v4 = vsel %vm2559_vm2, %v12754_v1, %v5373_v9  ;;  %v5376_v53 = vsel %vm2559_vm2, %v5373_v9, %v12755_v14  ;;  %v7448_v8 = vmul.f32 %v6818_v33, %v387_v51  ;;  %v7451_v40 = vmul.f32 %v6823_v36, %v387_v51  ;;  %v382_v14 = vpop.permute.xlu0 %381 }
 0x111   : > { %v7440_v39 = vsel %vm3200_vm3, %v3222_v38, %v12756_v56  ;;  %v5682_v24 = vadd.f32 %v5374_v4, %v5042_v10  ;;  %v5683_v50 = vadd.f32 %v5376_v53, %v5043_v6  ;;  %v1296_v9 = vrot.slane %v7423_v49, 1  ;;  %v279_v53 = vld [vmem:[%s6712_s5 + $0x2f8] sm:$0xff] }
 0x112   : > { %v6112_v60 = vld [vmem:[#allocation2 + $0x1e] ss:$2 sm:$0xff]  ;;  %v6116_v28 = vld [vmem:[#allocation2 + $0x1f] ss:$2 sm:$0xff]  ;;  %v7462_v11 = vmul.f32 %v6827_v41, %v387_v51  ;;  %v12757_v13 = vmax.f32 %v7203_v45, %v7205_v55  ;;  %v1937_v6 = vrot.slane %v7432_v43, 2  ;;  %v2587_v1 = vrot.slane %v7435_v62, 6  ;;  %776 = vperm.xlu1 %6589, %v279_v53  }
 0x113   : > { %v6121_v25 = vmax.f32 %v6112_v60, %v6116_v28  ;;  %v5794_v38 = vadd.f32 %v7117_v44, %v5682_v24  ;;  %v5795_v58 = vadd.f32 %v7117_v44, %v5683_v50  ;;  %v7470_v4 = vmul.f32 %v6829_v42, %v387_v51  ;;  %v278_v60 = vld [vmem:[%s6712_s5 + $0x2f0] sm:$0xff] }
 0x114   : > { %v7475_v24 = vmul.f32 %v6821_v35, %v387_v51  ;;  %v1592_v50 = vadd.f32 %v1291_v61, %v7180_v57  ;;  %771 = vperm.xlu0 %6588, %v278_v60   ;;  %v3228_v45 = vrot.slane %v7448_v8, 7  ;;  %v12758_v57 = vrot.slane %v7217_v12, 2  ;;  %v397_v12 = vpop.permute.xlu1 %396 }
 0x115   : > { %v6123_v10 = vmax.f32 %v12757_v13, %v6121_v25  ;;  %v5899_v28 = vmax.f32 %v5794_v38, 0.0  ;;  %v5900_v56 = vmax.f32 %v5795_v58, 0.0  ;;  %v3526_v13 = vadd.f32 %v7332_v21, %v7325_v2 }
 0x116   : > { %v12759_v61 = vrot.slane %v7256_v31, 2  ;;  %v1066_v58 = vmul.f32 %v6806_v18, %v382_v14  ;;  %v12760_v53 = vrot.slane %v7374_v0, 2  ;;  %v12761_v2 = vmov %v12758_v57 }
 0x117   : > { %6125 = vst.msk [vmem:[%s7456_s28] sm:$0xff] %vm5998_vm6, %v6123_v10  ;;  %6005 = vst.msk [vmem:[#allocation2 + $0x30] sm:$0xff] %vm5998_vm6, %v5899_v28  ;;  %v1707_v10 = vmul.f32 %v6809_v23, %v382_v14  ;;  %v2360_v28 = vmul.f32 %v6814_v30, %v382_v14  ;;  %v3743_v25 = vadd.f32 %v7243_v46, %v3526_v13 }
 0x118   : > { %6006 = vst.msk [vmem:[#allocation2 + $0x38] sm:$0xff] %vm5998_vm6, %v5900_v56  ;;  %v1930_v38 = vsel %vm1903_vm1, %v12759_v61, %v12758_v57  ;;  %v1932_v21 = vsel %vm1903_vm1, %v12761_v2, %v12760_v53  ;;  %v3001_v56 = vmul.f32 %v6818_v33, %v382_v14  ;;  %v844_v57 = vmul.f32 %v6812_v29, %v382_v14  ;;  %v407_v62 = vpop.permute.xlu1 %406 }
 0x119   : > { %v2232_v60 = vadd.f32 %v1930_v38, %v7282_v52  ;;  %v2233_v31 = vadd.f32 %v1932_v21, %v1592_v50  ;;  %v1294_v61 = vrot.slane %v1066_v58, 1  ;;  %v1935_v51 = vrot.slane %v1707_v10, 2 }
 0x11a   : > { %v2585_v37 = vrot.slane %v2360_v28, 6  ;;  %v3226_v55 = vrot.slane %v3001_v56, 7  ;;  %v3641_v19 = vmul.f32 %v6821_v35, %v382_v14  ;;  %v12762_v53 = vrot.slane %v7314_v27, 1 }
 0x11b   : > { %v1297_v38 = vsel %vm1262_vm0, %v1294_v61, %v1296_v9  ;;  %v3875_v50 = vmul.f32 %v6823_v36, %v382_v14  ;;  %v4516_v58 = vmul.f32 %v6827_v41, %v382_v14  ;;  %v12763_v2 = vrot.slane %v7317_v16, 2 }
 0x11c   : > { %v1295_v52 = vsel %vm1262_vm0, %v12762_v53, %v1294_v61  ;;  %v1595_v46 = vadd.f32 %v1297_v38, %v844_v57  ;;  %v2586_v13 = vsel %vm2559_vm2, %v2583_v63, %v2585_v37  ;;  %v2588_v27 = vsel %vm2559_vm2, %v2585_v37, %v2587_v1 }
 0x11d   : > { %v1594_v10 = vadd.f32 %v1295_v52, %v7335_v59  ;;  %v1936_v21 = vsel %vm1903_vm1, %v12763_v2, %v1935_v51  ;;  %v2888_v28 = vadd.f32 %v2586_v13, %v2232_v60  ;;  %v5157_v56 = vmul.f32 %v6829_v42, %v382_v14 }
 0x11e   : > { %v7526_v61 = vmul.f32 %v6812_v29, %v397_v12  ;;  %v1938_v22 = vsel %vm1903_vm1, %v1935_v51, %v1937_v6  ;;  %v2889_v63 = vadd.f32 %v2588_v27, %v2233_v31  ;;  %v12764_v53 = vrot.slane %v7341_v34, 7 }
 0x11f   : > { %v6114_v59 = vld [vmem:[#allocation2 + $0x2e] ss:$2 sm:$0x3f]  ;;  %v6118_v57 = vld [vmem:[#allocation2 + $0x2f] ss:$2 sm:$0x3f]  ;;  %v7535_v52 = vmul.f32 %v6806_v18, %v397_v12  ;;  %v7537_v14 = vadd.f32 %v1936_v21, %v1594_v10  ;;  %v3229_v38 = vsel %vm3200_vm3, %v3226_v55, %v3228_v45  ;;  %v7542_v2 = vadd.f32 %v1938_v22, %v1595_v46 }
 0x120   : > { %v3227_v37 = vsel %vm3200_vm3, %v12764_v53, %v3226_v55  ;;  %v6122_v60 = vmax.f32 %v6114_v59, %v6118_v57  ;;  %v4096_v13 = vrot.slane %v3875_v50, 4  ;;  %v4737_v31 = vrot.slane %v4516_v58, 5 }
 0x121   : > { %v3529_v51 = vadd.f32 %v3227_v37, %v2888_v28  ;;  %v7545_v34 = vmul.f32 %v6809_v23, %v397_v12  ;;  %v12765_v27 = vmax.f32 %v7306_v17, %v7308_v32  ;;  %v12766_v59 = vrot.slane %v7344_v3, 4 }
 0x122   : > { %v12767_v21 = vrot.slane %v7451_v40, 4  ;;  %v5377_v50 = vrot.slane %v5157_v56, 6  ;;  %v7556_v46 = vadd.f32 %v3229_v38, %v2889_v63  ;;  %v1300_v57 = vrot.slane %v7535_v52, 1 }
 0x123   : > { %v6124_v53 = vmax.f32 %v12765_v27, %v6122_v60  ;;  %v4097_v10 = vsel %vm4078_vm4, %v12766_v59, %v4096_v13  ;;  %v12768_v17 = vrot.slane %v7358_v15, 5  ;;  %v12769_v3 = vrot.slane %v7462_v11, 5  ;;  %v392_v59 = vpop.permute.xlu0 %391 }
 0x124   : > { %v4099_v55 = vsel %vm4078_vm4, %v4096_v13, %v12767_v21  ;;  %v4403_v58 = vadd.f32 %v4097_v10, %v7337_v54  ;;  %v7569_v56 = vmul.f32 %v6814_v30, %v397_v12  ;;  %v7572_v54 = vmul.f32 %v6818_v33, %v397_v12 }
 0x125   : > { %v4404_v28 = vadd.f32 %v4099_v55, %v3743_v25  ;;  %6127 = vst.msk [vmem:[%s7456_s28 + $0x8] sm:$0x3f] %vm6126_vm7, %v6124_v53  ;;  %v4738_v32 = vsel %vm4719_vm5, %v12768_v17, %v4737_v31  ;;  %v4740_v22 = vsel %vm4719_vm5, %v4737_v31, %v12769_v3  ;;  %v1941_v37 = vrot.slane %v7545_v34, 2 }
 0x126   : > { %v5044_v25 = vadd.f32 %v4738_v32, %v4403_v58  ;;  %v7576_v15 = vmul.f32 %v6823_v36, %v397_v12  ;;  %v7578_v60 = vadd.f32 %v3641_v19, %v3529_v51  ;;  %v12770_v38 = vrot.slane %v7364_v20, 6  ;;  %v281_v19 = vld [vmem:[%s6712_s5 + $0x308] sm:$0xff]  ;;  %v280_v51 = vld [vmem:[%s6712_s5 + $0x300] sm:$0xff] }
 0x127   : > { %v5045_v63 = vadd.f32 %v4740_v22, %v4404_v28  ;;  %v12771_v31 = vrot.slane %v7470_v4, 6  ;;  %v7587_v53 = vmul.f32 %v6827_v41, %v397_v12  ;;  %v2591_v55 = vrot.slane %v7569_v56, 6  ;;  %786 = vperm.xlu1 %6589, %v281_v19   ;;  %781 = vperm.xlu0 %6588, %v280_v51  }
 0x128   : > { %v5378_v13 = vsel %vm2559_vm2, %v12770_v38, %v5377_v50  ;;  %v7591_v58 = vmul.f32 %v6821_v35, %v397_v12  ;;  %v3232_v20 = vrot.slane %v7572_v54, 7  ;;  %v4102_v28 = vrot.slane %v7576_v15, 4 }
 0x129   : > { %v5380_v27 = vsel %vm2559_vm2, %v5377_v50, %v12771_v31  ;;  %v5684_v10 = vadd.f32 %v5378_v13, %v5044_v25  ;;  %v7598_v17 = vmul.f32 %v6829_v42, %v397_v12  ;;  %v12772_v50 = vrot.slane %v7317_v16, 2 }
 0x12a   : > { %v5685_v21 = vadd.f32 %v5380_v27, %v5045_v63  ;;  %v12773_v32 = vrot.slane %v7374_v0, 2  ;;  %v12662_v63 = vrot.slane %v7587_v53, 5  ;;  %v1068_v38 = vmul.f32 %v6806_v18, %v392_v59 }
 0x12b   : > { %v5796_v22 = vadd.f32 %v7117_v44, %v5684_v10  ;;  %v3528_v12 = vadd.f32 %v7440_v39, %v7420_v26  ;;  %v1709_v13 = vmul.f32 %v6809_v23, %v392_v59  ;;  %v2362_v16 = vmul.f32 %v6814_v30, %v392_v59 }
 0x12c   : > { %v1934_v3 = vsel %vm1903_vm1, %v12773_v32, %v12772_v50  ;;  %v5797_v25 = vadd.f32 %v7117_v44, %v5685_v21  ;;  %v3003_v0 = vmul.f32 %v6818_v33, %v392_v59  ;;  %v846_v19 = vmul.f32 %v6812_v29, %v392_v59 }
 0x12d   : > { %v5901_v31 = vmax.f32 %v5796_v22, 0.0  ;;  %v1298_v10 = vrot.slane %v1068_v38, 1  ;;  %v1939_v51 = vrot.slane %v1709_v13, 2  ;;  %v2589_v21 = vrot.slane %v2362_v16, 6 }
 0x12e   : > { %v5902_v27 = vmax.f32 %v5797_v25, 0.0  ;;  %v3230_v50 = vrot.slane %v3003_v0, 7  ;;  %v3877_v32 = vmul.f32 %v6823_v36, %v392_v59  ;;  %v4518_v22 = vmul.f32 %v6827_v41, %v392_v59 }
 0x12f   : > { %6007 = vst.msk [vmem:[#allocation2 + $0x40] sm:$0xff] %vm5998_vm6, %v5901_v31  ;;  %v1299_v26 = vsel %vm1262_vm0, %v1296_v9, %v1298_v10  ;;  %v1301_v39 = vsel %vm1262_vm0, %v1298_v10, %v1300_v57  ;;  %v5159_v25 = vmul.f32 %v6829_v42, %v392_v59  ;;  %v12661_v38 = vrot.slane %v7598_v17, 6 }
 0x130   : > { %6008 = vst.msk [vmem:[#allocation2 + $0x48] sm:$0xff] %vm5998_vm6, %v5902_v27  ;;  %v2234_v13 = vadd.f32 %v1934_v3, %v7406_v7  ;;  %v1596_v16 = vadd.f32 %v1299_v26, %v7443_v47  ;;  %v1597_v0 = vadd.f32 %v1301_v39, %v846_v19  ;;  %v3745_v31 = vadd.f32 %v7355_v48, %v3528_v12 }
 0x131   : > { %v2590_v49 = vsel %vm2559_vm2, %v2587_v1, %v2589_v21  ;;  %v2592_v9 = vsel %vm2559_vm2, %v2589_v21, %v2591_v55  ;;  %v3643_v27 = vmul.f32 %v6821_v35, %v392_v59  ;;  %v1940_v10 = vsel %vm1903_vm1, %v1937_v6, %v1939_v51 }
 0x132   : > { %v1942_v7 = vsel %vm1903_vm1, %v1939_v51, %v1941_v37  ;;  %v2890_v47 = vadd.f32 %v2590_v49, %v2234_v13  ;;  %v2891_v48 = vadd.f32 %v2592_v9, %v7537_v14  ;;  %v3231_v1 = vsel %vm3200_vm3, %v3228_v45, %v3230_v50 }
 0x133   : > { %v4100_v3 = vrot.slane %v3877_v32, 4  ;;  %v4741_v12 = vrot.slane %v4518_v22, 5  ;;  %v5381_v19 = vrot.slane %v5159_v25, 6  ;;  %v7647_v59 = vadd.f32 %v1940_v10, %v1596_v16 }
 0x134   : > { %v7649_v43 = vadd.f32 %v1942_v7, %v1597_v0  ;;  %v3233_v6 = vsel %vm3200_vm3, %v3230_v50, %v3232_v20  ;;  %v3531_v51 = vadd.f32 %v3231_v1, %v2890_v47  ;;  %v12774_v21 = vrot.slane %v7451_v40, 4  ;;  %v402_v1 = vpop.permute.xlu0 %401 }
 0x135   : > { %v4103_v8 = vsel %vm4078_vm4, %v4100_v3, %v4102_v28  ;;  %v7661_v45 = vmul.f32 %v6812_v29, %v407_v62  ;;  %v7664_v32 = vmul.f32 %v6806_v18, %v407_v62  ;;  %v7670_v50 = vadd.f32 %v3233_v6, %v2891_v48 }
 0x136   : > { %v4101_v14 = vsel %vm4078_vm4, %v12774_v21, %v4100_v3  ;;  %v4406_v22 = vadd.f32 %v4103_v8, %v3745_v31  ;;  %v7674_v25 = vmul.f32 %v6809_v23, %v407_v62  ;;  %v7676_v13 = vadd.f32 %v3643_v27, %v3531_v51  ;;  %v283_v21 = vld [vmem:[%s6712_s5 + $0x318] sm:$0xff] }
 0x137   : > { %v7666_v26 = vld [vmem:[#allocation2 + $0x3c] ss:$2 sm:$0xff]  ;;  %v7668_v39 = vld [vmem:[#allocation2 + $0x3d] ss:$2 sm:$0xff]  ;;  %v4405_v40 = vadd.f32 %v4101_v14, %v7445_v5  ;;  %v12775_v16 = vrot.slane %v7462_v11, 5  ;;  %v4744_v49 = vsel %vm4719_vm5, %v4741_v12, %v12662_v63  ;;  %v12776_v9 = vrot.slane %v7470_v4, 6  ;;  %796 = vperm.xlu1 %6589, %v283_v21  }
 0x138   : > { %v5047_v10 = vadd.f32 %v4744_v49, %v4406_v22  ;;  %v7688_v7 = vmul.f32 %v6814_v30, %v407_v62  ;;  %v7691_v27 = vmul.f32 %v6818_v33, %v407_v62  ;;  %v5384_v47 = vsel %vm2559_vm2, %v5381_v19, %v12661_v38  ;;  %v282_v14 = vld [vmem:[%s6712_s5 + $0x310] sm:$0xff] }
 0x139   : > { %v4742_v0 = vsel %vm4719_vm5, %v12775_v16, %v4741_v12  ;;  %v5382_v5 = vsel %vm2559_vm2, %v12776_v9, %v5381_v19  ;;  %v1304_v4 = vrot.slane %v7664_v32, 1  ;;  %v7700_v48 = vmul.f32 %v6823_v36, %v407_v62  ;;  %791 = vperm.xlu0 %6588, %v282_v14  }
 0x13a   : > { %v5046_v31 = vadd.f32 %v4742_v0, %v4405_v40  ;;  %v5687_v12 = vadd.f32 %v5384_v47, %v5047_v10  ;;  %v1945_v6 = vrot.slane %v7674_v25, 2  ;;  %v7704_v51 = vmul.f32 %v6821_v35, %v407_v62 }
 0x13b   : > { %v2595_v8 = vrot.slane %v7688_v7, 6  ;;  %v7711_v19 = vmul.f32 %v6827_v41, %v407_v62  ;;  %v7714_v22 = vmul.f32 %v6829_v42, %v407_v62  ;;  %v4106_v49 = vrot.slane %v7700_v48, 4 }
 0x13c   : > { %v5686_v3 = vadd.f32 %v5382_v5, %v5046_v31  ;;  %v5799_v0 = vadd.f32 %v7117_v44, %v5687_v12  ;;  %v1070_v9 = vmul.f32 %v6806_v18, %v402_v1  ;;  %v848_v5 = vmul.f32 %v6812_v29, %v402_v1 }
 0x13d   : > { %v1711_v31 = vmul.f32 %v6809_v23, %v402_v1  ;;  %v2364_v10 = vmul.f32 %v6814_v30, %v402_v1  ;;  %v3005_v47 = vmul.f32 %v6818_v33, %v402_v1  ;;  %v3879_v14 = vmul.f32 %v6823_v36, %v402_v1 }
 0x13e   : > { %v5798_v16 = vadd.f32 %v7117_v44, %v5686_v3  ;;  %v5904_v11 = vmax.f32 %v5799_v0, 0.0  ;;  %v1302_v21 = vrot.slane %v1070_v9, 1  ;;  %v4520_v63 = vmul.f32 %v6827_v41, %v402_v1 }
 0x13f   : > { %v1943_v3 = vrot.slane %v1711_v31, 2  ;;  %v2593_v38 = vrot.slane %v2364_v10, 6  ;;  %v3234_v12 = vrot.slane %v3005_v47, 7  ;;  %v4104_v0 = vrot.slane %v3879_v14, 4 }
 0x140   : > { %v5903_v62 = vmax.f32 %v5798_v16, 0.0  ;;  %6010 = vst.msk [vmem:[#allocation2 + $0x58] sm:$0xff] %vm5998_vm6, %v5904_v11  ;;  %v1303_v40 = vsel %vm1262_vm0, %v1300_v57, %v1302_v21  ;;  %v1305_v16 = vsel %vm1262_vm0, %v1302_v21, %v1304_v4  ;;  %v5161_v9 = vmul.f32 %v6829_v42, %v402_v1 }
 0x141   : > { %v12664_v31 = vrot.slane %v7711_v19, 5  ;;  %v12663_v10 = vrot.slane %v7714_v22, 6  ;;  %v3747_v47 = vadd.f32 %v7475_v24, %v7556_v46  ;;  %v3645_v11 = vmul.f32 %v6821_v35, %v402_v1 }
 0x142   : > { %6009 = vst.msk [vmem:[#allocation2 + $0x50] sm:$0xff] %vm5998_vm6, %v5903_v62  ;;  %v1598_v52 = vadd.f32 %v1303_v40, %v7526_v61  ;;  %v1599_v62 = vadd.f32 %v1305_v16, %v848_v5  ;;  %v2594_v57 = vsel %vm2559_vm2, %v2591_v55, %v2593_v38  ;;  %v2596_v21 = vsel %vm2559_vm2, %v2593_v38, %v2595_v8 }
 0x143   : > { %v1944_v14 = vsel %vm1903_vm1, %v1941_v37, %v1943_v3  ;;  %v1946_v24 = vsel %vm1903_vm1, %v1943_v3, %v1945_v6  ;;  %v2892_v46 = vadd.f32 %v2594_v57, %v7542_v2  ;;  %v3235_v61 = vsel %vm3200_vm3, %v3232_v20, %v3234_v12  ;;  %v417_v20 = vpop.permute.xlu1 %416 }
 0x144   : > { %v4105_v56 = vsel %vm4078_vm4, %v4102_v28, %v4104_v0  ;;  %v4107_v34 = vsel %vm4078_vm4, %v4104_v0, %v4106_v49  ;;  %v4745_v55 = vrot.slane %v4520_v63, 5  ;;  %v5385_v37 = vrot.slane %v5161_v9, 6 }
 0x145   : > { %v2893_v38 = vadd.f32 %v2596_v21, %v7647_v59  ;;  %v12777_v1 = vrot.slane %v7691_v27, 7  ;;  %v4407_v54 = vadd.f32 %v4105_v56, %v7578_v60  ;;  %v4408_v40 = vadd.f32 %v4107_v34, %v3747_v47 }
 0x146   : > { %v7768_v5 = vadd.f32 %v1944_v14, %v1598_v52  ;;  %v3533_v15 = vadd.f32 %v3235_v61, %v2892_v46  ;;  %v12778_v28 = vrot.slane %v7587_v53, 5  ;;  %v4748_v63 = vsel %vm4719_vm5, %v4745_v55, %v12664_v31 }
 0x147   : > { %v3237_v2 = vsel %vm3200_vm3, %v3234_v12, %v12777_v1  ;;  %v7780_v12 = vadd.f32 %v1946_v24, %v1599_v62  ;;  %v5049_v0 = vadd.f32 %v4748_v63, %v4408_v40  ;;  %v12779_v9 = vrot.slane %v7598_v17, 6 }
 0x148   : > { %v4746_v3 = vsel %vm4719_vm5, %v12778_v28, %v4745_v55  ;;  %v5388_v47 = vsel %vm2559_vm2, %v5385_v37, %v12663_v10  ;;  %v7789_v52 = vmul.f32 %v6806_v18, %v417_v20  ;;  %v7792_v57 = vmul.f32 %v6809_v23, %v417_v20  ;;  %v412_v55 = vpop.permute.xlu0 %411 }
 0x149   : > { %v7776_v59 = vld [vmem:[#allocation2 + $0x4c] ss:$2 sm:$0x3f]  ;;  %v7778_v16 = vld [vmem:[#allocation2 + $0x4d] ss:$2 sm:$0x3f]  ;;  %v5048_v60 = vadd.f32 %v4746_v3, %v4407_v54  ;;  %v5386_v53 = vsel %vm2559_vm2, %v12779_v9, %v5385_v37  ;;  %v7795_v62 = vmul.f32 %v6814_v30, %v417_v20  ;;  %v7797_v21 = vadd.f32 %v3237_v2, %v2893_v38 }
 0x14a   : > { %v5689_v17 = vadd.f32 %v5388_v47, %v5049_v0  ;;  %v7800_v24 = vmul.f32 %v6818_v33, %v417_v20  ;;  %v7804_v61 = vadd.f32 %v3645_v11, %v3533_v15  ;;  %v7807_v56 = vmul.f32 %v6812_v29, %v417_v20  ;;  %v285_v37 = vld [vmem:[%s6712_s5 + $0x328] sm:$0xff]  ;;  %v284_v38 = vld [vmem:[%s6712_s5 + $0x320] sm:$0xff] }
 0x14b   : > { %v5688_v14 = vadd.f32 %v5386_v53, %v5048_v60  ;;  %v7810_v34 = vmul.f32 %v6821_v35, %v417_v20  ;;  %v7817_v54 = vmul.f32 %v6823_v36, %v417_v20  ;;  %806 = vperm.xlu1 %6589, %v285_v37   ;;  %801 = vperm.xlu0 %6588, %v284_v38   ;;  %v1308_v11 = vrot.slane %v7789_v52, 1 }
 0x14c   : > { %v5801_v2 = vadd.f32 %v7117_v44, %v5689_v17  ;;  %v1949_v40 = vrot.slane %v7792_v57, 2  ;;  %v2599_v15 = vrot.slane %v7795_v62, 6  ;;  %v3240_v28 = vrot.slane %v7800_v24, 7 }
 0x14d   : > { %v5800_v1 = vadd.f32 %v7117_v44, %v5688_v14  ;;  %v7824_v60 = vmul.f32 %v6827_v41, %v417_v20  ;;  %v1072_v44 = vmul.f32 %v6806_v18, %v412_v55  ;;  %v7828_v0 = vmul.f32 %v6829_v42, %v417_v20 }
 0x14e   : > { %v5906_v63 = vmax.f32 %v5801_v2, 0.0  ;;  %v1713_v9 = vmul.f32 %v6809_v23, %v412_v55  ;;  %v2366_v53 = vmul.f32 %v6814_v30, %v412_v55  ;;  %v3007_v47 = vmul.f32 %v6818_v33, %v412_v55 }
 0x14f   : > { %v5905_v3 = vmax.f32 %v5800_v1, 0.0  ;;  %v1306_v17 = vrot.slane %v1072_v44, 1  ;;  %v3881_v37 = vmul.f32 %v6823_v36, %v412_v55  ;;  %v4522_v38 = vmul.f32 %v6827_v41, %v412_v55 }
 0x150   : > { %6012 = vst.msk [vmem:[#allocation2 + $0x68] sm:$0xff] %vm5998_vm6, %v5906_v63  ;;  %v3749_v20 = vadd.f32 %v7591_v58, %v7670_v50  ;;  %v850_v1 = vmul.f32 %v6812_v29, %v412_v55  ;;  %v1947_v2 = vrot.slane %v1713_v9, 2  ;;  %v2597_v46 = vrot.slane %v2366_v53, 6 }
 0x151   : > { %6011 = vst.msk [vmem:[#allocation2 + $0x60] sm:$0xff] %vm5998_vm6, %v5905_v3  ;;  %v1307_v3 = vsel %vm1262_vm0, %v1304_v4, %v1306_v17  ;;  %v1309_v63 = vsel %vm1262_vm0, %v1306_v17, %v1308_v11  ;;  %v3238_v44 = vrot.slane %v3007_v47, 7  ;;  %v4108_v10 = vrot.slane %v3881_v37, 4 }
 0x152   : > { %v12666_v31 = vrot.slane %v7824_v60, 5  ;;  %v12665_v14 = vrot.slane %v7828_v0, 6  ;;  %v3647_v58 = vmul.f32 %v6821_v35, %v412_v55  ;;  %v4749_v50 = vrot.slane %v4522_v38, 5  ;;  %v427_v38 = vpop.permute.xlu1 %426 }
 0x153   : > { %v1600_v9 = vadd.f32 %v1307_v3, %v7661_v45  ;;  %v2598_v32 = vsel %vm2559_vm2, %v2595_v8, %v2597_v46  ;;  %v2600_v4 = vsel %vm2559_vm2, %v2597_v46, %v2599_v15  ;;  %v5163_v53 = vmul.f32 %v6829_v42, %v412_v55 }
 0x154   : > { %v1601_v47 = vadd.f32 %v1309_v63, %v850_v1  ;;  %v1948_v17 = vsel %vm1903_vm1, %v1945_v6, %v1947_v2  ;;  %v1950_v37 = vsel %vm1903_vm1, %v1947_v2, %v1949_v40  ;;  %v2894_v45 = vadd.f32 %v2598_v32, %v7649_v43 }
 0x155   : > { %v12780_v7 = vrot.slane %v7691_v27, 7  ;;  %v3241_v46 = vsel %vm3200_vm3, %v3238_v44, %v3240_v28  ;;  %v4109_v25 = vsel %vm4078_vm4, %v4106_v49, %v4108_v10  ;;  %v12781_v6 = vrot.slane %v7817_v54, 4 }
 0x156   : > { %v2895_v43 = vadd.f32 %v2600_v4, %v7768_v5  ;;  %v4409_v27 = vadd.f32 %v4109_v25, %v7676_v13  ;;  %v12782_v63 = vrot.slane %v7711_v19, 5  ;;  %v4752_v49 = vsel %vm4719_vm5, %v4749_v50, %v12666_v31 }
 0x157   : > { %v3239_v8 = vsel %vm3200_vm3, %v12780_v7, %v3238_v44  ;;  %v4111_v55 = vsel %vm4078_vm4, %v4108_v10, %v12781_v6  ;;  %v5389_v10 = vrot.slane %v5163_v53, 6  ;;  %v7885_v7 = vadd.f32 %v1948_v17, %v1600_v9 }
 0x158   : > { %v6137_v1 = vld [vmem:[#allocation2 + $0x5a] ss:$2 sm:$0xff]  ;;  %v6141_v2 = vld [vmem:[#allocation2 + $0x5b] ss:$2 sm:$0xff]  ;;  %v4410_v3 = vadd.f32 %v4111_v55, %v3749_v20  ;;  %v4750_v44 = vsel %vm4719_vm5, %v12782_v63, %v4749_v50  ;;  %v3535_v48 = vadd.f32 %v3239_v8, %v2894_v45  ;;  %v7888_v13 = vmul.f32 %v6806_v18, %v427_v38 }
 0x159   : > { %v6146_v32 = vmax.f32 %v6137_v1, %v6141_v2  ;;  %v5050_v5 = vadd.f32 %v4750_v44, %v4409_v27  ;;  %v12783_v19 = vmax.f32 %v7666_v26, %v7668_v39  ;;  %v12784_v45 = vrot.slane %v7714_v22, 6  ;;  %v287_v26 = vld [vmem:[%s6712_s5 + $0x338] sm:$0xff]  ;;  %v286_v39 = vld [vmem:[%s6712_s5 + $0x330] sm:$0xff] }
 0x15a   : > { %v5051_v4 = vadd.f32 %v4752_v49, %v4410_v3  ;;  %v5392_v50 = vsel %vm2559_vm2, %v5389_v10, %v12665_v14  ;;  %v7900_v9 = vmul.f32 %v6809_v23, %v427_v38  ;;  %v7902_v53 = vadd.f32 %v1950_v37, %v1601_v47  ;;  %816 = vperm.xlu1 %6589, %v287_v26   ;;  %v7921_v47 = vld [vmem:[#allocation3] ss:$0 sm:$0xff]  ;;  %v437_v14 = vpop.permute.xlu1 %436 }
 0x15b   : > { %v6148_v20 = vmax.f32 %v12783_v19, %v6146_v32  ;;  %v5390_v8 = vsel %vm2559_vm2, %v12784_v45, %v5389_v10  ;;  %v7905_v6 = vmul.f32 %v6814_v30, %v427_v38  ;;  %v7911_v22 = vadd.f32 %v3241_v46, %v2895_v43  ;;  %811 = vperm.xlu0 %6588, %v286_v39  }
 0x15c   : > { %v5690_v17 = vadd.f32 %v5390_v8, %v5050_v5  ;;  %v5691_v25 = vadd.f32 %v5392_v50, %v5051_v4  ;;  %v7913_v55 = vadd.f32 %v3647_v58, %v3535_v48  ;;  %v7916_v1 = vmul.f32 %v6812_v29, %v427_v38  ;;  %v422_v58 = vpop.permute.xlu0 %421 }
 0x15d   : > { %6538 = vst.msk [vmem:[%s7456_s28 + $0x10] sm:$0xff] %vm5998_vm6, %v6148_v20  ;;  %v7919_v2 = vmul.f32 %v6818_v33, %v427_v38  ;;  %v1312_v3 = vrot.slane %v7888_v13, 1  ;;  %v7927_v46 = vmul.f32 %v6823_v36, %v427_v38  ;;  %v1953_v43 = vrot.slane %v7900_v9, 2 }
 0x15e   : > { %v5802_v37 = vadd.f32 %v7921_v47, %v5690_v17  ;;  %v5803_v27 = vadd.f32 %v7921_v47, %v5691_v25  ;;  %v2603_v63 = vrot.slane %v7905_v6, 6  ;;  %v7932_v44 = vmul.f32 %v6821_v35, %v427_v38 }
 0x15f   : > { %v7935_v32 = vmul.f32 %v6827_v41, %v427_v38  ;;  %v7939_v5 = vmul.f32 %v6829_v42, %v427_v38  ;;  %v1074_v4 = vmul.f32 %v6806_v18, %v422_v58  ;;  %v1715_v19 = vmul.f32 %v6809_v23, %v422_v58 }
 0x160   : > { %v5907_v48 = vmax.f32 %v5802_v37, 0.0  ;;  %v5908_v49 = vmax.f32 %v5803_v27, 0.0  ;;  %v2368_v20 = vmul.f32 %v6814_v30, %v422_v58  ;;  %v3009_v45 = vmul.f32 %v6818_v33, %v422_v58 }
 0x161   : > { %v4114_v8 = vrot.slane %v7927_v46, 4  ;;  %v3883_v50 = vmul.f32 %v6823_v36, %v422_v58  ;;  %v4524_v17 = vmul.f32 %v6827_v41, %v422_v58  ;;  %v5165_v38 = vmul.f32 %v6829_v42, %v422_v58 }
 0x162   : > { %6013 = vst.msk [vmem:[#allocation2 + $0x70] sm:$0xff] %vm5998_vm6, %v5907_v48  ;;  %6014 = vst.msk [vmem:[#allocation2 + $0x78] sm:$0xff] %vm5998_vm6, %v5908_v49  ;;  %v1310_v26 = vrot.slane %v1074_v4, 1  ;;  %v1951_v39 = vrot.slane %v1715_v19, 2  ;;  %v2601_v37 = vrot.slane %v2368_v20, 6  ;;  %v5395_v27 = vrot.slane %v7939_v5, 6 }
 0x163   : > { %v3751_v48 = vadd.f32 %v7704_v51, %v7797_v21  ;;  %v852_v49 = vmul.f32 %v6812_v29, %v422_v58  ;;  %v4112_v10 = vrot.slane %v3883_v50, 4  ;;  %v3242_v4 = vrot.slane %v3009_v45, 7 }
 0x164   : > { %v1311_v31 = vsel %vm1262_vm0, %v1308_v11, %v1310_v26  ;;  %v1313_v25 = vsel %vm1262_vm0, %v1310_v26, %v1312_v3  ;;  %v3649_v19 = vmul.f32 %v6821_v35, %v422_v58  ;;  %v2602_v20 = vsel %vm2559_vm2, %v2599_v15, %v2601_v37 }
 0x165   : > { %v2604_v51 = vsel %vm2559_vm2, %v2601_v37, %v2603_v63  ;;  %v4753_v21 = vrot.slane %v4524_v17, 5  ;;  %v5393_v50 = vrot.slane %v5165_v38, 6  ;;  %v1952_v52 = vsel %vm1903_vm1, %v1949_v40, %v1951_v39 }
 0x166   : > { %v1954_v11 = vsel %vm1903_vm1, %v1951_v39, %v1953_v43  ;;  %v2896_v58 = vadd.f32 %v2602_v20, %v7780_v12  ;;  %v7977_v62 = vmul.f32 %v6812_v29, %v437_v14  ;;  %v1602_v15 = vadd.f32 %v1311_v31, %v7807_v56 }
 0x167   : > { %v1603_v45 = vadd.f32 %v1313_v25, %v852_v49  ;;  %v12785_v26 = vrot.slane %v7817_v54, 4  ;;  %v4115_v57 = vsel %vm4078_vm4, %v4112_v10, %v4114_v8  ;;  %v2897_v39 = vadd.f32 %v2604_v51, %v7885_v7 }
 0x168   : > { %v3243_v12 = vsel %vm3200_vm3, %v3240_v28, %v3242_v4  ;;  %v4412_v31 = vadd.f32 %v4115_v57, %v3751_v48  ;;  %v12786_v25 = vrot.slane %v7824_v60, 5  ;;  %v12788_v24 = vrot.slane %v7828_v0, 6 }
 0x169   : > { %v4113_v17 = vsel %vm4078_vm4, %v12785_v26, %v4112_v10  ;;  %v6139_v40 = vld [vmem:[#allocation2 + $0x6a] ss:$2 sm:$0x3f]  ;;  %v6143_v38 = vld [vmem:[#allocation2 + $0x6b] ss:$2 sm:$0x3f]  ;;  %v3537_v54 = vadd.f32 %v3243_v12, %v2896_v58  ;;  %v12789_v60 = vmax.f32 %v7776_v59, %v7778_v16  ;;  %v8007_v51 = vmul.f32 %v6806_v18, %v437_v14 }
 0x16a   : > { %v4411_v37 = vadd.f32 %v4113_v17, %v7804_v61  ;;  %v6147_v56 = vmax.f32 %v6139_v40, %v6143_v38  ;;  %v4754_v49 = vsel %vm4719_vm5, %v12786_v25, %v4753_v21  ;;  %v12787_v10 = vrot.slane %v7935_v32, 5 }
 0x16b   : > { %v5394_v28 = vsel %vm2559_vm2, %v12788_v24, %v5393_v50  ;;  %v5396_v61 = vsel %vm2559_vm2, %v5393_v50, %v5395_v27  ;;  %v8013_v0 = vmul.f32 %v6814_v30, %v437_v14  ;;  %v2243_v58 = vadd.f32 %v1952_v52, %v1602_v15  ;;  %v288_v52 = vld [vmem:[%s6712_s5 + $0x340] sm:$0xff] }
 0x16c   : > { %v4756_v20 = vsel %vm4719_vm5, %v4753_v21, %v12787_v10  ;;  %v5052_v26 = vadd.f32 %v4754_v49, %v4411_v37  ;;  %v6149_v48 = vmax.f32 %v12789_v60, %v6147_v56  ;;  %v8010_v21 = vmul.f32 %v6809_v23, %v437_v14  ;;  %v432_v37 = vpop.permute.xlu0 %431  ;;  %821 = vperm.xlu0 %6588, %v288_v52  }
 0x16d   : > { %v5053_v7 = vadd.f32 %v4756_v20, %v4412_v31  ;;  %v12790_v17 = vrot.slane %v7919_v2, 7  ;;  %v8020_v59 = vadd.f32 %v1954_v11, %v1603_v45  ;;  %v8024_v38 = vadd.f32 %v3649_v19, %v3537_v54  ;;  %v289_v31 = vld [vmem:[%s6712_s5 + $0x348] sm:$0xff] }
 0x16e   : > { %v5692_v50 = vadd.f32 %v5394_v28, %v5052_v26  ;;  %6539 = vst.msk [vmem:[%s7456_s28 + $0x18] sm:$0x3f] %vm6126_vm7, %v6149_v48  ;;  %v8027_v12 = vmul.f32 %v6818_v33, %v437_v14  ;;  %v8034_v56 = vmul.f32 %v6821_v35, %v437_v14  ;;  %1043 = vperm.xlu1 %6589, %v289_v31   ;;  %v1316_v11 = vrot.slane %v8007_v51, 1 }
 0x16f   : > { %v3245_v57 = vsel %vm3200_vm3, %v3242_v4, %v12790_v17  ;;  %v5693_v40 = vadd.f32 %v5396_v61, %v5053_v7  ;;  %v1957_v19 = vrot.slane %v8010_v21, 2  ;;  %v2607_v45 = vrot.slane %v8013_v0, 6 }
 0x170   : > { %v8022_v16 = vadd.f32 %v3245_v57, %v2897_v39  ;;  %v5804_v15 = vadd.f32 %v7921_v47, %v5692_v50  ;;  %v8040_v39 = vmul.f32 %v6823_v36, %v437_v14  ;;  %v8043_v49 = vmul.f32 %v6827_v41, %v437_v14 }
 0x171   : > { %v5805_v4 = vadd.f32 %v7921_v47, %v5693_v40  ;;  %v1076_v10 = vmul.f32 %v6806_v18, %v432_v37  ;;  %v8047_v20 = vmul.f32 %v6829_v42, %v437_v14  ;;  %v1717_v26 = vmul.f32 %v6809_v23, %v432_v37 }
 0x172   : > { %v5909_v54 = vmax.f32 %v5804_v15, 0.0  ;;  %v2370_v7 = vmul.f32 %v6814_v30, %v432_v37  ;;  %v3011_v24 = vmul.f32 %v6818_v33, %v432_v37  ;;  %v12669_v28 = vrot.slane %v8027_v12, 7 }
 0x173   : > { %v5910_v25 = vmax.f32 %v5805_v4, 0.0  ;;  %v1314_v61 = vrot.slane %v1076_v10, 1  ;;  %v3885_v60 = vmul.f32 %v6823_v36, %v432_v37  ;;  %v4526_v48 = vmul.f32 %v6827_v41, %v432_v37 }
 0x174   : > { %6015 = vst.msk [vmem:[#allocation2 + $0x80] sm:$0xff] %vm5998_vm6, %v5909_v54  ;;  %v4118_v14 = vrot.slane %v8040_v39, 4  ;;  %v3753_v17 = vadd.f32 %v7810_v34, %v7911_v22  ;;  %v1955_v57 = vrot.slane %v1717_v26, 2  ;;  %v2605_v50 = vrot.slane %v2370_v7, 6 }
 0x175   : > { %6016 = vst.msk [vmem:[#allocation2 + $0x88] sm:$0xff] %vm5998_vm6, %v5910_v25  ;;  %v1315_v40 = vsel %vm1262_vm0, %v1312_v3, %v1314_v61  ;;  %v1317_v31 = vsel %vm1262_vm0, %v1314_v61, %v1316_v11  ;;  %v3246_v52 = vrot.slane %v3011_v24, 7  ;;  %v4116_v15 = vrot.slane %v3885_v60, 4 }
 0x176   : > { %v12668_v4 = vrot.slane %v8043_v49, 5  ;;  %v12667_v54 = vrot.slane %v8047_v20, 6  ;;  %v854_v25 = vmul.f32 %v6812_v29, %v432_v37  ;;  %v3651_v34 = vmul.f32 %v6821_v35, %v432_v37 }
 0x177   : > { %v2606_v13 = vsel %vm2559_vm2, %v2603_v63, %v2605_v50  ;;  %v2608_v22 = vsel %vm2559_vm2, %v2605_v50, %v2607_v45  ;;  %v4757_v3 = vrot.slane %v4526_v48, 5  ;;  %v5167_v10 = vmul.f32 %v6829_v42, %v432_v37 }
 0x178   : > { %v1604_v26 = vadd.f32 %v1315_v40, %v7916_v1  ;;  %v1605_v7 = vadd.f32 %v1317_v31, %v854_v25  ;;  %v1956_v24 = vsel %vm1903_vm1, %v1953_v43, %v1955_v57  ;;  %v2898_v61 = vadd.f32 %v2606_v13, %v7902_v53  ;;  %v447_v1 = vpop.permute.xlu1 %446 }
 0x179   : > { %v1958_v6 = vsel %vm1903_vm1, %v1955_v57, %v1957_v19  ;;  %v12791_v63 = vrot.slane %v7919_v2, 7  ;;  %v4117_v37 = vsel %vm4078_vm4, %v4114_v8, %v4116_v15  ;;  %v4119_v9 = vsel %vm4078_vm4, %v4116_v15, %v4118_v14 }
 0x17a   : > { %v2899_v43 = vadd.f32 %v2608_v22, %v2243_v58  ;;  %v3249_v53 = vsel %vm3200_vm3, %v3246_v52, %v12669_v28  ;;  %v4413_v48 = vadd.f32 %v4117_v37, %v7913_v55  ;;  %v4414_v2 = vadd.f32 %v4119_v9, %v3753_v17  ;;  %v442_v37 = vpop.permute.xlu0 %441 }
 0x17b   : > { %v3247_v60 = vsel %vm3200_vm3, %v12791_v63, %v3246_v52  ;;  %v12792_v46 = vrot.slane %v7935_v32, 5  ;;  %v4760_v50 = vsel %vm4719_vm5, %v4757_v3, %v12668_v4  ;;  %v5397_v40 = vrot.slane %v5167_v10, 6  ;;  %v8104_v58 = vld [vmem:[#allocation2 + $0x78] ss:$2 sm:$0xff]  ;;  %v8106_v31 = vld [vmem:[#allocation2 + $0x79] ss:$2 sm:$0xff] }
 0x17c   : > { %v3539_v57 = vadd.f32 %v3247_v60, %v2898_v61  ;;  %v8108_v52 = vadd.f32 %v1956_v24, %v1604_v26  ;;  %v5055_v15 = vadd.f32 %v4760_v50, %v4414_v2  ;;  %v8111_v17 = vmul.f32 %v6806_v18, %v447_v1  ;;  %v290_v10 = vld [vmem:[%s6712_s5 + $0x350] sm:$0xff] }
 0x17d   : > { %v4758_v8 = vsel %vm4719_vm5, %v12792_v46, %v4757_v3  ;;  %v5398_v32 = vsel %vm2559_vm2, %v5395_v27, %v5397_v40  ;;  %v5400_v25 = vsel %vm2559_vm2, %v5397_v40, %v12667_v54  ;;  %v8120_v13 = vmul.f32 %v6809_v23, %v447_v1  ;;  %v291_v3 = vld [vmem:[%s6712_s5 + $0x358] sm:$0xff]  ;;  %2330 = vperm.xlu0 %6588, %v290_v10   ;;  %v457_v54 = vpop.permute.xlu1 %456 }
 0x17e   : > { %v5054_v55 = vadd.f32 %v4758_v8, %v4413_v48  ;;  %v8123_v22 = vmul.f32 %v6814_v30, %v447_v1  ;;  %v8127_v26 = vadd.f32 %v1958_v6, %v1605_v7  ;;  %v5695_v61 = vadd.f32 %v5400_v25, %v5055_v15  ;;  %2335 = vperm.xlu1 %6589, %v291_v3  }
 0x17f   : > { %v8131_v27 = vadd.f32 %v3249_v53, %v2899_v43  ;;  %v8133_v63 = vadd.f32 %v3651_v34, %v3539_v57  ;;  %v8136_v60 = vmul.f32 %v6812_v29, %v447_v1  ;;  %v1320_v6 = vrot.slane %v8111_v17, 1 }
 0x180   : > { %v5694_v24 = vadd.f32 %v5398_v32, %v5054_v55  ;;  %v5807_v7 = vadd.f32 %v7921_v47, %v5695_v61  ;;  %v8142_v48 = vmul.f32 %v6818_v33, %v447_v1  ;;  %v1961_v2 = vrot.slane %v8120_v13, 2 }
 0x181   : > { %v2611_v43 = vrot.slane %v8123_v22, 6  ;;  %v8147_v34 = vmul.f32 %v6823_v36, %v447_v1  ;;  %v8150_v53 = vmul.f32 %v6827_v41, %v447_v1  ;;  %v8153_v8 = vmul.f32 %v6821_v35, %v447_v1 }
 0x182   : > { %v5806_v9 = vadd.f32 %v7921_v47, %v5694_v24  ;;  %v5912_v46 = vmax.f32 %v5807_v7, 0.0  ;;  %v1078_v50 = vmul.f32 %v6806_v18, %v442_v37  ;;  %v8157_v40 = vmul.f32 %v6829_v42, %v447_v1 }
 0x183   : > { %v1719_v55 = vmul.f32 %v6809_v23, %v442_v37  ;;  %v2372_v15 = vmul.f32 %v6814_v30, %v442_v37  ;;  %v3013_v32 = vmul.f32 %v6818_v33, %v442_v37  ;;  %v3887_v10 = vmul.f32 %v6823_v36, %v442_v37 }
 0x184   : > { %v5911_v57 = vmax.f32 %v5806_v9, 0.0  ;;  %6018 = vst.msk [vmem:[#allocation2 + $0x98] sm:$0xff] %vm5998_vm6, %v5912_v46  ;;  %v1318_v3 = vrot.slane %v1078_v50, 1  ;;  %v4528_v24 = vmul.f32 %v6827_v41, %v442_v37  ;;  %v12671_v1 = vrot.slane %v8147_v34, 4 }
 0x185   : > { %v3755_v9 = vadd.f32 %v7932_v44, %v8022_v16  ;;  %v2609_v7 = vrot.slane %v2372_v15, 6  ;;  %v1959_v50 = vrot.slane %v1719_v55, 2  ;;  %v4120_v5 = vrot.slane %v3887_v10, 4 }
 0x186   : > { %6017 = vst.msk [vmem:[#allocation2 + $0x90] sm:$0xff] %vm5998_vm6, %v5911_v57  ;;  %v1319_v57 = vsel %vm1262_vm0, %v1316_v11, %v1318_v3  ;;  %v1321_v46 = vsel %vm1262_vm0, %v1318_v3, %v1320_v6  ;;  %v12670_v25 = vrot.slane %v8157_v40, 6  ;;  %v856_v4 = vmul.f32 %v6812_v29, %v442_v37 }
 0x187   : > { %v3250_v61 = vrot.slane %v3013_v32, 7  ;;  %v3653_v28 = vmul.f32 %v6821_v35, %v442_v37  ;;  %v2610_v44 = vsel %vm2559_vm2, %v2607_v45, %v2609_v7  ;;  %v2612_v51 = vsel %vm2559_vm2, %v2609_v7, %v2611_v43 }
 0x188   : > { %v4761_v16 = vrot.slane %v4528_v24, 5  ;;  %v5169_v11 = vmul.f32 %v6829_v42, %v442_v37  ;;  %v1606_v55 = vadd.f32 %v1319_v57, %v7977_v62  ;;  %v1607_v15 = vadd.f32 %v1321_v46, %v856_v4 }
 0x189   : > { %v2900_v3 = vadd.f32 %v2610_v44, %v8020_v59  ;;  %v8190_v32 = vmul.f32 %v6812_v29, %v457_v54  ;;  %v1960_v0 = vsel %vm1903_vm1, %v1957_v19, %v1959_v50  ;;  %v1962_v45 = vsel %vm1903_vm1, %v1959_v50, %v1961_v2 }
 0x18a   : > { %v4121_v37 = vsel %vm4078_vm4, %v4118_v14, %v4120_v5  ;;  %v4123_v62 = vsel %vm4078_vm4, %v4120_v5, %v12671_v1  ;;  %v2901_v59 = vadd.f32 %v2612_v51, %v8108_v52  ;;  %v12793_v4 = vrot.slane %v8027_v12, 7 }
 0x18b   : > { %v4415_v19 = vadd.f32 %v4121_v37, %v8024_v38  ;;  %v4416_v10 = vadd.f32 %v4123_v62, %v3755_v9  ;;  %v12794_v7 = vrot.slane %v8043_v49, 5  ;;  %v12795_v14 = vrot.slane %v8150_v53, 5 }
 0x18c   : > { %v3251_v21 = vsel %vm3200_vm3, %v12793_v4, %v3250_v61  ;;  %v5401_v46 = vrot.slane %v5169_v11, 6  ;;  %v12796_v12 = vrot.slane %v8142_v48, 7  ;;  %v8223_v49 = vmul.f32 %v6806_v18, %v457_v54 }
 0x18d   : > { %v3541_v24 = vadd.f32 %v3251_v21, %v2900_v3  ;;  %v4762_v39 = vsel %vm4719_vm5, %v12794_v7, %v4761_v16  ;;  %v4764_v57 = vsel %vm4719_vm5, %v4761_v16, %v12795_v14  ;;  %v8215_v5 = vld [vmem:[#allocation2 + $0x88] ss:$2 sm:$0x3f]  ;;  %v8217_v52 = vld [vmem:[#allocation2 + $0x89] ss:$2 sm:$0x3f]  ;;  %v8232_v11 = vmul.f32 %v6809_v23, %v457_v54  ;;  %v452_v7 = vpop.permute.xlu0 %451 }
 0x18e   : > { %v3253_v50 = vsel %vm3200_vm3, %v3250_v61, %v12796_v12  ;;  %v5056_v38 = vadd.f32 %v4762_v39, %v4415_v19  ;;  %v5057_v9 = vadd.f32 %v4764_v57, %v4416_v10  ;;  %v12797_v44 = vrot.slane %v8047_v20, 6  ;;  %v293_v39 = vld [vmem:[%s6712_s5 + $0x368] sm:$0xff]  ;;  %v292_v14 = vld [vmem:[%s6712_s5 + $0x360] sm:$0xff] }
 0x18f   : > { %v5404_v16 = vsel %vm2559_vm2, %v5401_v46, %v12670_v25  ;;  %v8235_v61 = vmul.f32 %v6814_v30, %v457_v54  ;;  %v2247_v3 = vadd.f32 %v1960_v0, %v1606_v55  ;;  %v8237_v37 = vadd.f32 %v1962_v45, %v1607_v15  ;;  %3844 = vperm.xlu1 %6589, %v293_v39   ;;  %v8279_v25 = vpop.permute.xlu1 %466 }
 0x190   : > { %v5402_v51 = vsel %vm2559_vm2, %v12797_v44, %v5401_v46  ;;  %v5697_v4 = vadd.f32 %v5404_v16, %v5057_v9  ;;  %v8241_v21 = vadd.f32 %v3253_v50, %v2901_v59  ;;  %v8243_v19 = vadd.f32 %v3653_v28, %v3541_v24  ;;  %2340 = vperm.xlu0 %6588, %v292_v14  }
 0x191   : > { %v5696_v62 = vadd.f32 %v5402_v51, %v5056_v38  ;;  %v8246_v10 = vmul.f32 %v6818_v33, %v457_v54  ;;  %v12673_v15 = vrot.slane %v8223_v49, 1  ;;  %v8254_v0 = vmul.f32 %v6823_v36, %v457_v54 }
 0x192   : > { %v5809_v55 = vadd.f32 %v7921_v47, %v5697_v4  ;;  %v12674_v28 = vrot.slane %v8232_v11, 2  ;;  %v12672_v45 = vrot.slane %v8235_v61, 6  ;;  %v8259_v59 = vmul.f32 %v6827_v41, %v457_v54 }
 0x193   : > { %v5808_v57 = vadd.f32 %v7921_v47, %v5696_v62  ;;  %v8262_v24 = vmul.f32 %v6829_v42, %v457_v54  ;;  %v1080_v50 = vmul.f32 %v6806_v18, %v452_v7  ;;  %v1721_v38 = vmul.f32 %v6809_v23, %v452_v7 }
 0x194   : > { %v5914_v12 = vmax.f32 %v5809_v55, 0.0  ;;  %v8267_v9 = vmul.f32 %v6821_v35, %v457_v54  ;;  %v2374_v44 = vmul.f32 %v6814_v30, %v452_v7  ;;  %v3015_v51 = vmul.f32 %v6818_v33, %v452_v7 }
 0x195   : > { %v5913_v46 = vmax.f32 %v5808_v57, 0.0  ;;  %v3889_v16 = vmul.f32 %v6823_v36, %v452_v7  ;;  %v4126_v4 = vrot.slane %v8254_v0, 4  ;;  %v3757_v39 = vadd.f32 %v8034_v56, %v8131_v27 }
 0x196   : > { %6020 = vst.msk [vmem:[#allocation2 + $0xa8] sm:$0xff] %vm5998_vm6, %v5914_v12  ;;  %v1322_v14 = vrot.slane %v1080_v50, 1  ;;  %v1963_v57 = vrot.slane %v1721_v38, 2  ;;  %v2613_v55 = vrot.slane %v2374_v44, 6  ;;  %v4530_v12 = vmul.f32 %v6827_v41, %v452_v7 }
 0x197   : > { %6019 = vst.msk [vmem:[#allocation2 + $0xa0] sm:$0xff] %vm5998_vm6, %v5913_v46  ;;  %v4124_v20 = vrot.slane %v3889_v16, 4  ;;  %v858_v46 = vmul.f32 %v6812_v29, %v452_v7  ;;  %v5171_v62 = vmul.f32 %v6829_v42, %v452_v7  ;;  %v3254_v38 = vrot.slane %v3015_v51, 7 }
 0x198   : > { %v1323_v56 = vsel %vm1262_vm0, %v1320_v6, %v1322_v14  ;;  %v1325_v27 = vsel %vm1262_vm0, %v1322_v14, %v12673_v15  ;;  %v2614_v50 = vsel %vm2559_vm2, %v2611_v43, %v2613_v55  ;;  %v2616_v44 = vsel %vm2559_vm2, %v2613_v55, %v12672_v45 }
 0x199   : > { %v2902_v16 = vadd.f32 %v2614_v50, %v8127_v26  ;;  %v3655_v1 = vmul.f32 %v6821_v35, %v452_v7  ;;  %v8301_v17 = vmul.f32 %v6812_v29, %v8279_v25  ;;  %v1964_v6 = vsel %vm1903_vm1, %v1961_v2, %v1963_v57 }
 0x19a   : > { %v1966_v22 = vsel %vm1903_vm1, %v1963_v57, %v12674_v28  ;;  %v12798_v43 = vrot.slane %v8147_v34, 4  ;;  %v4127_v26 = vsel %vm4078_vm4, %v4124_v20, %v4126_v4  ;;  %v1608_v7 = vadd.f32 %v1323_v56, %v8136_v60 }
 0x19b   : > { %v1609_v14 = vadd.f32 %v1325_v27, %v858_v46  ;;  %v4418_v13 = vadd.f32 %v4127_v26, %v3757_v39  ;;  %v2903_v45 = vadd.f32 %v2616_v44, %v2247_v3  ;;  %v12799_v15 = vrot.slane %v8142_v48, 7 }
 0x19c   : > { %v4125_v51 = vsel %vm4078_vm4, %v12798_v43, %v4124_v20  ;;  %v4765_v34 = vrot.slane %v4530_v12, 5  ;;  %v5405_v28 = vrot.slane %v5171_v62, 6  ;;  %v12800_v54 = vrot.slane %v8246_v10, 7 }
 0x19d   : > { %v4417_v55 = vadd.f32 %v4125_v51, %v8133_v63  ;;  %v3255_v57 = vsel %vm3200_vm3, %v12799_v15, %v3254_v38  ;;  %v8325_v63 = vmul.f32 %v6806_v18, %v8279_v25  ;;  %v12801_v3 = vrot.slane %v8150_v53, 5 }
 0x19e   : > { %v6162_v50 = vld [vmem:[#allocation2 + $0x96] ss:$2 sm:$0xff]  ;;  %v6166_v2 = vld [vmem:[#allocation2 + $0x97] ss:$2 sm:$0xff]  ;;  %v3257_v20 = vsel %vm3200_vm3, %v3254_v38, %v12800_v54  ;;  %v3543_v60 = vadd.f32 %v3255_v57, %v2902_v16  ;;  %v12802_v15 = vrot.slane %v8259_v59, 5  ;;  %v8335_v39 = vmul.f32 %v6809_v23, %v8279_v25  ;;  %v462_v38 = vpop.permute.xlu0 %461 }
 0x19f   : > { %v6171_v43 = vmax.f32 %v6162_v50, %v6166_v2  ;;  %v4766_v48 = vsel %vm4719_vm5, %v12801_v3, %v4765_v34  ;;  %v8339_v54 = vmul.f32 %v6814_v30, %v8279_v25  ;;  %v12803_v46 = vmax.f32 %v8104_v58, %v8106_v31  ;;  %v295_v58 = vld [vmem:[%s6712_s5 + $0x378] sm:$0xff]  ;;  %v294_v31 = vld [vmem:[%s6712_s5 + $0x370] sm:$0xff] }
 0x1a0   : > { %v4768_v62 = vsel %vm4719_vm5, %v4765_v34, %v12802_v15  ;;  %v5058_v53 = vadd.f32 %v4766_v48, %v4417_v55  ;;  %v8346_v27 = vmul.f32 %v6818_v33, %v8279_v25  ;;  %v2249_v44 = vadd.f32 %v1964_v6, %v1608_v7  ;;  %3854 = vperm.xlu1 %6589, %v295_v58  }
 0x1a1   : > { %v6173_v12 = vmax.f32 %v12803_v46, %v6171_v43  ;;  %v5059_v56 = vadd.f32 %v4768_v62, %v4418_v13  ;;  %v8348_v16 = vadd.f32 %v1966_v22, %v1609_v14  ;;  %v12804_v51 = vrot.slane %v8157_v40, 6  ;;  %3849 = vperm.xlu0 %6588, %v294_v31  }
 0x1a2   : > { %v12805_v50 = vrot.slane %v8262_v24, 6  ;;  %v8360_v55 = vadd.f32 %v3257_v20, %v2903_v45  ;;  %v8362_v13 = vadd.f32 %v3655_v1, %v3543_v60  ;;  %v1328_v22 = vrot.slane %v8325_v63, 1 }
 0x1a3   : > { %v5406_v26 = vsel %vm2559_vm2, %v12804_v51, %v5405_v28  ;;  %6540 = vst.msk [vmem:[%s7456_s28 + $0x20] sm:$0xff] %vm5998_vm6, %v6173_v12  ;;  %v1969_v40 = vrot.slane %v8335_v39, 2  ;;  %v2619_v7 = vrot.slane %v8339_v54, 6  ;;  %v1082_v14 = vmul.f32 %v6806_v18, %v462_v38 }
 0x1a4   : > { %v5408_v2 = vsel %vm2559_vm2, %v5405_v28, %v12805_v50  ;;  %v5698_v57 = vadd.f32 %v5406_v26, %v5058_v53  ;;  %v3260_v45 = vrot.slane %v8346_v27, 7  ;;  %v8373_v1 = vmul.f32 %v6823_v36, %v8279_v25 }
 0x1a5   : > { %v5699_v6 = vadd.f32 %v5408_v2, %v5059_v56  ;;  %v8377_v43 = vmul.f32 %v6827_v41, %v8279_v25  ;;  %v1326_v20 = vrot.slane %v1082_v14, 1  ;;  %v1723_v60 = vmul.f32 %v6809_v23, %v462_v38 }
 0x1a6   : > { %v5810_v28 = vadd.f32 %v7921_v47, %v5698_v57  ;;  %v2376_v3 = vmul.f32 %v6814_v30, %v462_v38  ;;  %v8383_v62 = vmul.f32 %v6829_v42, %v8279_v25  ;;  %v3017_v46 = vmul.f32 %v6818_v33, %v462_v38 }
 0x1a7   : > { %v5811_v34 = vadd.f32 %v7921_v47, %v5699_v6  ;;  %v8388_v12 = vmul.f32 %v6821_v35, %v8279_v25  ;;  %v12806_v53 = vrot.slane %v8223_v49, 1  ;;  %v1967_v51 = vrot.slane %v1723_v60, 2 }
 0x1a8   : > { %v5915_v48 = vmax.f32 %v5810_v28, 0.0  ;;  %v2617_v26 = vrot.slane %v2376_v3, 6  ;;  %v3759_v50 = vadd.f32 %v8153_v8, %v8241_v21  ;;  %v860_v2 = vmul.f32 %v6812_v29, %v462_v38 }
 0x1a9   : > { %v5916_v15 = vmax.f32 %v5811_v34, 0.0  ;;  %v1327_v56 = vsel %vm1262_vm0, %v12806_v53, %v1326_v20  ;;  %v3891_v25 = vmul.f32 %v6823_v36, %v462_v38  ;;  %v4130_v31 = vrot.slane %v8373_v1, 4 }
 0x1aa   : > { %6021 = vst.msk [vmem:[#allocation2 + $0xb0] sm:$0xff] %vm5998_vm6, %v5915_v48  ;;  %v1610_v58 = vadd.f32 %v1327_v56, %v8190_v32  ;;  %v4771_v49 = vrot.slane %v8377_v43, 5  ;;  %v1329_v57 = vsel %vm1262_vm0, %v1326_v20, %v1328_v22  ;;  %v12807_v6 = vrot.slane %v8235_v61, 6  ;;  %v477_v56 = vpop.permute.xlu1 %476 }
 0x1ab   : > { %6022 = vst.msk [vmem:[#allocation2 + $0xb8] sm:$0xff] %vm5998_vm6, %v5916_v15  ;;  %v12675_v8 = vrot.slane %v8383_v62, 6  ;;  %v2620_v32 = vsel %vm2559_vm2, %v2617_v26, %v2619_v7  ;;  %v3258_v21 = vrot.slane %v3017_v46, 7  ;;  %v3657_v28 = vmul.f32 %v6821_v35, %v462_v38 }
 0x1ac   : > { %v2618_v14 = vsel %vm2559_vm2, %v12807_v6, %v2617_v26  ;;  %v12808_v34 = vrot.slane %v8232_v11, 2  ;;  %v4128_v20 = vrot.slane %v3891_v25, 4  ;;  %v4532_v61 = vmul.f32 %v6827_v41, %v462_v38 }
 0x1ad   : > { %v2904_v3 = vadd.f32 %v2618_v14, %v8237_v37  ;;  %v1611_v48 = vadd.f32 %v1329_v57, %v860_v2  ;;  %v1970_v15 = vsel %vm1903_vm1, %v1967_v51, %v1969_v40  ;;  %v5173_v46 = vmul.f32 %v6829_v42, %v462_v38 }
 0x1ae   : > { %v1968_v60 = vsel %vm1903_vm1, %v12808_v34, %v1967_v51  ;;  %v2905_v26 = vadd.f32 %v2620_v32, %v2249_v44  ;;  %v4129_v11 = vsel %vm4078_vm4, %v4126_v4, %v4128_v20  ;;  %v4131_v37 = vsel %vm4078_vm4, %v4128_v20, %v4130_v31 }
 0x1af   : > { %v8421_v53 = vadd.f32 %v1968_v60, %v1610_v58  ;;  %v4769_v25 = vrot.slane %v4532_v61, 5  ;;  %v12809_v2 = vrot.slane %v8246_v10, 7  ;;  %v4419_v51 = vadd.f32 %v4129_v11, %v8243_v19 }
 0x1b0   : > { %v4420_v58 = vadd.f32 %v4131_v37, %v3759_v50  ;;  %v5409_v6 = vrot.slane %v5173_v46, 6  ;;  %v12810_v0 = vrot.slane %v8259_v59, 5  ;;  %v8441_v34 = vmul.f32 %v6806_v18, %v477_v56 }
 0x1b1   : > { %v3259_v57 = vsel %vm3200_vm3, %v12809_v2, %v3258_v21  ;;  %v6164_v38 = vld [vmem:[#allocation2 + $0xa6] ss:$2 sm:$0x3f]  ;;  %v6168_v14 = vld [vmem:[#allocation2 + $0xa7] ss:$2 sm:$0x3f]  ;;  %v4772_v32 = vsel %vm4719_vm5, %v4769_v25, %v4771_v49  ;;  %v8443_v60 = vadd.f32 %v1970_v15, %v1611_v48  ;;  %v8452_v61 = vmul.f32 %v6809_v23, %v477_v56 }
 0x1b2   : > { %v3545_v44 = vadd.f32 %v3259_v57, %v2904_v3  ;;  %v4770_v4 = vsel %vm4719_vm5, %v12810_v0, %v4769_v25  ;;  %v6172_v10 = vmax.f32 %v6164_v38, %v6168_v14  ;;  %v5061_v50 = vadd.f32 %v4772_v32, %v4420_v58  ;;  %v472_v58 = vpop.permute.xlu0 %471 }
 0x1b3   : > { %v5060_v19 = vadd.f32 %v4770_v4, %v4419_v51  ;;  %v12811_v3 = vrot.slane %v8262_v24, 6  ;;  %v5412_v20 = vsel %vm2559_vm2, %v5409_v6, %v12675_v8  ;;  %v8455_v46 = vmul.f32 %v6814_v30, %v477_v56  ;;  %v487_v8 = vpop.permute.xlu1 %486 }
 0x1b4   : > { %v12812_v48 = vmax.f32 %v8215_v5, %v8217_v52  ;;  %v3261_v24 = vsel %vm3200_vm3, %v3258_v21, %v3260_v45  ;;  %v5701_v37 = vadd.f32 %v5412_v20, %v5061_v50  ;;  %v8465_v2 = vadd.f32 %v3657_v28, %v3545_v44 }
 0x1b5   : > { %v5410_v59 = vsel %vm2559_vm2, %v12811_v3, %v5409_v6  ;;  %v8463_v25 = vadd.f32 %v3261_v24, %v2905_v26  ;;  %v8468_v57 = vmul.f32 %v6812_v29, %v477_v56  ;;  %v1332_v51 = vrot.slane %v8441_v34, 1  ;;  %v296_v6 = vld [vmem:[%s6712_s5 + $0x380] sm:$0xff] }
 0x1b6   : > { %v6174_v15 = vmax.f32 %v12812_v48, %v6172_v10  ;;  %v5700_v11 = vadd.f32 %v5410_v59, %v5060_v19  ;;  %v5813_v52 = vadd.f32 %v7921_v47, %v5701_v37  ;;  %v8477_v21 = vmul.f32 %v6818_v33, %v477_v56  ;;  %3859 = vperm.xlu0 %6588, %v296_v6  }
 0x1b7   : > { %v8480_v26 = vmul.f32 %v6823_v36, %v477_v56  ;;  %v1973_v28 = vrot.slane %v8452_v61, 2  ;;  %v2623_v38 = vrot.slane %v8455_v46, 6  ;;  %v8485_v14 = vmul.f32 %v6827_v41, %v477_v56 }
 0x1b8   : > { %6541 = vst.msk [vmem:[%s7456_s28 + $0x28] sm:$0x3f] %vm6126_vm7, %v6174_v15  ;;  %v5812_v5 = vadd.f32 %v7921_v47, %v5700_v11  ;;  %v8488_v44 = vmul.f32 %v6829_v42, %v477_v56  ;;  %v5918_v4 = vmax.f32 %v5813_v52, 0.0  ;;  %v8491_v32 = vmul.f32 %v6821_v35, %v477_v56 }
 0x1b9   : > { %v1084_v10 = vmul.f32 %v6806_v18, %v472_v58  ;;  %v1725_v19 = vmul.f32 %v6809_v23, %v472_v58  ;;  %v2378_v50 = vmul.f32 %v6814_v30, %v472_v58  ;;  %v3019_v3 = vmul.f32 %v6818_v33, %v472_v58 }
 0x1ba   : > { %v5917_v0 = vmax.f32 %v5812_v5, 0.0  ;;  %v3893_v59 = vmul.f32 %v6823_v36, %v472_v58  ;;  %6024 = vst.msk [vmem:[#allocation2 + $0xc8] sm:$0xff] %vm5998_vm6, %v5918_v4  ;;  %v3264_v20 = vrot.slane %v8477_v21, 7  ;;  %v4134_v48 = vrot.slane %v8480_v26, 4 }
 0x1bb   : > { %v3761_v56 = vadd.f32 %v8267_v9, %v8360_v55  ;;  %v1330_v15 = vrot.slane %v1084_v10, 1  ;;  %v4775_v24 = vrot.slane %v8485_v14, 5  ;;  %v12677_v11 = vrot.slane %v8488_v44, 6 }
 0x1bc   : > { %6023 = vst.msk [vmem:[#allocation2 + $0xc0] sm:$0xff] %vm5998_vm6, %v5917_v0  ;;  %v2621_v37 = vrot.slane %v2378_v50, 6  ;;  %v4132_v6 = vrot.slane %v3893_v59, 4  ;;  %v862_v5 = vmul.f32 %v6812_v29, %v472_v58  ;;  %v3262_v4 = vrot.slane %v3019_v3, 7 }
 0x1bd   : > { %v1331_v52 = vsel %vm1262_vm0, %v1328_v22, %v1330_v15  ;;  %v1333_v0 = vsel %vm1262_vm0, %v1330_v15, %v1332_v51  ;;  %v1971_v9 = vrot.slane %v1725_v19, 2  ;;  %v4534_v50 = vmul.f32 %v6827_v41, %v472_v58 }
 0x1be   : > { %v2622_v55 = vsel %vm2559_vm2, %v2619_v7, %v2621_v37  ;;  %v2624_v10 = vsel %vm2559_vm2, %v2621_v37, %v2623_v38  ;;  %v1612_v63 = vadd.f32 %v1331_v52, %v8301_v17  ;;  %v1613_v22 = vadd.f32 %v1333_v0, %v862_v5 }
 0x1bf   : > { %v2906_v59 = vadd.f32 %v2622_v55, %v8348_v16  ;;  %v5175_v15 = vmul.f32 %v6829_v42, %v472_v58  ;;  %v3659_v3 = vmul.f32 %v6821_v35, %v472_v58  ;;  %v4133_v54 = vsel %vm4078_vm4, %v4130_v31, %v4132_v6 }
 0x1c0   : > { %v4135_v7 = vsel %vm4078_vm4, %v4132_v6, %v4134_v48  ;;  %v8531_v19 = vmul.f32 %v6812_v29, %v487_v8  ;;  %v2907_v17 = vadd.f32 %v2624_v10, %v8421_v53  ;;  %v3263_v16 = vsel %vm3200_vm3, %v3260_v45, %v3262_v4 }
 0x1c1   : > { %v4421_v37 = vadd.f32 %v4133_v54, %v8362_v13  ;;  %v4422_v58 = vadd.f32 %v4135_v7, %v3761_v56  ;;  %v1972_v1 = vsel %vm1903_vm1, %v1969_v40, %v1971_v9  ;;  %v1974_v31 = vsel %vm1903_vm1, %v1971_v9, %v1973_v28 }
 0x1c2   : > { %v3547_v6 = vadd.f32 %v3263_v16, %v2906_v59  ;;  %v4773_v5 = vrot.slane %v4534_v50, 5  ;;  %v8544_v52 = vadd.f32 %v1972_v1, %v1612_v63  ;;  %v8546_v53 = vadd.f32 %v1974_v31, %v1613_v22  ;;  %v482_v63 = vpop.permute.xlu0 %481 }
 0x1c3   : > { %v3265_v27 = vsel %vm3200_vm3, %v3262_v4, %v3264_v20  ;;  %v5413_v13 = vrot.slane %v5175_v15, 6  ;;  %v8551_v45 = vld [vmem:[#allocation2 + $0xb4] ss:$2 sm:$0xff]  ;;  %v8553_v39 = vld [vmem:[#allocation2 + $0xb5] ss:$2 sm:$0xff]  ;;  %v8562_v0 = vmul.f32 %v6806_v18, %v487_v8  ;;  %v8565_v9 = vmul.f32 %v6809_v23, %v487_v8 }
 0x1c4   : > { %v4774_v40 = vsel %vm4719_vm5, %v4771_v49, %v4773_v5  ;;  %v4776_v56 = vsel %vm4719_vm5, %v4773_v5, %v4775_v24  ;;  %v8567_v4 = vld [vmem:[#allocation2 + $0xc4] ss:$2 sm:$0x3f]  ;;  %v8569_v55 = vld [vmem:[#allocation2 + $0xc5] ss:$2 sm:$0x3f]  ;;  %v8571_v10 = vadd.f32 %v3265_v27, %v2907_v17  ;;  %v8574_v49 = vmul.f32 %v6814_v30, %v487_v8 }
 0x1c5   : > { %v5062_v50 = vadd.f32 %v4774_v40, %v4421_v37  ;;  %v5063_v43 = vadd.f32 %v4776_v56, %v4422_v58  ;;  %v8576_v22 = vadd.f32 %v3659_v3, %v3547_v6  ;;  %v12813_v59 = vrot.slane %v8383_v62, 6 }
 0x1c6   : > { %v5416_v54 = vsel %vm2559_vm2, %v5413_v13, %v12677_v11  ;;  %v8585_v7 = vmul.f32 %v6818_v33, %v487_v8  ;;  %v8590_v58 = vmul.f32 %v6821_v35, %v487_v8  ;;  %v12676_v3 = vrot.slane %v8562_v0, 1 }
 0x1c7   : > { %v5414_v15 = vsel %vm2559_vm2, %v12813_v59, %v5413_v13  ;;  %v5703_v37 = vadd.f32 %v5416_v54, %v5063_v43  ;;  %v1977_v1 = vrot.slane %v8565_v9, 2  ;;  %v1086_v31 = vmul.f32 %v6806_v18, %v482_v63 }
 0x1c8   : > { %v5702_v16 = vadd.f32 %v5414_v15, %v5062_v50  ;;  %v2627_v27 = vrot.slane %v8574_v49, 6  ;;  %v8601_v13 = vmul.f32 %v6823_v36, %v487_v8  ;;  %v8604_v40 = vmul.f32 %v6827_v41, %v487_v8 }
 0x1c9   : > { %v5815_v5 = vadd.f32 %v7921_v47, %v5703_v37  ;;  %v1334_v56 = vrot.slane %v1086_v31, 1  ;;  %v1727_v50 = vmul.f32 %v6809_v23, %v482_v63  ;;  %v2380_v43 = vmul.f32 %v6814_v30, %v482_v63 }
 0x1ca   : > { %v5814_v6 = vadd.f32 %v7921_v47, %v5702_v16  ;;  %v8609_v54 = vmul.f32 %v6829_v42, %v487_v8  ;;  %v3021_v47 = vmul.f32 %v6818_v33, %v482_v63  ;;  %v3268_v16 = vrot.slane %v8585_v7, 7 }
 0x1cb   : > { %v5920_v15 = vmax.f32 %v5815_v5, 0.0  ;;  %v3763_v37 = vadd.f32 %v8388_v12, %v8463_v25  ;;  %v864_v62 = vmul.f32 %v6812_v29, %v482_v63  ;;  %v2625_v17 = vrot.slane %v2380_v43, 6 }
 0x1cc   : > { %v5919_v59 = vmax.f32 %v5814_v6, 0.0  ;;  %v1335_v31 = vsel %vm1262_vm0, %v1332_v51, %v1334_v56  ;;  %v1337_v8 = vsel %vm1262_vm0, %v1334_v56, %v12676_v3  ;;  %v1975_v6 = vrot.slane %v1727_v50, 2 }
 0x1cd   : > { %6026 = vst.msk [vmem:[#allocation2 + $0xd8] sm:$0xff] %vm5998_vm6, %v5920_v15  ;;  %v3895_v5 = vmul.f32 %v6823_v36, %v482_v63  ;;  %v12680_v12 = vrot.slane %v8601_v13, 4  ;;  %v2626_v25 = vsel %vm2559_vm2, %v2623_v38, %v2625_v17  ;;  %v2628_v43 = vsel %vm2559_vm2, %v2625_v17, %v2627_v27 }
 0x1ce   : > { %6025 = vst.msk [vmem:[#allocation2 + $0xd0] sm:$0xff] %vm5998_vm6, %v5919_v59  ;;  %v3266_v34 = vrot.slane %v3021_v47, 7  ;;  %v12679_v51 = vrot.slane %v8604_v40, 5  ;;  %v12678_v59 = vrot.slane %v8609_v54, 6  ;;  %v2908_v56 = vadd.f32 %v2626_v25, %v8443_v60  ;;  %v497_v25 = vpop.permute.xlu1 %496 }
 0x1cf   : > { %v3661_v50 = vmul.f32 %v6821_v35, %v482_v63  ;;  %v1614_v15 = vadd.f32 %v1335_v31, %v8468_v57  ;;  %v1615_v3 = vadd.f32 %v1337_v8, %v864_v62  ;;  %v4136_v11 = vrot.slane %v3895_v5, 4 }
 0x1d0   : > { %v4536_v46 = vmul.f32 %v6827_v41, %v482_v63  ;;  %v1976_v38 = vsel %vm1903_vm1, %v1973_v28, %v1975_v6  ;;  %v1978_v17 = vsel %vm1903_vm1, %v1975_v6, %v1977_v1  ;;  %v2909_v47 = vadd.f32 %v2628_v43, %v8544_v52 }
 0x1d1   : > { %v5177_v60 = vmul.f32 %v6829_v42, %v482_v63  ;;  %v3267_v57 = vsel %vm3200_vm3, %v3264_v20, %v3266_v34  ;;  %v4137_v62 = vsel %vm4078_vm4, %v4134_v48, %v4136_v11  ;;  %v4139_v61 = vsel %vm4078_vm4, %v4136_v11, %v12680_v12 }
 0x1d2   : > { %v4777_v28 = vrot.slane %v4536_v46, 5  ;;  %v3549_v31 = vadd.f32 %v3267_v57, %v2908_v56  ;;  %v4423_v8 = vadd.f32 %v4137_v62, %v8465_v2  ;;  %v4424_v52 = vadd.f32 %v4139_v61, %v3763_v37  ;;  %v8694_v62 = vld [vmem:[#allocation3] ss:$0 sm:$0xff] }
 0x1d3   : > { %v5417_v6 = vrot.slane %v5177_v60, 6  ;;  %v8663_v20 = vmul.f32 %v6806_v18, %v497_v25  ;;  %v8666_v48 = vmul.f32 %v6809_v23, %v497_v25  ;;  %v2255_v11 = vadd.f32 %v1976_v38, %v1614_v15 }
 0x1d4   : > { %v4778_v21 = vsel %vm4719_vm5, %v4775_v24, %v4777_v28  ;;  %v4780_v26 = vsel %vm4719_vm5, %v4777_v28, %v12679_v51  ;;  %v8668_v63 = vadd.f32 %v1978_v17, %v1615_v3  ;;  %v3269_v14 = vsel %vm3200_vm3, %v3266_v34, %v3268_v16  ;;  %v492_v17 = vpop.permute.xlu0 %491 }
 0x1d5   : > { %v5064_v2 = vadd.f32 %v4778_v21, %v4423_v8  ;;  %v5065_v37 = vadd.f32 %v4780_v26, %v4424_v52  ;;  %v12814_v24 = vrot.slane %v8488_v44, 6  ;;  %v5420_v43 = vsel %vm2559_vm2, %v5417_v6, %v12678_v59 }
 0x1d6   : > { %v8680_v56 = vmul.f32 %v6814_v30, %v497_v25  ;;  %v8682_v15 = vadd.f32 %v3269_v14, %v2909_v47  ;;  %v8685_v38 = vmul.f32 %v6812_v29, %v497_v25  ;;  %v8687_v34 = vadd.f32 %v3661_v50, %v3549_v31 }
 0x1d7   : > { %v5418_v5 = vsel %vm2559_vm2, %v12814_v24, %v5417_v6  ;;  %v5705_v46 = vadd.f32 %v5420_v43, %v5065_v37  ;;  %v12681_v44 = vrot.slane %v8663_v20, 1  ;;  %v1981_v60 = vrot.slane %v8666_v48, 2 }
 0x1d8   : > { %v5704_v3 = vadd.f32 %v5418_v5, %v5064_v2  ;;  %v8692_v57 = vmul.f32 %v6818_v33, %v497_v25  ;;  %v8699_v28 = vmul.f32 %v6821_v35, %v497_v25  ;;  %v8702_v8 = vmul.f32 %v6823_v36, %v497_v25 }
 0x1d9   : > { %v5817_v61 = vadd.f32 %v8694_v62, %v5705_v46  ;;  %v12682_v50 = vrot.slane %v8680_v56, 6  ;;  %v8706_v31 = vmul.f32 %v6827_v41, %v497_v25  ;;  %v1088_v52 = vmul.f32 %v6806_v18, %v492_v17 }
 0x1da   : > { %v5816_v47 = vadd.f32 %v8694_v62, %v5704_v3  ;;  %v1729_v6 = vmul.f32 %v6809_v23, %v492_v17  ;;  %v2382_v2 = vmul.f32 %v6814_v30, %v492_v17  ;;  %v3023_v37 = vmul.f32 %v6818_v33, %v492_v17 }
 0x1db   : > { %v5922_v26 = vmax.f32 %v5817_v61, 0.0  ;;  %v3272_v14 = vrot.slane %v8692_v57, 7  ;;  %v8714_v24 = vmul.f32 %v6829_v42, %v497_v25  ;;  %v3765_v5 = vadd.f32 %v8491_v32, %v8571_v10 }
 0x1dc   : > { %v5921_v21 = vmax.f32 %v5816_v47, 0.0  ;;  %v1338_v43 = vrot.slane %v1088_v52, 1  ;;  %v1979_v3 = vrot.slane %v1729_v6, 2  ;;  %v2629_v46 = vrot.slane %v2382_v2, 6 }
 0x1dd   : > { %6028 = vst.msk [vmem:[#allocation2 + $0xe8] sm:$0xff] %vm5998_vm6, %v5922_v26  ;;  %v3897_v47 = vmul.f32 %v6823_v36, %v492_v17  ;;  %v4538_v61 = vmul.f32 %v6827_v41, %v492_v17  ;;  %v4142_v59 = vrot.slane %v8702_v8, 4  ;;  %v4783_v51 = vrot.slane %v8706_v31, 5 }
 0x1de   : > { %6027 = vst.msk [vmem:[#allocation2 + $0xe0] sm:$0xff] %vm5998_vm6, %v5921_v21  ;;  %v12815_v25 = vrot.slane %v8562_v0, 1  ;;  %v3270_v32 = vrot.slane %v3023_v37, 7  ;;  %v1341_v10 = vsel %vm1262_vm0, %v1338_v43, %v12681_v44  ;;  %v2630_v52 = vsel %vm2559_vm2, %v2627_v27, %v2629_v46 }
 0x1df   : > { %v2632_v6 = vsel %vm2559_vm2, %v2629_v46, %v12682_v50  ;;  %v5179_v21 = vmul.f32 %v6829_v42, %v492_v17  ;;  %v5423_v26 = vrot.slane %v8714_v24, 6  ;;  %v866_v0 = vmul.f32 %v6812_v29, %v492_v17 }
 0x1e0   : > { %v1339_v12 = vsel %vm1262_vm0, %v12815_v25, %v1338_v43  ;;  %v2910_v37 = vadd.f32 %v2630_v52, %v8546_v53  ;;  %v1980_v49 = vsel %vm1903_vm1, %v1977_v1, %v1979_v3  ;;  %v3663_v27 = vmul.f32 %v6821_v35, %v492_v17 }
 0x1e1   : > { %v1616_v2 = vadd.f32 %v1339_v12, %v8531_v19  ;;  %v4140_v43 = vrot.slane %v3897_v47, 4  ;;  %v4781_v25 = vrot.slane %v4538_v61, 5  ;;  %v1617_v44 = vadd.f32 %v1341_v10, %v866_v0  ;;  %v507_v12 = vpop.permute.xlu1 %506 }
 0x1e2   : > { %v1982_v46 = vsel %vm1903_vm1, %v1979_v3, %v1981_v60  ;;  %v2911_v50 = vadd.f32 %v2632_v6, %v2255_v11  ;;  %v3271_v19 = vsel %vm3200_vm3, %v3268_v16, %v3270_v32  ;;  %v3273_v53 = vsel %vm3200_vm3, %v3270_v32, %v3272_v14 }
 0x1e3   : > { %v12816_v9 = vrot.slane %v8601_v13, 4  ;;  %v4143_v17 = vsel %vm4078_vm4, %v4140_v43, %v4142_v59  ;;  %v5421_v47 = vrot.slane %v5179_v21, 6  ;;  %v8760_v61 = vadd.f32 %v1980_v49, %v1616_v2 }
 0x1e4   : > { %v3551_v7 = vadd.f32 %v3271_v19, %v2910_v37  ;;  %v4426_v10 = vadd.f32 %v4143_v17, %v3765_v5  ;;  %v12817_v32 = vrot.slane %v8604_v40, 5  ;;  %v4784_v0 = vsel %vm4719_vm5, %v4781_v25, %v4783_v51 }
 0x1e5   : > { %v4141_v1 = vsel %vm4078_vm4, %v12816_v9, %v4140_v43  ;;  %v6187_v3 = vld [vmem:[#allocation2 + $0xd2] ss:$2 sm:$0xff]  ;;  %v6189_v11 = vld [vmem:[#allocation2 + $0xe2] ss:$2 sm:$0x3f]  ;;  %v8770_v21 = vmul.f32 %v6806_v18, %v507_v12  ;;  %v8773_v2 = vmul.f32 %v6809_v23, %v507_v12  ;;  %v12818_v40 = vrot.slane %v8609_v54, 6 }
 0x1e6   : > { %v4425_v16 = vadd.f32 %v4141_v1, %v8576_v22  ;;  %v6191_v52 = vld [vmem:[#allocation2 + $0xd3] ss:$2 sm:$0xff]  ;;  %v6193_v6 = vld [vmem:[#allocation2 + $0xe3] ss:$2 sm:$0x3f]  ;;  %v4782_v13 = vsel %vm4719_vm5, %v12817_v32, %v4781_v25  ;;  %v5067_v5 = vadd.f32 %v4784_v0, %v4426_v10  ;;  %v5424_v25 = vsel %vm2559_vm2, %v5421_v47, %v5423_v26  ;;  %v502_v10 = vpop.permute.xlu0 %501 }
 0x1e7   : > { %v6196_v37 = vmax.f32 %v6187_v3, %v6191_v52  ;;  %v6197_v49 = vmax.f32 %v6189_v11, %v6193_v6  ;;  %v5422_v43 = vsel %vm2559_vm2, %v12818_v40, %v5421_v47  ;;  %v8782_v19 = vmul.f32 %v6814_v30, %v507_v12 }
 0x1e8   : > { %v5066_v22 = vadd.f32 %v4782_v13, %v4425_v16  ;;  %v8785_v9 = vmul.f32 %v6818_v33, %v507_v12  ;;  %v12819_v1 = vmax.f32 %v8551_v45, %v8553_v39  ;;  %v12820_v3 = vmax.f32 %v8567_v4, %v8569_v55 }
 0x1e9   : > { %v5707_v16 = vadd.f32 %v5424_v25, %v5067_v5  ;;  %v8793_v52 = vadd.f32 %v1982_v46, %v1617_v44  ;;  %v8795_v47 = vadd.f32 %v3273_v53, %v2911_v50  ;;  %v8797_v6 = vadd.f32 %v3663_v27, %v3551_v7 }
 0x1ea   : > { %v6198_v17 = vmax.f32 %v12819_v1, %v6196_v37  ;;  %v6199_v54 = vmax.f32 %v12820_v3, %v6197_v49  ;;  %v5706_v11 = vadd.f32 %v5422_v43, %v5066_v22  ;;  %v8800_v32 = vmul.f32 %v6812_v29, %v507_v12 }
 0x1eb   : > { %v5819_v39 = vadd.f32 %v8694_v62, %v5707_v16  ;;  %v1344_v4 = vrot.slane %v8770_v21, 1  ;;  %v1985_v55 = vrot.slane %v8773_v2, 2  ;;  %v12683_v44 = vrot.slane %v8782_v19, 6 }
 0x1ec   : > { %6542 = vst.msk [vmem:[%s7456_s28 + $0x30] sm:$0xff] %vm5998_vm6, %v6198_v17  ;;  %v5818_v45 = vadd.f32 %v8694_v62, %v5706_v11  ;;  %v3276_v50 = vrot.slane %v8785_v9, 7  ;;  %v8813_v27 = vmul.f32 %v6821_v35, %v507_v12  ;;  %v1090_v46 = vmul.f32 %v6806_v18, %v502_v10 }
 0x1ed   : > { %6543 = vst.msk [vmem:[%s7456_s28 + $0x38] sm:$0x3f] %vm6126_vm7, %v6199_v54  ;;  %v5924_v7 = vmax.f32 %v5819_v39, 0.0  ;;  %v8817_v13 = vmul.f32 %v6823_v36, %v507_v12  ;;  %v1731_v0 = vmul.f32 %v6809_v23, %v502_v10  ;;  %v8821_v37 = vmul.f32 %v6827_v41, %v507_v12 }
 0x1ee   : > { %v5923_v53 = vmax.f32 %v5818_v45, 0.0  ;;  %v1342_v49 = vrot.slane %v1090_v46, 1  ;;  %v2384_v22 = vmul.f32 %v6814_v30, %v502_v10  ;;  %v3025_v5 = vmul.f32 %v6818_v33, %v502_v10 }
 0x1ef   : > { %6030 = vst.msk [vmem:[#allocation2 + $0xf8] sm:$0xff] %vm5998_vm6, %v5924_v7  ;;  %v8828_v40 = vmul.f32 %v6829_v42, %v507_v12  ;;  %v3767_v43 = vadd.f32 %v8590_v58, %v8682_v15  ;;  %v1983_v25 = vrot.slane %v1731_v0, 2  ;;  %v3899_v1 = vmul.f32 %v6823_v36, %v502_v10 }
 0x1f0   : > { %6029 = vst.msk [vmem:[#allocation2 + $0xf0] sm:$0xff] %vm5998_vm6, %v5923_v53  ;;  %v12821_v17 = vrot.slane %v8663_v20, 1  ;;  %v1345_v54 = vsel %vm1262_vm0, %v1342_v49, %v1344_v4  ;;  %v2633_v11 = vrot.slane %v2384_v22, 6  ;;  %v4540_v16 = vmul.f32 %v6827_v41, %v502_v10 }
 0x1f1   : > { %v4146_v12 = vrot.slane %v8817_v13, 4  ;;  %v868_v45 = vmul.f32 %v6812_v29, %v502_v10  ;;  %v3274_v15 = vrot.slane %v3025_v5, 7  ;;  %v4787_v39 = vrot.slane %v8821_v37, 5 }
 0x1f2   : > { %v1343_v3 = vsel %vm1262_vm0, %v12821_v17, %v1342_v49  ;;  %v12822_v20 = vrot.slane %v8680_v56, 6  ;;  %v2636_v53 = vsel %vm2559_vm2, %v2633_v11, %v12683_v44  ;;  %v5181_v7 = vmul.f32 %v6829_v42, %v502_v10 }
 0x1f3   : > { %v1618_v58 = vadd.f32 %v1343_v3, %v8685_v38  ;;  %v12684_v0 = vrot.slane %v8828_v40, 6  ;;  %v1619_v49 = vadd.f32 %v1345_v54, %v868_v45  ;;  %v3665_v38 = vmul.f32 %v6821_v35, %v502_v10 }
 0x1f4   : > { %v2634_v46 = vsel %vm2559_vm2, %v12822_v20, %v2633_v11  ;;  %v1984_v5 = vsel %vm1903_vm1, %v1981_v60, %v1983_v25  ;;  %v1986_v56 = vsel %vm1903_vm1, %v1983_v25, %v1985_v55  ;;  %v4144_v17 = vrot.slane %v3899_v1, 4  ;;  %v517_v11 = vpop.permute.xlu1 %516 }
 0x1f5   : > { %v2912_v22 = vadd.f32 %v2634_v46, %v8668_v63  ;;  %v4785_v3 = vrot.slane %v4540_v16, 5  ;;  %v8860_v20 = vadd.f32 %v1984_v5, %v1618_v58  ;;  %v2913_v44 = vadd.f32 %v2636_v53, %v8760_v61 }
 0x1f6   : > { %v3275_v63 = vsel %vm3200_vm3, %v3272_v14, %v3274_v15  ;;  %v3277_v48 = vsel %vm3200_vm3, %v3274_v15, %v3276_v50  ;;  %v4145_v1 = vsel %vm4078_vm4, %v4142_v59, %v4144_v17  ;;  %v4147_v61 = vsel %vm4078_vm4, %v4144_v17, %v4146_v12 }
 0x1f7   : > { %v8869_v60 = vld [vmem:[#allocation2 + $0xf0] ss:$2 sm:$0xff]  ;;  %v8871_v10 = vld [vmem:[#allocation2 + $0xf1] ss:$2 sm:$0xff]  ;;  %v3553_v25 = vadd.f32 %v3275_v63, %v2912_v22  ;;  %v5425_v57 = vrot.slane %v5181_v7, 6  ;;  %v4427_v14 = vadd.f32 %v4145_v1, %v8687_v34  ;;  %v4428_v54 = vadd.f32 %v4147_v61, %v3767_v43  ;;  %v512_v22 = vpop.permute.xlu0 %511 }
 0x1f8   : > { %v8881_v16 = vmul.f32 %v6806_v18, %v517_v11  ;;  %v8884_v45 = vmul.f32 %v6809_v23, %v517_v11  ;;  %v8886_v58 = vadd.f32 %v1986_v56, %v1619_v49  ;;  %v4786_v59 = vsel %vm4719_vm5, %v4783_v51, %v4785_v3  ;;  %v527_v13 = vpop.permute.xlu1 %526 }
 0x1f9   : > { %v4788_v8 = vsel %vm4719_vm5, %v4785_v3, %v4787_v39  ;;  %v8895_v15 = vmul.f32 %v6812_v29, %v517_v11  ;;  %v8899_v43 = vadd.f32 %v3277_v48, %v2913_v44  ;;  %v5068_v46 = vadd.f32 %v4786_v59, %v4427_v14 }
 0x1fa   : > { %v5069_v53 = vadd.f32 %v4788_v8, %v4428_v54  ;;  %v8901_v7 = vadd.f32 %v3665_v38, %v3553_v25  ;;  %v5426_v51 = vsel %vm2559_vm2, %v5423_v26, %v5425_v57  ;;  %v5428_v31 = vsel %vm2559_vm2, %v5425_v57, %v12684_v0 }
 0x1fb   : > { %v8910_v49 = vmul.f32 %v6814_v30, %v517_v11  ;;  %v5708_v5 = vadd.f32 %v5426_v51, %v5068_v46  ;;  %v12685_v44 = vrot.slane %v8881_v16, 1  ;;  %v8915_v38 = vmul.f32 %v6818_v33, %v517_v11 }
 0x1fc   : > { %v5709_v56 = vadd.f32 %v5428_v31, %v5069_v53  ;;  %v8918_v24 = vmul.f32 %v6821_v35, %v517_v11  ;;  %v8921_v26 = vmul.f32 %v6823_v36, %v517_v11  ;;  %v8924_v3 = vmul.f32 %v6827_v41, %v517_v11 }
 0x1fd   : > { %v5820_v63 = vadd.f32 %v8694_v62, %v5708_v5  ;;  %v8929_v25 = vmul.f32 %v6829_v42, %v517_v11  ;;  %v1092_v1 = vmul.f32 %v6806_v18, %v512_v22  ;;  %v2639_v61 = vrot.slane %v8910_v49, 6 }
 0x1fe   : > { %v5821_v48 = vadd.f32 %v8694_v62, %v5709_v56  ;;  %v1733_v57 = vmul.f32 %v6809_v23, %v512_v22  ;;  %v2386_v14 = vmul.f32 %v6814_v30, %v512_v22  ;;  %v3027_v54 = vmul.f32 %v6818_v33, %v512_v22 }
 0x1ff   : > { %v5925_v59 = vmax.f32 %v5820_v63, 0.0  ;;  %v1346_v46 = vrot.slane %v1092_v1, 1  ;;  %v3901_v53 = vmul.f32 %v6823_v36, %v512_v22  ;;  %v4150_v11 = vrot.slane %v8921_v26, 4 }
 0x200   : > { %v5926_v8 = vmax.f32 %v5821_v48, 0.0  ;;  %v2637_v31 = vrot.slane %v2386_v14, 6  ;;  %v4542_v5 = vmul.f32 %v6827_v41, %v512_v22  ;;  %v5183_v1 = vmul.f32 %v6829_v42, %v512_v22 }
 0x201   : > { %6031 = vst.msk [vmem:[#allocation2 + $0x100] sm:$0xff] %vm5998_vm6, %v5925_v59  ;;  %v1347_v56 = vsel %vm1262_vm0, %v1344_v4, %v1346_v46  ;;  %v1349_v63 = vsel %vm1262_vm0, %v1346_v46, %v12685_v44  ;;  %v4148_v48 = vrot.slane %v3901_v53, 4  ;;  %v12687_v34 = vrot.slane %v8924_v3, 5 }
 0x202   : > { %6032 = vst.msk [vmem:[#allocation2 + $0x108] sm:$0xff] %vm5998_vm6, %v5926_v8  ;;  %v870_v14 = vmul.f32 %v6812_v29, %v512_v22  ;;  %v1987_v0 = vrot.slane %v1733_v57, 2  ;;  %v3278_v51 = vrot.slane %v3027_v54, 7  ;;  %v12686_v59 = vrot.slane %v8929_v25, 6 }
 0x203   : > { %v3769_v21 = vadd.f32 %v8699_v28, %v8795_v47  ;;  %v12823_v4 = vrot.slane %v8782_v19, 6  ;;  %v3667_v46 = vmul.f32 %v6821_v35, %v512_v22  ;;  %v1620_v53 = vadd.f32 %v1347_v56, %v8800_v32 }
 0x204   : > { %v1621_v44 = vadd.f32 %v1349_v63, %v870_v14  ;;  %v2640_v17 = vsel %vm2559_vm2, %v2637_v31, %v2639_v61  ;;  %v4149_v54 = vsel %vm4078_vm4, %v4146_v12, %v4148_v48  ;;  %v4151_v28 = vsel %vm4078_vm4, %v4148_v48, %v4150_v11 }
 0x205   : > { %v2638_v8 = vsel %vm2559_vm2, %v12823_v4, %v2637_v31  ;;  %v4789_v19 = vrot.slane %v4542_v5, 5  ;;  %v5429_v47 = vrot.slane %v5183_v1, 6  ;;  %v1988_v32 = vsel %vm1903_vm1, %v1985_v55, %v1987_v0 }
 0x206   : > { %v2914_v57 = vadd.f32 %v2638_v8, %v8793_v52  ;;  %v3279_v22 = vsel %vm3200_vm3, %v3276_v50, %v3278_v51  ;;  %v4429_v52 = vadd.f32 %v4149_v54, %v8797_v6  ;;  %v4430_v31 = vadd.f32 %v4151_v28, %v3769_v21 }
 0x207   : > { %v2915_v12 = vadd.f32 %v2640_v17, %v8860_v20  ;;  %v4790_v5 = vsel %vm4719_vm5, %v4787_v39, %v4789_v19  ;;  %v4792_v2 = vsel %vm4719_vm5, %v4789_v19, %v12687_v34  ;;  %v12824_v50 = vrot.slane %v8884_v45, 2  ;;  %v522_v19 = vpop.permute.xlu0 %521 }
 0x208   : > { %v3555_v56 = vadd.f32 %v3279_v22, %v2914_v57  ;;  %v12825_v63 = vrot.slane %v8915_v38, 7  ;;  %v5070_v17 = vadd.f32 %v4790_v5, %v4429_v52  ;;  %v5071_v37 = vadd.f32 %v4792_v2, %v4430_v31 }
 0x209   : > { %v8983_v55 = vld [vmem:[#allocation2 + $0x100] ss:$2 sm:$0x3f]  ;;  %v8985_v9 = vld [vmem:[#allocation2 + $0x101] ss:$2 sm:$0x3f]  ;;  %v1990_v6 = vsel %vm1903_vm1, %v1987_v0, %v12824_v50  ;;  %v5432_v1 = vsel %vm2559_vm2, %v5429_v47, %v12686_v59  ;;  %v9000_v14 = vmul.f32 %v6806_v18, %v527_v13  ;;  %v9003_v21 = vmul.f32 %v6809_v23, %v527_v13 }
 0x20a   : > { %v3281_v20 = vsel %vm3200_vm3, %v3278_v51, %v12825_v63  ;;  %v12826_v39 = vrot.slane %v8828_v40, 6  ;;  %v2261_v0 = vadd.f32 %v1988_v32, %v1620_v53  ;;  %v9005_v4 = vadd.f32 %v1990_v6, %v1621_v44 }
 0x20b   : > { %v5711_v8 = vadd.f32 %v5432_v1, %v5071_v37  ;;  %v9009_v57 = vadd.f32 %v3281_v20, %v2915_v12  ;;  %v9011_v54 = vadd.f32 %v3667_v46, %v3555_v56  ;;  %v9014_v28 = vmul.f32 %v6812_v29, %v527_v13 }
 0x20c   : > { %v5430_v48 = vsel %vm2559_vm2, %v12826_v39, %v5429_v47  ;;  %v9019_v44 = vmul.f32 %v6814_v30, %v527_v13  ;;  %v9022_v53 = vmul.f32 %v6818_v33, %v527_v13  ;;  %v1352_v32 = vrot.slane %v9000_v14, 1 }
 0x20d   : > { %v5710_v51 = vadd.f32 %v5430_v48, %v5070_v17  ;;  %v5823_v22 = vadd.f32 %v8694_v62, %v5711_v8  ;;  %v12688_v52 = vrot.slane %v9003_v21, 2  ;;  %v9027_v46 = vmul.f32 %v6821_v35, %v527_v13 }
 0x20e   : > { %v9030_v31 = vmul.f32 %v6823_v36, %v527_v13  ;;  %v9033_v5 = vmul.f32 %v6827_v41, %v527_v13  ;;  %v1094_v2 = vmul.f32 %v6806_v18, %v522_v19  ;;  %v9037_v50 = vmul.f32 %v6829_v42, %v527_v13 }
 0x20f   : > { %v5822_v47 = vadd.f32 %v8694_v62, %v5710_v51  ;;  %v5928_v56 = vmax.f32 %v5823_v22, 0.0  ;;  %v1735_v6 = vmul.f32 %v6809_v23, %v522_v19  ;;  %v2388_v63 = vmul.f32 %v6814_v30, %v522_v19 }
 0x210   : > { %v3029_v20 = vmul.f32 %v6818_v33, %v522_v19  ;;  %v2643_v17 = vrot.slane %v9019_v44, 6  ;;  %v1350_v37 = vrot.slane %v1094_v2, 1  ;;  %v3903_v39 = vmul.f32 %v6823_v36, %v522_v19 }
 0x211   : > { %v5927_v12 = vmax.f32 %v5822_v47, 0.0  ;;  %6034 = vst.msk [vmem:[#allocation2 + $0x118] sm:$0xff] %vm5998_vm6, %v5928_v56  ;;  %v4544_v48 = vmul.f32 %v6827_v41, %v522_v19  ;;  %v4154_v1 = vrot.slane %v9030_v31, 4  ;;  %v3771_v51 = vadd.f32 %v8813_v27, %v8899_v43 }
 0x212   : > { %v2641_v8 = vrot.slane %v2388_v63, 6  ;;  %v12827_v47 = vrot.slane %v8881_v16, 1  ;;  %v1991_v56 = vrot.slane %v1735_v6, 2  ;;  %v4152_v2 = vrot.slane %v3903_v39, 4 }
 0x213   : > { %6033 = vst.msk [vmem:[#allocation2 + $0x110] sm:$0xff] %vm5998_vm6, %v5927_v12  ;;  %v1353_v12 = vsel %vm1262_vm0, %v1350_v37, %v1352_v32  ;;  %v4795_v40 = vrot.slane %v9033_v5, 5  ;;  %v12689_v13 = vrot.slane %v9037_v50, 6  ;;  %v872_v59 = vmul.f32 %v6812_v29, %v522_v19 }
 0x214   : > { %v1351_v22 = vsel %vm1262_vm0, %v12827_v47, %v1350_v37  ;;  %v3282_v34 = vrot.slane %v3029_v20, 7  ;;  %v2642_v27 = vsel %vm2559_vm2, %v2639_v61, %v2641_v8  ;;  %v2644_v16 = vsel %vm2559_vm2, %v2641_v8, %v2643_v17 }
 0x215   : > { %v4793_v43 = vrot.slane %v4544_v48, 5  ;;  %v5185_v63 = vmul.f32 %v6829_v42, %v522_v19  ;;  %v1622_v6 = vadd.f32 %v1351_v22, %v8895_v15  ;;  %v1623_v37 = vadd.f32 %v1353_v12, %v872_v59  ;;  %v537_v59 = vpop.permute.xlu1 %536 }
 0x216   : > { %v2916_v39 = vadd.f32 %v2642_v27, %v8886_v58  ;;  %v3669_v47 = vmul.f32 %v6821_v35, %v522_v19  ;;  %v12828_v20 = vrot.slane %v8884_v45, 2  ;;  %v1994_v61 = vsel %vm1903_vm1, %v1991_v56, %v12688_v52 }
 0x217   : > { %v4153_v48 = vsel %vm4078_vm4, %v4150_v11, %v4152_v2  ;;  %v4155_v15 = vsel %vm4078_vm4, %v4152_v2, %v4154_v1  ;;  %v2917_v19 = vadd.f32 %v2644_v16, %v2261_v0  ;;  %v12829_v45 = vrot.slane %v8915_v38, 7 }
 0x218   : > { %v1992_v49 = vsel %vm1903_vm1, %v12828_v20, %v1991_v56  ;;  %v4431_v12 = vadd.f32 %v4153_v48, %v8901_v7  ;;  %v4432_v27 = vadd.f32 %v4155_v15, %v3771_v51  ;;  %v12830_v26 = vrot.slane %v8924_v3, 5 }
 0x219   : > { %v3283_v22 = vsel %vm3200_vm3, %v12829_v45, %v3282_v34  ;;  %v4796_v2 = vsel %vm4719_vm5, %v4793_v43, %v4795_v40  ;;  %v5433_v20 = vrot.slane %v5185_v63, 6  ;;  %v9093_v38 = vmul.f32 %v6806_v18, %v537_v59 }
 0x21a   : > { %v6212_v58 = vld [vmem:[#allocation2 + $0x10e] ss:$2 sm:$0xff]  ;;  %v6216_v8 = vld [vmem:[#allocation2 + $0x10f] ss:$2 sm:$0xff]  ;;  %v4794_v11 = vsel %vm4719_vm5, %v12830_v26, %v4793_v43  ;;  %v3557_v52 = vadd.f32 %v3283_v22, %v2916_v39  ;;  %v5073_v16 = vadd.f32 %v4796_v2, %v4432_v27  ;;  %v12831_v7 = vmax.f32 %v8869_v60, %v8871_v10 }
 0x21b   : > { %v6221_v56 = vmax.f32 %v6212_v58, %v6216_v8  ;;  %v5072_v0 = vadd.f32 %v4794_v11, %v4431_v12  ;;  %v12832_v3 = vrot.slane %v8929_v25, 6  ;;  %v5436_v15 = vsel %vm2559_vm2, %v5433_v20, %v12689_v13 }
 0x21c   : > { %v9105_v43 = vmul.f32 %v6809_v23, %v537_v59  ;;  %v2263_v63 = vadd.f32 %v1992_v49, %v1622_v6  ;;  %v12833_v39 = vrot.slane %v9022_v53, 7  ;;  %v5713_v45 = vadd.f32 %v5436_v15, %v5073_v16 }
 0x21d   : > { %v6223_v51 = vmax.f32 %v12831_v7, %v6221_v56  ;;  %v5434_v48 = vsel %vm2559_vm2, %v12832_v3, %v5433_v20  ;;  %v9112_v60 = vadd.f32 %v1994_v61, %v1623_v37  ;;  %v9117_v25 = vmul.f32 %v6812_v29, %v537_v59  ;;  %v532_v37 = vpop.permute.xlu0 %531 }
 0x21e   : > { %v3285_v58 = vsel %vm3200_vm3, %v3282_v34, %v12833_v39  ;;  %v5712_v8 = vadd.f32 %v5434_v48, %v5072_v0  ;;  %v9120_v22 = vmul.f32 %v6814_v30, %v537_v59  ;;  %v5825_v49 = vadd.f32 %v8694_v62, %v5713_v45 }
 0x21f   : > { %6544 = vst.msk [vmem:[%s7456_s28 + $0x40] sm:$0xff] %vm5998_vm6, %v6223_v51  ;;  %v9114_v10 = vadd.f32 %v3285_v58, %v2917_v19  ;;  %v9125_v34 = vmul.f32 %v6818_v33, %v537_v59  ;;  %v9128_v12 = vmul.f32 %v6823_v36, %v537_v59  ;;  %v9130_v61 = vadd.f32 %v3669_v47, %v3557_v52 }
 0x220   : > { %v5824_v6 = vadd.f32 %v8694_v62, %v5712_v8  ;;  %v1356_v19 = vrot.slane %v9093_v38, 1  ;;  %v9135_v56 = vmul.f32 %v6821_v35, %v537_v59  ;;  %v5930_v11 = vmax.f32 %v5825_v49, 0.0 }
 0x221   : > { %v9138_v2 = vmul.f32 %v6827_v41, %v537_v59  ;;  %v9141_v20 = vmul.f32 %v6829_v42, %v537_v59  ;;  %v2647_v0 = vrot.slane %v9120_v22, 6  ;;  %v1096_v52 = vmul.f32 %v6806_v18, %v532_v37 }
 0x222   : > { %v5929_v26 = vmax.f32 %v5824_v6, 0.0  ;;  %v2390_v47 = vmul.f32 %v6814_v30, %v532_v37  ;;  %v3031_v16 = vmul.f32 %v6818_v33, %v532_v37  ;;  %6036 = vst.msk [vmem:[#allocation2 + $0x128] sm:$0xff] %vm5998_vm6, %v5930_v11  ;;  %v4158_v51 = vrot.slane %v9128_v12, 4 }
 0x223   : > { %v3905_v3 = vmul.f32 %v6823_v36, %v532_v37  ;;  %v4546_v59 = vmul.f32 %v6827_v41, %v532_v37  ;;  %v1354_v48 = vrot.slane %v1096_v52, 1  ;;  %v1737_v15 = vmul.f32 %v6809_v23, %v532_v37 }
 0x224   : > { %6035 = vst.msk [vmem:[#allocation2 + $0x120] sm:$0xff] %vm5998_vm6, %v5929_v26  ;;  %v2645_v39 = vrot.slane %v2390_v47, 6  ;;  %v5187_v58 = vmul.f32 %v6829_v42, %v532_v37  ;;  %v4799_v8 = vrot.slane %v9138_v2, 5  ;;  %v3773_v6 = vadd.f32 %v8918_v24, %v9009_v57  ;;  %v547_v26 = vpop.permute.xlu1 %546 }
 0x225   : > { %v4156_v49 = vrot.slane %v3905_v3, 4  ;;  %v874_v11 = vmul.f32 %v6812_v29, %v532_v37  ;;  %v1355_v52 = vsel %vm1262_vm0, %v1352_v32, %v1354_v48  ;;  %v1357_v47 = vsel %vm1262_vm0, %v1354_v48, %v1356_v19 }
 0x226   : > { %v3286_v7 = vrot.slane %v3031_v16, 7  ;;  %v2646_v27 = vsel %vm2559_vm2, %v2643_v17, %v2645_v39  ;;  %v2648_v24 = vsel %vm2559_vm2, %v2645_v39, %v2647_v0  ;;  %v3671_v57 = vmul.f32 %v6821_v35, %v532_v37 }
 0x227   : > { %v4797_v3 = vrot.slane %v4546_v59, 5  ;;  %v1995_v45 = vrot.slane %v1737_v15, 2  ;;  %v2918_v14 = vadd.f32 %v2646_v27, %v9005_v4  ;;  %v5437_v32 = vrot.slane %v5187_v58, 6 }
 0x228   : > { %v9175_v13 = vmul.f32 %v6812_v29, %v547_v26  ;;  %v1624_v16 = vadd.f32 %v1355_v52, %v9014_v28  ;;  %v1625_v48 = vadd.f32 %v1357_v47, %v874_v11  ;;  %v4157_v44 = vsel %vm4078_vm4, %v4154_v1, %v4156_v49 }
 0x229   : > { %v4159_v17 = vsel %vm4078_vm4, %v4156_v49, %v4158_v51  ;;  %v2919_v15 = vadd.f32 %v2648_v24, %v2263_v63  ;;  %v12834_v4 = vrot.slane %v9022_v53, 7  ;;  %v4433_v39 = vadd.f32 %v4157_v44, %v9011_v54 }
 0x22a   : > { %v4434_v58 = vadd.f32 %v4159_v17, %v3773_v6  ;;  %v4798_v31 = vsel %vm4719_vm5, %v4795_v40, %v4797_v3  ;;  %v4800_v1 = vsel %vm4719_vm5, %v4797_v3, %v4799_v8  ;;  %v12835_v63 = vrot.slane %v9003_v21, 2 }
 0x22b   : > { %v6214_v37 = vld [vmem:[#allocation2 + $0x11e] ss:$2 sm:$0x3f]  ;;  %v6218_v59 = vld [vmem:[#allocation2 + $0x11f] ss:$2 sm:$0x3f]  ;;  %v3287_v27 = vsel %vm3200_vm3, %v12834_v4, %v3286_v7  ;;  %v5074_v49 = vadd.f32 %v4798_v31, %v4433_v39  ;;  %v12837_v47 = vmax.f32 %v8983_v55, %v8985_v9  ;;  %v9207_v3 = vmul.f32 %v6806_v18, %v547_v26 }
 0x22c   : > { %v6222_v28 = vmax.f32 %v6214_v37, %v6218_v59  ;;  %v3559_v11 = vadd.f32 %v3287_v27, %v2918_v14  ;;  %v1996_v53 = vsel %vm1903_vm1, %v12835_v63, %v1995_v45  ;;  %v5075_v52 = vadd.f32 %v4800_v1, %v4434_v58  ;;  %v542_v27 = vpop.permute.xlu0 %541 }
 0x22d   : > { %v12836_v54 = vrot.slane %v9037_v50, 6  ;;  %v12838_v40 = vrot.slane %v9141_v20, 6  ;;  %v9210_v21 = vmul.f32 %v6809_v23, %v547_v26  ;;  %v12839_v14 = vrot.slane %v9105_v43, 2 }
 0x22e   : > { %v6224_v5 = vmax.f32 %v12837_v47, %v6222_v28  ;;  %v12840_v44 = vrot.slane %v9125_v34, 7  ;;  %v2265_v37 = vadd.f32 %v1996_v53, %v1624_v16  ;;  %v9224_v4 = vadd.f32 %v3671_v57, %v3559_v11 }
 0x22f   : > { %v5438_v6 = vsel %vm2559_vm2, %v12836_v54, %v5437_v32  ;;  %v5440_v24 = vsel %vm2559_vm2, %v5437_v32, %v12838_v40  ;;  %v1998_v50 = vsel %vm1903_vm1, %v1995_v45, %v12839_v14  ;;  %v9229_v58 = vmul.f32 %v6814_v30, %v547_v26 }
 0x230   : > { %v3289_v17 = vsel %vm3200_vm3, %v3286_v7, %v12840_v44  ;;  %v5714_v55 = vadd.f32 %v5438_v6, %v5074_v49  ;;  %v5715_v9 = vadd.f32 %v5440_v24, %v5075_v52  ;;  %6545 = vst.msk [vmem:[%s7456_s28 + $0x48] sm:$0x3f] %vm6126_vm7, %v6224_v5  ;;  %v9220_v32 = vadd.f32 %v1998_v50, %v1625_v48 }
 0x231   : > { %v9222_v59 = vadd.f32 %v3289_v17, %v2919_v15  ;;  %v9232_v7 = vmul.f32 %v6818_v33, %v547_v26  ;;  %v1360_v28 = vrot.slane %v9207_v3, 1  ;;  %v2001_v16 = vrot.slane %v9210_v21, 2 }
 0x232   : > { %v5826_v39 = vadd.f32 %v8694_v62, %v5714_v55  ;;  %v5827_v45 = vadd.f32 %v8694_v62, %v5715_v9  ;;  %v9237_v48 = vmul.f32 %v6821_v35, %v547_v26  ;;  %v9240_v57 = vmul.f32 %v6823_v36, %v547_v26 }
 0x233   : > { %v9243_v31 = vmul.f32 %v6827_v41, %v547_v26  ;;  %v1098_v1 = vmul.f32 %v6806_v18, %v542_v27  ;;  %v9247_v63 = vmul.f32 %v6829_v42, %v547_v26  ;;  %v1739_v53 = vmul.f32 %v6809_v23, %v542_v27 }
 0x234   : > { %v5931_v15 = vmax.f32 %v5826_v39, 0.0  ;;  %v5932_v11 = vmax.f32 %v5827_v45, 0.0  ;;  %v2392_v49 = vmul.f32 %v6814_v30, %v542_v27  ;;  %v3033_v52 = vmul.f32 %v6818_v33, %v542_v27 }
 0x235   : > { %v2651_v54 = vrot.slane %v9229_v58, 6  ;;  %v1358_v6 = vrot.slane %v1098_v1, 1  ;;  %v3907_v47 = vmul.f32 %v6823_v36, %v542_v27  ;;  %v4548_v5 = vmul.f32 %v6827_v41, %v542_v27 }
 0x236   : > { %6037 = vst.msk [vmem:[#allocation2 + $0x130] sm:$0xff] %vm5998_vm6, %v5931_v15  ;;  %6038 = vst.msk [vmem:[#allocation2 + $0x138] sm:$0xff] %vm5998_vm6, %v5932_v11  ;;  %v3292_v26 = vrot.slane %v9232_v7, 7  ;;  %v4162_v40 = vrot.slane %v9240_v57, 4  ;;  %v3775_v24 = vadd.f32 %v9027_v46, %v9114_v10  ;;  %v2649_v14 = vrot.slane %v2392_v49, 6 }
 0x237   : > { %v1359_v50 = vsel %vm1262_vm0, %v1356_v19, %v1358_v6  ;;  %v1361_v44 = vsel %vm1262_vm0, %v1358_v6, %v1360_v28  ;;  %v1999_v17 = vrot.slane %v1739_v53, 2  ;;  %v4160_v55 = vrot.slane %v3907_v47, 4  ;;  %v557_v47 = vpop.permute.xlu1 %556 }
 0x238   : > { %v4803_v9 = vrot.slane %v9243_v31, 5  ;;  %v12690_v39 = vrot.slane %v9247_v63, 6  ;;  %v876_v45 = vmul.f32 %v6812_v29, %v542_v27  ;;  %v3290_v15 = vrot.slane %v3033_v52, 7 }
 0x239   : > { %v2650_v46 = vsel %vm2559_vm2, %v2647_v0, %v2649_v14  ;;  %v2652_v38 = vsel %vm2559_vm2, %v2649_v14, %v2651_v54  ;;  %v4801_v10 = vrot.slane %v4548_v5, 5  ;;  %v5189_v19 = vmul.f32 %v6829_v42, %v542_v27 }
 0x23a   : > { %v1626_v11 = vadd.f32 %v1359_v50, %v9117_v25  ;;  %v1627_v1 = vadd.f32 %v1361_v44, %v876_v45  ;;  %v2920_v53 = vadd.f32 %v2650_v46, %v9112_v60  ;;  %v3673_v49 = vmul.f32 %v6821_v35, %v542_v27 }
 0x23b   : > { %v12841_v52 = vrot.slane %v9105_v43, 2  ;;  %v2002_v0 = vsel %vm1903_vm1, %v1999_v17, %v2001_v16  ;;  %v4161_v6 = vsel %vm4078_vm4, %v4158_v51, %v4160_v55  ;;  %v4163_v25 = vsel %vm4078_vm4, %v4160_v55, %v4162_v40 }
 0x23c   : > { %v2921_v60 = vadd.f32 %v2652_v38, %v2265_v37  ;;  %v12842_v27 = vrot.slane %v9125_v34, 7  ;;  %v4435_v5 = vadd.f32 %v4161_v6, %v9130_v61  ;;  %v4436_v14 = vadd.f32 %v4163_v25, %v3775_v24 }
 0x23d   : > { %v2000_v22 = vsel %vm1903_vm1, %v12841_v52, %v1999_v17  ;;  %v4802_v12 = vsel %vm4719_vm5, %v4799_v8, %v4801_v10  ;;  %v4804_v51 = vsel %vm4719_vm5, %v4801_v10, %v4803_v9  ;;  %v5441_v44 = vrot.slane %v5189_v19, 6  ;;  %v9302_v17 = vld [vmem:[#allocation2 + $0x12c] ss:$2 sm:$0xff]  ;;  %v9304_v37 = vld [vmem:[#allocation2 + $0x12d] ss:$2 sm:$0xff] }
 0x23e   : > { %v3291_v43 = vsel %vm3200_vm3, %v12842_v27, %v3290_v15  ;;  %v3293_v34 = vsel %vm3200_vm3, %v3290_v15, %v3292_v26  ;;  %v5076_v61 = vadd.f32 %v4802_v12, %v4435_v5  ;;  %v5077_v24 = vadd.f32 %v4804_v51, %v4436_v14  ;;  %v552_v27 = vpop.permute.xlu0 %551 }
 0x23f   : > { %v3561_v50 = vadd.f32 %v3291_v43, %v2920_v53  ;;  %v9310_v55 = vmul.f32 %v6806_v18, %v557_v47  ;;  %v12843_v2 = vrot.slane %v9141_v20, 6  ;;  %v5444_v45 = vsel %vm2559_vm2, %v5441_v44, %v12690_v39  ;;  %v567_v20 = vpop.permute.xlu1 %566 }
 0x240   : > { %v9319_v46 = vmul.f32 %v6809_v23, %v557_v47  ;;  %v9322_v38 = vmul.f32 %v6814_v30, %v557_v47  ;;  %v2267_v15 = vadd.f32 %v2000_v22, %v1626_v11  ;;  %v9324_v10 = vadd.f32 %v2002_v0, %v1627_v1 }
 0x241   : > { %v5442_v8 = vsel %vm2559_vm2, %v12843_v2, %v5441_v44  ;;  %v5717_v53 = vadd.f32 %v5444_v45, %v5077_v24  ;;  %v9328_v52 = vadd.f32 %v3293_v34, %v2921_v60  ;;  %v9330_v6 = vadd.f32 %v3673_v49, %v3561_v50 }
 0x242   : > { %v5716_v19 = vadd.f32 %v5442_v8, %v5076_v61  ;;  %v9333_v25 = vmul.f32 %v6812_v29, %v557_v47  ;;  %v1364_v11 = vrot.slane %v9310_v55, 1  ;;  %v9339_v1 = vmul.f32 %v6818_v33, %v557_v47 }
 0x243   : > { %v5829_v5 = vadd.f32 %v8694_v62, %v5717_v53  ;;  %v2655_v0 = vrot.slane %v9322_v38, 6  ;;  %v9344_v49 = vmul.f32 %v6823_v36, %v557_v47  ;;  %v9347_v60 = vmul.f32 %v6827_v41, %v557_v47 }
 0x244   : > { %v5828_v43 = vadd.f32 %v8694_v62, %v5716_v19  ;;  %v9350_v12 = vmul.f32 %v6821_v35, %v557_v47  ;;  %v1100_v62 = vmul.f32 %v6806_v18, %v552_v27  ;;  %v9354_v51 = vmul.f32 %v6829_v42, %v557_v47 }
 0x245   : > { %v5934_v50 = vmax.f32 %v5829_v5, 0.0  ;;  %v1741_v44 = vmul.f32 %v6809_v23, %v552_v27  ;;  %v2394_v34 = vmul.f32 %v6814_v30, %v552_v27  ;;  %v3035_v61 = vmul.f32 %v6818_v33, %v552_v27 }
 0x246   : > { %v5933_v14 = vmax.f32 %v5828_v43, 0.0  ;;  %v1362_v2 = vrot.slane %v1100_v62, 1  ;;  %v3909_v8 = vmul.f32 %v6823_v36, %v552_v27  ;;  %v4550_v45 = vmul.f32 %v6827_v41, %v552_v27 }
 0x247   : > { %6040 = vst.msk [vmem:[#allocation2 + $0x148] sm:$0xff] %vm5998_vm6, %v5934_v50  ;;  %v4166_v47 = vrot.slane %v9344_v49, 4  ;;  %v12692_v19 = vrot.slane %v9347_v60, 5  ;;  %v2003_v53 = vrot.slane %v1741_v44, 2  ;;  %v2653_v43 = vrot.slane %v2394_v34, 6 }
 0x248   : > { %6039 = vst.msk [vmem:[#allocation2 + $0x140] sm:$0xff] %vm5998_vm6, %v5933_v14  ;;  %v1363_v5 = vsel %vm1262_vm0, %v1360_v28, %v1362_v2  ;;  %v1365_v14 = vsel %vm1262_vm0, %v1362_v2, %v1364_v11  ;;  %v3294_v50 = vrot.slane %v3035_v61, 7  ;;  %v4164_v62 = vrot.slane %v3909_v8, 4 }
 0x249   : > { %v12691_v39 = vrot.slane %v9354_v51, 6  ;;  %v3777_v24 = vadd.f32 %v9135_v56, %v9222_v59  ;;  %v878_v22 = vmul.f32 %v6812_v29, %v552_v27  ;;  %v4805_v44 = vrot.slane %v4550_v45, 5 }
 0x24a   : > { %v2654_v3 = vsel %vm2559_vm2, %v2651_v54, %v2653_v43  ;;  %v2656_v28 = vsel %vm2559_vm2, %v2653_v43, %v2655_v0  ;;  %v3675_v34 = vmul.f32 %v6821_v35, %v552_v27  ;;  %v5191_v61 = vmul.f32 %v6829_v42, %v552_v27 }
 0x24b   : > { %v1628_v2 = vadd.f32 %v1363_v5, %v9175_v13  ;;  %v1629_v8 = vadd.f32 %v1365_v14, %v878_v22  ;;  %v2922_v56 = vadd.f32 %v2654_v3, %v9220_v32  ;;  %v9387_v59 = vmul.f32 %v6812_v29, %v567_v20 }
 0x24c   : > { %v2004_v58 = vsel %vm1903_vm1, %v2001_v16, %v2003_v53  ;;  %v3295_v54 = vsel %vm3200_vm3, %v3292_v26, %v3294_v50  ;;  %v4165_v27 = vsel %vm4078_vm4, %v4162_v40, %v4164_v62  ;;  %v4167_v13 = vsel %vm4078_vm4, %v4164_v62, %v4166_v47 }
 0x24d   : > { %v2923_v32 = vadd.f32 %v2656_v28, %v2267_v15  ;;  %v4437_v22 = vadd.f32 %v4165_v27, %v9224_v4  ;;  %v4438_v45 = vadd.f32 %v4167_v13, %v3777_v24  ;;  %v4806_v21 = vsel %vm4719_vm5, %v4803_v9, %v4805_v44 }
 0x24e   : > { %v3563_v16 = vadd.f32 %v3295_v54, %v2922_v56  ;;  %v4808_v7 = vsel %vm4719_vm5, %v4805_v44, %v12692_v19  ;;  %v5445_v57 = vrot.slane %v5191_v61, 6  ;;  %v9409_v26 = vmul.f32 %v6806_v18, %v567_v20 }
 0x24f   : > { %v9411_v40 = vld [vmem:[#allocation2 + $0x13c] ss:$2 sm:$0x3f]  ;;  %v9413_v43 = vld [vmem:[#allocation2 + $0x13d] ss:$2 sm:$0x3f]  ;;  %v5078_v24 = vadd.f32 %v4806_v21, %v4437_v22  ;;  %v5079_v5 = vadd.f32 %v4808_v7, %v4438_v45  ;;  %v9428_v3 = vmul.f32 %v6809_v23, %v567_v20  ;;  %v9431_v28 = vmul.f32 %v6814_v30, %v567_v20  ;;  %v562_v22 = vpop.permute.xlu0 %561 }
 0x250   : > { %v12844_v4 = vrot.slane %v9319_v46, 2  ;;  %v12845_v31 = vrot.slane %v9339_v1, 7  ;;  %v12846_v14 = vrot.slane %v9247_v63, 6  ;;  %v5448_v44 = vsel %vm2559_vm2, %v5445_v57, %v12691_v39  ;;  %v9442_v45 = vld [vmem:[#allocation3] ss:$0 sm:$0xff]  ;;  %v9475_v39 = vpop.permute.xlu1 %576 }
 0x251   : > { %v5719_v56 = vadd.f32 %v5448_v44, %v5079_v5  ;;  %v9439_v27 = vadd.f32 %v3675_v34, %v3563_v16  ;;  %v12694_v13 = vrot.slane %v9409_v26, 1  ;;  %v12693_v34 = vrot.slane %v9431_v28, 6 }
 0x252   : > { %v2006_v15 = vsel %vm1903_vm1, %v2003_v53, %v12844_v4  ;;  %v3297_v9 = vsel %vm3200_vm3, %v3294_v50, %v12845_v31  ;;  %v5446_v62 = vsel %vm2559_vm2, %v12846_v14, %v5445_v57  ;;  %v2269_v53 = vadd.f32 %v2004_v58, %v1628_v2 }
 0x253   : > { %v9433_v61 = vadd.f32 %v2006_v15, %v1629_v8  ;;  %v5718_v50 = vadd.f32 %v5446_v62, %v5078_v24  ;;  %v9437_v54 = vadd.f32 %v3297_v9, %v2923_v32  ;;  %v5831_v2 = vadd.f32 %v9442_v45, %v5719_v56 }
 0x254   : > { %v9447_v8 = vmul.f32 %v6818_v33, %v567_v20  ;;  %v9450_v58 = vmul.f32 %v6823_v36, %v567_v20  ;;  %v12695_v32 = vrot.slane %v9428_v3, 2  ;;  %v9455_v16 = vmul.f32 %v6827_v41, %v567_v20 }
 0x255   : > { %v5830_v21 = vadd.f32 %v9442_v45, %v5718_v50  ;;  %v9458_v7 = vmul.f32 %v6829_v42, %v567_v20  ;;  %v5936_v4 = vmax.f32 %v5831_v2, 0.0  ;;  %v1102_v15 = vmul.f32 %v6806_v18, %v562_v22 }
 0x256   : > { %v1743_v31 = vmul.f32 %v6809_v23, %v562_v22  ;;  %v9463_v9 = vmul.f32 %v6821_v35, %v567_v20  ;;  %v2396_v24 = vmul.f32 %v6814_v30, %v562_v22  ;;  %v3037_v5 = vmul.f32 %v6818_v33, %v562_v22 }
 0x257   : > { %v5935_v57 = vmax.f32 %v5830_v21, 0.0  ;;  %v3911_v14 = vmul.f32 %v6823_v36, %v562_v22  ;;  %6042 = vst.msk [vmem:[#allocation2 + $0x158] sm:$0xff] %vm5998_vm6, %v5936_v4  ;;  %v4170_v44 = vrot.slane %v9450_v58, 4  ;;  %v3779_v50 = vadd.f32 %v9237_v48, %v9328_v52 }
 0x258   : > { %v1366_v56 = vrot.slane %v1102_v15, 1  ;;  %v2007_v21 = vrot.slane %v1743_v31, 2  ;;  %v2657_v2 = vrot.slane %v2396_v24, 6  ;;  %v4552_v4 = vmul.f32 %v6827_v41, %v562_v22 }
 0x259   : > { %6041 = vst.msk [vmem:[#allocation2 + $0x150] sm:$0xff] %vm5998_vm6, %v5935_v57  ;;  %v4168_v63 = vrot.slane %v3911_v14, 4  ;;  %v880_v57 = vmul.f32 %v6812_v29, %v562_v22  ;;  %v5193_v62 = vmul.f32 %v6829_v42, %v562_v22  ;;  %v3298_v31 = vrot.slane %v3037_v5, 7 }
 0x25a   : > { %v1367_v48 = vsel %vm1262_vm0, %v1364_v11, %v1366_v56  ;;  %v1369_v52 = vsel %vm1262_vm0, %v1366_v56, %v12694_v13  ;;  %v2658_v15 = vsel %vm2559_vm2, %v2655_v0, %v2657_v2  ;;  %v2660_v24 = vsel %vm2559_vm2, %v2657_v2, %v12693_v34 }
 0x25b   : > { %v2924_v14 = vadd.f32 %v2658_v15, %v9324_v10  ;;  %v3677_v19 = vmul.f32 %v6821_v35, %v562_v22  ;;  %v9497_v55 = vmul.f32 %v6812_v29, %v9475_v39  ;;  %v12847_v11 = vrot.slane %v9319_v46, 2 }
 0x25c   : > { %v2010_v38 = vsel %vm1903_vm1, %v2007_v21, %v12695_v32  ;;  %v4169_v0 = vsel %vm4078_vm4, %v4166_v47, %v4168_v63  ;;  %v4171_v10 = vsel %vm4078_vm4, %v4168_v63, %v4170_v44  ;;  %v1630_v22 = vadd.f32 %v1367_v48, %v9333_v25 }
 0x25d   : > { %v2008_v56 = vsel %vm1903_vm1, %v12847_v11, %v2007_v21  ;;  %v1631_v5 = vadd.f32 %v1369_v52, %v880_v57  ;;  %v4439_v2 = vadd.f32 %v4169_v0, %v9330_v6  ;;  %v4440_v46 = vadd.f32 %v4171_v10, %v3779_v50 }
 0x25e   : > { %v2925_v34 = vadd.f32 %v2660_v24, %v2269_v53  ;;  %v12848_v13 = vrot.slane %v9339_v1, 7  ;;  %v4809_v49 = vrot.slane %v4552_v4, 5  ;;  %v5449_v32 = vrot.slane %v5193_v62, 6 }
 0x25f   : > { %v12849_v20 = vrot.slane %v9447_v8, 7  ;;  %v9521_v6 = vmul.f32 %v6806_v18, %v9475_v39  ;;  %v12850_v50 = vrot.slane %v9347_v60, 5  ;;  %v12851_v1 = vrot.slane %v9455_v16, 5 }
 0x260   : > { %v6237_v15 = vld [vmem:[#allocation2 + $0x14a] ss:$2 sm:$0xff]  ;;  %v6241_v11 = vld [vmem:[#allocation2 + $0x14b] ss:$2 sm:$0xff]  ;;  %v3299_v21 = vsel %vm3200_vm3, %v12848_v13, %v3298_v31  ;;  %v9531_v62 = vmul.f32 %v6809_v23, %v9475_v39  ;;  %v12852_v57 = vmax.f32 %v9302_v17, %v9304_v37  ;;  %v9542_v52 = vmul.f32 %v6818_v33, %v9475_v39 }
 0x261   : > { %v6246_v47 = vmax.f32 %v6237_v15, %v6241_v11  ;;  %v3301_v63 = vsel %vm3200_vm3, %v3298_v31, %v12849_v20  ;;  %v3565_v25 = vadd.f32 %v3299_v21, %v2924_v14  ;;  %v4810_v53 = vsel %vm4719_vm5, %v12850_v50, %v4809_v49  ;;  %v572_v31 = vpop.permute.xlu0 %571 }
 0x262   : > { %v4812_v13 = vsel %vm4719_vm5, %v4809_v49, %v12851_v1  ;;  %v9535_v20 = vmul.f32 %v6814_v30, %v9475_v39  ;;  %v5080_v48 = vadd.f32 %v4810_v53, %v4439_v2  ;;  %v2271_v24 = vadd.f32 %v2008_v56, %v1630_v22 }
 0x263   : > { %v6248_v4 = vmax.f32 %v12852_v57, %v6246_v47  ;;  %v5081_v60 = vadd.f32 %v4812_v13, %v4440_v46  ;;  %v9544_v14 = vadd.f32 %v2010_v38, %v1631_v5  ;;  %v12853_v0 = vrot.slane %v9354_v51, 6 }
 0x264   : > { %v12854_v15 = vrot.slane %v9458_v7, 6  ;;  %v9554_v17 = vadd.f32 %v3301_v63, %v2925_v34  ;;  %v9556_v37 = vadd.f32 %v3677_v19, %v3565_v25  ;;  %v1372_v56 = vrot.slane %v9521_v6, 1 }
 0x265   : > { %v5450_v10 = vsel %vm2559_vm2, %v12853_v0, %v5449_v32  ;;  %6546 = vst.msk [vmem:[%s7456_s28 + $0x50] sm:$0xff] %vm5998_vm6, %v6248_v4  ;;  %v2013_v38 = vrot.slane %v9531_v62, 2  ;;  %v2663_v51 = vrot.slane %v9535_v20, 6  ;;  %v1104_v22 = vmul.f32 %v6806_v18, %v572_v31 }
 0x266   : > { %v5452_v11 = vsel %vm2559_vm2, %v5449_v32, %v12854_v15  ;;  %v5720_v2 = vadd.f32 %v5450_v10, %v5080_v48  ;;  %v3304_v21 = vrot.slane %v9542_v52, 7  ;;  %v9567_v19 = vmul.f32 %v6823_v36, %v9475_v39 }
 0x267   : > { %v5721_v46 = vadd.f32 %v5452_v11, %v5081_v60  ;;  %v9571_v34 = vmul.f32 %v6827_v41, %v9475_v39  ;;  %v1370_v49 = vrot.slane %v1104_v22, 1  ;;  %v1745_v47 = vmul.f32 %v6809_v23, %v572_v31 }
 0x268   : > { %v5832_v5 = vadd.f32 %v9442_v45, %v5720_v2  ;;  %v2398_v63 = vmul.f32 %v6814_v30, %v572_v31  ;;  %v9577_v53 = vmul.f32 %v6829_v42, %v9475_v39  ;;  %v3039_v1 = vmul.f32 %v6818_v33, %v572_v31 }
 0x269   : > { %v5833_v32 = vadd.f32 %v9442_v45, %v5721_v46  ;;  %v9582_v13 = vmul.f32 %v6821_v35, %v9475_v39  ;;  %v12855_v57 = vrot.slane %v9409_v26, 1  ;;  %v2011_v48 = vrot.slane %v1745_v47, 2 }
 0x26a   : > { %v5937_v25 = vmax.f32 %v5832_v5, 0.0  ;;  %v2661_v60 = vrot.slane %v2398_v63, 6  ;;  %v3781_v0 = vadd.f32 %v9350_v12, %v9437_v54  ;;  %v882_v10 = vmul.f32 %v6812_v29, %v572_v31 }
 0x26b   : > { %v5938_v50 = vmax.f32 %v5833_v32, 0.0  ;;  %v1371_v4 = vsel %vm1262_vm0, %v12855_v57, %v1370_v49  ;;  %v3913_v39 = vmul.f32 %v6823_v36, %v572_v31  ;;  %v4174_v11 = vrot.slane %v9567_v19, 4 }
 0x26c   : > { %6043 = vst.msk [vmem:[#allocation2 + $0x160] sm:$0xff] %vm5998_vm6, %v5937_v25  ;;  %v1632_v15 = vadd.f32 %v1371_v4, %v9387_v59  ;;  %v4815_v26 = vrot.slane %v9571_v34, 5  ;;  %v1373_v2 = vsel %vm1262_vm0, %v1370_v49, %v1372_v56  ;;  %v12856_v46 = vrot.slane %v9431_v28, 6  ;;  %v587_v4 = vpop.permute.xlu1 %586 }
 0x26d   : > { %6044 = vst.msk [vmem:[#allocation2 + $0x168] sm:$0xff] %vm5998_vm6, %v5938_v50  ;;  %v12696_v12 = vrot.slane %v9577_v53, 6  ;;  %v2664_v59 = vsel %vm2559_vm2, %v2661_v60, %v2663_v51  ;;  %v3302_v54 = vrot.slane %v3039_v1, 7  ;;  %v3679_v5 = vmul.f32 %v6821_v35, %v572_v31 }
 0x26e   : > { %v2662_v22 = vsel %vm2559_vm2, %v12856_v46, %v2661_v60  ;;  %v12857_v32 = vrot.slane %v9428_v3, 2  ;;  %v4172_v49 = vrot.slane %v3913_v39, 4  ;;  %v4554_v28 = vmul.f32 %v6827_v41, %v572_v31 }
 0x26f   : > { %v2926_v63 = vadd.f32 %v2662_v22, %v9433_v61  ;;  %v1633_v25 = vadd.f32 %v1373_v2, %v882_v10  ;;  %v2014_v50 = vsel %vm1903_vm1, %v2011_v48, %v2013_v38  ;;  %v5195_v1 = vmul.f32 %v6829_v42, %v572_v31 }
 0x270   : > { %v2012_v47 = vsel %vm1903_vm1, %v12857_v32, %v2011_v48  ;;  %v2927_v60 = vadd.f32 %v2664_v59, %v2271_v24  ;;  %v4173_v3 = vsel %vm4078_vm4, %v4170_v44, %v4172_v49  ;;  %v4175_v61 = vsel %vm4078_vm4, %v4172_v49, %v4174_v11 }
 0x271   : > { %v9615_v57 = vadd.f32 %v2012_v47, %v1632_v15  ;;  %v4813_v39 = vrot.slane %v4554_v28, 5  ;;  %v12858_v10 = vrot.slane %v9447_v8, 7  ;;  %v4441_v48 = vadd.f32 %v4173_v3, %v9439_v27 }
 0x272   : > { %v4442_v15 = vadd.f32 %v4175_v61, %v3781_v0  ;;  %v5453_v46 = vrot.slane %v5195_v1, 6  ;;  %v12859_v58 = vrot.slane %v9455_v16, 5  ;;  %v9635_v32 = vmul.f32 %v6806_v18, %v587_v4 }
 0x273   : > { %v3303_v2 = vsel %vm3200_vm3, %v12858_v10, %v3302_v54  ;;  %v6239_v31 = vld [vmem:[#allocation2 + $0x15a] ss:$2 sm:$0x3f]  ;;  %v6243_v22 = vld [vmem:[#allocation2 + $0x15b] ss:$2 sm:$0x3f]  ;;  %v4816_v59 = vsel %vm4719_vm5, %v4813_v39, %v4815_v26  ;;  %v9637_v47 = vadd.f32 %v2014_v50, %v1633_v25  ;;  %v9646_v28 = vmul.f32 %v6809_v23, %v587_v4 }
 0x274   : > { %v3567_v24 = vadd.f32 %v3303_v2, %v2926_v63  ;;  %v4814_v44 = vsel %vm4719_vm5, %v12859_v58, %v4813_v39  ;;  %v6247_v8 = vmax.f32 %v6239_v31, %v6243_v22  ;;  %v5083_v0 = vadd.f32 %v4816_v59, %v4442_v15  ;;  %v582_v15 = vpop.permute.xlu0 %581 }
 0x275   : > { %v5082_v27 = vadd.f32 %v4814_v44, %v4441_v48  ;;  %v12860_v49 = vrot.slane %v9458_v7, 6  ;;  %v5456_v16 = vsel %vm2559_vm2, %v5453_v46, %v12696_v12  ;;  %v9649_v1 = vmul.f32 %v6814_v30, %v587_v4  ;;  %v9704_v12 = vpop.permute.xlu1 %596 }
 0x276   : > { %v12861_v25 = vmax.f32 %v9411_v40, %v9413_v43  ;;  %v3305_v7 = vsel %vm3200_vm3, %v3302_v54, %v3304_v21  ;;  %v5723_v61 = vadd.f32 %v5456_v16, %v5083_v0  ;;  %v9659_v10 = vadd.f32 %v3679_v5, %v3567_v24 }
 0x277   : > { %v5454_v63 = vsel %vm2559_vm2, %v12860_v49, %v5453_v46  ;;  %v9657_v39 = vadd.f32 %v3305_v7, %v2927_v60  ;;  %v9662_v2 = vmul.f32 %v6812_v29, %v587_v4  ;;  %v1376_v48 = vrot.slane %v9635_v32, 1 }
 0x278   : > { %v6249_v50 = vmax.f32 %v12861_v25, %v6247_v8  ;;  %v5722_v3 = vadd.f32 %v5454_v63, %v5082_v27  ;;  %v5835_v43 = vadd.f32 %v9442_v45, %v5723_v61  ;;  %v9670_v54 = vmul.f32 %v6818_v33, %v587_v4 }
 0x279   : > { %v9673_v60 = vmul.f32 %v6823_v36, %v587_v4  ;;  %v2017_v5 = vrot.slane %v9646_v28, 2  ;;  %v2667_v46 = vrot.slane %v9649_v1, 6  ;;  %v9678_v31 = vmul.f32 %v6827_v41, %v587_v4 }
 0x27a   : > { %6547 = vst.msk [vmem:[%s7456_s28 + $0x58] sm:$0x3f] %vm6126_vm7, %v6249_v50  ;;  %v5834_v40 = vadd.f32 %v9442_v45, %v5722_v3  ;;  %v9681_v22 = vmul.f32 %v6829_v42, %v587_v4  ;;  %v5940_v58 = vmax.f32 %v5835_v43, 0.0  ;;  %v1106_v44 = vmul.f32 %v6806_v18, %v582_v15 }
 0x27b   : > { %v1747_v59 = vmul.f32 %v6809_v23, %v582_v15  ;;  %v9686_v8 = vmul.f32 %v6821_v35, %v587_v4  ;;  %v2400_v27 = vmul.f32 %v6814_v30, %v582_v15  ;;  %v3041_v0 = vmul.f32 %v6818_v33, %v582_v15 }
 0x27c   : > { %v5939_v24 = vmax.f32 %v5834_v40, 0.0  ;;  %v3915_v49 = vmul.f32 %v6823_v36, %v582_v15  ;;  %6046 = vst.msk [vmem:[#allocation2 + $0x178] sm:$0xff] %vm5998_vm6, %v5940_v58  ;;  %v3308_v63 = vrot.slane %v9670_v54, 7  ;;  %v4178_v16 = vrot.slane %v9673_v60, 4 }
 0x27d   : > { %v3783_v25 = vadd.f32 %v9463_v9, %v9554_v17  ;;  %v1374_v50 = vrot.slane %v1106_v44, 1  ;;  %v12698_v4 = vrot.slane %v9678_v31, 5  ;;  %v2015_v7 = vrot.slane %v1747_v59, 2 }
 0x27e   : > { %6045 = vst.msk [vmem:[#allocation2 + $0x170] sm:$0xff] %vm5998_vm6, %v5939_v24  ;;  %v2665_v3 = vrot.slane %v2400_v27, 6  ;;  %v4176_v61 = vrot.slane %v3915_v49, 4  ;;  %v12697_v40 = vrot.slane %v9681_v22, 6  ;;  %v884_v43 = vmul.f32 %v6812_v29, %v582_v15 }
 0x27f   : > { %v1375_v24 = vsel %vm1262_vm0, %v1372_v56, %v1374_v50  ;;  %v4556_v58 = vmul.f32 %v6827_v41, %v582_v15  ;;  %v1377_v9 = vsel %vm1262_vm0, %v1374_v50, %v1376_v48  ;;  %v3306_v44 = vrot.slane %v3041_v0, 7 }
 0x280   : > { %v2666_v17 = vsel %vm2559_vm2, %v2663_v51, %v2665_v3  ;;  %v5197_v59 = vmul.f32 %v6829_v42, %v582_v15  ;;  %v1634_v27 = vadd.f32 %v1375_v24, %v9497_v55  ;;  %v2668_v6 = vsel %vm2559_vm2, %v2665_v3, %v2667_v46 }
 0x281   : > { %v2928_v56 = vadd.f32 %v2666_v17, %v9544_v14  ;;  %v3681_v49 = vmul.f32 %v6821_v35, %v582_v15  ;;  %v2016_v50 = vsel %vm1903_vm1, %v2013_v38, %v2015_v7  ;;  %v4177_v20 = vsel %vm4078_vm4, %v4174_v11, %v4176_v61 }
 0x282   : > { %v4179_v55 = vsel %vm4078_vm4, %v4176_v61, %v4178_v16  ;;  %v9730_v51 = vmul.f32 %v6812_v29, %v9704_v12  ;;  %v1635_v0 = vadd.f32 %v1377_v9, %v884_v43  ;;  %v2018_v14 = vsel %vm1903_vm1, %v2015_v7, %v2017_v5 }
 0x283   : > { %v4443_v62 = vadd.f32 %v4177_v20, %v9556_v37  ;;  %v4444_v38 = vadd.f32 %v4179_v55, %v3783_v25  ;;  %v2929_v19 = vadd.f32 %v2668_v6, %v9615_v57  ;;  %v3307_v11 = vsel %vm3200_vm3, %v3304_v21, %v3306_v44 }
 0x284   : > { %v4817_v15 = vrot.slane %v4556_v58, 5  ;;  %v5457_v3 = vrot.slane %v5197_v59, 6  ;;  %v2275_v43 = vadd.f32 %v2016_v50, %v1634_v27  ;;  %v3309_v7 = vsel %vm3200_vm3, %v3306_v44, %v3308_v63 }
 0x285   : > { %v9740_v61 = vld [vmem:[#allocation2 + $0x168] ss:$2 sm:$0xff]  ;;  %v9742_v24 = vld [vmem:[#allocation2 + $0x169] ss:$2 sm:$0xff]  ;;  %v3569_v9 = vadd.f32 %v3307_v11, %v2928_v56  ;;  %v9749_v37 = vmul.f32 %v6806_v18, %v9704_v12  ;;  %v9759_v57 = vmul.f32 %v6809_v23, %v9704_v12  ;;  %v9763_v25 = vmul.f32 %v6814_v30, %v9704_v12 }
 0x286   : > { %v4818_v52 = vsel %vm4719_vm5, %v4815_v26, %v4817_v15  ;;  %v4820_v21 = vsel %vm4719_vm5, %v4817_v15, %v12698_v4  ;;  %v9765_v58 = vadd.f32 %v2018_v14, %v1635_v0  ;;  %v9769_v34 = vmul.f32 %v6818_v33, %v9704_v12  ;;  %v592_v26 = vpop.permute.xlu0 %591 }
 0x287   : > { %v5084_v17 = vadd.f32 %v4818_v52, %v4443_v62  ;;  %v5085_v44 = vadd.f32 %v4820_v21, %v4444_v38  ;;  %v9773_v27 = vadd.f32 %v3309_v7, %v2929_v19  ;;  %v12862_v6 = vrot.slane %v9577_v53, 6 }
 0x288   : > { %v5460_v50 = vsel %vm2559_vm2, %v5457_v3, %v12697_v40  ;;  %v9781_v20 = vadd.f32 %v3681_v49, %v3569_v9  ;;  %v1380_v14 = vrot.slane %v9749_v37, 1  ;;  %v2021_v62 = vrot.slane %v9759_v57, 2 }
 0x289   : > { %v5458_v56 = vsel %vm2559_vm2, %v12862_v6, %v5457_v3  ;;  %v5725_v0 = vadd.f32 %v5460_v50, %v5085_v44  ;;  %v2671_v38 = vrot.slane %v9763_v25, 6  ;;  %v9788_v19 = vmul.f32 %v6823_v36, %v9704_v12 }
 0x28a   : > { %v5724_v55 = vadd.f32 %v5458_v56, %v5084_v17  ;;  %v1108_v53 = vmul.f32 %v6806_v18, %v592_v26  ;;  %v12702_v49 = vrot.slane %v9769_v34, 7  ;;  %v9796_v3 = vmul.f32 %v6827_v41, %v9704_v12 }
 0x28b   : > { %v5837_v15 = vadd.f32 %v9442_v45, %v5725_v0  ;;  %v1749_v9 = vmul.f32 %v6809_v23, %v592_v26  ;;  %v2402_v52 = vmul.f32 %v6814_v30, %v592_v26  ;;  %v3043_v21 = vmul.f32 %v6818_v33, %v592_v26 }
 0x28c   : > { %v5836_v11 = vadd.f32 %v9442_v45, %v5724_v55  ;;  %v1378_v7 = vrot.slane %v1108_v53, 1  ;;  %v9803_v6 = vmul.f32 %v6829_v42, %v9704_v12  ;;  %v3917_v56 = vmul.f32 %v6823_v36, %v592_v26 }
 0x28d   : > { %v5942_v44 = vmax.f32 %v5837_v15, 0.0  ;;  %v12700_v50 = vrot.slane %v9788_v19, 4  ;;  %v2669_v53 = vrot.slane %v2402_v52, 6  ;;  %v2019_v15 = vrot.slane %v1749_v9, 2 }
 0x28e   : > { %v5941_v17 = vmax.f32 %v5836_v11, 0.0  ;;  %v1379_v55 = vsel %vm1262_vm0, %v1376_v48, %v1378_v7  ;;  %v1381_v0 = vsel %vm1262_vm0, %v1378_v7, %v1380_v14  ;;  %v886_v11 = vmul.f32 %v6812_v29, %v592_v26 }
 0x28f   : > { %6048 = vst.msk [vmem:[#allocation2 + $0x188] sm:$0xff] %vm5998_vm6, %v5942_v44  ;;  %v3310_v59 = vrot.slane %v3043_v21, 7  ;;  %v4180_v40 = vrot.slane %v3917_v56, 4  ;;  %v9818_v4 = vmul.f32 %v6821_v35, %v9704_v12  ;;  %v3785_v32 = vadd.f32 %v9582_v13, %v9657_v39 }
 0x290   : > { %6047 = vst.msk [vmem:[#allocation2 + $0x180] sm:$0xff] %vm5998_vm6, %v5941_v17  ;;  %v2670_v48 = vsel %vm2559_vm2, %v2667_v46, %v2669_v53  ;;  %v2672_v7 = vsel %vm2559_vm2, %v2669_v53, %v2671_v38  ;;  %v1636_v52 = vadd.f32 %v1379_v55, %v9662_v2  ;;  %v1637_v9 = vadd.f32 %v1381_v0, %v886_v11 }
 0x291   : > { %v2930_v21 = vadd.f32 %v2670_v48, %v9637_v47  ;;  %v2931_v17 = vadd.f32 %v2672_v7, %v2275_v43  ;;  %v12699_v12 = vrot.slane %v9796_v3, 5  ;;  %v12701_v44 = vrot.slane %v9803_v6, 6  ;;  %v607_v43 = vpop.permute.xlu1 %606 }
 0x292   : > { %v3311_v13 = vsel %vm3200_vm3, %v3308_v63, %v3310_v59  ;;  %v4181_v1 = vsel %vm4078_vm4, %v4178_v16, %v4180_v40  ;;  %v2020_v39 = vsel %vm1903_vm1, %v2017_v5, %v2019_v15  ;;  %v3683_v47 = vmul.f32 %v6821_v35, %v592_v26 }
 0x293   : > { %v3571_v2 = vadd.f32 %v3311_v13, %v2930_v21  ;;  %v4183_v46 = vsel %vm4078_vm4, %v4180_v40, %v12700_v50  ;;  %v2022_v54 = vsel %vm1903_vm1, %v2019_v15, %v2021_v62  ;;  %v3313_v60 = vsel %vm3200_vm3, %v3310_v59, %v12702_v49 }
 0x294   : > { %v4558_v28 = vmul.f32 %v6827_v41, %v592_v26  ;;  %v5199_v5 = vmul.f32 %v6829_v42, %v592_v26  ;;  %v9853_v63 = vadd.f32 %v2020_v39, %v1636_v52  ;;  %v9855_v16 = vadd.f32 %v2022_v54, %v1637_v9 }
 0x295   : > { %v9857_v56 = vadd.f32 %v3313_v60, %v2931_v17  ;;  %v4445_v40 = vadd.f32 %v4181_v1, %v9659_v10  ;;  %v4446_v53 = vadd.f32 %v4183_v46, %v3785_v32  ;;  %v9865_v11 = vmul.f32 %v6812_v29, %v607_v43  ;;  %v602_v17 = vpop.permute.xlu0 %601 }
 0x296   : > { %v9868_v59 = vmul.f32 %v6806_v18, %v607_v43  ;;  %v9871_v26 = vmul.f32 %v6809_v23, %v607_v43  ;;  %v9873_v15 = vadd.f32 %v3683_v47, %v3571_v2  ;;  %v4821_v48 = vrot.slane %v4558_v28, 5 }
 0x297   : > { %v9860_v55 = vld [vmem:[#allocation2 + $0x178] ss:$2 sm:$0x3f]  ;;  %v9862_v0 = vld [vmem:[#allocation2 + $0x179] ss:$2 sm:$0x3f]  ;;  %v9876_v10 = vmul.f32 %v6814_v30, %v607_v43  ;;  %v9879_v52 = vmul.f32 %v6818_v33, %v607_v43  ;;  %v9882_v32 = vmul.f32 %v6821_v35, %v607_v43  ;;  %v9885_v9 = vmul.f32 %v6823_v36, %v607_v43 }
 0x298   : > { %v5461_v7 = vrot.slane %v5199_v5, 6  ;;  %v9888_v21 = vmul.f32 %v6827_v41, %v607_v43  ;;  %v12863_v1 = vrot.slane %v9678_v31, 5  ;;  %v4824_v2 = vsel %vm4719_vm5, %v4821_v48, %v12699_v12 }
 0x299   : > { %v9899_v47 = vmul.f32 %v6829_v42, %v607_v43  ;;  %v5087_v54 = vadd.f32 %v4824_v2, %v4446_v53  ;;  %v1384_v60 = vrot.slane %v9868_v59, 1  ;;  %v12864_v5 = vrot.slane %v9681_v22, 6 }
 0x29a   : > { %v4822_v39 = vsel %vm4719_vm5, %v12863_v1, %v4821_v48  ;;  %v5464_v31 = vsel %vm2559_vm2, %v5461_v7, %v12701_v44  ;;  %v1110_v1 = vmul.f32 %v6806_v18, %v602_v17  ;;  %v1751_v48 = vmul.f32 %v6809_v23, %v602_v17 }
 0x29b   : > { %v5086_v46 = vadd.f32 %v4822_v39, %v4445_v40  ;;  %v5462_v13 = vsel %vm2559_vm2, %v12864_v5, %v5461_v7  ;;  %v5727_v12 = vadd.f32 %v5464_v31, %v5087_v54  ;;  %v2404_v40 = vmul.f32 %v6814_v30, %v602_v17 }
 0x29c   : > { %v3045_v53 = vmul.f32 %v6818_v33, %v602_v17  ;;  %v2675_v39 = vrot.slane %v9876_v10, 6  ;;  %v4186_v2 = vrot.slane %v9885_v9, 4  ;;  %v1382_v5 = vrot.slane %v1110_v1, 1 }
 0x29d   : > { %v5726_v43 = vadd.f32 %v5462_v13, %v5086_v46  ;;  %v5839_v7 = vadd.f32 %v9442_v45, %v5727_v12  ;;  %v2023_v44 = vrot.slane %v1751_v48, 2  ;;  %v2673_v49 = vrot.slane %v2404_v40, 6 }
 0x29e   : > { %v4827_v13 = vrot.slane %v9888_v21, 5  ;;  %v12705_v46 = vrot.slane %v9899_v47, 6  ;;  %v1383_v54 = vsel %vm1262_vm0, %v1380_v14, %v1382_v5  ;;  %v3919_v31 = vmul.f32 %v6823_v36, %v602_v17 }
 0x29f   : > { %v5838_v50 = vadd.f32 %v9442_v45, %v5726_v43  ;;  %v5944_v28 = vmax.f32 %v5839_v7, 0.0  ;;  %v3787_v1 = vadd.f32 %v9686_v8, %v9773_v27  ;;  %v3314_v43 = vrot.slane %v3045_v53, 7  ;;  %v617_v7 = vpop.permute.xlu1 %616 }
 0x2a0   : > { %v888_v12 = vmul.f32 %v6812_v29, %v602_v17  ;;  %v1385_v48 = vsel %vm1262_vm0, %v1382_v5, %v1384_v60  ;;  %v2674_v37 = vsel %vm2559_vm2, %v2671_v38, %v2673_v49  ;;  %v2676_v14 = vsel %vm2559_vm2, %v2673_v49, %v2675_v39 }
 0x2a1   : > { %v5943_v22 = vmax.f32 %v5838_v50, 0.0  ;;  %6050 = vst.msk [vmem:[#allocation2 + $0x198] sm:$0xff] %vm5998_vm6, %v5944_v28  ;;  %v1638_v8 = vadd.f32 %v1383_v54, %v9730_v51  ;;  %v2024_v27 = vsel %vm1903_vm1, %v2021_v62, %v2023_v44  ;;  %v2932_v50 = vadd.f32 %v2674_v37, %v9765_v58 }
 0x2a2   : > { %v3685_v25 = vmul.f32 %v6821_v35, %v602_v17  ;;  %v12865_v38 = vrot.slane %v9871_v26, 2  ;;  %v4184_v53 = vrot.slane %v3919_v31, 4  ;;  %v4560_v49 = vmul.f32 %v6827_v41, %v602_v17 }
 0x2a3   : > { %6049 = vst.msk [vmem:[#allocation2 + $0x190] sm:$0xff] %vm5998_vm6, %v5943_v22  ;;  %v5201_v22 = vmul.f32 %v6829_v42, %v602_v17  ;;  %v1639_v28 = vadd.f32 %v1385_v48, %v888_v12  ;;  %v2933_v51 = vadd.f32 %v2676_v14, %v9853_v63  ;;  %v12866_v57 = vrot.slane %v9769_v34, 7 }
 0x2a4   : > { %v2026_v40 = vsel %vm1903_vm1, %v2023_v44, %v12865_v38  ;;  %v12867_v58 = vrot.slane %v9879_v52, 7  ;;  %v12868_v54 = vrot.slane %v9788_v19, 4  ;;  %v4187_v17 = vsel %vm4078_vm4, %v4184_v53, %v4186_v2 }
 0x2a5   : > { %v3315_v62 = vsel %vm3200_vm3, %v12866_v57, %v3314_v43  ;;  %v4825_v31 = vrot.slane %v4560_v49, 5  ;;  %v5465_v12 = vrot.slane %v5201_v22, 6  ;;  %v9962_v63 = vadd.f32 %v2024_v27, %v1638_v8 }
 0x2a6   : > { %v3317_v5 = vsel %vm3200_vm3, %v3314_v43, %v12867_v58  ;;  %v4185_v44 = vsel %vm4078_vm4, %v12868_v54, %v4184_v53  ;;  %v3573_v34 = vadd.f32 %v3315_v62, %v2932_v50  ;;  %v4448_v37 = vadd.f32 %v4187_v17, %v3787_v1  ;;  %v612_v17 = vpop.permute.xlu0 %611 }
 0x2a7   : > { %v4447_v48 = vadd.f32 %v4185_v44, %v9781_v20  ;;  %v12869_v14 = vrot.slane %v9796_v3, 5  ;;  %v4828_v19 = vsel %vm4719_vm5, %v4825_v31, %v4827_v13  ;;  %v9972_v38 = vmul.f32 %v6806_v18, %v617_v7 }
 0x2a8   : > { %v9975_v53 = vmul.f32 %v6809_v23, %v617_v7  ;;  %v9977_v8 = vadd.f32 %v2026_v40, %v1639_v28  ;;  %v5089_v50 = vadd.f32 %v4828_v19, %v4448_v37  ;;  %v9980_v20 = vmul.f32 %v6812_v29, %v617_v7 }
 0x2a9   : > { %v4826_v43 = vsel %vm4719_vm5, %v12869_v14, %v4825_v31  ;;  %v9982_v49 = vadd.f32 %v3317_v5, %v2933_v51  ;;  %v12870_v22 = vrot.slane %v9803_v6, 6  ;;  %v5468_v62 = vsel %vm2559_vm2, %v5465_v12, %v12705_v46  ;;  %v627_v46 = vpop.permute.xlu1 %626 }
 0x2aa   : > { %v5088_v27 = vadd.f32 %v4826_v43, %v4447_v48  ;;  %v6262_v3 = vld [vmem:[#allocation2 + $0x186] ss:$2 sm:$0xff]  ;;  %v6266_v1 = vld [vmem:[#allocation2 + $0x187] ss:$2 sm:$0xff]  ;;  %v9991_v40 = vmul.f32 %v6814_v30, %v617_v7  ;;  %v9993_v58 = vadd.f32 %v3685_v25, %v3573_v34  ;;  %v5729_v44 = vadd.f32 %v5468_v62, %v5089_v50 }
 0x2ab   : > { %v5466_v57 = vsel %vm2559_vm2, %v12870_v22, %v5465_v12  ;;  %v6271_v28 = vmax.f32 %v6262_v3, %v6266_v1  ;;  %v12704_v51 = vrot.slane %v9972_v38, 1  ;;  %v2029_v6 = vrot.slane %v9975_v53, 2 }
 0x2ac   : > { %v5728_v54 = vadd.f32 %v5466_v57, %v5088_v27  ;;  %v9998_v5 = vmul.f32 %v6818_v33, %v617_v7  ;;  %v10001_v31 = vmul.f32 %v6823_v36, %v617_v7  ;;  %v12871_v12 = vmax.f32 %v9740_v61, %v9742_v24 }
 0x2ad   : > { %v5841_v34 = vadd.f32 %v9442_v45, %v5729_v44  ;;  %v10009_v37 = vmul.f32 %v6821_v35, %v617_v7  ;;  %v12703_v14 = vrot.slane %v9991_v40, 6  ;;  %v10013_v43 = vmul.f32 %v6827_v41, %v617_v7 }
 0x2ae   : > { %v6273_v48 = vmax.f32 %v12871_v12, %v6271_v28  ;;  %v5840_v25 = vadd.f32 %v9442_v45, %v5728_v54  ;;  %v1112_v19 = vmul.f32 %v6806_v18, %v612_v17  ;;  %v1753_v27 = vmul.f32 %v6809_v23, %v612_v17 }
 0x2af   : > { %v5946_v24 = vmax.f32 %v5841_v34, 0.0  ;;  %v2406_v50 = vmul.f32 %v6814_v30, %v612_v17  ;;  %v3047_v3 = vmul.f32 %v6818_v33, %v612_v17  ;;  %v3320_v1 = vrot.slane %v9998_v5, 7 }
 0x2b0   : > { %6548 = vst.msk [vmem:[%s7456_s28 + $0x60] sm:$0xff] %vm5998_vm6, %v6273_v48  ;;  %v5945_v61 = vmax.f32 %v5840_v25, 0.0  ;;  %v4190_v22 = vrot.slane %v10001_v31, 4  ;;  %v10024_v57 = vmul.f32 %v6829_v42, %v617_v7  ;;  %v1386_v62 = vrot.slane %v1112_v19, 1 }
 0x2b1   : > { %6052 = vst.msk [vmem:[#allocation2 + $0x1a8] sm:$0xff] %vm5998_vm6, %v5946_v24  ;;  %v2027_v28 = vrot.slane %v1753_v27, 2  ;;  %v2677_v54 = vrot.slane %v2406_v50, 6  ;;  %v3921_v44 = vmul.f32 %v6823_v36, %v612_v17  ;;  %v4562_v12 = vmul.f32 %v6827_v41, %v612_v17 }
 0x2b2   : > { %6051 = vst.msk [vmem:[#allocation2 + $0x1a0] sm:$0xff] %vm5998_vm6, %v5945_v61  ;;  %v4831_v48 = vrot.slane %v10013_v43, 5  ;;  %v3789_v25 = vadd.f32 %v9818_v4, %v9857_v56  ;;  %v3318_v34 = vrot.slane %v3047_v3, 7  ;;  %v5203_v7 = vmul.f32 %v6829_v42, %v612_v17 }
 0x2b3   : > { %v1387_v19 = vsel %vm1262_vm0, %v1384_v60, %v1386_v62  ;;  %v1389_v27 = vsel %vm1262_vm0, %v1386_v62, %v12704_v51  ;;  %v2678_v61 = vsel %vm2559_vm2, %v2675_v39, %v2677_v54  ;;  %v2680_v24 = vsel %vm2559_vm2, %v2677_v54, %v12703_v14 }
 0x2b4   : > { %v890_v56 = vmul.f32 %v6812_v29, %v612_v17  ;;  %v2934_v59 = vadd.f32 %v2678_v61, %v9855_v16  ;;  %v3687_v60 = vmul.f32 %v6821_v35, %v612_v17  ;;  %v12872_v50 = vrot.slane %v9871_v26, 2 }
 0x2b5   : > { %v2030_v10 = vsel %vm1903_vm1, %v2027_v28, %v2029_v6  ;;  %v4188_v39 = vrot.slane %v3921_v44, 4  ;;  %v4829_v62 = vrot.slane %v4562_v12, 5  ;;  %v1640_v54 = vadd.f32 %v1387_v19, %v9865_v11 }
 0x2b6   : > { %v2028_v3 = vsel %vm1903_vm1, %v12872_v50, %v2027_v28  ;;  %v1641_v14 = vadd.f32 %v1389_v27, %v890_v56  ;;  %v2935_v51 = vadd.f32 %v2680_v24, %v9962_v63  ;;  %v5469_v4 = vrot.slane %v5203_v7, 6 }
 0x2b7   : > { %v12873_v16 = vrot.slane %v9879_v52, 7  ;;  %v3321_v26 = vsel %vm3200_vm3, %v3318_v34, %v3320_v1  ;;  %v4189_v28 = vsel %vm4078_vm4, %v4186_v2, %v4188_v39  ;;  %v4191_v11 = vsel %vm4078_vm4, %v4188_v39, %v4190_v22 }
 0x2b8   : > { %v4449_v7 = vadd.f32 %v4189_v28, %v9873_v15  ;;  %v4450_v52 = vadd.f32 %v4191_v11, %v3789_v25  ;;  %v4830_v19 = vsel %vm4719_vm5, %v4827_v13, %v4829_v62  ;;  %v4832_v9 = vsel %vm4719_vm5, %v4829_v62, %v4831_v48 }
 0x2b9   : > { %v3319_v17 = vsel %vm3200_vm3, %v12873_v16, %v3318_v34  ;;  %v6264_v44 = vld [vmem:[#allocation2 + $0x196] ss:$2 sm:$0x3f]  ;;  %v6268_v63 = vld [vmem:[#allocation2 + $0x197] ss:$2 sm:$0x3f]  ;;  %v10078_v2 = vmul.f32 %v6806_v18, %v627_v46  ;;  %v10081_v34 = vmul.f32 %v6809_v23, %v627_v46  ;;  %v2281_v61 = vadd.f32 %v2028_v3, %v1640_v54  ;;  %v622_v3 = vpop.permute.xlu0 %621 }
 0x2ba   : > { %v3575_v12 = vadd.f32 %v3319_v17, %v2934_v59  ;;  %v6272_v27 = vmax.f32 %v6264_v44, %v6268_v63  ;;  %v5090_v24 = vadd.f32 %v4830_v19, %v4449_v7  ;;  %v5091_v15 = vadd.f32 %v4832_v9, %v4450_v52 }
 0x2bb   : > { %v12874_v25 = vrot.slane %v9899_v47, 6  ;;  %v12875_v13 = vmax.f32 %v9860_v55, %v9862_v0  ;;  %v12876_v59 = vrot.slane %v10024_v57, 6  ;;  %v10093_v39 = vmul.f32 %v6814_v30, %v627_v46 }
 0x2bc   : > { %v10096_v62 = vmul.f32 %v6818_v33, %v627_v46  ;;  %v10098_v54 = vadd.f32 %v2030_v10, %v1641_v14  ;;  %v10100_v47 = vadd.f32 %v3321_v26, %v2935_v51  ;;  %v10104_v55 = vadd.f32 %v3687_v60, %v3575_v12 }
 0x2bd   : > { %v5470_v21 = vsel %vm2559_vm2, %v12874_v25, %v5469_v4  ;;  %v6274_v56 = vmax.f32 %v12875_v13, %v6272_v27  ;;  %v5472_v50 = vsel %vm2559_vm2, %v5469_v4, %v12876_v59  ;;  %v10107_v0 = vmul.f32 %v6812_v29, %v627_v46 }
 0x2be   : > { %v5730_v16 = vadd.f32 %v5470_v21, %v5090_v24  ;;  %v5731_v17 = vadd.f32 %v5472_v50, %v5091_v15  ;;  %v1392_v4 = vrot.slane %v10078_v2, 1  ;;  %v2033_v28 = vrot.slane %v10081_v34, 2 }
 0x2bf   : > { %6549 = vst.msk [vmem:[%s7456_s28 + $0x68] sm:$0x3f] %vm6126_vm7, %v6274_v56  ;;  %v10114_v51 = vmul.f32 %v6823_v36, %v627_v46  ;;  %v1114_v10 = vmul.f32 %v6806_v18, %v622_v3  ;;  %v2683_v26 = vrot.slane %v10093_v39, 6  ;;  %v3324_v60 = vrot.slane %v10096_v62, 7 }
 0x2c0   : > { %v5842_v11 = vadd.f32 %v9442_v45, %v5730_v16  ;;  %v5843_v14 = vadd.f32 %v9442_v45, %v5731_v17  ;;  %v10120_v44 = vmul.f32 %v6821_v35, %v627_v46  ;;  %v1755_v63 = vmul.f32 %v6809_v23, %v622_v3 }
 0x2c1   : > { %v1390_v52 = vrot.slane %v1114_v10, 1  ;;  %v2408_v19 = vmul.f32 %v6814_v30, %v622_v3  ;;  %v10125_v45 = vmul.f32 %v6827_v41, %v627_v46  ;;  %v10128_v27 = vmul.f32 %v6829_v42, %v627_v46 }
 0x2c2   : > { %v5947_v12 = vmax.f32 %v5842_v11, 0.0  ;;  %v5948_v7 = vmax.f32 %v5843_v14, 0.0  ;;  %v3049_v9 = vmul.f32 %v6818_v33, %v622_v3  ;;  %v3923_v24 = vmul.f32 %v6823_v36, %v622_v3 }
 0x2c3   : > { %v4194_v15 = vrot.slane %v10114_v51, 4  ;;  %v12877_v25 = vrot.slane %v9972_v38, 1  ;;  %v1393_v13 = vsel %vm1262_vm0, %v1390_v52, %v1392_v4  ;;  %v2681_v46 = vrot.slane %v2408_v19, 6 }
 0x2c4   : > { %6053 = vst.msk [vmem:[#allocation2 + $0x1b0] sm:$0xff] %vm5998_vm6, %v5947_v12  ;;  %6054 = vst.msk [vmem:[#allocation2 + $0x1b8] sm:$0xff] %vm5998_vm6, %v5948_v7  ;;  %v3791_v56 = vadd.f32 %v9882_v32, %v9982_v49  ;;  %v892_v59 = vmul.f32 %v6812_v29, %v622_v3  ;;  %v2031_v50 = vrot.slane %v1755_v63, 2  ;;  %v4564_v16 = vmul.f32 %v6827_v41, %v622_v3 }
 0x2c5   : > { %v1391_v21 = vsel %vm1262_vm0, %v12877_v25, %v1390_v52  ;;  %v12878_v17 = vrot.slane %v9991_v40, 6  ;;  %v2684_v38 = vsel %vm2559_vm2, %v2681_v46, %v2683_v26  ;;  %v3322_v14 = vrot.slane %v3049_v9, 7  ;;  %v637_v25 = vpop.permute.xlu1 %636 }
 0x2c6   : > { %v4192_v10 = vrot.slane %v3923_v24, 4  ;;  %v12707_v12 = vrot.slane %v10125_v45, 5  ;;  %v1642_v7 = vadd.f32 %v1391_v21, %v9980_v20  ;;  %v1643_v32 = vadd.f32 %v1393_v13, %v892_v59 }
 0x2c7   : > { %v2682_v11 = vsel %vm2559_vm2, %v12878_v17, %v2681_v46  ;;  %v12706_v63 = vrot.slane %v10128_v27, 6  ;;  %v3689_v52 = vmul.f32 %v6821_v35, %v622_v3  ;;  %v2032_v9 = vsel %vm1903_vm1, %v2029_v6, %v2031_v50 }
 0x2c8   : > { %v2936_v49 = vadd.f32 %v2682_v11, %v9977_v8  ;;  %v4193_v40 = vsel %vm4078_vm4, %v4190_v22, %v4192_v10  ;;  %v4195_v19 = vsel %vm4078_vm4, %v4192_v10, %v4194_v15  ;;  %v2937_v20 = vadd.f32 %v2684_v38, %v2281_v61 }
 0x2c9   : > { %v4451_v24 = vadd.f32 %v4193_v40, %v9993_v58  ;;  %v4452_v8 = vadd.f32 %v4195_v19, %v3791_v56  ;;  %v2034_v21 = vsel %vm1903_vm1, %v2031_v50, %v2033_v28  ;;  %v3323_v31 = vsel %vm3200_vm3, %v3320_v1, %v3322_v14 }
 0x2ca   : > { %v4833_v22 = vrot.slane %v4564_v16, 5  ;;  %v5205_v13 = vmul.f32 %v6829_v42, %v622_v3  ;;  %v10173_v46 = vadd.f32 %v2032_v9, %v1642_v7  ;;  %v10175_v53 = vadd.f32 %v2034_v21, %v1643_v32 }
 0x2cb   : > { %v3325_v58 = vsel %vm3200_vm3, %v3322_v14, %v3324_v60  ;;  %v3577_v6 = vadd.f32 %v3323_v31, %v2936_v49  ;;  %v10180_v61 = vld [vmem:[#allocation2 + $0x1a4] ss:$2 sm:$0xff]  ;;  %v10182_v56 = vld [vmem:[#allocation2 + $0x1b4] ss:$2 sm:$0x3f]  ;;  %v10191_v59 = vmul.f32 %v6806_v18, %v637_v25  ;;  %v10200_v43 = vmul.f32 %v6812_v29, %v637_v25  ;;  %v632_v49 = vpop.permute.xlu0 %631 }
 0x2cc   : > { %v4834_v5 = vsel %vm4719_vm5, %v4831_v48, %v4833_v22  ;;  %v4836_v1 = vsel %vm4719_vm5, %v4833_v22, %v12707_v12  ;;  %v5473_v3 = vrot.slane %v5205_v13, 6  ;;  %v10193_v50 = vld [vmem:[#allocation2 + $0x1a5] ss:$2 sm:$0xff]  ;;  %v10195_v16 = vld [vmem:[#allocation2 + $0x1b5] ss:$2 sm:$0x3f]  ;;  %v10197_v17 = vadd.f32 %v3325_v58, %v2937_v20 }
 0x2cd   : > { %v5092_v11 = vadd.f32 %v4834_v5, %v4451_v24  ;;  %v5093_v38 = vadd.f32 %v4836_v1, %v4452_v8  ;;  %v12879_v48 = vrot.slane %v10024_v57, 6  ;;  %v10209_v7 = vmul.f32 %v6809_v23, %v637_v25  ;;  %v10227_v31 = vld [vmem:[#allocation3] ss:$0 sm:$0xff] }
 0x2ce   : > { %v5476_v10 = vsel %vm2559_vm2, %v5473_v3, %v12706_v63  ;;  %v10212_v32 = vmul.f32 %v6814_v30, %v637_v25  ;;  %v10214_v40 = vadd.f32 %v3689_v52, %v3577_v6  ;;  %v10217_v20 = vmul.f32 %v6818_v33, %v637_v25 }
 0x2cf   : > { %v5474_v14 = vsel %vm2559_vm2, %v12879_v48, %v5473_v3  ;;  %v5733_v9 = vadd.f32 %v5476_v10, %v5093_v38  ;;  %v1396_v8 = vrot.slane %v10191_v59, 1  ;;  %v10225_v21 = vmul.f32 %v6821_v35, %v637_v25 }
 0x2d0   : > { %v5732_v19 = vadd.f32 %v5474_v14, %v5092_v11  ;;  %v10232_v13 = vmul.f32 %v6823_v36, %v637_v25  ;;  %v1116_v58 = vmul.f32 %v6806_v18, %v632_v49  ;;  %v2037_v6 = vrot.slane %v10209_v7, 2 }
 0x2d1   : > { %v5845_v22 = vadd.f32 %v10227_v31, %v5733_v9  ;;  %v2687_v5 = vrot.slane %v10212_v32, 6  ;;  %v10238_v1 = vmul.f32 %v6827_v41, %v637_v25  ;;  %v1757_v3 = vmul.f32 %v6809_v23, %v632_v49 }
 0x2d2   : > { %v5844_v52 = vadd.f32 %v10227_v31, %v5732_v19  ;;  %v1394_v48 = vrot.slane %v1116_v58, 1  ;;  %v2410_v14 = vmul.f32 %v6814_v30, %v632_v49  ;;  %v10244_v19 = vmul.f32 %v6829_v42, %v637_v25 }
 0x2d3   : > { %v5950_v38 = vmax.f32 %v5845_v22, 0.0  ;;  %v3051_v9 = vmul.f32 %v6818_v33, %v632_v49  ;;  %v3925_v24 = vmul.f32 %v6823_v36, %v632_v49  ;;  %v4198_v57 = vrot.slane %v10232_v13, 4 }
 0x2d4   : > { %v5949_v11 = vmax.f32 %v5844_v52, 0.0  ;;  %v3793_v52 = vadd.f32 %v10009_v37, %v10100_v47  ;;  %v1395_v22 = vsel %vm1262_vm0, %v1392_v4, %v1394_v48  ;;  %v2685_v58 = vrot.slane %v2410_v14, 6 }
 0x2d5   : > { %6056 = vst.msk [vmem:[#allocation2 + $0x1c8] sm:$0xff] %vm5998_vm6, %v5950_v38  ;;  %v894_v63 = vmul.f32 %v6812_v29, %v632_v49  ;;  %v2035_v10 = vrot.slane %v1757_v3, 2  ;;  %v3326_v12 = vrot.slane %v3051_v9, 7  ;;  %v4196_v37 = vrot.slane %v3925_v24, 4  ;;  %v647_v24 = vpop.permute.xlu1 %646 }
 0x2d6   : > { %6055 = vst.msk [vmem:[#allocation2 + $0x1c0] sm:$0xff] %vm5998_vm6, %v5949_v11  ;;  %v1397_v11 = vsel %vm1262_vm0, %v1394_v48, %v1396_v8  ;;  %v2686_v38 = vsel %vm2559_vm2, %v2683_v26, %v2685_v58  ;;  %v4566_v2 = vmul.f32 %v6827_v41, %v632_v49  ;;  %v5479_v47 = vrot.slane %v10244_v19, 6 }
 0x2d7   : > { %v1644_v4 = vadd.f32 %v1395_v22, %v10107_v0  ;;  %v2688_v14 = vsel %vm2559_vm2, %v2685_v58, %v2687_v5  ;;  %v2938_v25 = vadd.f32 %v2686_v38, %v10098_v54  ;;  %v1645_v48 = vadd.f32 %v1397_v11, %v894_v63 }
 0x2d8   : > { %v3691_v3 = vmul.f32 %v6821_v35, %v632_v49  ;;  %v4197_v39 = vsel %vm4078_vm4, %v4194_v15, %v4196_v37  ;;  %v4199_v26 = vsel %vm4078_vm4, %v4196_v37, %v4198_v57  ;;  %v2036_v0 = vsel %vm1903_vm1, %v2033_v28, %v2035_v10 }
 0x2d9   : > { %v2038_v54 = vsel %vm1903_vm1, %v2035_v10, %v2037_v6  ;;  %v4453_v63 = vadd.f32 %v4197_v39, %v10104_v55  ;;  %v4454_v9 = vadd.f32 %v4199_v26, %v3793_v52  ;;  %v2939_v51 = vadd.f32 %v2688_v14, %v10173_v46 }
 0x2da   : > { %v3327_v15 = vsel %vm3200_vm3, %v3324_v60, %v3326_v12  ;;  %v4837_v22 = vrot.slane %v4566_v2, 5  ;;  %v5207_v58 = vmul.f32 %v6829_v42, %v632_v49  ;;  %v10290_v11 = vadd.f32 %v2036_v0, %v1644_v4 }
 0x2db   : > { %v3579_v34 = vadd.f32 %v3327_v15, %v2938_v25  ;;  %v10293_v28 = vmul.f32 %v6806_v18, %v647_v24  ;;  %v10296_v10 = vmul.f32 %v6809_v23, %v647_v24  ;;  %v12880_v55 = vrot.slane %v10125_v45, 5  ;;  %v642_v45 = vpop.permute.xlu0 %641 }
 0x2dc   : > { %v12881_v62 = vrot.slane %v10238_v1, 5  ;;  %v5477_v52 = vrot.slane %v5207_v58, 6  ;;  %v10305_v49 = vmul.f32 %v6814_v30, %v647_v24  ;;  %v12882_v25 = vrot.slane %v10217_v20, 7 }
 0x2dd   : > { %v4838_v46 = vsel %vm4719_vm5, %v12880_v55, %v4837_v22  ;;  %v10311_v4 = vmul.f32 %v6818_v33, %v647_v24  ;;  %v10313_v14 = vadd.f32 %v2038_v54, %v1645_v48  ;;  %v12883_v26 = vrot.slane %v10128_v27, 6 }
 0x2de   : > { %v4840_v60 = vsel %vm4719_vm5, %v4837_v22, %v12881_v62  ;;  %v3329_v38 = vsel %vm3200_vm3, %v3326_v12, %v12882_v25  ;;  %v5094_v37 = vadd.f32 %v4838_v46, %v4453_v63  ;;  %v5480_v15 = vsel %vm2559_vm2, %v5477_v52, %v5479_v47 }
 0x2df   : > { %v5095_v2 = vadd.f32 %v4840_v60, %v4454_v9  ;;  %v10315_v39 = vadd.f32 %v3329_v38, %v2939_v51  ;;  %v5478_v0 = vsel %vm2559_vm2, %v12883_v26, %v5477_v52  ;;  %v10323_v22 = vadd.f32 %v3691_v3, %v3579_v34 }
 0x2e0   : > { %v5734_v12 = vadd.f32 %v5478_v0, %v5094_v37  ;;  %v10326_v9 = vmul.f32 %v6812_v29, %v647_v24  ;;  %v12708_v48 = vrot.slane %v10293_v28, 1  ;;  %v2041_v54 = vrot.slane %v10296_v10, 2 }
 0x2e1   : > { %v5735_v63 = vadd.f32 %v5480_v15, %v5095_v2  ;;  %v2691_v51 = vrot.slane %v10305_v49, 6  ;;  %v1118_v27 = vmul.f32 %v6806_v18, %v642_v45  ;;  %v3332_v3 = vrot.slane %v10311_v4, 7 }
 0x2e2   : > { %v5846_v58 = vadd.f32 %v10227_v31, %v5734_v12  ;;  %v10336_v34 = vmul.f32 %v6823_v36, %v647_v24  ;;  %v10339_v46 = vmul.f32 %v6827_v41, %v647_v24  ;;  %v1759_v60 = vmul.f32 %v6809_v23, %v642_v45 }
 0x2e3   : > { %v5847_v55 = vadd.f32 %v10227_v31, %v5735_v63  ;;  %v1398_v62 = vrot.slane %v1118_v27, 1  ;;  %v2412_v52 = vmul.f32 %v6814_v30, %v642_v45  ;;  %v10344_v37 = vmul.f32 %v6829_v42, %v647_v24 }
 0x2e4   : > { %v5951_v25 = vmax.f32 %v5846_v58, 0.0  ;;  %v3053_v2 = vmul.f32 %v6818_v33, %v642_v45  ;;  %v10348_v26 = vmul.f32 %v6821_v35, %v647_v24  ;;  %v2039_v15 = vrot.slane %v1759_v60, 2 }
 0x2e5   : > { %v5952_v38 = vmax.f32 %v5847_v55, 0.0  ;;  %v1399_v0 = vsel %vm1262_vm0, %v1396_v8, %v1398_v62  ;;  %v2689_v12 = vrot.slane %v2412_v52, 6  ;;  %v3795_v63 = vadd.f32 %v10120_v44, %v10197_v17 }
 0x2e6   : > { %6057 = vst.msk [vmem:[#allocation2 + $0x1d0] sm:$0xff] %vm5998_vm6, %v5951_v25  ;;  %v896_v27 = vmul.f32 %v6812_v29, %v642_v45  ;;  %v1646_v58 = vadd.f32 %v1399_v0, %v10200_v43  ;;  %v3927_v24 = vmul.f32 %v6823_v36, %v642_v45  ;;  %v4202_v55 = vrot.slane %v10336_v34, 4 }
 0x2e7   : > { %6058 = vst.msk [vmem:[#allocation2 + $0x1d8] sm:$0xff] %vm5998_vm6, %v5952_v38  ;;  %v4843_v59 = vrot.slane %v10339_v46, 5  ;;  %v1401_v8 = vsel %vm1262_vm0, %v1398_v62, %v12708_v48  ;;  %v2690_v60 = vsel %vm2559_vm2, %v2687_v5, %v2689_v12  ;;  %v12709_v44 = vrot.slane %v10344_v37, 6 }
 0x2e8   : > { %v2692_v17 = vsel %vm2559_vm2, %v2689_v12, %v2691_v51  ;;  %v3330_v43 = vrot.slane %v3053_v2, 7  ;;  %v3693_v52 = vmul.f32 %v6821_v35, %v642_v45  ;;  %v2040_v25 = vsel %vm1903_vm1, %v2037_v6, %v2039_v15 }
 0x2e9   : > { %v2940_v38 = vadd.f32 %v2690_v60, %v10175_v53  ;;  %v4200_v62 = vrot.slane %v3927_v24, 4  ;;  %v4568_v32 = vmul.f32 %v6827_v41, %v642_v45  ;;  %v1647_v0 = vadd.f32 %v1401_v8, %v896_v27  ;;  %v657_v27 = vpop.permute.xlu1 %656 }
 0x2ea   : > { %v2042_v5 = vsel %vm1903_vm1, %v2039_v15, %v2041_v54  ;;  %v10381_v48 = vadd.f32 %v2040_v25, %v1646_v58  ;;  %v5209_v2 = vmul.f32 %v6829_v42, %v642_v45  ;;  %v2941_v12 = vadd.f32 %v2692_v17, %v10290_v11 }
 0x2eb   : > { %v4201_v7 = vsel %vm4078_vm4, %v4198_v57, %v4200_v62  ;;  %v4203_v53 = vsel %vm4078_vm4, %v4200_v62, %v4202_v55  ;;  %v4841_v6 = vrot.slane %v4568_v32, 5  ;;  %v12884_v24 = vrot.slane %v10217_v20, 7 }
 0x2ec   : > { %v4455_v58 = vadd.f32 %v4201_v7, %v10214_v40  ;;  %v4456_v8 = vadd.f32 %v4203_v53, %v3795_v63  ;;  %v5481_v45 = vrot.slane %v5209_v2, 6  ;;  %v3333_v57 = vsel %vm3200_vm3, %v3330_v43, %v3332_v3 }
 0x2ed   : > { %v3331_v15 = vsel %vm3200_vm3, %v12884_v24, %v3330_v43  ;;  %v6287_v60 = vld [vmem:[#allocation2 + $0x1c2] ss:$2 sm:$0xff]  ;;  %v12885_v17 = vrot.slane %v10238_v1, 5  ;;  %v4844_v20 = vsel %vm4719_vm5, %v4841_v6, %v4843_v59  ;;  %v6291_v62 = vld [vmem:[#allocation2 + $0x1c3] ss:$2 sm:$0xff]  ;;  %v10405_v2 = vmul.f32 %v6806_v18, %v657_v27 }
 0x2ee   : > { %v6289_v11 = vld [vmem:[#allocation2 + $0x1d2] ss:$2 sm:$0x3f]  ;;  %v3581_v13 = vadd.f32 %v3331_v15, %v2940_v38  ;;  %v6293_v32 = vld [vmem:[#allocation2 + $0x1d3] ss:$2 sm:$0x3f]  ;;  %v5097_v63 = vadd.f32 %v4844_v20, %v4456_v8  ;;  %v10408_v7 = vmul.f32 %v6809_v23, %v657_v27  ;;  %v6296_v43 = vmax.f32 %v6287_v60, %v6291_v62 }
 0x2ef   : > { %v4842_v25 = vsel %vm4719_vm5, %v12885_v17, %v4841_v6  ;;  %v6297_v38 = vmax.f32 %v6289_v11, %v6293_v32  ;;  %v5482_v1 = vsel %vm2559_vm2, %v5479_v47, %v5481_v45  ;;  %v5484_v53 = vsel %vm2559_vm2, %v5481_v45, %v12709_v44  ;;  %v652_v45 = vpop.permute.xlu0 %651 }
 0x2f0   : > { %v5096_v40 = vadd.f32 %v4842_v25, %v4455_v58  ;;  %v10416_v6 = vadd.f32 %v2042_v5, %v1647_v0  ;;  %v10418_v24 = vadd.f32 %v3333_v57, %v2941_v12  ;;  %v5737_v58 = vadd.f32 %v5484_v53, %v5097_v63 }
 0x2f1   : > { %v12886_v8 = vmax.f32 %v10180_v61, %v10193_v50  ;;  %v12887_v19 = vmax.f32 %v10182_v56, %v10195_v16  ;;  %v10426_v47 = vadd.f32 %v3693_v52, %v3581_v13  ;;  %v10429_v17 = vmul.f32 %v6812_v29, %v657_v27 }
 0x2f2   : > { %v5736_v15 = vadd.f32 %v5482_v1, %v5096_v40  ;;  %v5849_v5 = vadd.f32 %v10227_v31, %v5737_v58  ;;  %v1404_v12 = vrot.slane %v10405_v2, 1  ;;  %v10435_v57 = vmul.f32 %v6814_v30, %v657_v27 }
 0x2f3   : > { %v6298_v60 = vmax.f32 %v12886_v8, %v6296_v43  ;;  %v6299_v11 = vmax.f32 %v12887_v19, %v6297_v38  ;;  %v2045_v61 = vrot.slane %v10408_v7, 2  ;;  %v10443_v56 = vmul.f32 %v6818_v33, %v657_v27 }
 0x2f4   : > { %v5848_v0 = vadd.f32 %v10227_v31, %v5736_v15  ;;  %v10446_v50 = vmul.f32 %v6821_v35, %v657_v27  ;;  %v10449_v16 = vmul.f32 %v6823_v36, %v657_v27  ;;  %v5954_v13 = vmax.f32 %v5849_v5, 0.0 }
 0x2f5   : > { %6550 = vst.msk [vmem:[%s7456_s28 + $0x70] sm:$0xff] %vm5998_vm6, %v6298_v60  ;;  %v10452_v25 = vmul.f32 %v6827_v41, %v657_v27  ;;  %v1120_v20 = vmul.f32 %v6806_v18, %v652_v45  ;;  %v10456_v62 = vmul.f32 %v6829_v42, %v657_v27  ;;  %v1761_v32 = vmul.f32 %v6809_v23, %v652_v45 }
 0x2f6   : > { %6551 = vst.msk [vmem:[%s7456_s28 + $0x78] sm:$0x3f] %vm6126_vm7, %v6299_v11  ;;  %v5953_v52 = vmax.f32 %v5848_v0, 0.0  ;;  %v2414_v40 = vmul.f32 %v6814_v30, %v652_v45  ;;  %v3055_v63 = vmul.f32 %v6818_v33, %v652_v45  ;;  %v2695_v43 = vrot.slane %v10435_v57, 6 }
 0x2f7   : > { %6060 = vst.msk [vmem:[#allocation2 + $0x1e8] sm:$0xff] %vm5998_vm6, %v5954_v13  ;;  %v1402_v38 = vrot.slane %v1120_v20, 1  ;;  %v3929_v1 = vmul.f32 %v6823_v36, %v652_v45  ;;  %v4570_v53 = vmul.f32 %v6827_v41, %v652_v45  ;;  %v3336_v27 = vrot.slane %v10443_v56, 7 }
 0x2f8   : > { %6059 = vst.msk [vmem:[#allocation2 + $0x1e0] sm:$0xff] %vm5998_vm6, %v5953_v52  ;;  %v4206_v15 = vrot.slane %v10449_v16, 4  ;;  %v3797_v58 = vadd.f32 %v10225_v21, %v10315_v39  ;;  %v2693_v8 = vrot.slane %v2414_v40, 6  ;;  %v12888_v60 = vrot.slane %v10293_v28, 1 }
 0x2f9   : > { %v1405_v11 = vsel %vm1262_vm0, %v1402_v38, %v1404_v12  ;;  %v2043_v0 = vrot.slane %v1761_v32, 2  ;;  %v4204_v5 = vrot.slane %v3929_v1, 4  ;;  %v4847_v52 = vrot.slane %v10452_v25, 5 }
 0x2fa   : > { %v1403_v19 = vsel %vm1262_vm0, %v12888_v60, %v1402_v38  ;;  %v12710_v13 = vrot.slane %v10456_v62, 6  ;;  %v898_v20 = vmul.f32 %v6812_v29, %v652_v45  ;;  %v3334_v44 = vrot.slane %v3055_v63, 7 }
 0x2fb   : > { %v2694_v21 = vsel %vm2559_vm2, %v2691_v51, %v2693_v8  ;;  %v2696_v28 = vsel %vm2559_vm2, %v2693_v8, %v2695_v43  ;;  %v4845_v39 = vrot.slane %v4570_v53, 5  ;;  %v5211_v40 = vmul.f32 %v6829_v42, %v652_v45  ;;  %v667_v53 = vpop.permute.xlu1 %666 }
 0x2fc   : > { %v1648_v32 = vadd.f32 %v1403_v19, %v10326_v9  ;;  %v1649_v38 = vadd.f32 %v1405_v11, %v898_v20  ;;  %v2942_v1 = vadd.f32 %v2694_v21, %v10313_v14  ;;  %v3695_v60 = vmul.f32 %v6821_v35, %v652_v45 }
 0x2fd   : > { %v2044_v49 = vsel %vm1903_vm1, %v2041_v54, %v2043_v0  ;;  %v2046_v51 = vsel %vm1903_vm1, %v2043_v0, %v2045_v61  ;;  %v4205_v63 = vsel %vm4078_vm4, %v4202_v55, %v4204_v5  ;;  %v4207_v9 = vsel %vm4078_vm4, %v4204_v5, %v4206_v15 }
 0x2fe   : > { %v2943_v14 = vadd.f32 %v2696_v28, %v10381_v48  ;;  %v3335_v10 = vsel %vm3200_vm3, %v3332_v3, %v3334_v44  ;;  %v4457_v54 = vadd.f32 %v4205_v63, %v10323_v22  ;;  %v4458_v45 = vadd.f32 %v4207_v9, %v3797_v58  ;;  %v662_v9 = vpop.permute.xlu0 %661 }
 0x2ff   : > { %v3583_v8 = vadd.f32 %v3335_v10, %v2942_v1  ;;  %v4846_v34 = vsel %vm4719_vm5, %v4843_v59, %v4845_v39  ;;  %v4848_v55 = vsel %vm4719_vm5, %v4845_v39, %v4847_v52  ;;  %v5485_v19 = vrot.slane %v5211_v40, 6  ;;  %v10512_v11 = vld [vmem:[#allocation2 + $0x1e0] ss:$2 sm:$0xff]  ;;  %v10514_v48 = vld [vmem:[#allocation2 + $0x1e1] ss:$2 sm:$0xff] }
 0x300   : > { %v3337_v4 = vsel %vm3200_vm3, %v3334_v44, %v3336_v27  ;;  %v5098_v22 = vadd.f32 %v4846_v34, %v4457_v54  ;;  %v5099_v3 = vadd.f32 %v4848_v55, %v4458_v45  ;;  %v10520_v58 = vmul.f32 %v6806_v18, %v667_v53 }
 0x301   : > { %v12889_v46 = vrot.slane %v10344_v37, 6  ;;  %v5488_v0 = vsel %vm2559_vm2, %v5485_v19, %v12710_v13  ;;  %v10529_v5 = vmul.f32 %v6809_v23, %v667_v53  ;;  %v10532_v20 = vmul.f32 %v6814_v30, %v667_v53  ;;  %v677_v13 = vpop.permute.xlu1 %676 }
 0x302   : > { %v2289_v44 = vadd.f32 %v2044_v49, %v1648_v32  ;;  %v10534_v21 = vadd.f32 %v2046_v51, %v1649_v38  ;;  %v5739_v39 = vadd.f32 %v5488_v0, %v5099_v3  ;;  %v10538_v40 = vadd.f32 %v3337_v4, %v2943_v14 }
 0x303   : > { %v5486_v59 = vsel %vm2559_vm2, %v12889_v46, %v5485_v19  ;;  %v10540_v1 = vadd.f32 %v3695_v60, %v3583_v8  ;;  %v10543_v63 = vmul.f32 %v6812_v29, %v667_v53  ;;  %v1408_v32 = vrot.slane %v10520_v58, 1 }
 0x304   : > { %v5738_v28 = vadd.f32 %v5486_v59, %v5098_v22  ;;  %v5851_v54 = vadd.f32 %v10227_v31, %v5739_v39  ;;  %v10549_v38 = vmul.f32 %v6818_v33, %v667_v53  ;;  %v2699_v51 = vrot.slane %v10532_v20, 6 }
 0x305   : > { %v10554_v60 = vmul.f32 %v6823_v36, %v667_v53  ;;  %v10557_v14 = vmul.f32 %v6827_v41, %v667_v53  ;;  %v10560_v34 = vmul.f32 %v6821_v35, %v667_v53  ;;  %v1122_v55 = vmul.f32 %v6806_v18, %v662_v9 }
 0x306   : > { %v5850_v10 = vadd.f32 %v10227_v31, %v5738_v28  ;;  %v5956_v8 = vmax.f32 %v5851_v54, 0.0  ;;  %v10564_v19 = vmul.f32 %v6829_v42, %v667_v53  ;;  %v1763_v4 = vmul.f32 %v6809_v23, %v662_v9 }
 0x307   : > { %v2416_v22 = vmul.f32 %v6814_v30, %v662_v9  ;;  %v3057_v3 = vmul.f32 %v6818_v33, %v662_v9  ;;  %v1406_v59 = vrot.slane %v1122_v55, 1  ;;  %v3931_v0 = vmul.f32 %v6823_v36, %v662_v9 }
 0x308   : > { %v5955_v45 = vmax.f32 %v5850_v10, 0.0  ;;  %6062 = vst.msk [vmem:[#allocation2 + $0x1f8] sm:$0xff] %vm5998_vm6, %v5956_v8  ;;  %v4572_v28 = vmul.f32 %v6827_v41, %v662_v9  ;;  %v4210_v53 = vrot.slane %v10554_v60, 4  ;;  %v2047_v10 = vrot.slane %v1763_v4, 2 }
 0x309   : > { %v2697_v54 = vrot.slane %v2416_v22, 6  ;;  %v1407_v37 = vsel %vm1262_vm0, %v1404_v12, %v1406_v59  ;;  %v3338_v8 = vrot.slane %v3057_v3, 7  ;;  %v4208_v55 = vrot.slane %v3931_v0, 4 }
 0x30a   : > { %6061 = vst.msk [vmem:[#allocation2 + $0x1f0] sm:$0xff] %vm5998_vm6, %v5955_v45  ;;  %v1409_v45 = vsel %vm1262_vm0, %v1406_v59, %v1408_v32  ;;  %v12711_v46 = vrot.slane %v10564_v19, 6  ;;  %v3799_v49 = vadd.f32 %v10348_v26, %v10418_v24  ;;  %v900_v39 = vmul.f32 %v6812_v29, %v662_v9 }
 0x30b   : > { %v4849_v4 = vrot.slane %v4572_v28, 5  ;;  %v2698_v2 = vsel %vm2559_vm2, %v2695_v43, %v2697_v54  ;;  %v2700_v12 = vsel %vm2559_vm2, %v2697_v54, %v2699_v51  ;;  %v3697_v22 = vmul.f32 %v6821_v35, %v662_v9 }
 0x30c   : > { %v5213_v3 = vmul.f32 %v6829_v42, %v662_v9  ;;  %v1650_v59 = vadd.f32 %v1407_v37, %v10429_v17  ;;  %v1651_v0 = vadd.f32 %v1409_v45, %v900_v39  ;;  %v2944_v26 = vadd.f32 %v2698_v2, %v10416_v6 }
 0x30d   : > { %v10597_v24 = vmul.f32 %v6812_v29, %v677_v13  ;;  %v2048_v57 = vsel %vm1903_vm1, %v2045_v61, %v2047_v10  ;;  %v3339_v43 = vsel %vm3200_vm3, %v3336_v27, %v3338_v8  ;;  %v4209_v9 = vsel %vm4078_vm4, %v4206_v15, %v4208_v55 }
 0x30e   : > { %v4211_v17 = vsel %vm4078_vm4, %v4208_v55, %v4210_v53  ;;  %v2945_v6 = vadd.f32 %v2700_v12, %v2289_v44  ;;  %v4459_v37 = vadd.f32 %v4209_v9, %v10426_v47  ;;  %v4850_v7 = vsel %vm4719_vm5, %v4847_v52, %v4849_v4 }
 0x30f   : > { %v4460_v28 = vadd.f32 %v4211_v17, %v3799_v49  ;;  %v3585_v61 = vadd.f32 %v3339_v43, %v2944_v26  ;;  %v12890_v56 = vrot.slane %v10557_v14, 5  ;;  %v5489_v16 = vrot.slane %v5213_v3, 6 }
 0x310   : > { %v10619_v15 = vmul.f32 %v6806_v18, %v677_v13  ;;  %v12891_v47 = vrot.slane %v10529_v5, 2  ;;  %v12892_v25 = vrot.slane %v10549_v38, 7  ;;  %v5100_v49 = vadd.f32 %v4850_v7, %v4459_v37 }
 0x311   : > { %v4852_v27 = vsel %vm4719_vm5, %v4849_v4, %v12890_v56  ;;  %v10621_v39 = vld [vmem:[#allocation2 + $0x1f0] ss:$2 sm:$0x3f]  ;;  %v10623_v54 = vld [vmem:[#allocation2 + $0x1f1] ss:$2 sm:$0x3f]  ;;  %v5492_v2 = vsel %vm2559_vm2, %v5489_v16, %v12711_v46  ;;  %v10638_v12 = vmul.f32 %v6809_v23, %v677_v13  ;;  %v10641_v3 = vmul.f32 %v6814_v30, %v677_v13 }
 0x312   : > { %v2050_v44 = vsel %vm1903_vm1, %v2047_v10, %v12891_v47  ;;  %v3341_v52 = vsel %vm3200_vm3, %v3338_v8, %v12892_v25  ;;  %v5101_v45 = vadd.f32 %v4852_v27, %v4460_v28  ;;  %v12893_v55 = vrot.slane %v10456_v62, 6  ;;  %v672_v28 = vpop.permute.xlu0 %671  ;;  %v10683_v62 = vpop.permute.xlu1 %686 }
 0x313   : > { %v2291_v10 = vadd.f32 %v2048_v57, %v1650_v59  ;;  %v10643_v26 = vadd.f32 %v2050_v44, %v1651_v0  ;;  %v10647_v9 = vadd.f32 %v3341_v52, %v2945_v6  ;;  %v10649_v17 = vadd.f32 %v3697_v22, %v3585_v61 }
 0x314   : > { %v5490_v4 = vsel %vm2559_vm2, %v12893_v55, %v5489_v16  ;;  %v5741_v43 = vadd.f32 %v5492_v2, %v5101_v45  ;;  %v12713_v37 = vrot.slane %v10619_v15, 1  ;;  %v10655_v59 = vmul.f32 %v6818_v33, %v677_v13 }
 0x315   : > { %v5740_v8 = vadd.f32 %v5490_v4, %v5100_v49  ;;  %v10658_v0 = vmul.f32 %v6823_v36, %v677_v13  ;;  %v12714_v57 = vrot.slane %v10638_v12, 2  ;;  %v12712_v6 = vrot.slane %v10641_v3, 6 }
 0x316   : > { %v5853_v56 = vadd.f32 %v10227_v31, %v5741_v43  ;;  %v10663_v22 = vmul.f32 %v6827_v41, %v677_v13  ;;  %v10666_v61 = vmul.f32 %v6829_v42, %v677_v13  ;;  %v1124_v47 = vmul.f32 %v6806_v18, %v672_v28 }
 0x317   : > { %v5852_v7 = vadd.f32 %v10227_v31, %v5740_v8  ;;  %v1765_v44 = vmul.f32 %v6809_v23, %v672_v28  ;;  %v10671_v25 = vmul.f32 %v6821_v35, %v677_v13  ;;  %v2418_v52 = vmul.f32 %v6814_v30, %v672_v28 }
 0x318   : > { %v5958_v16 = vmax.f32 %v5853_v56, 0.0  ;;  %v3059_v49 = vmul.f32 %v6818_v33, %v672_v28  ;;  %v3933_v45 = vmul.f32 %v6823_v36, %v672_v28  ;;  %v4214_v4 = vrot.slane %v10658_v0, 4 }
 0x319   : > { %v5957_v27 = vmax.f32 %v5852_v7, 0.0  ;;  %v3801_v2 = vadd.f32 %v10446_v50, %v10538_v40  ;;  %v1410_v8 = vrot.slane %v1124_v47, 1  ;;  %v2051_v43 = vrot.slane %v1765_v44, 2 }
 0x31a   : > { %6064 = vst.msk [vmem:[#allocation2 + $0x208] sm:$0xff] %vm5998_vm6, %v5958_v16  ;;  %v2701_v7 = vrot.slane %v2418_v52, 6  ;;  %v4212_v56 = vrot.slane %v3933_v45, 4  ;;  %v4574_v16 = vmul.f32 %v6827_v41, %v672_v28  ;;  %v5215_v55 = vmul.f32 %v6829_v42, %v672_v28 }
 0x31b   : > { %6063 = vst.msk [vmem:[#allocation2 + $0x200] sm:$0xff] %vm5998_vm6, %v5957_v27  ;;  %v902_v27 = vmul.f32 %v6812_v29, %v672_v28  ;;  %v1411_v50 = vsel %vm1262_vm0, %v1408_v32, %v1410_v8  ;;  %v1413_v40 = vsel %vm1262_vm0, %v1410_v8, %v12713_v37  ;;  %v3342_v44 = vrot.slane %v3059_v49, 7 }
 0x31c   : > { %v2702_v47 = vsel %vm2559_vm2, %v2699_v51, %v2701_v7  ;;  %v2704_v52 = vsel %vm2559_vm2, %v2701_v7, %v12712_v6  ;;  %v3699_v46 = vmul.f32 %v6821_v35, %v672_v28  ;;  %v10705_v58 = vmul.f32 %v6812_v29, %v10683_v62 }
 0x31d   : > { %v2946_v45 = vadd.f32 %v2702_v47, %v10534_v21  ;;  %v12894_v32 = vrot.slane %v10529_v5, 2  ;;  %v2054_v20 = vsel %vm1903_vm1, %v2051_v43, %v12714_v57  ;;  %v4213_v51 = vsel %vm4078_vm4, %v4210_v53, %v4212_v56 }
 0x31e   : > { %v4215_v21 = vsel %vm4078_vm4, %v4212_v56, %v4214_v4  ;;  %v1652_v28 = vadd.f32 %v1411_v50, %v10543_v63  ;;  %v1653_v49 = vadd.f32 %v1413_v40, %v902_v27  ;;  %v4461_v7 = vadd.f32 %v4213_v51, %v10540_v1 }
 0x31f   : > { %v2052_v8 = vsel %vm1903_vm1, %v12894_v32, %v2051_v43  ;;  %v4462_v5 = vadd.f32 %v4215_v21, %v3801_v2  ;;  %v2947_v6 = vadd.f32 %v2704_v52, %v2291_v10  ;;  %v12895_v37 = vrot.slane %v10549_v38, 7 }
 0x320   : > { %v4853_v60 = vrot.slane %v4574_v16, 5  ;;  %v5493_v57 = vrot.slane %v5215_v55, 6  ;;  %v12896_v13 = vrot.slane %v10655_v59, 7  ;;  %v10729_v1 = vmul.f32 %v6806_v18, %v10683_v62 }
 0x321   : > { %v3343_v43 = vsel %vm3200_vm3, %v12895_v37, %v3342_v44  ;;  %v12897_v2 = vrot.slane %v10557_v14, 5  ;;  %v12898_v38 = vrot.slane %v10663_v22, 5  ;;  %v10739_v55 = vmul.f32 %v6809_v23, %v10683_v62 }
 0x322   : > { %v6312_v47 = vld [vmem:[#allocation2 + $0x1fe] ss:$2 sm:$0xff]  ;;  %v6316_v32 = vld [vmem:[#allocation2 + $0x1ff] ss:$2 sm:$0xff]  ;;  %v3345_v56 = vsel %vm3200_vm3, %v3342_v44, %v12896_v13  ;;  %v3587_v63 = vadd.f32 %v3343_v43, %v2946_v45  ;;  %v10743_v13 = vmul.f32 %v6814_v30, %v10683_v62  ;;  %v12899_v27 = vmax.f32 %v10512_v11, %v10514_v48  ;;  %v682_v44 = vpop.permute.xlu0 %681 }
 0x323   : > { %v6321_v53 = vmax.f32 %v6312_v47, %v6316_v32  ;;  %v4854_v10 = vsel %vm4719_vm5, %v12897_v2, %v4853_v60  ;;  %v4856_v37 = vsel %vm4719_vm5, %v4853_v60, %v12898_v38  ;;  %v10750_v40 = vmul.f32 %v6818_v33, %v10683_v62 }
 0x324   : > { %v5102_v50 = vadd.f32 %v4854_v10, %v4461_v7  ;;  %v5103_v14 = vadd.f32 %v4856_v37, %v4462_v5  ;;  %v2293_v52 = vadd.f32 %v2052_v8, %v1652_v28  ;;  %v10752_v45 = vadd.f32 %v2054_v20, %v1653_v49 }
 0x325   : > { %v6323_v16 = vmax.f32 %v12899_v27, %v6321_v53  ;;  %v12900_v51 = vrot.slane %v10564_v19, 6  ;;  %v12901_v47 = vrot.slane %v10666_v61, 6  ;;  %v10762_v11 = vadd.f32 %v3345_v56, %v2947_v6 }
 0x326   : > { %v10764_v48 = vadd.f32 %v3699_v46, %v3587_v63  ;;  %v1416_v8 = vrot.slane %v10729_v1, 1  ;;  %v2057_v20 = vrot.slane %v10739_v55, 2  ;;  %v2707_v19 = vrot.slane %v10743_v13, 6 }
 0x327   : > { %v5494_v21 = vsel %vm2559_vm2, %v12900_v51, %v5493_v57  ;;  %v5496_v32 = vsel %vm2559_vm2, %v5493_v57, %v12901_v47  ;;  %6552 = vst.msk [vmem:[%s7456_s28 + $0x80] sm:$0xff] %vm5998_vm6, %v6323_v16  ;;  %v1126_v28 = vmul.f32 %v6806_v18, %v682_v44  ;;  %v3348_v43 = vrot.slane %v10750_v40, 7 }
 0x328   : > { %v5742_v7 = vadd.f32 %v5494_v21, %v5102_v50  ;;  %v5743_v5 = vadd.f32 %v5496_v32, %v5103_v14  ;;  %v10775_v46 = vmul.f32 %v6823_v36, %v10683_v62  ;;  %v10779_v6 = vmul.f32 %v6827_v41, %v10683_v62 }
 0x329   : > { %v1414_v60 = vrot.slane %v1126_v28, 1  ;;  %v1767_v53 = vmul.f32 %v6809_v23, %v682_v44  ;;  %v2420_v56 = vmul.f32 %v6814_v30, %v682_v44  ;;  %v10785_v10 = vmul.f32 %v6829_v42, %v10683_v62 }
 0x32a   : > { %v5854_v49 = vadd.f32 %v10227_v31, %v5742_v7  ;;  %v5855_v57 = vadd.f32 %v10227_v31, %v5743_v5  ;;  %v3061_v38 = vmul.f32 %v6818_v33, %v682_v44  ;;  %v10790_v37 = vmul.f32 %v6821_v35, %v10683_v62 }
 0x32b   : > { %v12902_v27 = vrot.slane %v10619_v15, 1  ;;  %v2055_v50 = vrot.slane %v1767_v53, 2  ;;  %v2705_v14 = vrot.slane %v2420_v56, 6  ;;  %v3803_v51 = vadd.f32 %v10560_v34, %v10647_v9 }
 0x32c   : > { %v5959_v63 = vmax.f32 %v5854_v49, 0.0  ;;  %v5960_v2 = vmax.f32 %v5855_v57, 0.0  ;;  %v904_v21 = vmul.f32 %v6812_v29, %v682_v44  ;;  %v3935_v62 = vmul.f32 %v6823_v36, %v682_v44 }
 0x32d   : > { %v1415_v16 = vsel %vm1262_vm0, %v12902_v27, %v1414_v60  ;;  %v4218_v32 = vrot.slane %v10775_v46, 4  ;;  %v4859_v15 = vrot.slane %v10779_v6, 5  ;;  %v1417_v7 = vsel %vm1262_vm0, %v1414_v60, %v1416_v8 }
 0x32e   : > { %6065 = vst.msk [vmem:[#allocation2 + $0x210] sm:$0xff] %vm5998_vm6, %v5959_v63  ;;  %6066 = vst.msk [vmem:[#allocation2 + $0x218] sm:$0xff] %vm5998_vm6, %v5960_v2  ;;  %v1654_v47 = vadd.f32 %v1415_v16, %v10597_v24  ;;  %v12903_v5 = vrot.slane %v10641_v3, 6  ;;  %v5499_v34 = vrot.slane %v10785_v10, 6  ;;  %v2708_v24 = vsel %vm2559_vm2, %v2705_v14, %v2707_v19  ;;  %v697_v16 = vpop.permute.xlu1 %696 }
 0x32f   : > { %v3346_v9 = vrot.slane %v3061_v38, 7  ;;  %v3701_v49 = vmul.f32 %v6821_v35, %v682_v44  ;;  %v12904_v57 = vrot.slane %v10638_v12, 2  ;;  %v4216_v60 = vrot.slane %v3935_v62, 4 }
 0x330   : > { %v2706_v28 = vsel %vm2559_vm2, %v12903_v5, %v2705_v14  ;;  %v4576_v3 = vmul.f32 %v6827_v41, %v682_v44  ;;  %v1655_v63 = vadd.f32 %v1417_v7, %v904_v21  ;;  %v2058_v2 = vsel %vm1903_vm1, %v2055_v50, %v2057_v20 }
 0x331   : > { %v2056_v53 = vsel %vm1903_vm1, %v12904_v57, %v2055_v50  ;;  %v2948_v56 = vadd.f32 %v2706_v28, %v10643_v26  ;;  %v5217_v38 = vmul.f32 %v6829_v42, %v682_v44  ;;  %v2949_v14 = vadd.f32 %v2708_v24, %v2293_v52 }
 0x332   : > { %v10823_v27 = vadd.f32 %v2056_v53, %v1654_v47  ;;  %v4217_v12 = vsel %vm4078_vm4, %v4214_v4, %v4216_v60  ;;  %v4219_v26 = vsel %vm4078_vm4, %v4216_v60, %v4218_v32  ;;  %v4857_v62 = vrot.slane %v4576_v3, 5 }
 0x333   : > { %v12905_v21 = vrot.slane %v10655_v59, 7  ;;  %v4463_v50 = vadd.f32 %v4217_v12, %v10649_v17  ;;  %v4464_v47 = vadd.f32 %v4219_v26, %v3803_v51  ;;  %v5497_v5 = vrot.slane %v5217_v38, 6 }
 0x334   : > { %v12906_v0 = vrot.slane %v10663_v22, 5  ;;  %v4860_v24 = vsel %vm4719_vm5, %v4857_v62, %v4859_v15  ;;  %v10843_v57 = vmul.f32 %v6806_v18, %v697_v16  ;;  %v10845_v53 = vadd.f32 %v2058_v2, %v1655_v63 }
 0x335   : > { %v3347_v7 = vsel %vm3200_vm3, %v12905_v21, %v3346_v9  ;;  %v6314_v44 = vld [vmem:[#allocation2 + $0x20e] ss:$2 sm:$0x3f]  ;;  %v6318_v28 = vld [vmem:[#allocation2 + $0x20f] ss:$2 sm:$0x3f]  ;;  %v5105_v51 = vadd.f32 %v4860_v24, %v4464_v47  ;;  %v5500_v22 = vsel %vm2559_vm2, %v5497_v5, %v5499_v34  ;;  %v10854_v3 = vmul.f32 %v6809_v23, %v697_v16  ;;  %v692_v47 = vpop.permute.xlu0 %691 }
 0x336   : > { %v3589_v52 = vadd.f32 %v3347_v7, %v2948_v56  ;;  %v4858_v4 = vsel %vm4719_vm5, %v12906_v0, %v4857_v62  ;;  %v6322_v59 = vmax.f32 %v6314_v44, %v6318_v28  ;;  %v12907_v60 = vrot.slane %v10666_v61, 6 }
 0x337   : > { %v5104_v17 = vadd.f32 %v4858_v4, %v4463_v50  ;;  %v10857_v38 = vmul.f32 %v6814_v30, %v697_v16  ;;  %v12908_v63 = vmax.f32 %v10621_v39, %v10623_v54  ;;  %v3349_v61 = vsel %vm3200_vm3, %v3346_v9, %v3348_v43 }
 0x338   : > { %v5498_v56 = vsel %vm2559_vm2, %v12907_v60, %v5497_v5  ;;  %v5745_v26 = vadd.f32 %v5500_v22, %v5105_v51  ;;  %v10865_v62 = vadd.f32 %v3349_v61, %v2949_v14  ;;  %v10867_v21 = vadd.f32 %v3701_v49, %v3589_v52 }
 0x339   : > { %v6324_v2 = vmax.f32 %v12908_v63, %v6322_v59  ;;  %v5744_v12 = vadd.f32 %v5498_v56, %v5104_v17  ;;  %v10870_v7 = vmul.f32 %v6812_v29, %v697_v16  ;;  %v1420_v50 = vrot.slane %v10843_v57, 1 }
 0x33a   : > { %v5857_v54 = vadd.f32 %v10227_v31, %v5745_v26  ;;  %v10878_v9 = vmul.f32 %v6818_v33, %v697_v16  ;;  %v10881_v14 = vmul.f32 %v6823_v36, %v697_v16  ;;  %v2061_v49 = vrot.slane %v10854_v3, 2 }
 0x33b   : > { %6553 = vst.msk [vmem:[%s7456_s28 + $0x88] sm:$0x3f] %vm6126_vm7, %v6324_v2  ;;  %v5856_v39 = vadd.f32 %v10227_v31, %v5744_v12  ;;  %v2711_v5 = vrot.slane %v10857_v38, 6  ;;  %v10886_v44 = vmul.f32 %v6827_v41, %v697_v16  ;;  %v10889_v28 = vmul.f32 %v6829_v42, %v697_v16 }
 0x33c   : > { %v5962_v0 = vmax.f32 %v5857_v54, 0.0  ;;  %v1128_v31 = vmul.f32 %v6806_v18, %v692_v47  ;;  %v1769_v4 = vmul.f32 %v6809_v23, %v692_v47  ;;  %v10894_v24 = vmul.f32 %v6821_v35, %v697_v16 }
 0x33d   : > { %v5961_v52 = vmax.f32 %v5856_v39, 0.0  ;;  %v2422_v59 = vmul.f32 %v6814_v30, %v692_v47  ;;  %v3063_v17 = vmul.f32 %v6818_v33, %v692_v47  ;;  %v3937_v51 = vmul.f32 %v6823_v36, %v692_v47 }
 0x33e   : > { %6068 = vst.msk [vmem:[#allocation2 + $0x228] sm:$0xff] %vm5998_vm6, %v5962_v0  ;;  %v3352_v60 = vrot.slane %v10878_v9, 7  ;;  %v4222_v56 = vrot.slane %v10881_v14, 4  ;;  %v3805_v22 = vadd.f32 %v10671_v25, %v10762_v11  ;;  %v1418_v63 = vrot.slane %v1128_v31, 1  ;;  %v10912_v0 = vpop.permute.xlu1 %706 }
 0x33f   : > { %6067 = vst.msk [vmem:[#allocation2 + $0x220] sm:$0xff] %vm5998_vm6, %v5961_v52  ;;  %v12716_v16 = vrot.slane %v10886_v44, 5  ;;  %v2059_v2 = vrot.slane %v1769_v4, 2  ;;  %v2709_v61 = vrot.slane %v2422_v59, 6  ;;  %v4220_v12 = vrot.slane %v3937_v51, 4 }
 0x340   : > { %v12715_v26 = vrot.slane %v10889_v28, 6  ;;  %v906_v39 = vmul.f32 %v6812_v29, %v692_v47  ;;  %v1419_v54 = vsel %vm1262_vm0, %v1416_v8, %v1418_v63  ;;  %v4578_v52 = vmul.f32 %v6827_v41, %v692_v47 }
 0x341   : > { %v1421_v25 = vsel %vm1262_vm0, %v1418_v63, %v1420_v50  ;;  %v2710_v11 = vsel %vm2559_vm2, %v2707_v19, %v2709_v61  ;;  %v3350_v31 = vrot.slane %v3063_v17, 7  ;;  %v5219_v4 = vmul.f32 %v6829_v42, %v692_v47 }
 0x342   : > { %v1656_v59 = vadd.f32 %v1419_v54, %v10705_v58  ;;  %v2712_v1 = vsel %vm2559_vm2, %v2709_v61, %v2711_v5  ;;  %v2950_v8 = vadd.f32 %v2710_v11, %v10752_v45  ;;  %v3703_v51 = vmul.f32 %v6821_v35, %v692_v47 }
 0x343   : > { %v2060_v63 = vsel %vm1903_vm1, %v2057_v20, %v2059_v2  ;;  %v4221_v13 = vsel %vm4078_vm4, %v4218_v32, %v4220_v12  ;;  %v4223_v58 = vsel %vm4078_vm4, %v4220_v12, %v4222_v56  ;;  %v10938_v19 = vmul.f32 %v6812_v29, %v10912_v0 }
 0x344   : > { %v1657_v17 = vadd.f32 %v1421_v25, %v906_v39  ;;  %v2062_v45 = vsel %vm1903_vm1, %v2059_v2, %v2061_v49  ;;  %v4465_v55 = vadd.f32 %v4221_v13, %v10764_v48  ;;  %v4466_v20 = vadd.f32 %v4223_v58, %v3805_v22 }
 0x345   : > { %v2951_v46 = vadd.f32 %v2712_v1, %v10823_v27  ;;  %v3351_v32 = vsel %vm3200_vm3, %v3348_v43, %v3350_v31  ;;  %v4861_v47 = vrot.slane %v4578_v52, 5  ;;  %v5501_v61 = vrot.slane %v5219_v4, 6 }
 0x346   : > { %v10948_v12 = vld [vmem:[#allocation2 + $0x21c] ss:$2 sm:$0xff]  ;;  %v10950_v54 = vld [vmem:[#allocation2 + $0x21d] ss:$2 sm:$0xff]  ;;  %v2297_v39 = vadd.f32 %v2060_v63, %v1656_v59  ;;  %v3353_v2 = vsel %vm3200_vm3, %v3350_v31, %v3352_v60  ;;  %v3591_v25 = vadd.f32 %v3351_v32, %v2950_v8  ;;  %v10957_v48 = vmul.f32 %v6806_v18, %v10912_v0 }
 0x347   : > { %v4862_v40 = vsel %vm4719_vm5, %v4859_v15, %v4861_v47  ;;  %v4864_v43 = vsel %vm4719_vm5, %v4861_v47, %v12716_v16  ;;  %v10967_v27 = vmul.f32 %v6809_v23, %v10912_v0  ;;  %v10971_v22 = vmul.f32 %v6814_v30, %v10912_v0  ;;  %v702_v15 = vpop.permute.xlu0 %701 }
 0x348   : > { %v10973_v52 = vadd.f32 %v2062_v45, %v1657_v17  ;;  %v5106_v11 = vadd.f32 %v4862_v40, %v4465_v55  ;;  %v5107_v31 = vadd.f32 %v4864_v43, %v4466_v20  ;;  %v10977_v6 = vmul.f32 %v6818_v33, %v10912_v0 }
 0x349   : > { %v10981_v59 = vadd.f32 %v3353_v2, %v2951_v46  ;;  %v5502_v1 = vsel %vm2559_vm2, %v5499_v34, %v5501_v61  ;;  %v5504_v8 = vsel %vm2559_vm2, %v5501_v61, %v12715_v26  ;;  %v10989_v63 = vadd.f32 %v3703_v51, %v3591_v25  ;;  %v10999_v34 = vld [vmem:[#allocation3] ss:$0 sm:$0xff] }
 0x34a   : > { %v5746_v13 = vadd.f32 %v5502_v1, %v5106_v11  ;;  %v5747_v58 = vadd.f32 %v5504_v8, %v5107_v31  ;;  %v1424_v17 = vrot.slane %v10957_v48, 1  ;;  %v2065_v45 = vrot.slane %v10967_v27, 2 }
 0x34b   : > { %v2715_v55 = vrot.slane %v10971_v22, 6  ;;  %v10996_v20 = vmul.f32 %v6823_v36, %v10912_v0  ;;  %v1130_v10 = vmul.f32 %v6806_v18, %v702_v15  ;;  %v12720_v32 = vrot.slane %v10977_v6, 7 }
 0x34c   : > { %v5858_v46 = vadd.f32 %v10999_v34, %v5746_v13  ;;  %v5859_v51 = vadd.f32 %v10999_v34, %v5747_v58  ;;  %v11006_v47 = vmul.f32 %v6827_v41, %v10912_v0  ;;  %v1771_v2 = vmul.f32 %v6809_v23, %v702_v15 }
 0x34d   : > { %v1422_v61 = vrot.slane %v1130_v10, 1  ;;  %v2424_v25 = vmul.f32 %v6814_v30, %v702_v15  ;;  %v3065_v40 = vmul.f32 %v6818_v33, %v702_v15  ;;  %v11013_v31 = vmul.f32 %v6829_v42, %v10912_v0 }
 0x34e   : > { %v5963_v43 = vmax.f32 %v5858_v46, 0.0  ;;  %v5964_v11 = vmax.f32 %v5859_v51, 0.0  ;;  %v3939_v1 = vmul.f32 %v6823_v36, %v702_v15  ;;  %v12718_v8 = vrot.slane %v10996_v20, 4 }
 0x34f   : > { %v1423_v13 = vsel %vm1262_vm0, %v1420_v50, %v1422_v61  ;;  %v1425_v58 = vsel %vm1262_vm0, %v1422_v61, %v1424_v17  ;;  %v2713_v10 = vrot.slane %v2424_v25, 6  ;;  %v908_v46 = vmul.f32 %v6812_v29, %v702_v15 }
 0x350   : > { %6069 = vst.msk [vmem:[#allocation2 + $0x230] sm:$0xff] %vm5998_vm6, %v5963_v43  ;;  %6070 = vst.msk [vmem:[#allocation2 + $0x238] sm:$0xff] %vm5998_vm6, %v5964_v11  ;;  %v2063_v51 = vrot.slane %v1771_v2, 2  ;;  %v3354_v4 = vrot.slane %v3065_v40, 7  ;;  %v4224_v26 = vrot.slane %v3939_v1, 4  ;;  %v11028_v16 = vmul.f32 %v6821_v35, %v10912_v0 }
 0x351   : > { %v3807_v57 = vadd.f32 %v10790_v37, %v10865_v62  ;;  %v2714_v50 = vsel %vm2559_vm2, %v2711_v5, %v2713_v10  ;;  %v2716_v61 = vsel %vm2559_vm2, %v2713_v10, %v2715_v55  ;;  %v1658_v25 = vadd.f32 %v1423_v13, %v10870_v7 }
 0x352   : > { %v1659_v2 = vadd.f32 %v1425_v58, %v908_v46  ;;  %v2952_v40 = vadd.f32 %v2714_v50, %v10845_v53  ;;  %v2953_v43 = vadd.f32 %v2716_v61, %v2297_v39  ;;  %v12717_v0 = vrot.slane %v11006_v47, 5  ;;  %v717_v39 = vpop.permute.xlu1 %716 }
 0x353   : > { %v12719_v11 = vrot.slane %v11013_v31, 6  ;;  %v3355_v37 = vsel %vm3200_vm3, %v3352_v60, %v3354_v4  ;;  %v4225_v38 = vsel %vm4078_vm4, %v4222_v56, %v4224_v26  ;;  %v2064_v62 = vsel %vm1903_vm1, %v2061_v49, %v2063_v51 }
 0x354   : > { %v3593_v7 = vadd.f32 %v3355_v37, %v2952_v40  ;;  %v3705_v53 = vmul.f32 %v6821_v35, %v702_v15  ;;  %v4227_v5 = vsel %vm4078_vm4, %v4224_v26, %v12718_v8  ;;  %v2066_v9 = vsel %vm1903_vm1, %v2063_v51, %v2065_v45 }
 0x355   : > { %v3357_v14 = vsel %vm3200_vm3, %v3354_v4, %v12720_v32  ;;  %v4580_v3 = vmul.f32 %v6827_v41, %v702_v15  ;;  %v5221_v49 = vmul.f32 %v6829_v42, %v702_v15  ;;  %v11063_v60 = vadd.f32 %v2064_v62, %v1658_v25 }
 0x356   : > { %v11065_v56 = vadd.f32 %v2066_v9, %v1659_v2  ;;  %v11067_v1 = vadd.f32 %v3357_v14, %v2953_v43  ;;  %v4467_v26 = vadd.f32 %v4225_v38, %v10867_v21  ;;  %v4468_v10 = vadd.f32 %v4227_v5, %v3807_v57  ;;  %v712_v43 = vpop.permute.xlu0 %711 }
 0x357   : > { %v11070_v13 = vld [vmem:[#allocation2 + $0x22c] ss:$2 sm:$0x3f]  ;;  %v11072_v58 = vld [vmem:[#allocation2 + $0x22d] ss:$2 sm:$0x3f]  ;;  %v11075_v46 = vmul.f32 %v6812_v29, %v717_v39  ;;  %v11078_v4 = vmul.f32 %v6806_v18, %v717_v39  ;;  %v11081_v15 = vmul.f32 %v6809_v23, %v717_v39  ;;  %v11083_v51 = vadd.f32 %v3705_v53, %v3593_v7 }
 0x358   : > { %v4865_v50 = vrot.slane %v4580_v3, 5  ;;  %v5505_v61 = vrot.slane %v5221_v49, 6  ;;  %v11086_v21 = vmul.f32 %v6814_v30, %v717_v39  ;;  %v11089_v25 = vmul.f32 %v6818_v33, %v717_v39 }
 0x359   : > { %v11092_v57 = vmul.f32 %v6821_v35, %v717_v39  ;;  %v11095_v2 = vmul.f32 %v6823_v36, %v717_v39  ;;  %v11098_v40 = vmul.f32 %v6827_v41, %v717_v39  ;;  %v12909_v38 = vrot.slane %v10886_v44, 5 }
 0x35a   : > { %v4868_v7 = vsel %vm4719_vm5, %v4865_v50, %v12717_v0  ;;  %v11109_v53 = vmul.f32 %v6829_v42, %v717_v39  ;;  %v1428_v14 = vrot.slane %v11078_v4, 1  ;;  %v12910_v49 = vrot.slane %v10889_v28, 6 }
 0x35b   : > { %v4866_v62 = vsel %vm4719_vm5, %v12909_v38, %v4865_v50  ;;  %v5109_v9 = vadd.f32 %v4868_v7, %v4468_v10  ;;  %v5508_v44 = vsel %vm2559_vm2, %v5505_v61, %v12719_v11  ;;  %v1132_v38 = vmul.f32 %v6806_v18, %v712_v43 }
 0x35c   : > { %v5108_v5 = vadd.f32 %v4866_v62, %v4467_v26  ;;  %v5506_v37 = vsel %vm2559_vm2, %v12910_v49, %v5505_v61  ;;  %v1773_v50 = vmul.f32 %v6809_v23, %v712_v43  ;;  %v2426_v26 = vmul.f32 %v6814_v30, %v712_v43 }
 0x35d   : > { %v5749_v0 = vadd.f32 %v5508_v44, %v5109_v9  ;;  %v3067_v10 = vmul.f32 %v6818_v33, %v712_v43  ;;  %v2719_v62 = vrot.slane %v11086_v21, 6  ;;  %v4230_v7 = vrot.slane %v11095_v2, 4 }
 0x35e   : > { %v5748_v39 = vadd.f32 %v5506_v37, %v5108_v5  ;;  %v1426_v49 = vrot.slane %v1132_v38, 1  ;;  %v2067_v11 = vrot.slane %v1773_v50, 2  ;;  %v2717_v32 = vrot.slane %v2426_v26, 6 }
 0x35f   : > { %v5861_v61 = vadd.f32 %v10999_v34, %v5749_v0  ;;  %v4871_v37 = vrot.slane %v11098_v40, 5  ;;  %v5511_v5 = vrot.slane %v11109_v53, 6  ;;  %v3941_v44 = vmul.f32 %v6823_v36, %v712_v43 }
 0x360   : > { %v5860_v8 = vadd.f32 %v10999_v34, %v5748_v39  ;;  %v1427_v9 = vsel %vm1262_vm0, %v1424_v17, %v1426_v49  ;;  %v3809_v38 = vadd.f32 %v10894_v24, %v10981_v59  ;;  %v3358_v39 = vrot.slane %v3067_v10, 7 }
 0x361   : > { %v5966_v3 = vmax.f32 %v5861_v61, 0.0  ;;  %v910_v0 = vmul.f32 %v6812_v29, %v712_v43  ;;  %v1429_v50 = vsel %vm1262_vm0, %v1426_v49, %v1428_v14  ;;  %v2718_v48 = vsel %vm2559_vm2, %v2715_v55, %v2717_v32  ;;  %v727_v61 = vpop.permute.xlu1 %726 }
 0x362   : > { %v5965_v28 = vmax.f32 %v5860_v8, 0.0  ;;  %v2720_v17 = vsel %vm2559_vm2, %v2717_v32, %v2719_v62  ;;  %v1660_v24 = vadd.f32 %v1427_v9, %v10938_v19  ;;  %v2068_v59 = vsel %vm1903_vm1, %v2065_v45, %v2067_v11 }
 0x363   : > { %6072 = vst.msk [vmem:[#allocation2 + $0x248] sm:$0xff] %vm5998_vm6, %v5966_v3  ;;  %v2954_v8 = vadd.f32 %v2718_v48, %v10973_v52  ;;  %v3707_v22 = vmul.f32 %v6821_v35, %v712_v43  ;;  %v12911_v55 = vrot.slane %v11081_v15, 2  ;;  %v4228_v10 = vrot.slane %v3941_v44, 4 }
 0x364   : > { %6071 = vst.msk [vmem:[#allocation2 + $0x240] sm:$0xff] %vm5998_vm6, %v5965_v28  ;;  %v4582_v32 = vmul.f32 %v6827_v41, %v712_v43  ;;  %v5223_v28 = vmul.f32 %v6829_v42, %v712_v43  ;;  %v1661_v3 = vadd.f32 %v1429_v50, %v910_v0  ;;  %v2955_v19 = vadd.f32 %v2720_v17, %v11063_v60 }
 0x365   : > { %v2070_v26 = vsel %vm1903_vm1, %v2067_v11, %v12911_v55  ;;  %v12912_v27 = vrot.slane %v10977_v6, 7  ;;  %v12913_v52 = vrot.slane %v11089_v25, 7  ;;  %v12914_v9 = vrot.slane %v10996_v20, 4 }
 0x366   : > { %v4231_v43 = vsel %vm4078_vm4, %v4228_v10, %v4230_v7  ;;  %v4869_v44 = vrot.slane %v4582_v32, 5  ;;  %v5509_v0 = vrot.slane %v5223_v28, 6  ;;  %v11172_v60 = vadd.f32 %v2068_v59, %v1660_v24 }
 0x367   : > { %v3359_v45 = vsel %vm3200_vm3, %v12912_v27, %v3358_v39  ;;  %v3361_v49 = vsel %vm3200_vm3, %v3358_v39, %v12913_v52  ;;  %v4229_v11 = vsel %vm4078_vm4, %v12914_v9, %v4228_v10  ;;  %v4470_v48 = vadd.f32 %v4231_v43, %v3809_v38  ;;  %v722_v43 = vpop.permute.xlu0 %721 }
 0x368   : > { %v3595_v6 = vadd.f32 %v3359_v45, %v2954_v8  ;;  %v4469_v50 = vadd.f32 %v4229_v11, %v10989_v63  ;;  %v12915_v17 = vrot.slane %v11006_v47, 5  ;;  %v4872_v20 = vsel %vm4719_vm5, %v4869_v44, %v4871_v37 }
 0x369   : > { %v11182_v55 = vmul.f32 %v6806_v18, %v727_v61  ;;  %v11185_v10 = vmul.f32 %v6809_v23, %v727_v61  ;;  %v11187_v24 = vadd.f32 %v2070_v26, %v1661_v3  ;;  %v5111_v8 = vadd.f32 %v4872_v20, %v4470_v48 }
 0x36a   : > { %v4870_v39 = vsel %vm4719_vm5, %v12915_v17, %v4869_v44  ;;  %v11190_v63 = vmul.f32 %v6812_v29, %v727_v61  ;;  %v11192_v32 = vadd.f32 %v3361_v49, %v2955_v19  ;;  %v12916_v28 = vrot.slane %v11013_v31, 6 }
 0x36b   : > { %v5110_v59 = vadd.f32 %v4870_v39, %v4469_v50  ;;  %v6337_v47 = vld [vmem:[#allocation2 + $0x23a] ss:$2 sm:$0xff]  ;;  %v6341_v38 = vld [vmem:[#allocation2 + $0x23b] ss:$2 sm:$0xff]  ;;  %v5512_v45 = vsel %vm2559_vm2, %v5509_v0, %v5511_v5  ;;  %v11201_v26 = vmul.f32 %v6814_v30, %v727_v61  ;;  %v11203_v52 = vadd.f32 %v3707_v22, %v3595_v6 }
 0x36c   : > { %v5510_v27 = vsel %vm2559_vm2, %v12916_v28, %v5509_v0  ;;  %v6346_v3 = vmax.f32 %v6337_v47, %v6341_v38  ;;  %v5751_v11 = vadd.f32 %v5512_v45, %v5111_v8  ;;  %v12722_v19 = vrot.slane %v11182_v55, 1 }
 0x36d   : > { %v5750_v9 = vadd.f32 %v5510_v27, %v5110_v59  ;;  %v2073_v31 = vrot.slane %v11185_v10, 2  ;;  %v11208_v49 = vmul.f32 %v6818_v33, %v727_v61  ;;  %v11211_v44 = vmul.f32 %v6823_v36, %v727_v61 }
 0x36e   : > { %v12917_v0 = vmax.f32 %v10948_v12, %v10950_v54  ;;  %v5863_v6 = vadd.f32 %v10999_v34, %v5751_v11  ;;  %v11219_v48 = vmul.f32 %v6821_v35, %v727_v61  ;;  %v12721_v17 = vrot.slane %v11201_v26, 6 }
 0x36f   : > { %v5862_v22 = vadd.f32 %v10999_v34, %v5750_v9  ;;  %v11223_v39 = vmul.f32 %v6827_v41, %v727_v61  ;;  %v1134_v20 = vmul.f32 %v6806_v18, %v722_v43  ;;  %v1775_v59 = vmul.f32 %v6809_v23, %v722_v43 }
 0x370   : > { %v6348_v50 = vmax.f32 %v12917_v0, %v6346_v3  ;;  %v5968_v54 = vmax.f32 %v5863_v6, 0.0  ;;  %v2428_v8 = vmul.f32 %v6814_v30, %v722_v43  ;;  %v3069_v47 = vmul.f32 %v6818_v33, %v722_v43 }
 0x371   : > { %v5967_v12 = vmax.f32 %v5862_v22, 0.0  ;;  %v3364_v38 = vrot.slane %v11208_v49, 7  ;;  %v4234_v28 = vrot.slane %v11211_v44, 4  ;;  %v11234_v27 = vmul.f32 %v6829_v42, %v727_v61 }
 0x372   : > { %6554 = vst.msk [vmem:[%s7456_s28 + $0x90] sm:$0xff] %vm5998_vm6, %v6348_v50  ;;  %v1430_v45 = vrot.slane %v1134_v20, 1  ;;  %6074 = vst.msk [vmem:[#allocation2 + $0x258] sm:$0xff] %vm5998_vm6, %v5968_v54  ;;  %v2071_v3 = vrot.slane %v1775_v59, 2  ;;  %v2721_v9 = vrot.slane %v2428_v8, 6  ;;  %v3943_v11 = vmul.f32 %v6823_v36, %v722_v43 }
 0x373   : > { %6073 = vst.msk [vmem:[#allocation2 + $0x250] sm:$0xff] %vm5998_vm6, %v5967_v12  ;;  %v4584_v0 = vmul.f32 %v6827_v41, %v722_v43  ;;  %v4875_v50 = vrot.slane %v11223_v39, 5  ;;  %v3811_v22 = vadd.f32 %v11028_v16, %v11067_v1  ;;  %v3362_v6 = vrot.slane %v3069_v47, 7 }
 0x374   : > { %v5225_v61 = vmul.f32 %v6829_v42, %v722_v43  ;;  %v1431_v20 = vsel %vm1262_vm0, %v1428_v14, %v1430_v45  ;;  %v1433_v59 = vsel %vm1262_vm0, %v1430_v45, %v12722_v19  ;;  %v2722_v12 = vsel %vm2559_vm2, %v2719_v62, %v2721_v9 }
 0x375   : > { %v2724_v54 = vsel %vm2559_vm2, %v2721_v9, %v12721_v17  ;;  %v912_v1 = vmul.f32 %v6812_v29, %v722_v43  ;;  %v2956_v4 = vadd.f32 %v2722_v12, %v11065_v56  ;;  %v3709_v14 = vmul.f32 %v6821_v35, %v722_v43  ;;  %v737_v43 = vpop.permute.xlu1 %736 }
 0x376   : > { %v12918_v8 = vrot.slane %v11081_v15, 2  ;;  %v2074_v21 = vsel %vm1903_vm1, %v2071_v3, %v2073_v31  ;;  %v4232_v62 = vrot.slane %v3943_v11, 4  ;;  %v4873_v45 = vrot.slane %v4584_v0, 5 }
 0x377   : > { %v1662_v9 = vadd.f32 %v1431_v20, %v11075_v46  ;;  %v1663_v17 = vadd.f32 %v1433_v59, %v912_v1  ;;  %v2957_v19 = vadd.f32 %v2724_v54, %v11172_v60  ;;  %v12919_v16 = vrot.slane %v11089_v25, 7 }
 0x378   : > { %v2072_v47 = vsel %vm1903_vm1, %v12918_v8, %v2071_v3  ;;  %v3365_v15 = vsel %vm3200_vm3, %v3362_v6, %v3364_v38  ;;  %v4233_v3 = vsel %vm4078_vm4, %v4230_v7, %v4232_v62  ;;  %v4235_v46 = vsel %vm4078_vm4, %v4232_v62, %v4234_v28 }
 0x379   : > { %v3363_v56 = vsel %vm3200_vm3, %v12919_v16, %v3362_v6  ;;  %v5513_v11 = vrot.slane %v5225_v61, 6  ;;  %v4471_v25 = vadd.f32 %v4233_v3, %v11083_v51  ;;  %v4472_v59 = vadd.f32 %v4235_v46, %v3811_v22 }
 0x37a   : > { %v6339_v0 = vld [vmem:[#allocation2 + $0x24a] ss:$2 sm:$0x3f]  ;;  %v6343_v60 = vld [vmem:[#allocation2 + $0x24b] ss:$2 sm:$0x3f]  ;;  %v3597_v20 = vadd.f32 %v3363_v56, %v2956_v4  ;;  %v4874_v12 = vsel %vm4719_vm5, %v4871_v37, %v4873_v45  ;;  %v4876_v2 = vsel %vm4719_vm5, %v4873_v45, %v4875_v50  ;;  %v11288_v7 = vmul.f32 %v6806_v18, %v737_v43 }
 0x37b   : > { %v6347_v6 = vmax.f32 %v6339_v0, %v6343_v60  ;;  %v11291_v61 = vmul.f32 %v6809_v23, %v737_v43  ;;  %v2303_v54 = vadd.f32 %v2072_v47, %v1662_v9  ;;  %v11293_v16 = vadd.f32 %v2074_v21, %v1663_v17  ;;  %v732_v47 = vpop.permute.xlu0 %731 }
 0x37c   : > { %v5112_v51 = vadd.f32 %v4874_v12, %v4471_v25  ;;  %v5113_v22 = vadd.f32 %v4876_v2, %v4472_v59  ;;  %v12920_v40 = vmax.f32 %v11070_v13, %v11072_v58  ;;  %v5514_v1 = vsel %vm2559_vm2, %v5511_v5, %v5513_v11 }
 0x37d   : > { %v12921_v4 = vrot.slane %v11234_v27, 6  ;;  %v11305_v62 = vmul.f32 %v6814_v30, %v737_v43  ;;  %v11307_v17 = vadd.f32 %v3365_v15, %v2957_v19  ;;  %v11310_v9 = vmul.f32 %v6812_v29, %v737_v43 }
 0x37e   : > { %v6349_v37 = vmax.f32 %v12920_v40, %v6347_v6  ;;  %v5752_v21 = vadd.f32 %v5514_v1, %v5112_v51  ;;  %v11314_v13 = vadd.f32 %v3709_v14, %v3597_v20  ;;  %v1436_v58 = vrot.slane %v11288_v7, 1 }
 0x37f   : > { %v5516_v8 = vsel %vm2559_vm2, %v5513_v11, %v12921_v4  ;;  %v2077_v53 = vrot.slane %v11291_v61, 2  ;;  %v11319_v5 = vmul.f32 %v6818_v33, %v737_v43  ;;  %v11324_v15 = vmul.f32 %v6823_v36, %v737_v43 }
 0x380   : > { %v5753_v45 = vadd.f32 %v5516_v8, %v5113_v22  ;;  %6555 = vst.msk [vmem:[%s7456_s28 + $0x98] sm:$0x3f] %vm6126_vm7, %v6349_v37  ;;  %v5864_v56 = vadd.f32 %v10999_v34, %v5752_v21  ;;  %v1136_v3 = vmul.f32 %v6806_v18, %v732_v47  ;;  %v2727_v46 = vrot.slane %v11305_v62, 6 }
 0x381   : > { %v11329_v14 = vmul.f32 %v6821_v35, %v737_v43  ;;  %v11332_v11 = vmul.f32 %v6827_v41, %v737_v43  ;;  %v1777_v0 = vmul.f32 %v6809_v23, %v732_v47  ;;  %v2430_v59 = vmul.f32 %v6814_v30, %v732_v47 }
 0x382   : > { %v5865_v19 = vadd.f32 %v10999_v34, %v5753_v45  ;;  %v5969_v60 = vmax.f32 %v5864_v56, 0.0  ;;  %v1434_v25 = vrot.slane %v1136_v3, 1  ;;  %v3368_v12 = vrot.slane %v11319_v5, 7 }
 0x383   : > { %v11338_v6 = vmul.f32 %v6829_v42, %v737_v43  ;;  %v3071_v2 = vmul.f32 %v6818_v33, %v732_v47  ;;  %v3945_v51 = vmul.f32 %v6823_v36, %v732_v47  ;;  %v4238_v22 = vrot.slane %v11324_v15, 4 }
 0x384   : > { %v5970_v20 = vmax.f32 %v5865_v19, 0.0  ;;  %6075 = vst.msk [vmem:[#allocation2 + $0x260] sm:$0xff] %vm5998_vm6, %v5969_v60  ;;  %v3813_v40 = vadd.f32 %v11092_v57, %v11192_v32  ;;  %v12922_v37 = vrot.slane %v11182_v55, 1  ;;  %v2725_v4 = vrot.slane %v2430_v59, 6 }
 0x385   : > { %v4879_v43 = vrot.slane %v11332_v11, 5  ;;  %v914_v8 = vmul.f32 %v6812_v29, %v732_v47  ;;  %v1437_v21 = vsel %vm1262_vm0, %v1434_v25, %v1436_v58  ;;  %v2075_v45 = vrot.slane %v1777_v0, 2 }
 0x386   : > { %6076 = vst.msk [vmem:[#allocation2 + $0x268] sm:$0xff] %vm5998_vm6, %v5970_v20  ;;  %v1435_v1 = vsel %vm1262_vm0, %v12922_v37, %v1434_v25  ;;  %v12923_v56 = vrot.slane %v11201_v26, 6  ;;  %v3366_v3 = vrot.slane %v3071_v2, 7  ;;  %v4236_v57 = vrot.slane %v3945_v51, 4  ;;  %v747_v51 = vpop.permute.xlu1 %746 }
 0x387   : > { %v4586_v55 = vmul.f32 %v6827_v41, %v732_v47  ;;  %v5519_v32 = vrot.slane %v11338_v6, 6  ;;  %v1664_v60 = vadd.f32 %v1435_v1, %v11190_v63  ;;  %v2728_v20 = vsel %vm2559_vm2, %v2725_v4, %v2727_v46 }
 0x388   : > { %v2726_v19 = vsel %vm2559_vm2, %v12923_v56, %v2725_v4  ;;  %v1665_v25 = vadd.f32 %v1437_v21, %v914_v8  ;;  %v3711_v0 = vmul.f32 %v6821_v35, %v732_v47  ;;  %v4237_v26 = vsel %vm4078_vm4, %v4234_v28, %v4236_v57 }
 0x389   : > { %v2958_v59 = vadd.f32 %v2726_v19, %v11187_v24  ;;  %v4239_v2 = vsel %vm4078_vm4, %v4236_v57, %v4238_v22  ;;  %v2076_v63 = vsel %vm1903_vm1, %v2073_v31, %v2075_v45  ;;  %v2078_v24 = vsel %vm1903_vm1, %v2075_v45, %v2077_v53 }
 0x38a   : > { %v4473_v37 = vadd.f32 %v4237_v26, %v11203_v52  ;;  %v4474_v1 = vadd.f32 %v4239_v2, %v3813_v40  ;;  %v2959_v4 = vadd.f32 %v2728_v20, %v2303_v54  ;;  %v3367_v44 = vsel %vm3200_vm3, %v3364_v38, %v3366_v3  ;;  %v757_v62 = vpop.permute.xlu1 %756 }
 0x38b   : > { %v4877_v28 = vrot.slane %v4586_v55, 5  ;;  %v5227_v8 = vmul.f32 %v6829_v42, %v732_v47  ;;  %v11383_v21 = vadd.f32 %v2076_v63, %v1664_v60  ;;  %v3599_v10 = vadd.f32 %v3367_v44, %v2958_v59  ;;  %v11400_v47 = vld [vmem:[#allocation2 + $0x258] ss:$2 sm:$0xff]  ;;  %v11402_v40 = vld [vmem:[#allocation2 + $0x259] ss:$2 sm:$0xff] }
 0x38c   : > { %v11386_v31 = vmul.f32 %v6806_v18, %v747_v51  ;;  %v11389_v56 = vmul.f32 %v6809_v23, %v747_v51  ;;  %v11398_v54 = vmul.f32 %v6814_v30, %v747_v51  ;;  %v11404_v45 = vadd.f32 %v2078_v24, %v1665_v25  ;;  %v742_v25 = vpop.permute.xlu0 %741 }
 0x38d   : > { %v4878_v52 = vsel %vm4719_vm5, %v4875_v50, %v4877_v28  ;;  %v4880_v49 = vsel %vm4719_vm5, %v4877_v28, %v4879_v43  ;;  %v5517_v38 = vrot.slane %v5227_v8, 6  ;;  %v3369_v39 = vsel %vm3200_vm3, %v3366_v3, %v3368_v12 }
 0x38e   : > { %v5114_v19 = vadd.f32 %v4878_v52, %v4473_v37  ;;  %v5115_v50 = vadd.f32 %v4880_v49, %v4474_v1  ;;  %v11409_v57 = vadd.f32 %v3369_v39, %v2959_v4  ;;  %v12924_v55 = vrot.slane %v11234_v27, 6 }
 0x38f   : > { %v5520_v20 = vsel %vm2559_vm2, %v5517_v38, %v5519_v32  ;;  %v11418_v59 = vmul.f32 %v6812_v29, %v747_v51  ;;  %v11420_v26 = vadd.f32 %v3711_v0, %v3599_v10  ;;  %v11423_v63 = vmul.f32 %v6818_v33, %v747_v51 }
 0x390   : > { %v5518_v60 = vsel %vm2559_vm2, %v12924_v55, %v5517_v38  ;;  %v5755_v3 = vadd.f32 %v5520_v20, %v5115_v50  ;;  %v12723_v24 = vrot.slane %v11386_v31, 1  ;;  %v2081_v37 = vrot.slane %v11389_v56, 2 }
 0x391   : > { %v5754_v2 = vadd.f32 %v5518_v60, %v5114_v19  ;;  %v2731_v1 = vrot.slane %v11398_v54, 6  ;;  %v11433_v0 = vmul.f32 %v6823_v36, %v747_v51  ;;  %v1138_v28 = vmul.f32 %v6806_v18, %v742_v25 }
 0x392   : > { %v5867_v44 = vadd.f32 %v10999_v34, %v5755_v3  ;;  %v11437_v8 = vmul.f32 %v6827_v41, %v747_v51  ;;  %v11440_v10 = vmul.f32 %v6829_v42, %v747_v51  ;;  %v1779_v52 = vmul.f32 %v6809_v23, %v742_v25 }
 0x393   : > { %v5866_v4 = vadd.f32 %v10999_v34, %v5754_v2  ;;  %v2432_v49 = vmul.f32 %v6814_v30, %v742_v25  ;;  %v1438_v19 = vrot.slane %v1138_v28, 1  ;;  %v3073_v50 = vmul.f32 %v6818_v33, %v742_v25 }
 0x394   : > { %v5972_v39 = vmax.f32 %v5867_v44, 0.0  ;;  %v3372_v55 = vrot.slane %v11423_v63, 7  ;;  %v11447_v60 = vmul.f32 %v6821_v35, %v747_v51  ;;  %v2079_v20 = vrot.slane %v1779_v52, 2 }
 0x395   : > { %v5971_v38 = vmax.f32 %v5866_v4, 0.0  ;;  %v2729_v2 = vrot.slane %v2432_v49, 6  ;;  %v1439_v3 = vsel %vm1262_vm0, %v1436_v58, %v1438_v19  ;;  %v1441_v4 = vsel %vm1262_vm0, %v1438_v19, %v12723_v24 }
 0x396   : > { %6078 = vst.msk [vmem:[#allocation2 + $0x278] sm:$0xff] %vm5998_vm6, %v5972_v39  ;;  %v3947_v44 = vmul.f32 %v6823_v36, %v742_v25  ;;  %v4588_v28 = vmul.f32 %v6827_v41, %v742_v25  ;;  %v3815_v51 = vadd.f32 %v11219_v48, %v11307_v17  ;;  %v916_v52 = vmul.f32 %v6812_v29, %v742_v25 }
 0x397   : > { %6077 = vst.msk [vmem:[#allocation2 + $0x270] sm:$0xff] %vm5998_vm6, %v5971_v38  ;;  %v1666_v49 = vadd.f32 %v1439_v3, %v11310_v9  ;;  %v3370_v38 = vrot.slane %v3073_v50, 7  ;;  %v4242_v7 = vrot.slane %v11433_v0, 4  ;;  %v12724_v58 = vrot.slane %v11437_v8, 5 }
 0x398   : > { %v2730_v19 = vsel %vm2559_vm2, %v2727_v46, %v2729_v2  ;;  %v1667_v27 = vadd.f32 %v1441_v4, %v916_v52  ;;  %v2732_v48 = vsel %vm2559_vm2, %v2729_v2, %v2731_v1  ;;  %v3713_v9 = vmul.f32 %v6821_v35, %v742_v25 }
 0x399   : > { %v2960_v17 = vadd.f32 %v2730_v19, %v11293_v16  ;;  %v2080_v50 = vsel %vm1903_vm1, %v2077_v53, %v2079_v20  ;;  %v4240_v3 = vrot.slane %v3947_v44, 4  ;;  %v4881_v24 = vrot.slane %v4588_v28, 5 }
 0x39a   : > { %v5229_v39 = vmul.f32 %v6829_v42, %v742_v25  ;;  %v2082_v46 = vsel %vm1903_vm1, %v2079_v20, %v2081_v37  ;;  %v11481_v4 = vadd.f32 %v2080_v50, %v1666_v49  ;;  %v3371_v16 = vsel %vm3200_vm3, %v3368_v12, %v3370_v38 }
 0x39b   : > { %v3373_v61 = vsel %vm3200_vm3, %v3370_v38, %v3372_v55  ;;  %v2961_v53 = vadd.f32 %v2732_v48, %v11383_v21  ;;  %v3601_v2 = vadd.f32 %v3371_v16, %v2960_v17  ;;  %v4241_v25 = vsel %vm4078_vm4, %v4238_v22, %v4240_v3 }
 0x39c   : > { %v4243_v20 = vsel %vm4078_vm4, %v4240_v3, %v4242_v7  ;;  %v4475_v5 = vadd.f32 %v4241_v25, %v11314_v13  ;;  %v11500_v28 = vmul.f32 %v6806_v18, %v757_v62  ;;  %v11503_v52 = vmul.f32 %v6809_v23, %v757_v62 }
 0x39d   : > { %v4476_v12 = vadd.f32 %v4243_v20, %v3815_v51  ;;  %v4882_v15 = vsel %vm4719_vm5, %v4879_v43, %v4881_v24  ;;  %v4884_v22 = vsel %vm4719_vm5, %v4881_v24, %v12724_v58  ;;  %v5521_v49 = vrot.slane %v5229_v39, 6 }
 0x39e   : > { %v11496_v44 = vld [vmem:[#allocation2 + $0x268] ss:$2 sm:$0x3f]  ;;  %v11505_v21 = vld [vmem:[#allocation2 + $0x269] ss:$2 sm:$0x3f]  ;;  %v11514_v13 = vmul.f32 %v6814_v30, %v757_v62  ;;  %v11516_v51 = vadd.f32 %v2082_v46, %v1667_v27  ;;  %v5116_v38 = vadd.f32 %v4882_v15, %v4475_v5  ;;  %v11519_v48 = vmul.f32 %v6812_v29, %v757_v62  ;;  %v752_v27 = vpop.permute.xlu0 %751 }
 0x39f   : > { %v5117_v19 = vadd.f32 %v4884_v22, %v4476_v12  ;;  %v11521_v17 = vadd.f32 %v3373_v61, %v2961_v53  ;;  %v5522_v11 = vsel %vm2559_vm2, %v5519_v32, %v5521_v49  ;;  %v12925_v43 = vrot.slane %v11440_v10, 6 }
 0x3a0   : > { %v11530_v39 = vmul.f32 %v6818_v33, %v757_v62  ;;  %v11534_v3 = vadd.f32 %v3713_v9, %v3601_v2  ;;  %v5756_v46 = vadd.f32 %v5522_v11, %v5116_v38  ;;  %v12725_v61 = vrot.slane %v11500_v28, 1 }
 0x3a1   : > { %v5524_v24 = vsel %vm2559_vm2, %v5521_v49, %v12925_v43  ;;  %v2085_v6 = vrot.slane %v11503_v52, 2  ;;  %v2735_v32 = vrot.slane %v11514_v13, 6  ;;  %v11540_v53 = vmul.f32 %v6821_v35, %v757_v62 }
 0x3a2   : > { %v5757_v16 = vadd.f32 %v5524_v24, %v5117_v19  ;;  %v5868_v25 = vadd.f32 %v10999_v34, %v5756_v46  ;;  %v11545_v5 = vmul.f32 %v6823_v36, %v757_v62  ;;  %v1140_v9 = vmul.f32 %v6806_v18, %v752_v27 }
 0x3a3   : > { %v3376_v2 = vrot.slane %v11530_v39, 7  ;;  %v1781_v12 = vmul.f32 %v6809_v23, %v752_v27  ;;  %v2434_v15 = vmul.f32 %v6814_v30, %v752_v27  ;;  %v3075_v22 = vmul.f32 %v6818_v33, %v752_v27 }
 0x3a4   : > { %v5869_v20 = vadd.f32 %v10999_v34, %v5757_v16  ;;  %v5973_v49 = vmax.f32 %v5868_v25, 0.0  ;;  %v11553_v19 = vmul.f32 %v6827_v41, %v757_v62  ;;  %v1442_v11 = vrot.slane %v1140_v9, 1 }
 0x3a5   : > { %v11556_v43 = vmul.f32 %v6829_v42, %v757_v62  ;;  %v918_v24 = vmul.f32 %v6812_v29, %v752_v27  ;;  %v2083_v46 = vrot.slane %v1781_v12, 2  ;;  %v2733_v16 = vrot.slane %v2434_v15, 6 }
 0x3a6   : > { %v5974_v38 = vmax.f32 %v5869_v20, 0.0  ;;  %6079 = vst.msk [vmem:[#allocation2 + $0x280] sm:$0xff] %vm5998_vm6, %v5973_v49  ;;  %v12926_v50 = vrot.slane %v11386_v31, 1  ;;  %v1445_v20 = vsel %vm1262_vm0, %v1442_v11, %v12725_v61  ;;  %v3949_v9 = vmul.f32 %v6823_v36, %v752_v27 }
 0x3a7   : > { %v4590_v62 = vmul.f32 %v6827_v41, %v752_v27  ;;  %v3817_v12 = vadd.f32 %v11329_v14, %v11409_v57  ;;  %v3374_v49 = vrot.slane %v3075_v22, 7  ;;  %v2734_v31 = vsel %vm2559_vm2, %v2731_v1, %v2733_v16 }
 0x3a8   : > { %6080 = vst.msk [vmem:[#allocation2 + $0x288] sm:$0xff] %vm5998_vm6, %v5974_v38  ;;  %v1443_v25 = vsel %vm1262_vm0, %v12926_v50, %v1442_v11  ;;  %v1669_v38 = vadd.f32 %v1445_v20, %v918_v24  ;;  %v2736_v50 = vsel %vm2559_vm2, %v2733_v16, %v2735_v32  ;;  %v5231_v11 = vmul.f32 %v6829_v42, %v752_v27  ;;  %v767_v24 = vpop.permute.xlu1 %766 }
 0x3a9   : > { %v1668_v15 = vadd.f32 %v1443_v25, %v11418_v59  ;;  %v4887_v61 = vrot.slane %v11553_v19, 5  ;;  %v5527_v58 = vrot.slane %v11556_v43, 6  ;;  %v2962_v14 = vadd.f32 %v2734_v31, %v11404_v45 }
 0x3aa   : > { %v3715_v57 = vmul.f32 %v6821_v35, %v752_v27  ;;  %v2084_v54 = vsel %vm1903_vm1, %v2081_v37, %v2083_v46  ;;  %v2086_v59 = vsel %vm1903_vm1, %v2083_v46, %v2085_v6  ;;  %v4244_v1 = vrot.slane %v3949_v9, 4 }
 0x3ab   : > { %v4885_v22 = vrot.slane %v4590_v62, 5  ;;  %v11590_v16 = vadd.f32 %v2084_v54, %v1668_v15  ;;  %v2963_v25 = vadd.f32 %v2736_v50, %v11481_v4  ;;  %v3375_v45 = vsel %vm3200_vm3, %v3372_v55, %v3374_v49 }
 0x3ac   : > { %v3377_v56 = vsel %vm3200_vm3, %v3374_v49, %v3376_v2  ;;  %v11599_v37 = vadd.f32 %v2086_v59, %v1669_v38  ;;  %v4245_v27 = vsel %vm4078_vm4, %v4242_v7, %v4244_v1  ;;  %v12927_v46 = vrot.slane %v11545_v5, 4 }
 0x3ad   : > { %v5525_v9 = vrot.slane %v5231_v11, 6  ;;  %v6362_v4 = vld [vmem:[#allocation2 + $0x276] ss:$2 sm:$0xff]  ;;  %v6366_v62 = vld [vmem:[#allocation2 + $0x277] ss:$2 sm:$0xff]  ;;  %v3603_v63 = vadd.f32 %v3375_v45, %v2962_v14  ;;  %v4477_v55 = vadd.f32 %v4245_v27, %v11420_v26  ;;  %v11609_v31 = vmul.f32 %v6806_v18, %v767_v24  ;;  %v762_v45 = vpop.permute.xlu0 %761 }
 0x3ae   : > { %v4247_v20 = vsel %vm4078_vm4, %v4244_v1, %v12927_v46  ;;  %v6371_v49 = vmax.f32 %v6362_v4, %v6366_v62  ;;  %v12928_v38 = vrot.slane %v11437_v8, 5  ;;  %v4888_v7 = vsel %vm4719_vm5, %v4885_v22, %v4887_v61 }
 0x3af   : > { %v4478_v15 = vadd.f32 %v4247_v20, %v3817_v12  ;;  %v11618_v50 = vmul.f32 %v6809_v23, %v767_v24  ;;  %v11620_v11 = vadd.f32 %v3377_v56, %v2963_v25  ;;  %v11623_v14 = vmul.f32 %v6812_v29, %v767_v24 }
 0x3b0   : > { %v4886_v0 = vsel %vm4719_vm5, %v12928_v38, %v4885_v22  ;;  %v12929_v8 = vmax.f32 %v11400_v47, %v11402_v40  ;;  %v12930_v59 = vrot.slane %v11440_v10, 6  ;;  %v5528_v22 = vsel %vm2559_vm2, %v5525_v9, %v5527_v58 }
 0x3b1   : > { %v5118_v26 = vadd.f32 %v4886_v0, %v4477_v55  ;;  %v5119_v12 = vadd.f32 %v4888_v7, %v4478_v15  ;;  %v11635_v25 = vmul.f32 %v6814_v30, %v767_v24  ;;  %v11637_v56 = vadd.f32 %v3715_v57, %v3603_v63 }
 0x3b2   : > { %v6373_v54 = vmax.f32 %v12929_v8, %v6371_v49  ;;  %v5526_v1 = vsel %vm2559_vm2, %v12930_v59, %v5525_v9  ;;  %v11640_v20 = vmul.f32 %v6818_v33, %v767_v24  ;;  %v12726_v47 = vrot.slane %v11609_v31, 1 }
 0x3b3   : > { %v5758_v27 = vadd.f32 %v5526_v1, %v5118_v26  ;;  %v5759_v46 = vadd.f32 %v5528_v22, %v5119_v12  ;;  %v2089_v40 = vrot.slane %v11618_v50, 2  ;;  %v11647_v10 = vmul.f32 %v6821_v35, %v767_v24 }
 0x3b4   : > { %6556 = vst.msk [vmem:[%s7456_s28 + $0xa0] sm:$0xff] %vm5998_vm6, %v6373_v54  ;;  %v11650_v9 = vmul.f32 %v6823_v36, %v767_v24  ;;  %v11655_v62 = vmul.f32 %v6827_v41, %v767_v24  ;;  %v1142_v63 = vmul.f32 %v6806_v18, %v762_v45  ;;  %v2739_v55 = vrot.slane %v11635_v25, 6 }
 0x3b5   : > { %v5870_v57 = vadd.f32 %v10999_v34, %v5758_v27  ;;  %v5871_v4 = vadd.f32 %v10999_v34, %v5759_v46  ;;  %v1783_v15 = vmul.f32 %v6809_v23, %v762_v45  ;;  %v2436_v49 = vmul.f32 %v6814_v30, %v762_v45 }
 0x3b6   : > { %v3077_v38 = vmul.f32 %v6818_v33, %v762_v45  ;;  %v3380_v26 = vrot.slane %v11640_v20, 7  ;;  %v1446_v12 = vrot.slane %v1142_v63, 1  ;;  %v11664_v34 = vmul.f32 %v6829_v42, %v767_v24 }
 0x3b7   : > { %v5975_v0 = vmax.f32 %v5870_v57, 0.0  ;;  %v5976_v7 = vmax.f32 %v5871_v4, 0.0  ;;  %v920_v8 = vmul.f32 %v6812_v29, %v762_v45  ;;  %v2087_v54 = vrot.slane %v1783_v15, 2 }
 0x3b8   : > { %v2737_v59 = vrot.slane %v2436_v49, 6  ;;  %v12931_v1 = vrot.slane %v11500_v28, 1  ;;  %v1449_v27 = vsel %vm1262_vm0, %v1446_v12, %v12726_v47  ;;  %v3951_v46 = vmul.f32 %v6823_v36, %v762_v45 }
 0x3b9   : > { %6081 = vst.msk [vmem:[#allocation2 + $0x290] sm:$0xff] %vm5998_vm6, %v5975_v0  ;;  %6082 = vst.msk [vmem:[#allocation2 + $0x298] sm:$0xff] %vm5998_vm6, %v5976_v7  ;;  %v4592_v24 = vmul.f32 %v6827_v41, %v762_v45  ;;  %v4250_v57 = vrot.slane %v11650_v9, 4  ;;  %v4891_v4 = vrot.slane %v11655_v62, 5  ;;  %v3378_v15 = vrot.slane %v3077_v38, 7 }
 0x3ba   : > { %v1447_v22 = vsel %vm1262_vm0, %v12931_v1, %v1446_v12  ;;  %v1671_v49 = vadd.f32 %v1449_v27, %v920_v8  ;;  %v2738_v28 = vsel %vm2559_vm2, %v2735_v32, %v2737_v59  ;;  %v2740_v0 = vsel %vm2559_vm2, %v2737_v59, %v2739_v55  ;;  %v777_v59 = vpop.permute.xlu1 %776 }
 0x3bb   : > { %v1670_v63 = vadd.f32 %v1447_v22, %v11519_v48  ;;  %v5233_v7 = vmul.f32 %v6829_v42, %v762_v45  ;;  %v5531_v12 = vrot.slane %v11664_v34, 6  ;;  %v3819_v1 = vadd.f32 %v11447_v60, %v11521_v17 }
 0x3bc   : > { %v2964_v47 = vadd.f32 %v2738_v28, %v11516_v51  ;;  %v3717_v48 = vmul.f32 %v6821_v35, %v762_v45  ;;  %v2088_v13 = vsel %vm1903_vm1, %v2085_v6, %v2087_v54  ;;  %v2090_v32 = vsel %vm1903_vm1, %v2087_v54, %v2089_v40 }
 0x3bd   : > { %v4248_v38 = vrot.slane %v3951_v46, 4  ;;  %v4889_v8 = vrot.slane %v4592_v24, 5  ;;  %v11698_v22 = vadd.f32 %v2088_v13, %v1670_v63  ;;  %v2965_v27 = vadd.f32 %v2740_v0, %v11590_v16 }
 0x3be   : > { %v3379_v60 = vsel %vm3200_vm3, %v3376_v2, %v3378_v15  ;;  %v3381_v52 = vsel %vm3200_vm3, %v3378_v15, %v3380_v26  ;;  %v11707_v51 = vadd.f32 %v2090_v32, %v1671_v49  ;;  %v12932_v17 = vrot.slane %v11545_v5, 4 }
 0x3bf   : > { %v4251_v45 = vsel %vm4078_vm4, %v4248_v38, %v4250_v57  ;;  %v5529_v54 = vrot.slane %v5233_v7, 6  ;;  %v3605_v39 = vadd.f32 %v3379_v60, %v2964_v47  ;;  %v11717_v63 = vmul.f32 %v6806_v18, %v777_v59 }
 0x3c0   : > { %v4249_v6 = vsel %vm4078_vm4, %v12932_v17, %v4248_v38  ;;  %v6364_v16 = vld [vmem:[#allocation2 + $0x286] ss:$2 sm:$0x3f]  ;;  %v6368_v46 = vld [vmem:[#allocation2 + $0x287] ss:$2 sm:$0x3f]  ;;  %v4480_v24 = vadd.f32 %v4251_v45, %v3819_v1  ;;  %v4890_v5 = vsel %vm4719_vm5, %v4887_v61, %v4889_v8  ;;  %v4892_v49 = vsel %vm4719_vm5, %v4889_v8, %v4891_v4  ;;  %v772_v38 = vpop.permute.xlu0 %771 }
 0x3c1   : > { %v4479_v2 = vadd.f32 %v4249_v6, %v11534_v3  ;;  %v6372_v15 = vmax.f32 %v6364_v16, %v6368_v46  ;;  %v11726_v28 = vmul.f32 %v6809_v23, %v777_v59  ;;  %v11728_v47 = vadd.f32 %v3381_v52, %v2965_v27  ;;  %v11760_v17 = vld [vmem:[#allocation3] ss:$0 sm:$0xff] }
 0x3c2   : > { %v5121_v0 = vadd.f32 %v4892_v49, %v4480_v24  ;;  %v11731_v7 = vmul.f32 %v6812_v29, %v777_v59  ;;  %v12933_v19 = vmax.f32 %v11496_v44, %v11505_v21  ;;  %v5530_v61 = vsel %vm2559_vm2, %v5527_v58, %v5529_v54 }
 0x3c3   : > { %v5120_v3 = vadd.f32 %v4890_v5, %v4479_v2  ;;  %v5532_v13 = vsel %vm2559_vm2, %v5529_v54, %v5531_v12  ;;  %v11743_v32 = vmul.f32 %v6814_v30, %v777_v59  ;;  %v11745_v8 = vadd.f32 %v3717_v48, %v3605_v39 }
 0x3c4   : > { %v6374_v1 = vmax.f32 %v12933_v19, %v6372_v15  ;;  %v5761_v60 = vadd.f32 %v5532_v13, %v5121_v0  ;;  %v11748_v52 = vmul.f32 %v6818_v33, %v777_v59  ;;  %v12727_v44 = vrot.slane %v11717_v63, 1 }
 0x3c5   : > { %v5760_v27 = vadd.f32 %v5530_v61, %v5120_v3  ;;  %v2093_v58 = vrot.slane %v11726_v28, 2  ;;  %v11755_v21 = vmul.f32 %v6821_v35, %v777_v59  ;;  %v11758_v43 = vmul.f32 %v6823_v36, %v777_v59 }
 0x3c6   : > { %6557 = vst.msk [vmem:[%s7456_s28 + $0xa8] sm:$0x3f] %vm6126_vm7, %v6374_v1  ;;  %v5873_v6 = vadd.f32 %v11760_v17, %v5761_v60  ;;  %v11765_v45 = vmul.f32 %v6827_v41, %v777_v59  ;;  %v1144_v54 = vmul.f32 %v6806_v18, %v772_v38  ;;  %v2743_v16 = vrot.slane %v11743_v32, 6 }
 0x3c7   : > { %v5872_v48 = vadd.f32 %v11760_v17, %v5760_v27  ;;  %v1785_v46 = vmul.f32 %v6809_v23, %v772_v38  ;;  %v2438_v39 = vmul.f32 %v6814_v30, %v772_v38  ;;  %v3079_v2 = vmul.f32 %v6818_v33, %v772_v38 }
 0x3c8   : > { %v5978_v15 = vmax.f32 %v5873_v6, 0.0  ;;  %v3384_v5 = vrot.slane %v11748_v52, 7  ;;  %v1450_v49 = vrot.slane %v1144_v54, 1  ;;  %v4254_v3 = vrot.slane %v11758_v43, 4 }
 0x3c9   : > { %v5977_v24 = vmax.f32 %v5872_v48, 0.0  ;;  %v11775_v0 = vmul.f32 %v6829_v42, %v777_v59  ;;  %v2091_v19 = vrot.slane %v1785_v46, 2  ;;  %v2741_v1 = vrot.slane %v2438_v39, 6 }
 0x3ca   : > { %6084 = vst.msk [vmem:[#allocation2 + $0x2a8] sm:$0xff] %vm5998_vm6, %v5978_v15  ;;  %v12934_v61 = vrot.slane %v11609_v31, 1  ;;  %v1453_v27 = vsel %vm1262_vm0, %v1450_v49, %v12727_v44  ;;  %v3953_v60 = vmul.f32 %v6823_v36, %v772_v38  ;;  %v4594_v48 = vmul.f32 %v6827_v41, %v772_v38 }
 0x3cb   : > { %6083 = vst.msk [vmem:[#allocation2 + $0x2a0] sm:$0xff] %vm5998_vm6, %v5977_v24  ;;  %v4895_v59 = vrot.slane %v11765_v45, 5  ;;  %v922_v6 = vmul.f32 %v6812_v29, %v772_v38  ;;  %v3382_v46 = vrot.slane %v3079_v2, 7  ;;  %v3821_v31 = vadd.f32 %v11540_v53, %v11620_v11  ;;  %v787_v2 = vpop.permute.xlu1 %786 }
 0x3cc   : > { %v1451_v13 = vsel %vm1262_vm0, %v12934_v61, %v1450_v49  ;;  %v2742_v39 = vsel %vm2559_vm2, %v2739_v55, %v2741_v1  ;;  %v2744_v24 = vsel %vm2559_vm2, %v2741_v1, %v2743_v16  ;;  %v5235_v15 = vmul.f32 %v6829_v42, %v772_v38 }
 0x3cd   : > { %v1672_v54 = vadd.f32 %v1451_v13, %v11623_v14  ;;  %v12728_v49 = vrot.slane %v11775_v0, 6  ;;  %v1673_v61 = vadd.f32 %v1453_v27, %v922_v6  ;;  %v2966_v44 = vadd.f32 %v2742_v39, %v11599_v37 }
 0x3ce   : > { %v3719_v14 = vmul.f32 %v6821_v35, %v772_v38  ;;  %v2092_v53 = vsel %vm1903_vm1, %v2089_v40, %v2091_v19  ;;  %v2094_v11 = vsel %vm1903_vm1, %v2091_v19, %v2093_v58  ;;  %v4252_v25 = vrot.slane %v3953_v60, 4 }
 0x3cf   : > { %v4893_v55 = vrot.slane %v4594_v48, 5  ;;  %v11808_v1 = vadd.f32 %v2092_v53, %v1672_v54  ;;  %v2967_v13 = vadd.f32 %v2744_v24, %v11698_v22  ;;  %v3383_v37 = vsel %vm3200_vm3, %v3380_v26, %v3382_v46  ;;  %v782_v24 = vpop.permute.xlu0 %781 }
 0x3d0   : > { %v3385_v50 = vsel %vm3200_vm3, %v3382_v46, %v3384_v5  ;;  %v3607_v40 = vadd.f32 %v3383_v37, %v2966_v44  ;;  %v4253_v38 = vsel %vm4078_vm4, %v4250_v57, %v4252_v25  ;;  %v4255_v19 = vsel %vm4078_vm4, %v4252_v25, %v4254_v3 }
 0x3d1   : > { %v5533_v27 = vrot.slane %v5235_v15, 6  ;;  %v11823_v60 = vadd.f32 %v2094_v11, %v1673_v61  ;;  %v4481_v20 = vadd.f32 %v4253_v38, %v11637_v56  ;;  %v4482_v22 = vadd.f32 %v4255_v19, %v3821_v31 }
 0x3d2   : > { %v11827_v26 = vmul.f32 %v6806_v18, %v787_v2  ;;  %v11829_v48 = vld [vmem:[#allocation2 + $0x294] ss:$2 sm:$0xff]  ;;  %v11831_v44 = vld [vmem:[#allocation2 + $0x295] ss:$2 sm:$0xff]  ;;  %v4894_v9 = vsel %vm4719_vm5, %v4891_v4, %v4893_v55  ;;  %v4896_v57 = vsel %vm4719_vm5, %v4893_v55, %v4895_v59  ;;  %v11840_v6 = vmul.f32 %v6809_v23, %v787_v2 }
 0x3d3   : > { %v11843_v56 = vmul.f32 %v6814_v30, %v787_v2  ;;  %v11845_v54 = vld [vmem:[#allocation2 + $0x2a4] ss:$2 sm:$0x3f]  ;;  %v11847_v46 = vld [vmem:[#allocation2 + $0x2a5] ss:$2 sm:$0x3f]  ;;  %v5122_v31 = vadd.f32 %v4894_v9, %v4481_v20  ;;  %v5123_v39 = vadd.f32 %v4896_v57, %v4482_v22  ;;  %v11850_v62 = vmul.f32 %v6812_v29, %v787_v2 }
 0x3d4   : > { %v11853_v4 = vmul.f32 %v6818_v33, %v787_v2  ;;  %v11855_v15 = vadd.f32 %v3385_v50, %v2967_v13  ;;  %v11857_v61 = vadd.f32 %v3719_v14, %v3607_v40  ;;  %v5534_v53 = vsel %vm2559_vm2, %v5531_v12, %v5533_v27 }
 0x3d5   : > { %v5536_v11 = vsel %vm2559_vm2, %v5533_v27, %v12728_v49  ;;  %v5762_v55 = vadd.f32 %v5534_v53, %v5122_v31  ;;  %v12729_v38 = vrot.slane %v11827_v26, 1  ;;  %v2097_v14 = vrot.slane %v11840_v6, 2 }
 0x3d6   : > { %v5763_v37 = vadd.f32 %v5536_v11, %v5123_v39  ;;  %v2747_v34 = vrot.slane %v11843_v56, 6  ;;  %v1146_v12 = vmul.f32 %v6806_v18, %v782_v24  ;;  %v11877_v27 = vmul.f32 %v6823_v36, %v787_v2 }
 0x3d7   : > { %v5874_v50 = vadd.f32 %v11760_v17, %v5762_v55  ;;  %v11880_v20 = vmul.f32 %v6827_v41, %v787_v2  ;;  %v1787_v9 = vmul.f32 %v6809_v23, %v782_v24  ;;  %v2440_v57 = vmul.f32 %v6814_v30, %v782_v24 }
 0x3d8   : > { %v5875_v40 = vadd.f32 %v11760_v17, %v5763_v37  ;;  %v1454_v22 = vrot.slane %v1146_v12, 1  ;;  %v11885_v53 = vmul.f32 %v6829_v42, %v787_v2  ;;  %v3081_v11 = vmul.f32 %v6818_v33, %v782_v24 }
 0x3d9   : > { %v5979_v31 = vmax.f32 %v5874_v50, 0.0  ;;  %v11889_v55 = vmul.f32 %v6821_v35, %v787_v2  ;;  %v3823_v37 = vadd.f32 %v11647_v10, %v11728_v47  ;;  %v924_v13 = vmul.f32 %v6812_v29, %v782_v24 }
 0x3da   : > { %v5980_v39 = vmax.f32 %v5875_v40, 0.0  ;;  %v2745_v12 = vrot.slane %v2440_v57, 6  ;;  %v12935_v50 = vrot.slane %v11717_v63, 1  ;;  %v1457_v25 = vsel %vm1262_vm0, %v1454_v22, %v12729_v38 }
 0x3db   : > { %6085 = vst.msk [vmem:[#allocation2 + $0x2b0] sm:$0xff] %vm5998_vm6, %v5979_v31  ;;  %v2095_v2 = vrot.slane %v1787_v9, 2  ;;  %v3955_v49 = vmul.f32 %v6823_v36, %v782_v24  ;;  %v4258_v10 = vrot.slane %v11877_v27, 4  ;;  %v3386_v63 = vrot.slane %v3081_v11, 7 }
 0x3dc   : > { %6086 = vst.msk [vmem:[#allocation2 + $0x2b8] sm:$0xff] %vm5998_vm6, %v5980_v39  ;;  %v1455_v40 = vsel %vm1262_vm0, %v12935_v50, %v1454_v22  ;;  %v2746_v47 = vsel %vm2559_vm2, %v2743_v16, %v2745_v12  ;;  %v2748_v57 = vsel %vm2559_vm2, %v2745_v12, %v2747_v34  ;;  %v4899_v31 = vrot.slane %v11880_v20, 5 }
 0x3dd   : > { %v12730_v39 = vrot.slane %v11885_v53, 6  ;;  %v2968_v22 = vadd.f32 %v2746_v47, %v11707_v51  ;;  %v3721_v9 = vmul.f32 %v6821_v35, %v782_v24  ;;  %v1674_v50 = vadd.f32 %v1455_v40, %v11731_v7  ;;  %v797_v47 = vpop.permute.xlu1 %796 }
 0x3de   : > { %v1675_v38 = vadd.f32 %v1457_v25, %v924_v13  ;;  %v4256_v19 = vrot.slane %v3955_v49, 4  ;;  %v4596_v32 = vmul.f32 %v6827_v41, %v782_v24  ;;  %v2096_v16 = vsel %vm1903_vm1, %v2093_v58, %v2095_v2 }
 0x3df   : > { %v2098_v11 = vsel %vm1903_vm1, %v2095_v2, %v2097_v14  ;;  %v2969_v12 = vadd.f32 %v2748_v57, %v11808_v1  ;;  %v5237_v51 = vmul.f32 %v6829_v42, %v782_v24  ;;  %v3387_v7 = vsel %vm3200_vm3, %v3384_v5, %v3386_v63 }
 0x3e0   : > { %v4257_v49 = vsel %vm4078_vm4, %v4254_v3, %v4256_v19  ;;  %v4259_v28 = vsel %vm4078_vm4, %v4256_v19, %v4258_v10  ;;  %v4897_v58 = vrot.slane %v4596_v32, 5  ;;  %v3609_v25 = vadd.f32 %v3387_v7, %v2968_v22 }
 0x3e1   : > { %v4483_v13 = vadd.f32 %v4257_v49, %v11745_v8  ;;  %v4484_v1 = vadd.f32 %v4259_v28, %v3823_v37  ;;  %v5537_v40 = vrot.slane %v5237_v51, 6  ;;  %v11941_v5 = vmul.f32 %v6806_v18, %v797_v47 }
 0x3e2   : > { %v4898_v52 = vsel %vm4719_vm5, %v4895_v59, %v4897_v58  ;;  %v4900_v43 = vsel %vm4719_vm5, %v4897_v58, %v4899_v31  ;;  %v11944_v3 = vmul.f32 %v6809_v23, %v797_v47  ;;  %v11946_v24 = vadd.f32 %v2096_v16, %v1674_v50 }
 0x3e3   : > { %v12936_v8 = vrot.slane %v11853_v4, 7  ;;  %v5124_v37 = vadd.f32 %v4898_v52, %v4483_v13  ;;  %v5125_v45 = vadd.f32 %v4900_v43, %v4484_v1  ;;  %v11951_v2 = vadd.f32 %v2098_v11, %v1675_v38  ;;  %v792_v38 = vpop.permute.xlu0 %791 }
 0x3e4   : > { %v12937_v57 = vrot.slane %v11775_v0, 6  ;;  %v5540_v32 = vsel %vm2559_vm2, %v5537_v40, %v12730_v39  ;;  %v11962_v51 = vmul.f32 %v6812_v29, %v797_v47  ;;  %v11967_v11 = vadd.f32 %v3721_v9, %v3609_v25 }
 0x3e5   : > { %v3389_v19 = vsel %vm3200_vm3, %v3386_v63, %v12936_v8  ;;  %v5765_v16 = vadd.f32 %v5540_v32, %v5125_v45  ;;  %v11965_v63 = vmul.f32 %v6814_v30, %v797_v47  ;;  %v11972_v7 = vmul.f32 %v6818_v33, %v797_v47 }
 0x3e6   : > { %v11953_v59 = vadd.f32 %v3389_v19, %v2969_v12  ;;  %v5538_v22 = vsel %vm2559_vm2, %v12937_v57, %v5537_v40  ;;  %v12735_v12 = vrot.slane %v11941_v5, 1  ;;  %v11977_v58 = vmul.f32 %v6821_v35, %v797_v47 }
 0x3e7   : > { %v5764_v50 = vadd.f32 %v5538_v22, %v5124_v37  ;;  %v5877_v28 = vadd.f32 %v11760_v17, %v5765_v16  ;;  %v11980_v13 = vmul.f32 %v6823_v36, %v797_v47  ;;  %v11983_v9 = vmul.f32 %v6827_v41, %v797_v47 }
 0x3e8   : > { %v11986_v25 = vmul.f32 %v6829_v42, %v797_v47  ;;  %v1148_v1 = vmul.f32 %v6806_v18, %v792_v38  ;;  %v11990_v40 = vmul.f32 %v6809_v23, %v792_v38  ;;  %v2751_v8 = vrot.slane %v11965_v63, 6 }
 0x3e9   : > { %v5876_v49 = vadd.f32 %v11760_v17, %v5764_v50  ;;  %v5982_v43 = vmax.f32 %v5877_v28, 0.0  ;;  %v2442_v19 = vmul.f32 %v6814_v30, %v792_v38  ;;  %v3083_v57 = vmul.f32 %v6818_v33, %v792_v38 }
 0x3ea   : > { %v1458_v45 = vrot.slane %v1148_v1, 1  ;;  %v3957_v22 = vmul.f32 %v6823_v36, %v792_v38  ;;  %v4262_v47 = vrot.slane %v11980_v13, 4  ;;  %v3825_v32 = vadd.f32 %v11755_v21, %v11855_v15 }
 0x3eb   : > { %v5981_v52 = vmax.f32 %v5876_v49, 0.0  ;;  %6088 = vst.msk [vmem:[#allocation2 + $0x2c8] sm:$0xff] %vm5998_vm6, %v5982_v43  ;;  %v2749_v50 = vrot.slane %v2442_v19, 6  ;;  %v4598_v16 = vmul.f32 %v6827_v41, %v792_v38  ;;  %v4903_v49 = vrot.slane %v11983_v9, 5 }
 0x3ec   : > { %v12734_v1 = vrot.slane %v11990_v40, 2  ;;  %v4260_v0 = vrot.slane %v3957_v22, 4  ;;  %v926_v37 = vmul.f32 %v6812_v29, %v792_v38  ;;  %v5239_v15 = vmul.f32 %v6829_v42, %v792_v38 }
 0x3ed   : > { %6087 = vst.msk [vmem:[#allocation2 + $0x2c0] sm:$0xff] %vm5998_vm6, %v5981_v52  ;;  %v12938_v52 = vrot.slane %v11827_v26, 1  ;;  %v2750_v21 = vsel %vm2559_vm2, %v2747_v34, %v2749_v50  ;;  %v1461_v19 = vsel %vm1262_vm0, %v1458_v45, %v12735_v12  ;;  %v2752_v22 = vsel %vm2559_vm2, %v2749_v50, %v2751_v8  ;;  %v807_v50 = vpop.permute.xlu1 %806 }
 0x3ee   : > { %v3390_v28 = vrot.slane %v3083_v57, 7  ;;  %v3723_v39 = vmul.f32 %v6821_v35, %v792_v38  ;;  %v2970_v26 = vadd.f32 %v2750_v21, %v11823_v60  ;;  %v4261_v56 = vsel %vm4078_vm4, %v4258_v10, %v4260_v0 }
 0x3ef   : > { %v1459_v43 = vsel %vm1262_vm0, %v12938_v52, %v1458_v45  ;;  %v4263_v34 = vsel %vm4078_vm4, %v4260_v0, %v4262_v47  ;;  %v4901_v52 = vrot.slane %v4598_v16, 5  ;;  %v2100_v57 = vsel %vm1903_vm1, %v2097_v14, %v12734_v1 }
 0x3f0   : > { %v1676_v45 = vadd.f32 %v1459_v43, %v11850_v62  ;;  %v4485_v38 = vadd.f32 %v4261_v56, %v11857_v61  ;;  %v4486_v60 = vadd.f32 %v4263_v34, %v3825_v32  ;;  %v12035_v27 = vadd.f32 %v1461_v19, %v926_v37 }
 0x3f1   : > { %v4902_v10 = vsel %vm4719_vm5, %v4899_v31, %v4901_v52  ;;  %v4904_v62 = vsel %vm4719_vm5, %v4901_v52, %v4903_v49  ;;  %v5541_v0 = vrot.slane %v5239_v15, 6  ;;  %v2971_v6 = vadd.f32 %v2752_v22, %v11946_v24 }
 0x3f2   : > { %v12939_v14 = vrot.slane %v11853_v4, 7  ;;  %v5126_v32 = vadd.f32 %v4902_v10, %v4485_v38  ;;  %v5127_v37 = vadd.f32 %v4904_v62, %v4486_v60  ;;  %v12940_v31 = vrot.slane %v11885_v53, 6 }
 0x3f3   : > { %v12941_v34 = vrot.slane %v11986_v25, 6  ;;  %v12054_v52 = vmul.f32 %v6806_v18, %v807_v50  ;;  %v12942_v60 = vrot.slane %v11972_v7, 7  ;;  %v12060_v53 = vmul.f32 %v6809_v23, %v807_v50 }
 0x3f4   : > { %v6387_v16 = vld [vmem:[#allocation2 + $0x2b2] ss:$2 sm:$0xff]  ;;  %v6389_v43 = vld [vmem:[#allocation2 + $0x2c2] ss:$2 sm:$0x3f]  ;;  %v3391_v61 = vsel %vm3200_vm3, %v12939_v14, %v3390_v28  ;;  %v5542_v56 = vsel %vm2559_vm2, %v12940_v31, %v5541_v0  ;;  %v12063_v10 = vmul.f32 %v6814_v30, %v807_v50  ;;  %v12066_v62 = vmul.f32 %v6818_v33, %v807_v50  ;;  %v802_v31 = vpop.permute.xlu0 %801 }
 0x3f5   : > { %v6391_v21 = vld [vmem:[#allocation2 + $0x2b3] ss:$2 sm:$0xff]  ;;  %v6393_v19 = vld [vmem:[#allocation2 + $0x2c3] ss:$2 sm:$0x3f]  ;;  %v3611_v20 = vadd.f32 %v3391_v61, %v2970_v26  ;;  %v5544_v15 = vsel %vm2559_vm2, %v5541_v0, %v12941_v34  ;;  %v5766_v22 = vadd.f32 %v5542_v56, %v5126_v32  ;;  %v3393_v26 = vsel %vm3200_vm3, %v3390_v28, %v12942_v60 }
 0x3f6   : > { %v6396_v24 = vmax.f32 %v6387_v16, %v6391_v21  ;;  %v6397_v4 = vmax.f32 %v6389_v43, %v6393_v19  ;;  %v5767_v38 = vadd.f32 %v5544_v15, %v5127_v37  ;;  %v12943_v0 = vmax.f32 %v11829_v48, %v11831_v44 }
 0x3f7   : > { %v12944_v43 = vmax.f32 %v11845_v54, %v11847_v46  ;;  %v5878_v61 = vadd.f32 %v11760_v17, %v5766_v22  ;;  %v2317_v32 = vadd.f32 %v2100_v57, %v1676_v45  ;;  %v12076_v37 = vadd.f32 %v3393_v26, %v2971_v6 }
 0x3f8   : > { %v6398_v16 = vmax.f32 %v12943_v0, %v6396_v24  ;;  %v5879_v28 = vadd.f32 %v11760_v17, %v5767_v38  ;;  %v12078_v21 = vadd.f32 %v3723_v39, %v3611_v20  ;;  %v12081_v19 = vmul.f32 %v6812_v29, %v807_v50 }
 0x3f9   : > { %v6399_v14 = vmax.f32 %v12944_v43, %v6397_v4  ;;  %v5983_v48 = vmax.f32 %v5878_v61, 0.0  ;;  %v12732_v54 = vrot.slane %v12054_v52, 1  ;;  %v12089_v46 = vmul.f32 %v6823_v36, %v807_v50 }
 0x3fa   : > { %6558 = vst.msk [vmem:[%s7456_s28 + $0xb0] sm:$0xff] %vm5998_vm6, %v6398_v16  ;;  %v5984_v44 = vmax.f32 %v5879_v28, 0.0  ;;  %v12731_v39 = vrot.slane %v12063_v10, 6  ;;  %v12733_v57 = vrot.slane %v12066_v62, 7  ;;  %v12095_v6 = vmul.f32 %v6827_v41, %v807_v50 }
 0x3fb   : > { %6559 = vst.msk [vmem:[%s7456_s28 + $0xb8] sm:$0x3f] %vm6126_vm7, %v6399_v14  ;;  %v12100_v20 = vmul.f32 %v6821_v35, %v807_v50  ;;  %v12103_v56 = vmul.f32 %v6806_v18, %v802_v31  ;;  %v2444_v34 = vmul.f32 %v6814_v30, %v802_v31  ;;  %v3085_v15 = vmul.f32 %v6818_v33, %v802_v31 }
 0x3fc   : > { %6089 = vst.msk [vmem:[#allocation2 + $0x2d0] sm:$0xff] %vm5998_vm6, %v5983_v48  ;;  %6090 = vst.msk [vmem:[#allocation2 + $0x2d8] sm:$0xff] %vm5998_vm6, %v5984_v44  ;;  %v12108_v24 = vmul.f32 %v6829_v42, %v807_v50  ;;  %v3827_v4 = vadd.f32 %v11889_v55, %v11953_v59  ;;  %v3959_v22 = vmul.f32 %v6823_v36, %v802_v31  ;;  %v4266_v60 = vrot.slane %v12089_v46, 4 }
 0x3fd   : > { %v4600_v38 = vmul.f32 %v6827_v41, %v802_v31  ;;  %v12116_v26 = vmul.f32 %v6809_v23, %v802_v31  ;;  %v2753_v0 = vrot.slane %v2444_v34, 6  ;;  %v3394_v16 = vrot.slane %v3085_v15, 7 }
 0x3fe   : > { %v4907_v43 = vrot.slane %v12095_v6, 5  ;;  %v4264_v14 = vrot.slane %v3959_v22, 4  ;;  %v5241_v50 = vmul.f32 %v6829_v42, %v802_v31  ;;  %v928_v28 = vmul.f32 %v6812_v29, %v802_v31 }
 0x3ff   : > { %v4905_v61 = vrot.slane %v4600_v38, 5  ;;  %v12736_v55 = vrot.slane %v12103_v56, 1  ;;  %v2754_v59 = vsel %vm2559_vm2, %v2751_v8, %v2753_v0  ;;  %v2756_v48 = vsel %vm2559_vm2, %v2753_v0, %v12731_v39  ;;  %v12142_v39 = vpop.permute.xlu1 %816 }
 0x400   : > { %v5547_v44 = vrot.slane %v12108_v24, 6  ;;  %v2972_v34 = vadd.f32 %v2754_v59, %v11951_v2  ;;  %v3725_v15 = vmul.f32 %v6821_v35, %v802_v31  ;;  %v4265_v22 = vsel %vm4078_vm4, %v4262_v47, %v4264_v14 }
 0x401   : > { %v12945_v63 = vrot.slane %v11972_v7, 7  ;;  %v4267_v0 = vsel %vm4078_vm4, %v4264_v14, %v4266_v60  ;;  %v4487_v45 = vadd.f32 %v4265_v22, %v11967_v11  ;;  %v2973_v2 = vadd.f32 %v2756_v48, %v2317_v32 }
 0x402   : > { %v4488_v31 = vadd.f32 %v4267_v0, %v3827_v4  ;;  %v4906_v13 = vsel %vm4719_vm5, %v4903_v49, %v4905_v61  ;;  %v5545_v47 = vrot.slane %v5241_v50, 6  ;;  %v1465_v14 = vsel %vm1262_vm0, %v12736_v55, %v12732_v54 }
 0x403   : > { %v3395_v8 = vsel %vm3200_vm3, %v12945_v63, %v3394_v16  ;;  %v12147_v59 = vld [vmem:[#allocation2 + $0x2d0] ss:$2 sm:$0xff]  ;;  %v12149_v7 = vld [vmem:[#allocation2 + $0x2d1] ss:$2 sm:$0xff]  ;;  %v4908_v32 = vsel %vm4719_vm5, %v4905_v61, %v4907_v43  ;;  %v5128_v4 = vadd.f32 %v4906_v13, %v4487_v45  ;;  %v12946_v49 = vrot.slane %v11986_v25, 6  ;;  %v12184_v13 = vpop.permute.xlu0 %811 }
 0x404   : > { %v3613_v11 = vadd.f32 %v3395_v8, %v2972_v34  ;;  %v5129_v9 = vadd.f32 %v4908_v32, %v4488_v31  ;;  %v12164_v48 = vmul.f32 %v6806_v18, %v12142_v39  ;;  %v12168_v22 = vmul.f32 %v6814_v30, %v12142_v39 }
 0x405   : > { %v5546_v50 = vsel %vm2559_vm2, %v12946_v49, %v5545_v47  ;;  %v3397_v34 = vsel %vm3200_vm3, %v3394_v16, %v12733_v57  ;;  %v5548_v45 = vsel %vm2559_vm2, %v5545_v47, %v5547_v44  ;;  %v12178_v25 = vmul.f32 %v6823_v36, %v12142_v39 }
 0x406   : > { %v5768_v61 = vadd.f32 %v5546_v50, %v5128_v4  ;;  %v12182_v8 = vadd.f32 %v1465_v14, %v928_v28  ;;  %v3614_v0 = vadd.f32 %v3397_v34, %v2973_v2  ;;  %v5769_v31 = vadd.f32 %v5548_v45, %v5129_v9  ;;  %v1044_v34 = vpop.permute.xlu1 %1043 }
 0x407   : > { %v12186_v32 = vadd.f32 %v3725_v15, %v3613_v11  ;;  %v12191_v47 = vmul.f32 %v6818_v33, %v12142_v39  ;;  %v12195_v4 = vmul.f32 %v6827_v41, %v12142_v39  ;;  %v4270_v2 = vrot.slane %v12178_v25, 4 }
 0x408   : > { %v5880_v16 = vadd.f32 %v11760_v17, %v5768_v61  ;;  %v5881_v49 = vadd.f32 %v11760_v17, %v5769_v31  ;;  %v12202_v15 = vmul.f32 %v6829_v42, %v12142_v39  ;;  %v12206_v11 = vmul.f32 %v6806_v18, %v12184_v13 }
 0x409   : > { %v12210_v9 = vmul.f32 %v6809_v23, %v12184_v13  ;;  %v12214_v50 = vmul.f32 %v6814_v30, %v12184_v13  ;;  %v12218_v61 = vmul.f32 %v6818_v33, %v12184_v13  ;;  %v3961_v31 = vmul.f32 %v6823_v36, %v12184_v13 }
 0x40a   : > { %v5985_v14 = vmax.f32 %v5880_v16, 0.0  ;;  %v5986_v45 = vmax.f32 %v5881_v49, 0.0  ;;  %v4602_v16 = vmul.f32 %v6827_v41, %v12184_v13  ;;  %v12737_v63 = vrot.slane %v12195_v4, 5 }
 0x40b   : > { %v3829_v57 = vadd.f32 %v11977_v58, %v12076_v37  ;;  %v5243_v49 = vmul.f32 %v6829_v42, %v12184_v13  ;;  %v4268_v38 = vrot.slane %v3961_v31, 4  ;;  %v12234_v12 = vmul.f32 %v6806_v18, %v1044_v34 }
 0x40c   : > { %6091 = vst.msk [vmem:[#allocation2 + $0x2e0] sm:$0xff] %vm5998_vm6, %v5985_v14  ;;  %6092 = vst.msk [vmem:[#allocation2 + $0x2e8] sm:$0xff] %vm5998_vm6, %v5986_v45  ;;  %v4909_v1 = vrot.slane %v4602_v16, 5  ;;  %v12240_v58 = vmul.f32 %v6809_v23, %v1044_v34  ;;  %v12251_v54 = vmul.f32 %v6814_v30, %v1044_v34  ;;  %v12254_v55 = vmul.f32 %v6818_v33, %v1044_v34 }
 0x40d   : > { %12947 = vst [vmem:[#allocation7_spill] sm:$0xff] %v12234_v12  ;;  %v4269_v45 = vsel %vm4078_vm4, %v4266_v60, %v4268_v38  ;;  %v4271_v31 = vsel %vm4078_vm4, %v4268_v38, %v4270_v2  ;;  %v5549_v16 = vrot.slane %v5243_v49, 6  ;;  %v12264_v49 = vmul.f32 %v6823_v36, %v1044_v34 }
 0x40e   : > { %12948 = vst [vmem:[#allocation8_spill] sm:$0xff] %v12240_v58  ;;  %v4489_v14 = vadd.f32 %v4269_v45, %v12078_v21  ;;  %v4490_v28 = vadd.f32 %v4271_v31, %v3829_v57  ;;  %v4910_v46 = vsel %vm4719_vm5, %v4907_v43, %v4909_v1  ;;  %v4912_v60 = vsel %vm4719_vm5, %v4909_v1, %v12737_v63  ;;  %v12266_v21 = vpop.permute.xlu0 %821 }
 0x40f   : > { %v12270_v37 = vmul.f32 %v6827_v41, %v1044_v34  ;;  %v5550_v6 = vsel %vm2559_vm2, %v5547_v44, %v5549_v16  ;;  %v12949_v1 = vrot.slane %v12202_v15, 6  ;;  %v12279_v38 = vmul.f32 %v6821_v35, %v1044_v34 }
 0x410   : > { %v5130_v57 = vadd.f32 %v4910_v46, %v4489_v14  ;;  %v5131_v45 = vadd.f32 %v4912_v60, %v4490_v28  ;;  %v12282_v63 = vmul.f32 %v6829_v42, %v1044_v34  ;;  %v3963_v60 = vmul.f32 %v6823_v36, %v12266_v21 }
 0x411   : > { %v5552_v43 = vsel %vm2559_vm2, %v5549_v16, %v12949_v1  ;;  %v3831_v31 = vadd.f32 %v12100_v20, %v3614_v0  ;;  %v4604_v16 = vmul.f32 %v6827_v41, %v12266_v21  ;;  %v12302_v44 = vmul.f32 %v6814_v30, %v12266_v21 }
 0x412   : > { %v5770_v28 = vadd.f32 %v5550_v6, %v5130_v57  ;;  %v5771_v14 = vadd.f32 %v5552_v43, %v5131_v45  ;;  %v4272_v45 = vrot.slane %v3963_v60, 4  ;;  %v12295_v6 = vpop.permute.xlu1 %2335  ;;  %v5245_v0 = vmul.f32 %v6829_v42, %v12266_v21 }
 0x413   : > { %v12297_v43 = vld [vmem:[#allocation2 + $0x2e0] ss:$2 sm:$0x3f]  ;;  %v4913_v20 = vrot.slane %v4604_v16, 5  ;;  %v12950_v57 = vrot.slane %v12264_v49, 4  ;;  %v12316_v58 = vmul.f32 %v6818_v33, %v12266_v21  ;;  %v12321_v29 = vmul.f32 %v6814_v30, %v12295_v6 }
 0x414   : > { %v5882_v1 = vadd.f32 %v11760_v17, %v5770_v28  ;;  %v5883_v34 = vadd.f32 %v11760_v17, %v5771_v14  ;;  %v12306_v28 = vld [vmem:[#allocation2 + $0x2e1] ss:$2 sm:$0x3f]  ;;  %v4273_v60 = vsel %vm4078_vm4, %v4270_v2, %v4272_v45  ;;  %v12327_v25 = vmul.f32 %v6806_v18, %v12266_v21 }
 0x415   : > { %v4275_v24 = vsel %vm4078_vm4, %v4272_v45, %v12950_v57  ;;  %v4491_v16 = vadd.f32 %v4273_v60, %v12186_v32  ;;  %v12951_v2 = vrot.slane %v12195_v4, 5  ;;  %v2761_v57 = vrot.slane %v12302_v44, 6 }
 0x416   : > { %v5987_v14 = vmax.f32 %v5882_v1, 0.0  ;;  %v5988_v46 = vmax.f32 %v5883_v34, 0.0  ;;  %v4492_v12 = vadd.f32 %v4275_v24, %v3831_v31  ;;  %v12952_v34 = vrot.slane %v12270_v37, 5 }
 0x417   : > { %v4914_v1 = vsel %vm4719_vm5, %v12951_v2, %v4913_v20  ;;  %v5553_v31 = vrot.slane %v5245_v0, 6  ;;  %v6420_v24 = vmax.f32 %v12297_v43, %v12306_v28  ;;  %v12954_v4 = vrot.slane %v12282_v63, 6 }
 0x418   : > { %6093 = vst.msk [vmem:[#allocation2 + $0x2f0] sm:$0xff] %vm5998_vm6, %v5987_v14  ;;  %6094 = vst.msk [vmem:[#allocation2 + $0x2f8] sm:$0xff] %vm5998_vm6, %v5988_v46  ;;  %v4916_v32 = vsel %vm4719_vm5, %v4913_v20, %v12952_v34  ;;  %v5132_v45 = vadd.f32 %v4914_v1, %v4491_v16  ;;  %v12953_v14 = vrot.slane %v12202_v15, 6  ;;  %v12346_v2 = vmul.f32 %v6818_v33, %v12295_v6 }
 0x419   : > { %v5133_v46 = vadd.f32 %v4916_v32, %v4492_v12  ;;  %v5556_v60 = vsel %vm2559_vm2, %v5553_v31, %v12954_v4  ;;  %v12955_v20 = vrot.slane %v12103_v56, 1  ;;  %v12956_v0 = vrot.slane %v11941_v5, 1 }
 0x41a   : > { %v5554_v18 = vsel %vm2559_vm2, %v12953_v14, %v5553_v31  ;;  %v3402_v12 = vrot.slane %v12316_v58, 7  ;;  %v12357_v32 = vmul.f32 %v6823_v36, %v12295_v6  ;;  %v12957_v14 = vrot.slane %v11944_v3, 2 }
 0x41b   : > { %v1463_v34 = vsel %vm1262_vm0, %v12956_v0, %v12955_v20  ;;  %v5772_v16 = vadd.f32 %v5554_v18, %v5132_v45  ;;  %v5773_v15 = vadd.f32 %v5556_v60, %v5133_v46  ;;  %v12958_v56 = vrot.slane %v11990_v40, 2 }
 0x41c   : > { %v1678_v31 = vadd.f32 %v1463_v34, %v11962_v51  ;;  %v12959_v4 = vrot.slane %v12116_v26, 2  ;;  %v12960_v20 = vmov %v12957_v14  ;;  %v12961_v51 = vrot.slane %v12214_v50, 6 }
 0x41d   : > { %v2102_v5 = vsel %vm1903_vm1, %v12958_v56, %v12957_v14  ;;  %v5884_v46 = vadd.f32 %v11760_v17, %v5772_v16  ;;  %v5885_v18 = vadd.f32 %v11760_v17, %v5773_v15  ;;  %v12962_v0 = vrot.slane %v12063_v10, 6 }
 0x41e   : > { %v2104_v45 = vsel %vm1903_vm1, %v12960_v20, %v12959_v4  ;;  %v2318_v60 = vadd.f32 %v2102_v5, %v12035_v27  ;;  %v12381_v14 = vmul.f32 %v6827_v41, %v12295_v6  ;;  %v12963_v56 = vrot.slane %v12168_v22, 6  ;;  %v2331_v27 = vpop.permute.xlu0 %2330 }
 0x41f   : > { %v2758_v40 = vsel %vm2559_vm2, %v12962_v0, %v12961_v51  ;;  %v2319_v3 = vadd.f32 %v2104_v45, %v1678_v31  ;;  %v12964_v16 = vmov %v12961_v51  ;;  %v6412_v5 = vld [vmem:[#allocation2 + $0x2ee] ss:$2 sm:$0xff]  ;;  %v6416_v4 = vld [vmem:[#allocation2 + $0x2ef] ss:$2 sm:$0xff]  ;;  %v5989_v20 = vmax.f32 %v5884_v46, 0.0 }
 0x420   : > { %v2760_v15 = vsel %vm2559_vm2, %v12964_v16, %v12963_v56  ;;  %v5990_v10 = vmax.f32 %v5885_v18, 0.0  ;;  %v12390_v51 = vmul.f32 %v6829_v42, %v12295_v6  ;;  %v2974_v0 = vadd.f32 %v2758_v40, %v2318_v60 }
 0x421   : > { %v6421_v34 = vmax.f32 %v6412_v5, %v6416_v4  ;;  %v4278_v1 = vrot.slane %v12357_v32, 4  ;;  %v2975_v31 = vadd.f32 %v2760_v15, %v2319_v3  ;;  %v12965_v45 = vrot.slane %v12218_v61, 7  ;;  %6095 = vst.msk [vmem:[#allocation2 + $0x300] sm:$0xff] %vm5998_vm6, %v5989_v20 }
 0x422   : > { %v12966_v50 = vrot.slane %v12066_v62, 7  ;;  %6096 = vst.msk [vmem:[#allocation2 + $0x308] sm:$0xff] %vm5998_vm6, %v5990_v10  ;;  %v12967_v46 = vrot.slane %v12191_v47, 7  ;;  %v3727_v3 = vmul.f32 %v6821_v35, %v12184_v13  ;;  %v3965_v16 = vmul.f32 %v6823_v36, %v2331_v27 }
 0x423   : > { %v12968_v18 = vmov %v12965_v45  ;;  %v12969_v62 = vmax.f32 %v12147_v59, %v12149_v7  ;;  %v3728_v4 = vmul.f32 %v6821_v35, %v12142_v39  ;;  %v4606_v20 = vmul.f32 %v6827_v41, %v2331_v27 }
 0x424   : > { %v3399_v56 = vsel %vm3200_vm3, %v12966_v50, %v12965_v45  ;;  %v3401_v60 = vsel %vm3200_vm3, %v12968_v18, %v12967_v46  ;;  %v12416_v61 = vmul.f32 %v6821_v35, %v12295_v6  ;;  %v4919_v10 = vrot.slane %v12381_v14, 5  ;;  %v3845_v50 = vpop.permute.xlu1 %3844 }
 0x425   : > { %v3615_v40 = vadd.f32 %v3399_v56, %v2974_v0  ;;  %v6423_v15 = vmax.f32 %v12969_v62, %v6421_v34  ;;  %v3616_v5 = vadd.f32 %v3401_v60, %v2975_v31  ;;  %v4276_v0 = vrot.slane %v3965_v16, 4 }
 0x426   : > { %v5247_v45 = vmul.f32 %v6829_v42, %v2331_v27  ;;  %v5559_v59 = vrot.slane %v12390_v51, 6  ;;  %v4917_v31 = vrot.slane %v4606_v20, 5  ;;  %v12424_v56 = vmul.f32 %v6814_v30, %v2331_v27  ;;  %v12983_v51 = vld [vmem:[#allocation6_spill] sm:$0xff] }
 0x427   : > { %6560 = vst.msk [vmem:[%s7456_s28 + $0xc0] sm:$0xff] %vm5998_vm6, %v6423_v15  ;;  %v3832_v7 = vadd.f32 %v3727_v3, %v3615_v40  ;;  %v3833_v34 = vadd.f32 %v3728_v4, %v3616_v5  ;;  %v12970_v46 = vrot.slane %v12264_v49, 4  ;;  %v4279_v18 = vsel %vm4078_vm4, %v4276_v0, %v4278_v1 }
 0x428   : > { %v5557_v60 = vrot.slane %v5247_v45, 6  ;;  %v12433_v16 = vmul.f32 %v6818_v33, %v2331_v27  ;;  %v12436_v40 = vmul.f32 %v6821_v35, %v2331_v27  ;;  %v12971_v15 = vrot.slane %v12270_v37, 5 }
 0x429   : > { %v4277_v6 = vsel %vm4078_vm4, %v12970_v46, %v4276_v0  ;;  %v4494_v62 = vadd.f32 %v4279_v18, %v3833_v34  ;;  %v4920_v49 = vsel %vm4719_vm5, %v4917_v31, %v4919_v10  ;;  %v12972_v4 = vrot.slane %v12282_v63, 6  ;;  %v6414_v45 = vld [vmem:[#allocation2 + $0x2fe] ss:$2 sm:$0x3f] }
 0x42a   : > { %v4493_v3 = vadd.f32 %v4277_v6, %v3832_v7  ;;  %v4918_v5 = vsel %vm4719_vm5, %v12971_v15, %v4917_v31  ;;  %v12448_v0 = vmul.f32 %v6823_v36, %v3845_v50  ;;  %v6418_v27 = vld [vmem:[#allocation2 + $0x2ff] ss:$2 sm:$0x3f]  ;;  %v5560_v37 = vsel %vm2559_vm2, %v5557_v60, %v5559_v59 }
 0x42b   : > { %v5558_v20 = vsel %vm2559_vm2, %v12972_v4, %v5557_v60  ;;  %v5135_v7 = vadd.f32 %v4920_v49, %v4494_v62  ;;  %v12973_v34 = vrot.slane %v12206_v11, 1  ;;  %v12974_v6 = vrot.slane %v12054_v52, 1 }
 0x42c   : > { %v5134_v46 = vadd.f32 %v4918_v5, %v4493_v3  ;;  %v6422_v63 = vmax.f32 %v6414_v45, %v6418_v27  ;;  %v12975_v15 = vrot.slane %v12060_v53, 2  ;;  %v12976_v4 = vrot.slane %v12116_v26, 2 }
 0x42d   : > { %v1467_v31 = vsel %vm1262_vm0, %v12974_v6, %v12973_v34  ;;  %v12977_v62 = vrot.slane %v12210_v9, 2  ;;  %v5775_v52 = vadd.f32 %v5560_v37, %v5135_v7  ;;  %v12479_v27 = vmul.f32 %v6827_v41, %v3845_v50 }
 0x42e   : > { %v1680_v18 = vadd.f32 %v1467_v31, %v12081_v19  ;;  %v2106_v3 = vsel %vm1903_vm1, %v12976_v4, %v12975_v15  ;;  %v12978_v60 = vmov %v12975_v15  ;;  %v5774_v49 = vadd.f32 %v5558_v20, %v5134_v46  ;;  %v12486_v20 = vpop.permute.xlu0 %2340 }
 0x42f   : > { %v2108_v5 = vsel %vm1903_vm1, %v12978_v60, %v12977_v62  ;;  %v2320_v34 = vadd.f32 %v2106_v3, %v12182_v8  ;;  %v12979_v19 = vrot.slane %v12168_v22, 6  ;;  %v6424_v26 = vmax.f32 %v6420_v24, %v6422_v63 }
 0x430   : > { %v2321_v53 = vadd.f32 %v2108_v5, %v1680_v18  ;;  %v12980_v6 = vrot.slane %v12251_v54, 6  ;;  %v5886_v22 = vadd.f32 %v11760_v17, %v5774_v49  ;;  %v5887_v46 = vadd.f32 %v11760_v17, %v5775_v52 }
 0x431   : > { %v2762_v45 = vsel %vm2559_vm2, %v12979_v19, %v2761_v57  ;;  %v12491_v7 = vmul.f32 %v6829_v42, %v3845_v50  ;;  %6561 = vst.msk [vmem:[%s7456_s28 + $0xc8] sm:$0x3f] %vm6126_vm7, %v6424_v26  ;;  %v4282_v28 = vrot.slane %v12448_v0, 4  ;;  %v12981_v44 = vrot.slane %v12191_v47, 7  ;;  %v3855_v19 = vpop.permute.xlu1 %3854 }
 0x432   : > { %v2764_v8 = vsel %vm2559_vm2, %v2761_v57, %v12980_v6  ;;  %v2976_v43 = vadd.f32 %v2762_v45, %v2320_v34  ;;  %v12982_v37 = vrot.slane %v12254_v55, 7  ;;  %v5991_v50 = vmax.f32 %v5886_v22, 0.0 }
 0x433   : > { %v2977_v24 = vadd.f32 %v2764_v8, %v2321_v53  ;;  %v3403_v57 = vsel %vm3200_vm3, %v12981_v44, %v3402_v12  ;;  %v5992_v63 = vmax.f32 %v5887_v46, 0.0  ;;  %v3967_v15 = vmul.f32 %v6823_v36, %v12486_v20 }
 0x434   : > { %v3405_v31 = vsel %vm3200_vm3, %v3402_v12, %v12982_v37  ;;  %v3617_v18 = vadd.f32 %v3403_v57, %v2976_v43  ;;  %v3729_v3 = vmul.f32 %v6821_v35, %v12266_v21  ;;  %v12512_v47 = vmul.f32 %v6814_v30, %v12486_v20  ;;  %6097 = vst.msk [vmem:[#allocation2 + $0x310] sm:$0xff] %vm5998_vm6, %v5991_v50 }
 0x435   : > { %v3618_v4 = vadd.f32 %v3405_v31, %v2977_v24  ;;  %v4608_v62 = vmul.f32 %v6827_v41, %v12486_v20  ;;  %v2765_v58 = vrot.slane %v12424_v56, 6  ;;  %6098 = vst.msk [vmem:[#allocation2 + $0x318] sm:$0xff] %vm5998_vm6, %v5992_v63  ;;  %v4923_v12 = vrot.slane %v12479_v27, 5 }
 0x436   : > { %v4280_v60 = vrot.slane %v3967_v15, 4  ;;  %v5249_v5 = vmul.f32 %v6829_v42, %v12486_v20  ;;  %v5563_v49 = vrot.slane %v12491_v7, 6  ;;  %v3834_v52 = vadd.f32 %v3729_v3, %v3617_v18 }
 0x437   : > { %v3835_v30 = vadd.f32 %v12279_v38, %v3618_v4  ;;  %v4921_v34 = vrot.slane %v4608_v62, 5  ;;  %v3406_v45 = vrot.slane %v12433_v16, 7  ;;  %v2769_v6 = vrot.slane %v12512_v47, 6  ;;  %v12569_v62 = vld [vmem:[#allocation3] ss:$0 sm:$0xff] }
 0x438   : > { %v4281_v56 = vsel %vm4078_vm4, %v4278_v1, %v4280_v60  ;;  %v4283_v26 = vsel %vm4078_vm4, %v4280_v60, %v4282_v28  ;;  %v5561_v53 = vrot.slane %v5249_v5, 6  ;;  %v12534_v8 = vmul.f32 %v6818_v33, %v12486_v20 }
 0x439   : > { %v4495_v38 = vadd.f32 %v4281_v56, %v3834_v52  ;;  %v4496_v22 = vadd.f32 %v4283_v26, %v3835_v30  ;;  %v4922_v16 = vsel %vm4719_vm5, %v4919_v10, %v4921_v34  ;;  %v4924_v1 = vsel %vm4719_vm5, %v4921_v34, %v4923_v12 }
 0x43a   : > { %v12543_v32 = vmul.f32 %v6823_v36, %v3855_v19  ;;  %v12546_v46 = vmul.f32 %v6827_v41, %v3855_v19  ;;  %v5562_v33 = vsel %vm2559_vm2, %v5559_v59, %v5561_v53  ;;  %v5564_v14 = vsel %vm2559_vm2, %v5561_v53, %v5563_v49 }
 0x43b   : > { %v5136_v43 = vadd.f32 %v4922_v16, %v4495_v38  ;;  %v5137_v24 = vadd.f32 %v4924_v1, %v4496_v22  ;;  %v1468_v10 = vrot.slane %v12164_v48, 1  ;;  %v1470_v44 = vrot.slane %v12327_v25, 1 }
 0x43c   : > { %v1794_v57 = vmul.f32 %v6809_v23, %v12142_v39  ;;  %v1795_v37 = vmul.f32 %v6809_v23, %v12266_v21  ;;  %v930_v63 = vmul.f32 %v12983_v51, %v12184_v13  ;;  %v931_v59 = vmul.f32 %v12983_v51, %v12142_v39  ;;  %v3850_v13 = vpop.permute.xlu0 %3849 }
 0x43d   : > { %v5776_v31 = vadd.f32 %v5562_v33, %v5136_v43  ;;  %v5777_v50 = vadd.f32 %v5564_v14, %v5137_v24  ;;  %v12984_v18 = vrot.slane %v12206_v11, 1  ;;  %v1471_v25 = vsel %vm1262_vm0, %v1468_v10, %v1470_v44  ;;  %v12988_v33 = vld [vmem:[#allocation7_spill] sm:$0xff] }
 0x43e   : > { %v2109_v15 = vrot.slane %v1794_v57, 2  ;;  %v2111_v4 = vrot.slane %v1795_v37, 2  ;;  %v1682_v5 = vadd.f32 %v1471_v25, %v931_v59  ;;  %v12985_v52 = vrot.slane %v12210_v9, 2 }
 0x43f   : > { %v1469_v48 = vsel %vm1262_vm0, %v12984_v18, %v1468_v10  ;;  %v5888_v3 = vadd.f32 %v11760_v17, %v5776_v31  ;;  %v5889_v23 = vadd.f32 %v12569_v62, %v5777_v50  ;;  %v12986_v30 = vrot.slane %v12251_v54, 6 }
 0x440   : > { %v1681_v60 = vadd.f32 %v1469_v48, %v930_v63  ;;  %v2110_v39 = vsel %vm1903_vm1, %v12985_v52, %v2109_v15  ;;  %v2112_v11 = vsel %vm1903_vm1, %v2109_v15, %v2111_v4  ;;  %v12987_v56 = vrot.slane %v12321_v29, 6 }
 0x441   : > { %v2766_v34 = vsel %vm2559_vm2, %v12986_v30, %v2765_v58  ;;  %v5993_v26 = vmax.f32 %v5888_v3, 0.0  ;;  %v5994_v53 = vmax.f32 %v5889_v23, 0.0  ;;  %v2323_v22 = vadd.f32 %v2112_v11, %v1682_v5  ;;  %v12992_v3 = vld [vmem:[#allocation8_spill] sm:$0xff] }
 0x442   : > { %v2768_v17 = vsel %vm2559_vm2, %v2765_v58, %v12987_v56  ;;  %v2322_v38 = vadd.f32 %v2110_v39, %v1681_v60  ;;  %v4286_v16 = vrot.slane %v12543_v32, 4  ;;  %v5252_v9 = vmul.f32 %v6829_v42, %v3855_v19 }
 0x443   : > { %v3969_v1 = vmul.f32 %v6823_v36, %v3850_v13  ;;  %v4610_v43 = vmul.f32 %v6827_v41, %v3850_v13  ;;  %6099 = vst.msk [vmem:[#allocation2 + $0x320] sm:$0xff] %vm5998_vm6, %v5993_v26  ;;  %6100 = vst.msk [vmem:[#allocation2 + $0x328] sm:$0xff] %vm5998_vm6, %v5994_v53  ;;  %v2979_v24 = vadd.f32 %v2768_v17, %v2323_v22  ;;  %v12989_v14 = vrot.slane %v12988_v33, 1 }
 0x444   : > { %v2978_v54 = vadd.f32 %v2766_v34, %v2322_v38  ;;  %v932_v58 = vmul.f32 %v12983_v51, %v12266_v21  ;;  %v12990_v32 = vrot.slane %v12254_v55, 7  ;;  %v12991_v57 = vrot.slane %v12346_v2, 7  ;;  %v3860_v51 = vpop.permute.xlu0 %3859 }
 0x445   : > { %v1473_v10 = vsel %vm1262_vm0, %v1470_v44, %v12989_v14  ;;  %v4284_v31 = vrot.slane %v3969_v1, 4  ;;  %v5251_v50 = vmul.f32 %v6829_v42, %v3850_v13  ;;  %v3410_v63 = vrot.slane %v12534_v8, 7 }
 0x446   : > { %v3407_v19 = vsel %vm3200_vm3, %v12990_v32, %v3406_v45  ;;  %v3409_v37 = vsel %vm3200_vm3, %v3406_v45, %v12991_v57  ;;  %v1683_v21 = vadd.f32 %v1473_v10, %v932_v58  ;;  %v4927_v48 = vrot.slane %v12546_v46, 5  ;;  %v6433_v58 = vld [vmem:[#allocation2 + $0x30d] ss:$2 sm:$0xff] }
 0x447   : > { %v3619_v59 = vadd.f32 %v3407_v19, %v2978_v54  ;;  %v3620_v18 = vadd.f32 %v3409_v37, %v2979_v24  ;;  %v4285_v55 = vsel %vm4078_vm4, %v4282_v28, %v4284_v31  ;;  %v4287_v44 = vsel %vm4078_vm4, %v4284_v31, %v4286_v16  ;;  %v6429_v24 = vld [vmem:[#allocation2 + $0x30c] ss:$2 sm:$0xff] }
 0x448   : > { %v4925_v25 = vrot.slane %v4610_v43, 5  ;;  %v12993_v23 = vrot.slane %v12992_v3, 2  ;;  %v12994_v60 = vmov %v12987_v56  ;;  %v5567_v0 = vrot.slane %v5252_v9, 6 }
 0x449   : > { %v3836_v45 = vadd.f32 %v12436_v40, %v3619_v59  ;;  %v3837_v15 = vadd.f32 %v12416_v61, %v3620_v18  ;;  %v2770_v46 = vsel %vm2559_vm2, %v12994_v60, %v2769_v6  ;;  %v5565_v5 = vrot.slane %v5251_v50, 6 }
 0x44a   : > { %v2114_v8 = vsel %vm1903_vm1, %v2111_v4, %v12993_v23  ;;  %v3971_v13 = vmul.f32 %v6823_v36, %v3860_v51  ;;  %v4612_v40 = vmul.f32 %v6827_v41, %v3860_v51  ;;  %v4926_v61 = vsel %vm4719_vm5, %v4923_v12, %v4925_v25  ;;  %v6431_v37 = vld [vmem:[#allocation2 + $0x31c] ss:$2 sm:$0x3f]  ;;  %v6435_v31 = vld [vmem:[#allocation2 + $0x31d] ss:$2 sm:$0x3f] }
 0x44b   : > { %v2324_v28 = vadd.f32 %v2114_v8, %v1683_v21  ;;  %v4497_v52 = vadd.f32 %v4285_v55, %v3836_v45  ;;  %v4498_v39 = vadd.f32 %v4287_v44, %v3837_v15  ;;  %v4928_v4 = vsel %vm4719_vm5, %v4925_v25, %v4927_v48 }
 0x44c   : > { %v12995_v29 = vmov %v12991_v57  ;;  %v4288_v34 = vrot.slane %v3971_v13, 4  ;;  %v5253_v36 = vmul.f32 %v6829_v42, %v3860_v51  ;;  %v5566_v41 = vsel %vm2559_vm2, %v5563_v49, %v5565_v5 }
 0x44d   : > { %v2980_v47 = vadd.f32 %v2770_v46, %v2324_v28  ;;  %v3411_v6 = vsel %vm3200_vm3, %v12995_v29, %v3410_v63  ;;  %v5138_v11 = vadd.f32 %v4926_v61, %v4497_v52  ;;  %v5139_v30 = vadd.f32 %v4928_v4, %v4498_v39 }
 0x44e   : > { %v5568_v27 = vsel %vm2559_vm2, %v5565_v5, %v5567_v0  ;;  %v3733_v12 = vmul.f32 %v6821_v35, %v12486_v20  ;;  %v4289_v2 = vsel %vm4078_vm4, %v4286_v16, %v4288_v34  ;;  %v4929_v53 = vrot.slane %v4612_v40, 5 }
 0x44f   : > { %v3621_v56 = vadd.f32 %v3411_v6, %v2980_v47  ;;  %v5778_v17 = vadd.f32 %v5566_v41, %v5138_v11  ;;  %v5779_v26 = vadd.f32 %v5568_v27, %v5139_v30  ;;  %v5569_v9 = vrot.slane %v5253_v36, 6 }
 0x450   : > { %v4930_v43 = vsel %vm4719_vm5, %v4927_v48, %v4929_v53  ;;  %v6444_v32 = vmax.f32 %v6429_v24, %v6433_v58  ;;  %v6445_v59 = vmax.f32 %v6431_v37, %v6435_v31 }
 0x451   : > { %v3838_v38 = vadd.f32 %v3733_v12, %v3621_v56  ;;  %v5890_v22 = vadd.f32 %v12569_v62, %v5778_v17  ;;  %v5891_v42 = vadd.f32 %v12569_v62, %v5779_v26  ;;  %v5570_v35 = vsel %vm2559_vm2, %v5567_v0, %v5569_v9 }
 0x453   : > { %v4499_v7 = vadd.f32 %v4289_v2, %v3838_v38  ;;  %v5995_v1 = vmax.f32 %v5890_v22, 0.0  ;;  %v5996_v49 = vmax.f32 %v5891_v42, 0.0 }
 0x455   : > { %v5140_v54 = vadd.f32 %v4930_v43, %v4499_v7  ;;  %6101 = vst.msk [vmem:[#allocation2 + $0x330] sm:$0xff] %vm5998_vm6, %v5995_v1  ;;  %6102 = vst.msk [vmem:[#allocation2 + $0x338] sm:$0xff] %vm5998_vm6, %v5996_v49 }
 0x457   : > { %v5780_v20 = vadd.f32 %v5570_v35, %v5140_v54 }
 0x459   : > { %v5892_v16 = vadd.f32 %v12569_v62, %v5780_v20 }
 0x45b   : > { %v5997_v33 = vmax.f32 %v5892_v16, 0.0 }
 0x45c   : > { %v6437_v14 = vld [vmem:[#allocation2 + $0x32a] ss:$2 sm:$0xff]  ;;  %v6441_v10 = vld [vmem:[#allocation2 + $0x32b] ss:$2 sm:$0xff] }
 0x45d   : > { %6103 = vst.msk [vmem:[#allocation2 + $0x340] sm:$0xff] %vm5998_vm6, %v5997_v33  ;;  %v6446_v19 = vmax.f32 %v6437_v14, %v6441_v10 }
 0x45f   : > { %v6448_v57 = vmax.f32 %v6444_v32, %v6446_v19 }
 0x461   : > { %6562 = vst.msk [vmem:[%s7456_s28 + $0xd0] sm:$0xff] %vm5998_vm6, %v6448_v57 }
 0x464   : > { %v6439_v50 = vld [vmem:[#allocation2 + $0x33a] ss:$2 sm:$0x3f]  ;;  %v6443_v63 = vld [vmem:[#allocation2 + $0x33b] ss:$2 sm:$0x3f] }
 0x465   : > { %v6447_v18 = vmax.f32 %v6439_v50, %v6443_v63 }
 0x467   : > { %v6449_v62 = vmax.f32 %v6445_v59, %v6447_v18 }
 0x469   : > { %6563 = vst.msk [vmem:[%s7456_s28 + $0xd8] sm:$0x3f] %vm6126_vm7, %v6449_v62 }
 0x46a PF: > { %s14_s12 = sadd.s32 1, %s6635_s12  }
 0x46b   : > { %p11_p2 = scmp.ge.s32.totalorder %s14_s12, 4  }
 0x46d   :  { %13 = sbr.rel (!%p11_p2) target bundleno = 1 (0x1), region = 199 }
 0x474   :  { %6474 = vsyncpa [#allocation4], 1 }
 0x475   :  { %6476 = vsyncpa [#allocation4 + $0x1], 1 }

// kernel: cnn_forward.7
= control target key start
LH: loop header
LB: loop body
LE: loop exit
PB: predicated region body
PF: predicated region fallthrough
CT: control target
= control target key end

     0   :  { %v4710_v36 = vmov 1983009808   ;;  %v32_v38 = vlaneseq  ;;  %s6077_s0 = inlined_call_operand.vmem [shape: f32[2,1152], index: 0, kind: input, shape index: {}]   ;;  %s6078_s1 = inlined_call_operand.vmem [shape: bf16[1152,625], index: 1, kind: input, shape index: {}]   ;;  %s6079_s2 = inlined_call_operand.vmem [shape: f32[1,625], index: 2, kind: input, shape index: {}]   ;;  %s6080_s3 = inlined_call_operand.vmem [shape: bf16[625,128], index: 3, kind: input, shape index: {}]   ;;  %s6081_s4 = inlined_call_operand.vmem [shape: f32[1,128], index: 4, kind: input, shape index: {}]   ;;  %s6082_s5 = inlined_call_operand.hbm [shape: f32[2,128], index: 5, kind: output, shape index: {}]  }
   0x1   :  { %v4140_v0 = vld [vmem:[%s6078_s1 + $0x4] ss:$20 sps:$4 sm:$0xff]   ;;  %v4142_v1 = vld [vmem:[%s6078_s1 + $0xc] ss:$20 sps:$4 sm:$0xff]   ;;  %v4145_v3 = vld [vmem:[%s6078_s1 + $0x8] ss:$20 sps:$4 sm:$0xff]   ;;  %v30_v37 = vunpack.c.l.s4 %v4710_v36 }
   0x2   :  { %2418 = vmatprep.subr.bf16.mxu0 %v4140_v0  ;;  %v4144_v2 = vld [vmem:[%s6078_s1] ss:$20 sps:$4 sm:$0xff]   ;;  %2623 = vmatprep.subr.bf16.mxu1 %v4142_v1  ;;  %v4150_v6 = vld [vmem:[%s6078_s1 + $0x28] ss:$20 sps:$4 sm:$0xff]   ;;  %v4151_v7 = vld [vmem:[%s6078_s1 + $0x30] ss:$20 sps:$4 sm:$0xff]  }
   0x3   :  { %v4146_v4 = vld [vmem:[%s6078_s1 + $0x2c] ss:$20 sps:$4 sm:$0xff]   ;;  %2419 = vmatpush1.bf16.msra.mxu0 %v4144_v2  ;;  %2624 = vmatpush1.bf16.msra.mxu1 %v4145_v3  ;;  %v4148_v5 = vld [vmem:[%s6078_s1 + $0x34] ss:$20 sps:$4 sm:$0xff]   ;;  %v4154_v9 = vld [vmem:[%s6078_s1 + $0x5c] ss:$20 sps:$4 sm:$0xff]   ;;  %v31_v42 = vunpack.c.0.s8 %v30_v37 }
   0x4   :  { %2420 = vmatprep.subr.bf16.mxu0 %v4146_v4  ;;  %2625 = vmatprep.subr.bf16.mxu1 %v4148_v5  ;;  %v4152_v8 = vld [vmem:[%s6078_s1 + $0x54] ss:$20 sps:$4 sm:$0xff]   ;;  %v4156_v10 = vld [vmem:[%s6078_s1 + $0x50] ss:$20 sps:$4 sm:$0xff]   ;;  %v4157_v11 = vld [vmem:[%s6078_s1 + $0x58] ss:$20 sps:$4 sm:$0xff]  }
   0x5   :  { %v4158_v12 = vld [vmem:[%s6078_s1 + $0x7c] ss:$20 sps:$4 sm:$0xff]   ;;  %v4160_v13 = vld [vmem:[%s6078_s1 + $0x84] ss:$20 sps:$4 sm:$0xff]   ;;  %v4163_v15 = vld [vmem:[%s6078_s1 + $0x80] ss:$20 sps:$4 sm:$0xff]  }
   0x6   :  { %v4162_v14 = vld [vmem:[%s6078_s1 + $0x78] ss:$20 sps:$4 sm:$0xff]   ;;  %v4168_v18 = vld [vmem:[%s6078_s1 + $0xa0] ss:$20 sps:$4 sm:$0xff]   ;;  %v4169_v19 = vld [vmem:[%s6078_s1 + $0xa8] ss:$20 sps:$4 sm:$0xff]  }
   0x7   :  { %2421 = vmatpush1.bf16.msra.mxu0 %v4150_v6  ;;  %2626 = vmatpush1.bf16.msra.mxu1 %v4151_v7  ;;  %v4164_v16 = vld [vmem:[%s6078_s1 + $0xa4] ss:$20 sps:$4 sm:$0xff]   ;;  %v4166_v17 = vld [vmem:[%s6078_s1 + $0xac] ss:$20 sps:$4 sm:$0xff]   ;;  %v4172_v21 = vld [vmem:[%s6078_s1 + $0xd4] ss:$20 sps:$4 sm:$0xff]  }
   0x8   :  { %2422 = vmatprep.subr.bf16.mxu0 %v4152_v8  ;;  %2627 = vmatprep.subr.bf16.mxu1 %v4154_v9  ;;  %v4170_v20 = vld [vmem:[%s6078_s1 + $0xcc] ss:$20 sps:$4 sm:$0xff]   ;;  %v4174_v22 = vld [vmem:[%s6078_s1 + $0xc8] ss:$20 sps:$4 sm:$0xff]   ;;  %v4175_v23 = vld [vmem:[%s6078_s1 + $0xd0] ss:$20 sps:$4 sm:$0xff]  }
   0x9   :  { %v4176_v24 = vld [vmem:[%s6078_s1 + $0xf4] ss:$20 sps:$4 sm:$0xff]   ;;  %v4178_v25 = vld [vmem:[%s6078_s1 + $0xfc] ss:$20 sps:$4 sm:$0xff]   ;;  %v4181_v27 = vld [vmem:[%s6078_s1 + $0xf8] ss:$20 sps:$4 sm:$0xff]  }
   0xa   :  { %v4180_v26 = vld [vmem:[%s6078_s1 + $0xf0] ss:$20 sps:$4 sm:$0xff]   ;;  %v4186_v30 = vld [vmem:[%s6078_s1 + $0x118] ss:$20 sps:$4 sm:$0xff]   ;;  %v4187_v31 = vld [vmem:[%s6078_s1 + $0x120] ss:$20 sps:$4 sm:$0xff]  }
   0xb   :  { %2423 = vmatpush1.bf16.msra.mxu0 %v4156_v10  ;;  %2628 = vmatpush1.bf16.msra.mxu1 %v4157_v11  ;;  %v4182_v28 = vld [vmem:[%s6078_s1 + $0x11c] ss:$20 sps:$4 sm:$0xff]   ;;  %v4184_v29 = vld [vmem:[%s6078_s1 + $0x124] ss:$20 sps:$4 sm:$0xff]   ;;  %v4190_v33 = vld [vmem:[%s6078_s1 + $0x14c] ss:$20 sps:$4 sm:$0xff]  }
   0xc   :  { %2424 = vmatprep.subr.bf16.mxu0 %v4158_v12  ;;  %2629 = vmatprep.subr.bf16.mxu1 %v4160_v13  ;;  %v4188_v32 = vld [vmem:[%s6078_s1 + $0x144] ss:$20 sps:$4 sm:$0xff]   ;;  %v4192_v34 = vld [vmem:[%s6078_s1 + $0x140] ss:$20 sps:$4 sm:$0xff]   ;;  %v4193_v35 = vld [vmem:[%s6078_s1 + $0x148] ss:$20 sps:$4 sm:$0xff]  }
   0xd   :  { %v4194_v39 = vld [vmem:[%s6078_s1 + $0x16c] ss:$20 sps:$4 sm:$0xff]   ;;  %v4196_v40 = vld [vmem:[%s6078_s1 + $0x174] ss:$20 sps:$4 sm:$0xff]   ;;  %v4862_v43 = vshrl.u32 %v32_v38, 7 }
   0xe   :  { %v4198_v41 = vld [vmem:[%s6078_s1 + $0x168] ss:$20 sps:$4 sm:$0xff]   ;;  %v4199_v44 = vld [vmem:[%s6078_s1 + $0x170] ss:$20 sps:$4 sm:$0xff]   ;;  %v4205_v48 = vld [vmem:[%s6078_s1 + $0x198] ss:$20 sps:$4 sm:$0xff]  }
   0xf   :  { %2425 = vmatpush1.bf16.msra.mxu0 %v4162_v14  ;;  %2630 = vmatpush1.bf16.msra.mxu1 %v4163_v15  ;;  %v4200_v45 = vld [vmem:[%s6078_s1 + $0x194] ss:$20 sps:$4 sm:$0xff]   ;;  %v4202_v46 = vld [vmem:[%s6078_s1 + $0x19c] ss:$20 sps:$4 sm:$0xff]   ;;  %v4880_v49 = vsub.s32 %v31_v42, %v4862_v43  ;;  %v4208_v51 = vld [vmem:[%s6078_s1 + $0x1c4] ss:$20 sps:$4 sm:$0xff]  }
  0x10   :  { %2426 = vmatprep.subr.bf16.mxu0 %v4164_v16  ;;  %2631 = vmatprep.subr.bf16.mxu1 %v4166_v17  ;;  %v4204_v47 = vld [vmem:[%s6078_s1 + $0x190] ss:$20 sps:$4 sm:$0xff]   ;;  %v4210_v53 = vld [vmem:[%s6078_s1 + $0x1b8] ss:$20 sps:$4 sm:$0xff]   ;;  %v4211_v55 = vld [vmem:[%s6078_s1 + $0x1c0] ss:$20 sps:$4 sm:$0xff]  }
  0x11   :  { %v4206_v50 = vld [vmem:[%s6078_s1 + $0x1bc] ss:$20 sps:$4 sm:$0xff]   ;;  %v22_v52 = vld [vmem:[%s6077_s0] sm:$0xff]  ;;  %v4220_v63 = vld [vmem:[%s6078_s1 + $0x214] ss:$20 sps:$4 sm:$0xff]  }
  0x12   :  { %v35_v54 = vrot.slane %v22_v52, %v4880_v49  ;;  %v4212_v56 = vld [vmem:[%s6078_s1 + $0x1e4] ss:$20 sps:$4 sm:$0xff]   ;;  %v4214_v57 = vld [vmem:[%s6078_s1 + $0x1ec] ss:$20 sps:$4 sm:$0xff]   ;;  %v4217_v61 = vld [vmem:[%s6078_s1 + $0x1e8] ss:$20 sps:$4 sm:$0xff]   ;;  %v28_v4 = vcombine.high %v22_v52, %v22_v52 }
  0x13   :  { %2427 = vmatpush1.bf16.msra.mxu0 %v4168_v18  ;;  %2632 = vmatpush1.bf16.msra.mxu1 %v4169_v19  ;;  %v4216_v59 = vld [vmem:[%s6078_s1 + $0x1e0] ss:$20 sps:$4 sm:$0xff]   ;;  %v4222_v0 = vld [vmem:[%s6078_s1 + $0x208] ss:$20 sps:$4 sm:$0xff]   ;;  %v4223_v1 = vld [vmem:[%s6078_s1 + $0x210] ss:$20 sps:$4 sm:$0xff]  }
  0x14   :  { %2428 = vmatprep.subr.bf16.mxu0 %v4170_v20  ;;  %2633 = vmatprep.subr.bf16.mxu1 %v4172_v21  ;;  %v43_v58 = vcombine.high %v35_v54, %v35_v54  ;;  %v4218_v62 = vld [vmem:[%s6078_s1 + $0x20c] ss:$20 sps:$4 sm:$0xff]   ;;  %v4224_v2 = vld [vmem:[%s6078_s1 + $0x234] ss:$20 sps:$4 sm:$0xff]   ;;  %v4226_v3 = vld [vmem:[%s6078_s1 + $0x23c] ss:$20 sps:$4 sm:$0xff]   ;;  %v4945_v9 = vrot.slane %v28_v4, %v4880_v49  ;;  %v4964_v16 = vpack.c.bf16 %v35_v54, %v35_v54 }
  0x15   :  { %v4228_v5 = vld [vmem:[%s6078_s1 + $0x230] ss:$20 sps:$4 sm:$0xff]   ;;  %v4229_v6 = vld [vmem:[%s6078_s1 + $0x238] ss:$20 sps:$4 sm:$0xff]   ;;  %v4235_v11 = vld [vmem:[%s6078_s1 + $0x260] ss:$20 sps:$4 sm:$0xff]  }
  0x16   :  { %v4907_v60 = vpack.c.bf16 %v43_v58, %v43_v58  ;;  %v4230_v7 = vld [vmem:[%s6078_s1 + $0x25c] ss:$20 sps:$4 sm:$0xff]   ;;  %v4232_v8 = vld [vmem:[%s6078_s1 + $0x264] ss:$20 sps:$4 sm:$0xff]   ;;  %v4241_v13 = vld [vmem:[%s6078_s1 + $0x28c] ss:$20 sps:$4 sm:$0xff]   ;;  %v44_v14 = vcombine.high %v4945_v9, %v4945_v9 }
  0x17   :  { %2429 = vmatpush1.bf16.msra.mxu0 %v4174_v22  ;;  %2634 = vmatpush1.bf16.msra.mxu1 %v4175_v23  ;;  %v4234_v10 = vld [vmem:[%s6078_s1 + $0x258] ss:$20 sps:$4 sm:$0xff]   ;;  %v4236_v15 = vld [vmem:[%s6078_s1 + $0x280] ss:$20 sps:$4 sm:$0xff]   ;;  %v4239_v17 = vld [vmem:[%s6078_s1 + $0x288] ss:$20 sps:$4 sm:$0xff]  }
  0x18   :  { %2430 = vmatprep.subr.bf16.mxu0 %v4176_v24  ;;  %2635 = vmatprep.subr.bf16.mxu1 %v4178_v25  ;;  %v4238_v12 = vld [vmem:[%s6078_s1 + $0x284] ss:$20 sps:$4 sm:$0xff]   ;;  %v4244_v18 = vld [vmem:[%s6078_s1 + $0x2ac] ss:$20 sps:$4 sm:$0xff]   ;;  %v4247_v19 = vld [vmem:[%s6078_s1 + $0x2b4] ss:$20 sps:$4 sm:$0xff]   ;;  %v4975_v20 = vpack.c.bf16 %v44_v14, %v44_v14 }
  0x19   :  { %2450 = vmatprep.mubr.bf16.mxu0 %v4907_v60  ;;  %2655 = vmatprep.mubr.bf16.mxu1 %v4907_v60  ;;  %v4242_v21 = vld [vmem:[%s6078_s1 + $0x2a8] ss:$20 sps:$4 sm:$0xff]   ;;  %v4245_v22 = vld [vmem:[%s6078_s1 + $0x2b0] ss:$20 sps:$4 sm:$0xff]   ;;  %v4275_v42 = vld [vmem:[%s6078_s1 + $0x378] ss:$20 sps:$4 sm:$0xff]  }
  0x1a   :  { %v4250_v23 = vld [vmem:[%s6078_s1 + $0x2d4] ss:$20 sps:$4 sm:$0xff]   ;;  %v4253_v24 = vld [vmem:[%s6078_s1 + $0x2dc] ss:$20 sps:$4 sm:$0xff]   ;;  %v4323_v14 = vld [vmem:[%s6078_s1 + $0x4b8] ss:$20 sps:$4 sm:$0xff]  }
  0x1b   :  { %2431 = vmatpush1.bf16.msra.mxu0 %v4180_v26  ;;  %2636 = vmatpush1.bf16.msra.mxu1 %v4181_v27  ;;  %v4248_v25 = vld [vmem:[%s6078_s1 + $0x2d0] ss:$20 sps:$4 sm:$0xff]   ;;  %v4251_v26 = vld [vmem:[%s6078_s1 + $0x2d8] ss:$20 sps:$4 sm:$0xff]   ;;  %v4271_v36 = vld [vmem:[%s6078_s1 + $0x354] ss:$20 sps:$4 sm:$0xff]  }
  0x1c   :  { %2432 = vmatprep.subr.bf16.mxu0 %v4182_v28  ;;  %2637 = vmatprep.subr.bf16.mxu1 %v4184_v29  ;;  %v4256_v27 = vld [vmem:[%s6078_s1 + $0x2fc] ss:$20 sps:$4 sm:$0xff]   ;;  %v4259_v28 = vld [vmem:[%s6078_s1 + $0x304] ss:$20 sps:$4 sm:$0xff]   ;;  %v4295_v54 = vld [vmem:[%s6078_s1 + $0x3f4] ss:$20 sps:$4 sm:$0xff]  }
  0x1d   :  { %v4254_v29 = vld [vmem:[%s6078_s1 + $0x2f8] ss:$20 sps:$4 sm:$0xff]   ;;  %v4266_v37 = vld [vmem:[%s6078_s1 + $0x348] ss:$20 sps:$4 sm:$0xff]   ;;  %v4269_v38 = vld [vmem:[%s6078_s1 + $0x350] ss:$20 sps:$4 sm:$0xff]  }
  0x1e   :  { %v4287_v52 = vld [vmem:[%s6078_s1 + $0x3c8] ss:$20 sps:$4 sm:$0xff]   ;;  %v4308_v4 = vld [vmem:[%s6078_s1 + $0x460] ss:$20 sps:$4 sm:$0xff]  }
  0x1f   :  { %2433 = vmatpush1.bf16.msra.mxu0 %v4186_v30  ;;  %2638 = vmatpush1.bf16.msra.mxu1 %v4187_v31  ;;  %v4257_v30 = vld [vmem:[%s6078_s1 + $0x300] ss:$20 sps:$4 sm:$0xff]   ;;  %v4262_v31 = vld [vmem:[%s6078_s1 + $0x324] ss:$20 sps:$4 sm:$0xff]   ;;  %v4301_v58 = vld [vmem:[%s6078_s1 + $0x41c] ss:$20 sps:$4 sm:$0xff]  }
  0x20   :  { %2434 = vmatprep.subr.bf16.mxu0 %v4188_v32  ;;  %2639 = vmatprep.subr.bf16.mxu1 %v4190_v33  ;;  %v4265_v32 = vld [vmem:[%s6078_s1 + $0x32c] ss:$20 sps:$4 sm:$0xff]  }
  0x21   :  { %v4260_v33 = vld [vmem:[%s6078_s1 + $0x320] ss:$20 sps:$4 sm:$0xff]  }
  0x23   :  { %2435 = vmatpush1.bf16.msra.mxu0 %v4192_v34  ;;  %2640 = vmatpush1.bf16.msra.mxu1 %v4193_v35  ;;  %v4263_v34 = vld [vmem:[%s6078_s1 + $0x328] ss:$20 sps:$4 sm:$0xff]   ;;  %v4268_v35 = vld [vmem:[%s6078_s1 + $0x34c] ss:$20 sps:$4 sm:$0xff]  }
  0x24   :  { %2436 = vmatprep.subr.bf16.mxu0 %v4194_v39  ;;  %2641 = vmatprep.subr.bf16.mxu1 %v4196_v40  ;;  %v4274_v39 = vld [vmem:[%s6078_s1 + $0x374] ss:$20 sps:$4 sm:$0xff]   ;;  %v4277_v40 = vld [vmem:[%s6078_s1 + $0x37c] ss:$20 sps:$4 sm:$0xff]  }
  0x27   :  { %2437 = vmatpush1.bf16.msra.mxu0 %v4198_v41  ;;  %2642 = vmatpush1.bf16.msra.mxu1 %v4199_v44  ;;  %v4272_v41 = vld [vmem:[%s6078_s1 + $0x370] ss:$20 sps:$4 sm:$0xff]  }
  0x28   :  { %2438 = vmatprep.subr.bf16.mxu0 %v4200_v45  ;;  %2643 = vmatprep.subr.bf16.mxu1 %v4202_v46  ;;  %v4280_v44 = vld [vmem:[%s6078_s1 + $0x39c] ss:$20 sps:$4 sm:$0xff]   ;;  %v4283_v45 = vld [vmem:[%s6078_s1 + $0x3a4] ss:$20 sps:$4 sm:$0xff]  }
  0x29   :  { %v4278_v46 = vld [vmem:[%s6078_s1 + $0x398] ss:$20 sps:$4 sm:$0xff]  }
  0x2b   :  { %2439 = vmatpush1.bf16.msra.mxu0 %v4204_v47  ;;  %2644 = vmatpush1.bf16.msra.mxu1 %v4205_v48  ;;  %v4281_v47 = vld [vmem:[%s6078_s1 + $0x3a0] ss:$20 sps:$4 sm:$0xff]   ;;  %v4286_v48 = vld [vmem:[%s6078_s1 + $0x3c4] ss:$20 sps:$4 sm:$0xff]  }
  0x2c   :  { %2440 = vmatprep.subr.bf16.mxu0 %v4206_v50  ;;  %2645 = vmatprep.subr.bf16.mxu1 %v4208_v51  ;;  %v4289_v50 = vld [vmem:[%s6078_s1 + $0x3cc] ss:$20 sps:$4 sm:$0xff]  }
  0x2d   :  { %v4284_v51 = vld [vmem:[%s6078_s1 + $0x3c0] ss:$20 sps:$4 sm:$0xff]  }
  0x2f   :  { %2441 = vmatpush1.bf16.msra.mxu0 %v4210_v53  ;;  %2646 = vmatpush1.bf16.msra.mxu1 %v4211_v55  ;;  %v4292_v53 = vld [vmem:[%s6078_s1 + $0x3ec] ss:$20 sps:$4 sm:$0xff]   ;;  %v4290_v55 = vld [vmem:[%s6078_s1 + $0x3e8] ss:$20 sps:$4 sm:$0xff]  }
  0x30   :  { %2442 = vmatprep.subr.bf16.mxu0 %v4212_v56  ;;  %2647 = vmatprep.subr.bf16.mxu1 %v4214_v57  ;;  %v4293_v56 = vld [vmem:[%s6078_s1 + $0x3f0] ss:$20 sps:$4 sm:$0xff]   ;;  %v4298_v57 = vld [vmem:[%s6078_s1 + $0x414] ss:$20 sps:$4 sm:$0xff]  }
  0x33   :  { %2443 = vmatpush1.bf16.msra.mxu0 %v4216_v59  ;;  %2648 = vmatpush1.bf16.msra.mxu1 %v4217_v61  ;;  %v4296_v59 = vld [vmem:[%s6078_s1 + $0x410] ss:$20 sps:$4 sm:$0xff]   ;;  %v4299_v61 = vld [vmem:[%s6078_s1 + $0x418] ss:$20 sps:$4 sm:$0xff]  }
  0x34   :  { %2444 = vmatprep.subr.bf16.mxu0 %v4218_v62  ;;  %2649 = vmatprep.subr.bf16.mxu1 %v4220_v63  ;;  %v4304_v62 = vld [vmem:[%s6078_s1 + $0x43c] ss:$20 sps:$4 sm:$0xff]   ;;  %v4307_v63 = vld [vmem:[%s6078_s1 + $0x444] ss:$20 sps:$4 sm:$0xff]  }
  0x37   :  { %2445 = vmatpush1.bf16.msra.mxu0 %v4222_v0  ;;  %2650 = vmatpush1.bf16.msra.mxu1 %v4223_v1  ;;  %v4302_v0 = vld [vmem:[%s6078_s1 + $0x438] ss:$20 sps:$4 sm:$0xff]   ;;  %v4305_v1 = vld [vmem:[%s6078_s1 + $0x440] ss:$20 sps:$4 sm:$0xff]  }
  0x38   :  { %2446 = vmatprep.subr.bf16.mxu0 %v4224_v2  ;;  %2651 = vmatprep.subr.bf16.mxu1 %v4226_v3  ;;  %v4310_v2 = vld [vmem:[%s6078_s1 + $0x464] ss:$20 sps:$4 sm:$0xff]   ;;  %v4313_v3 = vld [vmem:[%s6078_s1 + $0x46c] ss:$20 sps:$4 sm:$0xff]  }
  0x3b   :  { %2447 = vmatpush1.bf16.msra.mxu0 %v4228_v5  ;;  %2652 = vmatpush1.bf16.msra.mxu1 %v4229_v6  ;;  %v4311_v5 = vld [vmem:[%s6078_s1 + $0x468] ss:$20 sps:$4 sm:$0xff]   ;;  %v4316_v6 = vld [vmem:[%s6078_s1 + $0x48c] ss:$20 sps:$4 sm:$0xff]  }
  0x3c   :  { %2448 = vmatprep.subr.bf16.mxu0 %v4230_v7  ;;  %2653 = vmatprep.subr.bf16.mxu1 %v4232_v8  ;;  %v4319_v7 = vld [vmem:[%s6078_s1 + $0x494] ss:$20 sps:$4 sm:$0xff]  }
  0x3d   :  { %v4314_v8 = vld [vmem:[%s6078_s1 + $0x488] ss:$20 sps:$4 sm:$0xff]  }
  0x3f   :  { %2449 = vmatpush1.bf16.msra.mxu0 %v4234_v10  ;;  %2654 = vmatpush1.bf16.msra.mxu1 %v4235_v11  ;;  %v4317_v10 = vld [vmem:[%s6078_s1 + $0x490] ss:$20 sps:$4 sm:$0xff]   ;;  %v4322_v11 = vld [vmem:[%s6078_s1 + $0x4b4] ss:$20 sps:$4 sm:$0xff]  }
  0x40   :  { %2459 = vmatprep.subr.bf16.mxu0 %v4238_v12  ;;  %2664 = vmatprep.subr.bf16.mxu1 %v4241_v13  ;;  %v4325_v12 = vld [vmem:[%s6078_s1 + $0x4bc] ss:$20 sps:$4 sm:$0xff]  }
  0x41   :  { %v4320_v13 = vld [vmem:[%s6078_s1 + $0x4b0] ss:$20 sps:$4 sm:$0xff]  }
  0x42   :  { %2451 = vmatmul.mubr.bf16.vlgmr.msra.gmra.mrb[0].mxu0 %v4964_v16  ;;  %2656 = vmatmul.mubr.bf16.vlgmr.msra.gmra.mrb[0].mxu1 %v4964_v16 }
  0x43   :  { %2460 = vmatpush1.bf16.msra.mxu0 %v4236_v15  ;;  %2665 = vmatpush1.bf16.msra.mxu1 %v4239_v17  ;;  %v4328_v15 = vld [vmem:[%s6078_s1 + $0x4dc] ss:$20 sps:$4 sm:$0xff]   ;;  %v4331_v17 = vld [vmem:[%s6078_s1 + $0x4e4] ss:$20 sps:$4 sm:$0xff]  }
  0x44   :  { %2461 = vmatprep.subr.bf16.mxu0 %v4244_v18  ;;  %2666 = vmatprep.subr.bf16.mxu1 %v4247_v19  ;;  %v4326_v18 = vld [vmem:[%s6078_s1 + $0x4d8] ss:$20 sps:$4 sm:$0xff]   ;;  %v4329_v19 = vld [vmem:[%s6078_s1 + $0x4e0] ss:$20 sps:$4 sm:$0xff]  }
  0x45   :  { %2491 = vmatprep.mubr.bf16.mxu0 %v4975_v20  ;;  %2696 = vmatprep.mubr.bf16.mxu1 %v4975_v20 }
  0x47   :  { %2462 = vmatpush1.bf16.msra.mxu0 %v4242_v21  ;;  %2667 = vmatpush1.bf16.msra.mxu1 %v4245_v22  ;;  %v4335_v21 = vld [vmem:[%s6078_s1 + $0x504] ss:$20 sps:$4 sm:$0xff]   ;;  %v4338_v22 = vld [vmem:[%s6078_s1 + $0x50c] ss:$20 sps:$4 sm:$0xff]  }
  0x48   :  { %2463 = vmatprep.subr.bf16.mxu0 %v4250_v23  ;;  %2668 = vmatprep.subr.bf16.mxu1 %v4253_v24  ;;  %v4333_v23 = vld [vmem:[%s6078_s1 + $0x500] ss:$20 sps:$4 sm:$0xff]   ;;  %v5166_v24 = vpack.c.bf16 %v4945_v9, %v4945_v9 }
  0x49   :  { %v4344_v9 = vld [vmem:[%s6078_s1 + $0x534] ss:$20 sps:$4 sm:$0xff]  }
  0x4b   :  { %2464 = vmatpush1.bf16.msra.mxu0 %v4248_v25  ;;  %2669 = vmatpush1.bf16.msra.mxu1 %v4251_v26  ;;  %v4336_v25 = vld [vmem:[%s6078_s1 + $0x508] ss:$20 sps:$4 sm:$0xff]  }
  0x4c   :  { %2465 = vmatprep.subr.bf16.mxu0 %v4256_v27  ;;  %2670 = vmatprep.subr.bf16.mxu1 %v4259_v28  ;;  %v5174_v26 = vld [vmem:[%s6077_s0 + $0x8] sm:$0xff] }
  0x4d   :  { %v4341_v27 = vld [vmem:[%s6078_s1 + $0x52c] ss:$20 sps:$4 sm:$0xff]   ;;  %v5184_v28 = vrot.slane %v5174_v26, %v4880_v49 }
  0x4f   :  { %2466 = vmatpush1.bf16.msra.mxu0 %v4254_v29  ;;  %2671 = vmatpush1.bf16.msra.mxu1 %v4257_v30  ;;  %v60_v29 = vcombine.high %v5184_v28, %v5184_v28  ;;  %v4339_v30 = vld [vmem:[%s6078_s1 + $0x528] ss:$20 sps:$4 sm:$0xff]  }
  0x50   :  { %2467 = vmatprep.subr.bf16.mxu0 %v4262_v31  ;;  %2672 = vmatprep.subr.bf16.mxu1 %v4265_v32  ;;  %v4342_v31 = vld [vmem:[%s6078_s1 + $0x530] ss:$20 sps:$4 sm:$0xff]   ;;  %v4347_v32 = vld [vmem:[%s6078_s1 + $0x554] ss:$20 sps:$4 sm:$0xff]  }
  0x53   :  { %2468 = vmatpush1.bf16.msra.mxu0 %v4260_v33  ;;  %2673 = vmatpush1.bf16.msra.mxu1 %v4263_v34  ;;  %v4350_v33 = vld [vmem:[%s6078_s1 + $0x55c] ss:$20 sps:$4 sm:$0xff]   ;;  %v5202_v34 = vpack.c.bf16 %v60_v29, %v60_v29  ;;  %v4420_v29 = vld [vmem:[%s6078_s1 + $0x738] ss:$20 sps:$4 sm:$0xff]  }
  0x54   :  { %2469 = vmatprep.subr.bf16.mxu0 %v4268_v35  ;;  %2674 = vmatprep.subr.bf16.mxu1 %v4271_v36  ;;  %v4345_v35 = vld [vmem:[%s6078_s1 + $0x550] ss:$20 sps:$4 sm:$0xff]   ;;  %v4348_v36 = vld [vmem:[%s6078_s1 + $0x558] ss:$20 sps:$4 sm:$0xff]  }
  0x57   :  { %2470 = vmatpush1.bf16.msra.mxu0 %v4266_v37  ;;  %2675 = vmatpush1.bf16.msra.mxu1 %v4269_v38  ;;  %v4353_v37 = vld [vmem:[%s6078_s1 + $0x57c] ss:$20 sps:$4 sm:$0xff]   ;;  %v4356_v38 = vld [vmem:[%s6078_s1 + $0x584] ss:$20 sps:$4 sm:$0xff]  }
  0x58   :  { %2471 = vmatprep.subr.bf16.mxu0 %v4274_v39  ;;  %2676 = vmatprep.subr.bf16.mxu1 %v4277_v40  ;;  %v4351_v39 = vld [vmem:[%s6078_s1 + $0x578] ss:$20 sps:$4 sm:$0xff]   ;;  %v4354_v40 = vld [vmem:[%s6078_s1 + $0x580] ss:$20 sps:$4 sm:$0xff]  }
  0x5b   :  { %2472 = vmatpush1.bf16.msra.mxu0 %v4272_v41  ;;  %2677 = vmatpush1.bf16.msra.mxu1 %v4275_v42  ;;  %v4359_v41 = vld [vmem:[%s6078_s1 + $0x5a4] ss:$20 sps:$4 sm:$0xff]   ;;  %v4362_v42 = vld [vmem:[%s6078_s1 + $0x5ac] ss:$20 sps:$4 sm:$0xff]  }
  0x5c   :  { %2473 = vmatprep.subr.bf16.mxu0 %v4280_v44  ;;  %2678 = vmatprep.subr.bf16.mxu1 %v4283_v45  ;;  %v4357_v44 = vld [vmem:[%s6078_s1 + $0x5a0] ss:$20 sps:$4 sm:$0xff]   ;;  %v4360_v45 = vld [vmem:[%s6078_s1 + $0x5a8] ss:$20 sps:$4 sm:$0xff]  }
  0x5f   :  { %2474 = vmatpush1.bf16.msra.mxu0 %v4278_v46  ;;  %2679 = vmatpush1.bf16.msra.mxu1 %v4281_v47  ;;  %v4365_v46 = vld [vmem:[%s6078_s1 + $0x5cc] ss:$20 sps:$4 sm:$0xff]   ;;  %v4368_v47 = vld [vmem:[%s6078_s1 + $0x5d4] ss:$20 sps:$4 sm:$0xff]  }
  0x60   :  { %2475 = vmatprep.subr.bf16.mxu0 %v4286_v48  ;;  %2680 = vmatprep.subr.bf16.mxu1 %v4289_v50  ;;  %v4363_v48 = vld [vmem:[%s6078_s1 + $0x5c8] ss:$20 sps:$4 sm:$0xff]   ;;  %v4366_v50 = vld [vmem:[%s6078_s1 + $0x5d0] ss:$20 sps:$4 sm:$0xff]  }
  0x63   :  { %2476 = vmatpush1.bf16.msra.mxu0 %v4284_v51  ;;  %2681 = vmatpush1.bf16.msra.mxu1 %v4287_v52  ;;  %v4371_v51 = vld [vmem:[%s6078_s1 + $0x5f4] ss:$20 sps:$4 sm:$0xff]   ;;  %v4374_v52 = vld [vmem:[%s6078_s1 + $0x5fc] ss:$20 sps:$4 sm:$0xff]  }
  0x64   :  { %2477 = vmatprep.subr.bf16.mxu0 %v4292_v53  ;;  %2682 = vmatprep.subr.bf16.mxu1 %v4295_v54  ;;  %v4369_v53 = vld [vmem:[%s6078_s1 + $0x5f0] ss:$20 sps:$4 sm:$0xff]   ;;  %v4372_v54 = vld [vmem:[%s6078_s1 + $0x5f8] ss:$20 sps:$4 sm:$0xff]  }
  0x67   :  { %2478 = vmatpush1.bf16.msra.mxu0 %v4290_v55  ;;  %2683 = vmatpush1.bf16.msra.mxu1 %v4293_v56  ;;  %v4377_v55 = vld [vmem:[%s6078_s1 + $0x61c] ss:$20 sps:$4 sm:$0xff]   ;;  %v4380_v56 = vld [vmem:[%s6078_s1 + $0x624] ss:$20 sps:$4 sm:$0xff]  }
  0x68   :  { %2479 = vmatprep.subr.bf16.mxu0 %v4298_v57  ;;  %2684 = vmatprep.subr.bf16.mxu1 %v4301_v58  ;;  %v4375_v57 = vld [vmem:[%s6078_s1 + $0x618] ss:$20 sps:$4 sm:$0xff]   ;;  %v4378_v58 = vld [vmem:[%s6078_s1 + $0x620] ss:$20 sps:$4 sm:$0xff]  }
  0x6b   :  { %2480 = vmatpush1.bf16.msra.mxu0 %v4296_v59  ;;  %2685 = vmatpush1.bf16.msra.mxu1 %v4299_v61  ;;  %v4383_v59 = vld [vmem:[%s6078_s1 + $0x644] ss:$20 sps:$4 sm:$0xff]   ;;  %v4386_v61 = vld [vmem:[%s6078_s1 + $0x64c] ss:$20 sps:$4 sm:$0xff]  }
  0x6c   :  { %2481 = vmatprep.subr.bf16.mxu0 %v4304_v62  ;;  %2686 = vmatprep.subr.bf16.mxu1 %v4307_v63  ;;  %v4381_v62 = vld [vmem:[%s6078_s1 + $0x640] ss:$20 sps:$4 sm:$0xff]   ;;  %v4384_v63 = vld [vmem:[%s6078_s1 + $0x648] ss:$20 sps:$4 sm:$0xff]  }
  0x6f   :  { %2482 = vmatpush1.bf16.msra.mxu0 %v4302_v0  ;;  %2687 = vmatpush1.bf16.msra.mxu1 %v4305_v1  ;;  %v4389_v0 = vld [vmem:[%s6078_s1 + $0x66c] ss:$20 sps:$4 sm:$0xff]   ;;  %v4392_v1 = vld [vmem:[%s6078_s1 + $0x674] ss:$20 sps:$4 sm:$0xff]  }
  0x70   :  { %2483 = vmatprep.subr.bf16.mxu0 %v4310_v2  ;;  %2688 = vmatprep.subr.bf16.mxu1 %v4313_v3  ;;  %v4387_v2 = vld [vmem:[%s6078_s1 + $0x668] ss:$20 sps:$4 sm:$0xff]   ;;  %v4390_v3 = vld [vmem:[%s6078_s1 + $0x670] ss:$20 sps:$4 sm:$0xff]  }
  0x73   :  { %2484 = vmatpush1.bf16.msra.mxu0 %v4308_v4  ;;  %2689 = vmatpush1.bf16.msra.mxu1 %v4311_v5  ;;  %v4395_v4 = vld [vmem:[%s6078_s1 + $0x694] ss:$20 sps:$4 sm:$0xff]   ;;  %v4398_v5 = vld [vmem:[%s6078_s1 + $0x69c] ss:$20 sps:$4 sm:$0xff]  }
  0x74   :  { %2485 = vmatprep.subr.bf16.mxu0 %v4316_v6  ;;  %2690 = vmatprep.subr.bf16.mxu1 %v4319_v7  ;;  %v4393_v6 = vld [vmem:[%s6078_s1 + $0x690] ss:$20 sps:$4 sm:$0xff]   ;;  %v4396_v7 = vld [vmem:[%s6078_s1 + $0x698] ss:$20 sps:$4 sm:$0xff]  }
  0x77   :  { %2486 = vmatpush1.bf16.msra.mxu0 %v4314_v8  ;;  %2691 = vmatpush1.bf16.msra.mxu1 %v4317_v10  ;;  %v4401_v8 = vld [vmem:[%s6078_s1 + $0x6bc] ss:$20 sps:$4 sm:$0xff]   ;;  %v4404_v10 = vld [vmem:[%s6078_s1 + $0x6c4] ss:$20 sps:$4 sm:$0xff]  }
  0x78   :  { %2487 = vmatprep.subr.bf16.mxu0 %v4322_v11  ;;  %2692 = vmatprep.subr.bf16.mxu1 %v4325_v12  ;;  %v4399_v11 = vld [vmem:[%s6078_s1 + $0x6b8] ss:$20 sps:$4 sm:$0xff]   ;;  %v4402_v12 = vld [vmem:[%s6078_s1 + $0x6c0] ss:$20 sps:$4 sm:$0xff]  }
  0x7b   :  { %2488 = vmatpush1.bf16.msra.mxu0 %v4320_v13  ;;  %2693 = vmatpush1.bf16.msra.mxu1 %v4323_v14  ;;  %v4407_v13 = vld [vmem:[%s6078_s1 + $0x6e4] ss:$20 sps:$4 sm:$0xff]   ;;  %v4410_v14 = vld [vmem:[%s6078_s1 + $0x6ec] ss:$20 sps:$4 sm:$0xff]  }
  0x7c   :  { %2489 = vmatprep.subr.bf16.mxu0 %v4328_v15  ;;  %2694 = vmatprep.subr.bf16.mxu1 %v4331_v17  ;;  %v4405_v15 = vld [vmem:[%s6078_s1 + $0x6e0] ss:$20 sps:$4 sm:$0xff]   ;;  %v4408_v17 = vld [vmem:[%s6078_s1 + $0x6e8] ss:$20 sps:$4 sm:$0xff]  }
  0x7f   :  { %2490 = vmatpush1.bf16.msra.mxu0 %v4326_v18  ;;  %2695 = vmatpush1.bf16.msra.mxu1 %v4329_v19  ;;  %v4413_v18 = vld [vmem:[%s6078_s1 + $0x70c] ss:$20 sps:$4 sm:$0xff]   ;;  %v4416_v19 = vld [vmem:[%s6078_s1 + $0x714] ss:$20 sps:$4 sm:$0xff]  }
  0x80   :  { %2500 = vmatprep.subr.bf16.mxu0 %v4335_v21  ;;  %2705 = vmatprep.subr.bf16.mxu1 %v4338_v22  ;;  %v4411_v21 = vld [vmem:[%s6078_s1 + $0x708] ss:$20 sps:$4 sm:$0xff]   ;;  %v4414_v22 = vld [vmem:[%s6078_s1 + $0x710] ss:$20 sps:$4 sm:$0xff]  }
  0x82   :  { %2492 = vmatmul.mubr.bf16.vlgmr.msra.gmra.mrb[0].mxu0 %v5166_v24  ;;  %2697 = vmatmul.mubr.bf16.vlgmr.msra.gmra.mrb[0].mxu1 %v5166_v24 }
  0x83   :  { %2501 = vmatpush1.bf16.msra.mxu0 %v4333_v23  ;;  %2706 = vmatpush1.bf16.msra.mxu1 %v4336_v25  ;;  %v4419_v23 = vld [vmem:[%s6078_s1 + $0x734] ss:$20 sps:$4 sm:$0xff]   ;;  %v4422_v25 = vld [vmem:[%s6078_s1 + $0x73c] ss:$20 sps:$4 sm:$0xff]  }
  0x84   :  { %2502 = vmatprep.subr.bf16.mxu0 %v4341_v27  ;;  %2707 = vmatprep.subr.bf16.mxu1 %v4344_v9  ;;  %v45_v27 = vcombine.high %v5174_v26, %v5174_v26  ;;  %v4417_v9 = vld [vmem:[%s6078_s1 + $0x730] ss:$20 sps:$4 sm:$0xff]  }
  0x85   :  { %2532 = vmatprep.mubr.bf16.mxu0 %v5202_v34  ;;  %2737 = vmatprep.mubr.bf16.mxu1 %v5202_v34  ;;  %v4428_v26 = vld [vmem:[%s6078_s1 + $0x764] ss:$20 sps:$4 sm:$0xff]  }
  0x87   :  { %2503 = vmatpush1.bf16.msra.mxu0 %v4339_v30  ;;  %2708 = vmatpush1.bf16.msra.mxu1 %v4342_v31  ;;  %v4425_v30 = vld [vmem:[%s6078_s1 + $0x75c] ss:$20 sps:$4 sm:$0xff]   ;;  %v5365_v31 = vrot.slane %v45_v27, %v4880_v49  ;;  %v4434_v49 = vld [vmem:[%s6078_s1 + $0x78c] ss:$20 sps:$4 sm:$0xff]  }
  0x88   :  { %2504 = vmatprep.subr.bf16.mxu0 %v4347_v32  ;;  %2709 = vmatprep.subr.bf16.mxu1 %v4350_v33  ;;  %v4423_v32 = vld [vmem:[%s6078_s1 + $0x758] ss:$20 sps:$4 sm:$0xff]   ;;  %v4426_v33 = vld [vmem:[%s6078_s1 + $0x760] ss:$20 sps:$4 sm:$0xff]  }
  0x89   :  { %v4498_v27 = vld [vmem:[%s6078_s1 + $0x940] ss:$20 sps:$4 sm:$0xff]  }
  0x8b   :  { %2505 = vmatpush1.bf16.msra.mxu0 %v4345_v35  ;;  %2710 = vmatpush1.bf16.msra.mxu1 %v4348_v36  ;;  %v4431_v35 = vld [vmem:[%s6078_s1 + $0x784] ss:$20 sps:$4 sm:$0xff]   ;;  %v61_v36 = vcombine.high %v5365_v31, %v5365_v31 }
  0x8c   :  { %2506 = vmatprep.subr.bf16.mxu0 %v4353_v37  ;;  %2711 = vmatprep.subr.bf16.mxu1 %v4356_v38  ;;  %v5383_v37 = vpack.c.bf16 %v5184_v28, %v5184_v28  ;;  %v4429_v38 = vld [vmem:[%s6078_s1 + $0x780] ss:$20 sps:$4 sm:$0xff]  }
  0x8d   :  { %v4440_v28 = vld [vmem:[%s6078_s1 + $0x7b4] ss:$20 sps:$4 sm:$0xff]  }
  0x8f   :  { %2507 = vmatpush1.bf16.msra.mxu0 %v4351_v39  ;;  %2712 = vmatpush1.bf16.msra.mxu1 %v4354_v40  ;;  %v4432_v39 = vld [vmem:[%s6078_s1 + $0x788] ss:$20 sps:$4 sm:$0xff]   ;;  %v4437_v40 = vld [vmem:[%s6078_s1 + $0x7ac] ss:$20 sps:$4 sm:$0xff]  }
  0x90   :  { %2508 = vmatprep.subr.bf16.mxu0 %v4359_v41  ;;  %2713 = vmatprep.subr.bf16.mxu1 %v4362_v42  ;;  %v4435_v41 = vld [vmem:[%s6078_s1 + $0x7a8] ss:$20 sps:$4 sm:$0xff]   ;;  %v5400_v42 = vpack.c.bf16 %v61_v36, %v61_v36 }
  0x91   :  { %v4515_v36 = vld [vmem:[%s6078_s1 + $0x9b4] ss:$20 sps:$4 sm:$0xff]  }
  0x93   :  { %2509 = vmatpush1.bf16.msra.mxu0 %v4357_v44  ;;  %2714 = vmatpush1.bf16.msra.mxu1 %v4360_v45  ;;  %v4438_v44 = vld [vmem:[%s6078_s1 + $0x7b0] ss:$20 sps:$4 sm:$0xff]   ;;  %v4443_v45 = vld [vmem:[%s6078_s1 + $0x7d4] ss:$20 sps:$4 sm:$0xff]  }
  0x94   :  { %2510 = vmatprep.subr.bf16.mxu0 %v4365_v46  ;;  %2715 = vmatprep.subr.bf16.mxu1 %v4368_v47  ;;  %v4446_v46 = vld [vmem:[%s6078_s1 + $0x7dc] ss:$20 sps:$4 sm:$0xff]  }
  0x95   :  { %v4441_v47 = vld [vmem:[%s6078_s1 + $0x7d0] ss:$20 sps:$4 sm:$0xff]  }
  0x97   :  { %2511 = vmatpush1.bf16.msra.mxu0 %v4363_v48  ;;  %2716 = vmatpush1.bf16.msra.mxu1 %v4366_v50  ;;  %v4444_v48 = vld [vmem:[%s6078_s1 + $0x7d8] ss:$20 sps:$4 sm:$0xff]   ;;  %v4449_v50 = vld [vmem:[%s6078_s1 + $0x7fc] ss:$20 sps:$4 sm:$0xff]  }
  0x98   :  { %2512 = vmatprep.subr.bf16.mxu0 %v4371_v51  ;;  %2717 = vmatprep.subr.bf16.mxu1 %v4374_v52  ;;  %v4452_v51 = vld [vmem:[%s6078_s1 + $0x804] ss:$20 sps:$4 sm:$0xff]  }
  0x99   :  { %v4447_v52 = vld [vmem:[%s6078_s1 + $0x7f8] ss:$20 sps:$4 sm:$0xff]  }
  0x9b   :  { %2513 = vmatpush1.bf16.msra.mxu0 %v4369_v53  ;;  %2718 = vmatpush1.bf16.msra.mxu1 %v4372_v54  ;;  %v4450_v53 = vld [vmem:[%s6078_s1 + $0x800] ss:$20 sps:$4 sm:$0xff]   ;;  %v4455_v54 = vld [vmem:[%s6078_s1 + $0x824] ss:$20 sps:$4 sm:$0xff]  }
  0x9c   :  { %2514 = vmatprep.subr.bf16.mxu0 %v4377_v55  ;;  %2719 = vmatprep.subr.bf16.mxu1 %v4380_v56  ;;  %v4458_v55 = vld [vmem:[%s6078_s1 + $0x82c] ss:$20 sps:$4 sm:$0xff]  }
  0x9d   :  { %v4453_v56 = vld [vmem:[%s6078_s1 + $0x820] ss:$20 sps:$4 sm:$0xff]  }
  0x9f   :  { %2515 = vmatpush1.bf16.msra.mxu0 %v4375_v57  ;;  %2720 = vmatpush1.bf16.msra.mxu1 %v4378_v58  ;;  %v4456_v57 = vld [vmem:[%s6078_s1 + $0x828] ss:$20 sps:$4 sm:$0xff]   ;;  %v4461_v58 = vld [vmem:[%s6078_s1 + $0x84c] ss:$20 sps:$4 sm:$0xff]  }
  0xa0   :  { %2516 = vmatprep.subr.bf16.mxu0 %v4383_v59  ;;  %2721 = vmatprep.subr.bf16.mxu1 %v4386_v61  ;;  %v4464_v59 = vld [vmem:[%s6078_s1 + $0x854] ss:$20 sps:$4 sm:$0xff]  }
  0xa1   :  { %v4459_v61 = vld [vmem:[%s6078_s1 + $0x848] ss:$20 sps:$4 sm:$0xff]  }
  0xa3   :  { %2517 = vmatpush1.bf16.msra.mxu0 %v4381_v62  ;;  %2722 = vmatpush1.bf16.msra.mxu1 %v4384_v63  ;;  %v4462_v62 = vld [vmem:[%s6078_s1 + $0x850] ss:$20 sps:$4 sm:$0xff]   ;;  %v4467_v63 = vld [vmem:[%s6078_s1 + $0x874] ss:$20 sps:$4 sm:$0xff]  }
  0xa4   :  { %2518 = vmatprep.subr.bf16.mxu0 %v4389_v0  ;;  %2723 = vmatprep.subr.bf16.mxu1 %v4392_v1  ;;  %v4470_v0 = vld [vmem:[%s6078_s1 + $0x87c] ss:$20 sps:$4 sm:$0xff]  }
  0xa5   :  { %v4465_v1 = vld [vmem:[%s6078_s1 + $0x870] ss:$20 sps:$4 sm:$0xff]  }
  0xa7   :  { %2519 = vmatpush1.bf16.msra.mxu0 %v4387_v2  ;;  %2724 = vmatpush1.bf16.msra.mxu1 %v4390_v3  ;;  %v4468_v2 = vld [vmem:[%s6078_s1 + $0x878] ss:$20 sps:$4 sm:$0xff]   ;;  %v4473_v3 = vld [vmem:[%s6078_s1 + $0x89c] ss:$20 sps:$4 sm:$0xff]  }
  0xa8   :  { %2520 = vmatprep.subr.bf16.mxu0 %v4395_v4  ;;  %2725 = vmatprep.subr.bf16.mxu1 %v4398_v5  ;;  %v4476_v4 = vld [vmem:[%s6078_s1 + $0x8a4] ss:$20 sps:$4 sm:$0xff]  }
  0xa9   :  { %v4471_v5 = vld [vmem:[%s6078_s1 + $0x898] ss:$20 sps:$4 sm:$0xff]  }
  0xab   :  { %2521 = vmatpush1.bf16.msra.mxu0 %v4393_v6  ;;  %2726 = vmatpush1.bf16.msra.mxu1 %v4396_v7  ;;  %v4474_v6 = vld [vmem:[%s6078_s1 + $0x8a0] ss:$20 sps:$4 sm:$0xff]   ;;  %v4479_v7 = vld [vmem:[%s6078_s1 + $0x8c4] ss:$20 sps:$4 sm:$0xff]  }
  0xac   :  { %2522 = vmatprep.subr.bf16.mxu0 %v4401_v8  ;;  %2727 = vmatprep.subr.bf16.mxu1 %v4404_v10  ;;  %v4482_v8 = vld [vmem:[%s6078_s1 + $0x8cc] ss:$20 sps:$4 sm:$0xff]  }
  0xad   :  { %v4477_v10 = vld [vmem:[%s6078_s1 + $0x8c0] ss:$20 sps:$4 sm:$0xff]  }
  0xaf   :  { %2523 = vmatpush1.bf16.msra.mxu0 %v4399_v11  ;;  %2728 = vmatpush1.bf16.msra.mxu1 %v4402_v12  ;;  %v4480_v11 = vld [vmem:[%s6078_s1 + $0x8c8] ss:$20 sps:$4 sm:$0xff]   ;;  %v4485_v12 = vld [vmem:[%s6078_s1 + $0x8ec] ss:$20 sps:$4 sm:$0xff]  }
  0xb0   :  { %2524 = vmatprep.subr.bf16.mxu0 %v4407_v13  ;;  %2729 = vmatprep.subr.bf16.mxu1 %v4410_v14  ;;  %v4488_v13 = vld [vmem:[%s6078_s1 + $0x8f4] ss:$20 sps:$4 sm:$0xff]  }
  0xb1   :  { %v4483_v14 = vld [vmem:[%s6078_s1 + $0x8e8] ss:$20 sps:$4 sm:$0xff]  }
  0xb3   :  { %2525 = vmatpush1.bf16.msra.mxu0 %v4405_v15  ;;  %2730 = vmatpush1.bf16.msra.mxu1 %v4408_v17  ;;  %v4486_v15 = vld [vmem:[%s6078_s1 + $0x8f0] ss:$20 sps:$4 sm:$0xff]   ;;  %v4491_v17 = vld [vmem:[%s6078_s1 + $0x914] ss:$20 sps:$4 sm:$0xff]  }
  0xb4   :  { %2526 = vmatprep.subr.bf16.mxu0 %v4413_v18  ;;  %2731 = vmatprep.subr.bf16.mxu1 %v4416_v19  ;;  %v4494_v18 = vld [vmem:[%s6078_s1 + $0x91c] ss:$20 sps:$4 sm:$0xff]  }
  0xb5   :  { %v4489_v19 = vld [vmem:[%s6078_s1 + $0x910] ss:$20 sps:$4 sm:$0xff]  }
  0xb7   :  { %2527 = vmatpush1.bf16.msra.mxu0 %v4411_v21  ;;  %2732 = vmatpush1.bf16.msra.mxu1 %v4414_v22  ;;  %v4492_v21 = vld [vmem:[%s6078_s1 + $0x918] ss:$20 sps:$4 sm:$0xff]   ;;  %v4497_v22 = vld [vmem:[%s6078_s1 + $0x93c] ss:$20 sps:$4 sm:$0xff]  }
  0xb8   :  { %2528 = vmatprep.subr.bf16.mxu0 %v4419_v23  ;;  %2733 = vmatprep.subr.bf16.mxu1 %v4422_v25  ;;  %v4500_v23 = vld [vmem:[%s6078_s1 + $0x944] ss:$20 sps:$4 sm:$0xff]  }
  0xb9   :  { %v4495_v25 = vld [vmem:[%s6078_s1 + $0x938] ss:$20 sps:$4 sm:$0xff]  }
  0xbb   :  { %2529 = vmatpush1.bf16.msra.mxu0 %v4417_v9  ;;  %2734 = vmatpush1.bf16.msra.mxu1 %v4420_v29  ;;  %v4503_v9 = vld [vmem:[%s6078_s1 + $0x964] ss:$20 sps:$4 sm:$0xff]   ;;  %v4506_v29 = vld [vmem:[%s6078_s1 + $0x96c] ss:$20 sps:$4 sm:$0xff]  }
  0xbc   :  { %2530 = vmatprep.subr.bf16.mxu0 %v4425_v30  ;;  %2735 = vmatprep.subr.bf16.mxu1 %v4428_v26  ;;  %v4501_v30 = vld [vmem:[%s6078_s1 + $0x960] ss:$20 sps:$4 sm:$0xff]   ;;  %v4504_v26 = vld [vmem:[%s6078_s1 + $0x968] ss:$20 sps:$4 sm:$0xff]  }
  0xbf   :  { %2531 = vmatpush1.bf16.msra.mxu0 %v4423_v32  ;;  %2736 = vmatpush1.bf16.msra.mxu1 %v4426_v33  ;;  %v4509_v32 = vld [vmem:[%s6078_s1 + $0x98c] ss:$20 sps:$4 sm:$0xff]   ;;  %v4512_v33 = vld [vmem:[%s6078_s1 + $0x994] ss:$20 sps:$4 sm:$0xff]  }
  0xc0   :  { %2541 = vmatprep.subr.bf16.mxu0 %v4431_v35  ;;  %2746 = vmatprep.subr.bf16.mxu1 %v4434_v49  ;;  %v4507_v35 = vld [vmem:[%s6078_s1 + $0x988] ss:$20 sps:$4 sm:$0xff]   ;;  %v4510_v49 = vld [vmem:[%s6078_s1 + $0x990] ss:$20 sps:$4 sm:$0xff]  }
  0xc2   :  { %2533 = vmatmul.mubr.bf16.vlgmr.msra.gmra.mrb[0].mxu0 %v5383_v37  ;;  %2738 = vmatmul.mubr.bf16.vlgmr.msra.gmra.mrb[0].mxu1 %v5383_v37 }
  0xc3   :  { %2542 = vmatpush1.bf16.msra.mxu0 %v4429_v38  ;;  %2747 = vmatpush1.bf16.msra.mxu1 %v4432_v39  ;;  %v4518_v38 = vld [vmem:[%s6078_s1 + $0x9bc] ss:$20 sps:$4 sm:$0xff]  }
  0xc4   :  { %2543 = vmatprep.subr.bf16.mxu0 %v4437_v40  ;;  %2748 = vmatprep.subr.bf16.mxu1 %v4440_v28  ;;  %v4513_v39 = vld [vmem:[%s6078_s1 + $0x9b0] ss:$20 sps:$4 sm:$0xff]   ;;  %v4516_v40 = vld [vmem:[%s6078_s1 + $0x9b8] ss:$20 sps:$4 sm:$0xff]  }
  0xc5   :  { %2573 = vmatprep.mubr.bf16.mxu0 %v5400_v42  ;;  %2778 = vmatprep.mubr.bf16.mxu1 %v5400_v42  ;;  %v4521_v28 = vld [vmem:[%s6078_s1 + $0x9dc] ss:$20 sps:$4 sm:$0xff]  }
  0xc7   :  { %2544 = vmatpush1.bf16.msra.mxu0 %v4435_v41  ;;  %2749 = vmatpush1.bf16.msra.mxu1 %v4438_v44  ;;  %v4524_v41 = vld [vmem:[%s6078_s1 + $0x9e4] ss:$20 sps:$4 sm:$0xff]  }
  0xc8   :  { %2545 = vmatprep.subr.bf16.mxu0 %v4443_v45  ;;  %2750 = vmatprep.subr.bf16.mxu1 %v4446_v46  ;;  %v4519_v44 = vld [vmem:[%s6078_s1 + $0x9d8] ss:$20 sps:$4 sm:$0xff]   ;;  %v4522_v45 = vld [vmem:[%s6078_s1 + $0x9e0] ss:$20 sps:$4 sm:$0xff]  }
  0xc9   :  { %v4528_v46 = vld [vmem:[%s6078_s1 + $0xa04] ss:$20 sps:$4 sm:$0xff]  }
  0xcb   :  { %2546 = vmatpush1.bf16.msra.mxu0 %v4441_v47  ;;  %2751 = vmatpush1.bf16.msra.mxu1 %v4444_v48  ;;  %v4531_v47 = vld [vmem:[%s6078_s1 + $0xa0c] ss:$20 sps:$4 sm:$0xff]  }
  0xcc   :  { %2547 = vmatprep.subr.bf16.mxu0 %v4449_v50  ;;  %2752 = vmatprep.subr.bf16.mxu1 %v4452_v51  ;;  %v4526_v48 = vld [vmem:[%s6078_s1 + $0xa00] ss:$20 sps:$4 sm:$0xff]   ;;  %v4529_v50 = vld [vmem:[%s6078_s1 + $0xa08] ss:$20 sps:$4 sm:$0xff]   ;;  %v5591_v51 = vpack.c.bf16 %v5365_v31, %v5365_v31  ;;  %v4535_v31 = vld [vmem:[%s6078_s1 + $0xa30] ss:$20 sps:$4 sm:$0xff]  }
  0xcf   :  { %2548 = vmatpush1.bf16.msra.mxu0 %v4447_v52  ;;  %2753 = vmatpush1.bf16.msra.mxu1 %v4450_v53  ;;  %v4534_v52 = vld [vmem:[%s6078_s1 + $0xa2c] ss:$20 sps:$4 sm:$0xff]   ;;  %v4537_v53 = vld [vmem:[%s6078_s1 + $0xa34] ss:$20 sps:$4 sm:$0xff]  }
  0xd0   :  { %2549 = vmatprep.subr.bf16.mxu0 %v4455_v54  ;;  %2754 = vmatprep.subr.bf16.mxu1 %v4458_v55  ;;  %v4532_v54 = vld [vmem:[%s6078_s1 + $0xa28] ss:$20 sps:$4 sm:$0xff]  }
  0xd1   :  { %v4540_v55 = vld [vmem:[%s6078_s1 + $0xa54] ss:$20 sps:$4 sm:$0xff]  }
  0xd3   :  { %2550 = vmatpush1.bf16.msra.mxu0 %v4453_v56  ;;  %2755 = vmatpush1.bf16.msra.mxu1 %v4456_v57  ;;  %v4543_v56 = vld [vmem:[%s6078_s1 + $0xa5c] ss:$20 sps:$4 sm:$0xff]  }
  0xd4   :  { %2551 = vmatprep.subr.bf16.mxu0 %v4461_v58  ;;  %2756 = vmatprep.subr.bf16.mxu1 %v4464_v59  ;;  %v4538_v57 = vld [vmem:[%s6078_s1 + $0xa50] ss:$20 sps:$4 sm:$0xff]   ;;  %v4711_v58 = vmov 0   ;;  %v4541_v59 = vld [vmem:[%s6078_s1 + $0xa58] ss:$20 sps:$4 sm:$0xff]  }
  0xd7   :  { %2552 = vmatpush1.bf16.msra.mxu0 %v4459_v61  ;;  %2757 = vmatpush1.bf16.msra.mxu1 %v4462_v62  ;;  %v4546_v61 = vld [vmem:[%s6078_s1 + $0xa7c] ss:$20 sps:$4 sm:$0xff]   ;;  %v4549_v62 = vld [vmem:[%s6078_s1 + $0xa84] ss:$20 sps:$4 sm:$0xff]  }
  0xd8   :  { %2553 = vmatprep.subr.bf16.mxu0 %v4467_v63  ;;  %2758 = vmatprep.subr.bf16.mxu1 %v4470_v0  ;;  %v4544_v63 = vld [vmem:[%s6078_s1 + $0xa78] ss:$20 sps:$4 sm:$0xff]   ;;  %v4547_v0 = vld [vmem:[%s6078_s1 + $0xa80] ss:$20 sps:$4 sm:$0xff]  }
  0xdb   :  { %2554 = vmatpush1.bf16.msra.mxu0 %v4465_v1  ;;  %2759 = vmatpush1.bf16.msra.mxu1 %v4468_v2  ;;  %v4552_v1 = vld [vmem:[%s6078_s1 + $0xaa4] ss:$20 sps:$4 sm:$0xff]   ;;  %v4555_v2 = vld [vmem:[%s6078_s1 + $0xaac] ss:$20 sps:$4 sm:$0xff]  }
  0xdc   :  { %2555 = vmatprep.subr.bf16.mxu0 %v4473_v3  ;;  %2760 = vmatprep.subr.bf16.mxu1 %v4476_v4  ;;  %v4550_v3 = vld [vmem:[%s6078_s1 + $0xaa0] ss:$20 sps:$4 sm:$0xff]   ;;  %v4553_v4 = vld [vmem:[%s6078_s1 + $0xaa8] ss:$20 sps:$4 sm:$0xff]  }
  0xdf   :  { %2556 = vmatpush1.bf16.msra.mxu0 %v4471_v5  ;;  %2761 = vmatpush1.bf16.msra.mxu1 %v4474_v6  ;;  %v4558_v5 = vld [vmem:[%s6078_s1 + $0xacc] ss:$20 sps:$4 sm:$0xff]   ;;  %v4561_v6 = vld [vmem:[%s6078_s1 + $0xad4] ss:$20 sps:$4 sm:$0xff]  }
  0xe0   :  { %2557 = vmatprep.subr.bf16.mxu0 %v4479_v7  ;;  %2762 = vmatprep.subr.bf16.mxu1 %v4482_v8  ;;  %v4556_v7 = vld [vmem:[%s6078_s1 + $0xac8] ss:$20 sps:$4 sm:$0xff]   ;;  %v4559_v8 = vld [vmem:[%s6078_s1 + $0xad0] ss:$20 sps:$4 sm:$0xff]  }
  0xe3   :  { %2558 = vmatpush1.bf16.msra.mxu0 %v4477_v10  ;;  %2763 = vmatpush1.bf16.msra.mxu1 %v4480_v11  ;;  %v4564_v10 = vld [vmem:[%s6078_s1 + $0xaf4] ss:$20 sps:$4 sm:$0xff]   ;;  %v4567_v11 = vld [vmem:[%s6078_s1 + $0xafc] ss:$20 sps:$4 sm:$0xff]  }
  0xe4   :  { %2559 = vmatprep.subr.bf16.mxu0 %v4485_v12  ;;  %2764 = vmatprep.subr.bf16.mxu1 %v4488_v13  ;;  %v4562_v12 = vld [vmem:[%s6078_s1 + $0xaf0] ss:$20 sps:$4 sm:$0xff]   ;;  %v4565_v13 = vld [vmem:[%s6078_s1 + $0xaf8] ss:$20 sps:$4 sm:$0xff]  }
  0xe7   :  { %2560 = vmatpush1.bf16.msra.mxu0 %v4483_v14  ;;  %2765 = vmatpush1.bf16.msra.mxu1 %v4486_v15  ;;  %v4570_v14 = vld [vmem:[%s6078_s1 + $0xb1c] ss:$20 sps:$4 sm:$0xff]   ;;  %v4573_v15 = vld [vmem:[%s6078_s1 + $0xb24] ss:$20 sps:$4 sm:$0xff]  }
  0xe8   :  { %2561 = vmatprep.subr.bf16.mxu0 %v4491_v17  ;;  %2766 = vmatprep.subr.bf16.mxu1 %v4494_v18  ;;  %v4568_v17 = vld [vmem:[%s6078_s1 + $0xb18] ss:$20 sps:$4 sm:$0xff]   ;;  %v3506_v18 = vld.sshfl [vmem:[%s6077_s0 + $0x10] sm:$0x3 pattern:$0x76325410] }
  0xeb   :  { %2562 = vmatpush1.bf16.msra.mxu0 %v4489_v19  ;;  %2767 = vmatpush1.bf16.msra.mxu1 %v4492_v21  ;;  %v4571_v19 = vld [vmem:[%s6078_s1 + $0xb20] ss:$20 sps:$4 sm:$0xff]   ;;  %v4575_v21 = vld [vmem:[%s6078_s1 + $0x150] ss:$20 sps:$4 sm:$0xff]  }
  0xec   :  { %2563 = vmatprep.subr.bf16.mxu0 %v4497_v22  ;;  %2768 = vmatprep.subr.bf16.mxu1 %v4500_v23  ;;  %v4577_v22 = vld [vmem:[%s6078_s1 + $0x3d0] ss:$20 sps:$4 sm:$0xff]  }
  0xed   :  { %v4576_v23 = vld [vmem:[%s6078_s1 + $0x10] ss:$20 sps:$4 sm:$0xff]  }
  0xef   :  { %2564 = vmatpush1.bf16.msra.mxu0 %v4495_v25  ;;  %2769 = vmatpush1.bf16.msra.mxu1 %v4498_v27  ;;  %v5693_v25 = vpack.c.bf16 %v3506_v18, %v3506_v18  ;;  %v4578_v27 = vld [vmem:[%s6078_s1 + $0x290] ss:$20 sps:$4 sm:$0xff]  }
  0xf0   :  { %2565 = vmatprep.subr.bf16.mxu0 %v4503_v9  ;;  %2770 = vmatprep.subr.bf16.mxu1 %v4506_v29  ;;  %v4579_v9 = vld [vmem:[%s6078_s1 + $0x178] ss:$20 sps:$4 sm:$0xff]  }
  0xf1   :  { %v4581_v29 = vld [vmem:[%s6078_s1 + $0x3f8] ss:$20 sps:$4 sm:$0xff]  }
  0xf3   :  { %2566 = vmatpush1.bf16.msra.mxu0 %v4501_v30  ;;  %2771 = vmatpush1.bf16.msra.mxu1 %v4504_v26  ;;  %v4580_v30 = vld [vmem:[%s6078_s1 + $0x38] ss:$20 sps:$4 sm:$0xff]  }
  0xf4   :  { %2567 = vmatprep.subr.bf16.mxu0 %v4509_v32  ;;  %2772 = vmatprep.subr.bf16.mxu1 %v4512_v33  ;;  %v4582_v26 = vld [vmem:[%s6078_s1 + $0x2b8] ss:$20 sps:$4 sm:$0xff]   ;;  %v4583_v32 = vld [vmem:[%s6078_s1 + $0x1a0] ss:$20 sps:$4 sm:$0xff]  }
  0xf5   :  { %v4585_v33 = vld [vmem:[%s6078_s1 + $0x420] ss:$20 sps:$4 sm:$0xff]  }
  0xf7   :  { %2568 = vmatpush1.bf16.msra.mxu0 %v4507_v35  ;;  %2773 = vmatpush1.bf16.msra.mxu1 %v4510_v49  ;;  %v4584_v35 = vld [vmem:[%s6078_s1 + $0x60] ss:$20 sps:$4 sm:$0xff]  }
  0xf8   :  { %2569 = vmatprep.subr.bf16.mxu0 %v4515_v36  ;;  %2774 = vmatprep.subr.bf16.mxu1 %v4518_v38  ;;  %v4586_v49 = vld [vmem:[%s6078_s1 + $0x2e0] ss:$20 sps:$4 sm:$0xff]   ;;  %v4587_v36 = vld [vmem:[%s6078_s1 + $0x1c8] ss:$20 sps:$4 sm:$0xff]  }
  0xf9   :  { %v4589_v38 = vld [vmem:[%s6078_s1 + $0x448] ss:$20 sps:$4 sm:$0xff]  }
  0xfb   :  { %2570 = vmatpush1.bf16.msra.mxu0 %v4513_v39  ;;  %2775 = vmatpush1.bf16.msra.mxu1 %v4516_v40  ;;  %v4588_v39 = vld [vmem:[%s6078_s1 + $0x88] ss:$20 sps:$4 sm:$0xff]   ;;  %v4593_v40 = vld [vmem:[%s6078_s1 + $0x470] ss:$20 sps:$4 sm:$0xff]  }
  0xfc   :  { %2571 = vmatprep.subr.bf16.mxu0 %v4521_v28  ;;  %2776 = vmatprep.subr.bf16.mxu1 %v4524_v41 }
  0xff   :  { %2572 = vmatpush1.bf16.msra.mxu0 %v4519_v44  ;;  %2777 = vmatpush1.bf16.msra.mxu1 %v4522_v45 }
 0x100   :  { %2582 = vmatprep.subr.bf16.mxu0 %v4528_v46  ;;  %2787 = vmatprep.subr.bf16.mxu1 %v4531_v47 }
 0x102   :  { %2574 = vmatmul.mubr.bf16.vlgmr.msra.gmra.mrb[0].mxu0 %v5591_v51  ;;  %2779 = vmatmul.mubr.bf16.vlgmr.msra.gmra.mrb[0].mxu1 %v5591_v51 }
 0x103   :  { %2583 = vmatpush1.bf16.msra.mxu0 %v4526_v48  ;;  %2788 = vmatpush1.bf16.msra.mxu1 %v4529_v50 }
 0x104   :  { %2584 = vmatprep.subr.bf16.mxu0 %v4534_v52  ;;  %2789 = vmatprep.subr.bf16.mxu1 %v4537_v53 }
 0x105   :  { %2614 = vmatprep.mubr.bf16.mxu0 %v4711_v58  ;;  %2819 = vmatprep.mubr.bf16.mxu1 %v4711_v58 }
 0x107   :  { %2585 = vmatpush1.bf16.msra.mxu0 %v4532_v54  ;;  %2790 = vmatpush1.bf16.msra.mxu1 %v4535_v31 }
 0x108   :  { %2586 = vmatprep.subr.bf16.mxu0 %v4540_v55  ;;  %2791 = vmatprep.subr.bf16.mxu1 %v4543_v56 }
 0x10b   :  { %2587 = vmatpush1.bf16.msra.mxu0 %v4538_v57  ;;  %2792 = vmatpush1.bf16.msra.mxu1 %v4541_v59 }
 0x10c   :  { %2588 = vmatprep.subr.bf16.mxu0 %v4546_v61  ;;  %2793 = vmatprep.subr.bf16.mxu1 %v4549_v62 }
 0x10f   :  { %2589 = vmatpush1.bf16.msra.mxu0 %v4544_v63  ;;  %2794 = vmatpush1.bf16.msra.mxu1 %v4547_v0 }
 0x110   :  { %2590 = vmatprep.subr.bf16.mxu0 %v4552_v1  ;;  %2795 = vmatprep.subr.bf16.mxu1 %v4555_v2 }
 0x113   :  { %2591 = vmatpush1.bf16.msra.mxu0 %v4550_v3  ;;  %2796 = vmatpush1.bf16.msra.mxu1 %v4553_v4 }
 0x114   :  { %2592 = vmatprep.subr.bf16.mxu0 %v4558_v5  ;;  %2797 = vmatprep.subr.bf16.mxu1 %v4561_v6 }
 0x117   :  { %2593 = vmatpush1.bf16.msra.mxu0 %v4556_v7  ;;  %2798 = vmatpush1.bf16.msra.mxu1 %v4559_v8 }
 0x118   :  { %2594 = vmatprep.subr.bf16.mxu0 %v4564_v10  ;;  %2799 = vmatprep.subr.bf16.mxu1 %v4567_v11 }
 0x11b   :  { %2595 = vmatpush1.bf16.msra.mxu0 %v4562_v12  ;;  %2800 = vmatpush1.bf16.msra.mxu1 %v4565_v13 }
 0x11c   :  { %2596 = vmatprep.subr.bf16.mxu0 %v4570_v14  ;;  %2801 = vmatprep.subr.bf16.mxu1 %v4573_v15 }
 0x11f   :  { %2597 = vmatpush1.bf16.msra.mxu0 %v4568_v17  ;;  %2802 = vmatpush1.bf16.msra.mxu1 %v4571_v19 }
 0x120   :  { %3909 = vmatprep.subr.bf16.mxu0 %v4575_v21  ;;  %3931 = vmatprep.subr.bf16.mxu1 %v4577_v22 }
 0x122   :  { %2615 = vmatmul.mubr.bf16.vlgmr.msra.gmra.mrb[0].mxu0 %v5693_v25  ;;  %2820 = vmatmul.mubr.bf16.vlgmr.msra.gmra.mrb[0].mxu1 %v5693_v25 }
 0x123   :  { %3910 = vmatpush3.bf16.msra.mxu0 %v4576_v23  ;;  %3932 = vmatpush3.bf16.msra.mxu1 %v4578_v27 }
 0x124   :  { %3911 = vmatprep.subr.bf16.mxu0 %v4579_v9  ;;  %3933 = vmatprep.subr.bf16.mxu1 %v4581_v29 }
 0x125   :  { %2860 = vmatprep.mubr.bf16.mxu0 %v4907_v60  ;;  %2900 = vmatprep.mubr.bf16.mxu1 %v4975_v20  ;;  %v4590_v60 = vld [vmem:[%s6078_s1 + $0x308] ss:$20 sps:$4 sm:$0xff]   ;;  %v4591_v20 = vld [vmem:[%s6078_s1 + $0x1f0] ss:$20 sps:$4 sm:$0xff]  }
 0x127   :  { %3912 = vmatpush3.bf16.msra.mxu0 %v4580_v30  ;;  %3934 = vmatpush3.bf16.msra.mxu1 %v4582_v26 }
 0x128   :  { %3913 = vmatprep.subr.bf16.mxu0 %v4583_v32  ;;  %3935 = vmatprep.subr.bf16.mxu1 %v4585_v33 }
 0x12b   :  { %3914 = vmatpush3.bf16.msra.mxu0 %v4584_v35  ;;  %3936 = vmatpush3.bf16.msra.mxu1 %v4586_v49 }
 0x12c   :  { %3915 = vmatprep.subr.bf16.mxu0 %v4587_v36  ;;  %3937 = vmatprep.subr.bf16.mxu1 %v4589_v38 }
 0x12d   :  { %10 = vsyncpa [#allocation3], 0  ;;  %v4592_v28 = vld [vmem:[%s6078_s1 + $0xb0] ss:$20 sps:$4 sm:$0xff]   ;;  %v4595_v44 = vld [vmem:[%s6078_s1 + $0x218] ss:$20 sps:$4 sm:$0xff]  }
 0x12e   :  { %v4594_v41 = vld [vmem:[%s6078_s1 + $0x330] ss:$20 sps:$4 sm:$0xff]   ;;  %v4597_v45 = vld [vmem:[%s6078_s1 + $0x498] ss:$20 sps:$4 sm:$0xff]   ;;  %v4599_v48 = vld [vmem:[%s6078_s1 + $0x240] ss:$20 sps:$4 sm:$0xff]  }
 0x12f   :  { %3916 = vmatpush3.bf16.msra.mxu0 %v4588_v39  ;;  %3938 = vmatpush3.bf16.msra.mxu1 %v4590_v60  ;;  %v4596_v46 = vld [vmem:[%s6078_s1 + $0xd8] ss:$20 sps:$4 sm:$0xff]   ;;  %v4601_v50 = vld [vmem:[%s6078_s1 + $0x4c0] ss:$20 sps:$4 sm:$0xff]   ;;  %v4603_v54 = vld [vmem:[%s6078_s1 + $0x268] ss:$20 sps:$4 sm:$0xff]  }
 0x130   :  { %3917 = vmatprep.subr.bf16.mxu0 %v4591_v20  ;;  %3939 = vmatprep.subr.bf16.mxu1 %v4593_v40  ;;  %v4598_v47 = vld [vmem:[%s6078_s1 + $0x358] ss:$20 sps:$4 sm:$0xff]   ;;  %v4600_v52 = vld [vmem:[%s6078_s1 + $0x100] ss:$20 sps:$4 sm:$0xff]   ;;  %v4605_v31 = vld [vmem:[%s6078_s1 + $0x4e8] ss:$20 sps:$4 sm:$0xff]  }
 0x131   :  { %v4602_v53 = vld [vmem:[%s6078_s1 + $0x380] ss:$20 sps:$4 sm:$0xff]   ;;  %v4604_v55 = vld [vmem:[%s6078_s1 + $0x128] ss:$20 sps:$4 sm:$0xff]   ;;  %v4607_v57 = vld [vmem:[%s6078_s1 + $0x650] ss:$20 sps:$4 sm:$0xff]  }
 0x132   :  { %v4606_v56 = vld [vmem:[%s6078_s1 + $0x3a8] ss:$20 sps:$4 sm:$0xff]   ;;  %v4609_v59 = vld [vmem:[%s6078_s1 + $0x8d0] ss:$20 sps:$4 sm:$0xff]   ;;  %v4611_v63 = vld [vmem:[%s6078_s1 + $0x678] ss:$20 sps:$4 sm:$0xff]  }
 0x133   :  { %3918 = vmatpush3.bf16.msra.mxu0 %v4592_v28  ;;  %3940 = vmatpush3.bf16.msra.mxu1 %v4594_v41  ;;  %v4608_v61 = vld [vmem:[%s6078_s1 + $0x510] ss:$20 sps:$4 sm:$0xff]   ;;  %v4613_v0 = vld [vmem:[%s6078_s1 + $0x8f8] ss:$20 sps:$4 sm:$0xff]   ;;  %v4615_v3 = vld [vmem:[%s6078_s1 + $0x6a0] ss:$20 sps:$4 sm:$0xff]  }
 0x134   :  { %3919 = vmatprep.subr.bf16.mxu0 %v4595_v44  ;;  %3941 = vmatprep.subr.bf16.mxu1 %v4597_v45  ;;  %v4610_v62 = vld [vmem:[%s6078_s1 + $0x790] ss:$20 sps:$4 sm:$0xff]   ;;  %v4612_v1 = vld [vmem:[%s6078_s1 + $0x538] ss:$20 sps:$4 sm:$0xff]   ;;  %v4618_v4 = vld [vmem:[%s6078_s1 + $0x7e0] ss:$20 sps:$4 sm:$0xff]  }
 0x135   :  { %v4614_v2 = vld [vmem:[%s6078_s1 + $0x7b8] ss:$20 sps:$4 sm:$0xff]   ;;  %v4619_v5 = vld [vmem:[%s6078_s1 + $0x6c8] ss:$20 sps:$4 sm:$0xff]   ;;  %v4623_v7 = vld [vmem:[%s6078_s1 + $0x6f0] ss:$20 sps:$4 sm:$0xff]  }
 0x136   :  { %v4622_v6 = vld [vmem:[%s6078_s1 + $0x808] ss:$20 sps:$4 sm:$0xff]   ;;  %v4625_v8 = vld [vmem:[%s6078_s1 + $0x970] ss:$20 sps:$4 sm:$0xff]   ;;  %v4627_v12 = vld [vmem:[%s6078_s1 + $0x718] ss:$20 sps:$4 sm:$0xff]  }
 0x137   :  { %3920 = vmatpush3.bf16.msra.mxu0 %v4596_v46  ;;  %3942 = vmatpush3.bf16.msra.mxu1 %v4598_v47  ;;  %v4624_v10 = vld [vmem:[%s6078_s1 + $0x5b0] ss:$20 sps:$4 sm:$0xff]   ;;  %v4629_v13 = vld [vmem:[%s6078_s1 + $0x998] ss:$20 sps:$4 sm:$0xff]   ;;  %v4631_v17 = vld [vmem:[%s6078_s1 + $0x740] ss:$20 sps:$4 sm:$0xff]  }
 0x138   :  { %3921 = vmatprep.subr.bf16.mxu0 %v4599_v48  ;;  %3943 = vmatprep.subr.bf16.mxu1 %v4601_v50  ;;  %v4626_v11 = vld [vmem:[%s6078_s1 + $0x830] ss:$20 sps:$4 sm:$0xff]   ;;  %v4628_v14 = vld [vmem:[%s6078_s1 + $0x5d8] ss:$20 sps:$4 sm:$0xff]   ;;  %v4633_v18 = vld [vmem:[%s6078_s1 + $0x9c0] ss:$20 sps:$4 sm:$0xff]  }
 0x139   :  { %v4630_v15 = vld [vmem:[%s6078_s1 + $0x858] ss:$20 sps:$4 sm:$0xff]   ;;  %v4632_v19 = vld [vmem:[%s6078_s1 + $0x600] ss:$20 sps:$4 sm:$0xff]   ;;  %v4635_v22 = vld [vmem:[%s6078_s1 + $0x768] ss:$20 sps:$4 sm:$0xff]  }
 0x13a   :  { %v4634_v21 = vld [vmem:[%s6078_s1 + $0x880] ss:$20 sps:$4 sm:$0xff]   ;;  %v4637_v23 = vld [vmem:[%s6078_s1 + $0x9e8] ss:$20 sps:$4 sm:$0xff]   ;;  %v4639_v30 = vld [vmem:[%s6078_s1 + $0xa10] ss:$20 sps:$4 sm:$0xff]  }
 0x13b   :  { %3922 = vmatpush3.bf16.msra.mxu0 %v4600_v52  ;;  %3944 = vmatpush3.bf16.msra.mxu1 %v4602_v53  ;;  %v4636_v27 = vld [vmem:[%s6078_s1 + $0x628] ss:$20 sps:$4 sm:$0xff]   ;;  %v4647_v29 = vld [vmem:[%s6080_s3 + $0x40] sm:$0xff]   ;;  %v4712_v26 = vmov 0.0   ;;  %v4640_v35 = vld [vmem:[%s6078_s1 + $0xa38] ss:$20 sps:$4 sm:$0xff]  }
 0x13c   :  { %3923 = vmatprep.subr.bf16.mxu0 %v4603_v54  ;;  %3945 = vmatprep.subr.bf16.mxu1 %v4605_v31  ;;  %v4638_v9 = vld [vmem:[%s6078_s1 + $0x8a8] ss:$20 sps:$4 sm:$0xff]   ;;  %v4649_v32 = vld [vmem:[%s6080_s3] sm:$0xff]   ;;  %vm4713_vm0 = vmmov 0   ;;  %v4657_v36 = vld [vmem:[%s6080_s3 + $0x10] sm:$0xff]   ;;  %vm3365_vm1 = vcmask 1040384  }
 0x13d   :  { %v4651_v33 = vld [vmem:[%s6080_s3 + $0x48] sm:$0xff]   ;;  %v4659_v38 = vld [vmem:[%s6080_s3 + $0x58] sm:$0xff]   ;;  %v4663_v20 = vld [vmem:[%s6080_s3 + $0x60] sm:$0xff]   ;;  %vm3361_vm2 = vcmask 924672   ;;  %s4714_s15 = smov [#allocation2]  }
 0x13e   :  { %v4653_v49 = vld [vmem:[%s6080_s3 + $0x8] sm:$0xff]   ;;  %v4661_v60 = vld [vmem:[%s6080_s3 + $0x18] sm:$0xff]   ;;  %v4643_v40 = vld [vmem:[%s6078_s1 + $0xab0] ss:$20 sps:$4 sm:$0xff]   ;;  %s3498_s16 = sshll.u32 %s4714_s15, 4  ;;  %s3499_s16 = int_to_ptr.vmem [resolvable:$true] %s3498_s16 }
 0x13f   :  { %3924 = vmatpush3.bf16.msra.mxu0 %v4604_v55  ;;  %3946 = vmatpush3.bf16.msra.mxu1 %v4606_v56  ;;  %v4642_v39 = vld [vmem:[%s6078_s1 + $0xa88] ss:$20 sps:$4 sm:$0xff]   ;;  %v4665_v28 = vld [vmem:[%s6080_s3 + $0x20] sm:$0xff]   ;;  %v4644_v44 = vld [vmem:[%s6078_s1 + $0xad8] ss:$20 sps:$4 sm:$0xff]   ;;  %p4691_p1 = scmp.lt.s32.totalorder %s3499_s16, %s3499_s16 }
 0x140   :  { %3953 = vmatprep.subr.bf16.mxu0 %v4607_v57  ;;  %3975 = vmatprep.subr.bf16.mxu1 %v4609_v59  ;;  %v4667_v41 = vld [vmem:[%s6080_s3 + $0x68] sm:$0xff]   ;;  %v4671_v46 = vld [vmem:[%s6080_s3 + $0x70] sm:$0xff]   ;;  %v4675_v50 = vld [vmem:[%s6080_s3 + $0x78] sm:$0xff]  }
 0x141   :  { %v4669_v45 = vld [vmem:[%s6080_s3 + $0x28] sm:$0xff]   ;;  %v4645_v47 = vld [vmem:[%s6078_s1 + $0xb00] ss:$20 sps:$4 sm:$0xff]   ;;  %v4677_v54 = vld [vmem:[%s6080_s3 + $0x38] sm:$0xff]  }
 0x142   :  { %2861 = vmatmul.mubr.bf16.vlgmr.msra.gmra.mrb[4].mxu0 %v4964_v16  ;;  %2901 = vmatmul.mubr.bf16.vlgmr.msra.gmra.mrb[4].mxu1 %v5166_v24  ;;  %v4617_v16 = vld [vmem:[%s6078_s1 + $0x920] ss:$20 sps:$4 sm:$0xff]   ;;  %v4646_v52 = vld [vmem:[%s6078_s1 + $0xb28] ss:$20 sps:$4 sm:$0xff]  }
 0x143   :  { %3954 = vmatpush3.bf16.msra.mxu0 %v4608_v61  ;;  %3976 = vmatpush3.bf16.msra.mxu1 %v4610_v62  ;;  %v4616_v24 = vld [vmem:[%s6078_s1 + $0x560] ss:$20 sps:$4 sm:$0xff]   ;;  %v4652_v55 = vld [vmem:[%s6080_s3 + $0xc8] sm:$0xff]   ;;  %v4662_v61 = vld [vmem:[%s6080_s3 + $0x98] sm:$0xff]  }
 0x144   :  { %3955 = vmatprep.subr.bf16.mxu0 %v4611_v63  ;;  %3977 = vmatprep.subr.bf16.mxu1 %v4613_v0  ;;  %v4673_v48 = vld [vmem:[%s6080_s3 + $0x30] sm:$0xff]   ;;  %v4648_v53 = vld [vmem:[%s6080_s3 + $0xc0] sm:$0xff]   ;;  %v4654_v56 = vld [vmem:[%s6080_s3 + $0x88] sm:$0xff]  }
 0x145   :  { %2940 = vmatprep.mubr.bf16.mxu0 %v5202_v34  ;;  %2980 = vmatprep.mubr.bf16.mxu1 %v5400_v42  ;;  %v4621_v34 = vld [vmem:[%s6078_s1 + $0x948] ss:$20 sps:$4 sm:$0xff]   ;;  %v4650_v31 = vld [vmem:[%s6080_s3 + $0x80] sm:$0xff]   ;;  %v4656_v57 = vld [vmem:[%s6080_s3 + $0xd0] sm:$0xff]  }
 0x146   :  { %v4620_v42 = vld [vmem:[%s6078_s1 + $0x588] ss:$20 sps:$4 sm:$0xff]   ;;  %v4658_v59 = vld [vmem:[%s6080_s3 + $0x90] sm:$0xff]   ;;  %v4664_v62 = vld [vmem:[%s6080_s3 + $0xe0] sm:$0xff]  }
 0x147   :  { %3956 = vmatpush3.bf16.msra.mxu0 %v4612_v1  ;;  %3978 = vmatpush3.bf16.msra.mxu1 %v4614_v2  ;;  %v4666_v63 = vld [vmem:[%s6080_s3 + $0xa0] sm:$0xff]   ;;  %v4668_v0 = vld [vmem:[%s6080_s3 + $0xe8] sm:$0xff]   ;;  %v4672_v2 = vld [vmem:[%s6080_s3 + $0xf0] sm:$0xff]  }
 0x148   :  { %3957 = vmatprep.subr.bf16.mxu0 %v4615_v3  ;;  %3979 = vmatprep.subr.bf16.mxu1 %v4617_v16  ;;  %v4670_v1 = vld [vmem:[%s6080_s3 + $0xa8] sm:$0xff]   ;;  %v4674_v3 = vld [vmem:[%s6080_s3 + $0xb0] sm:$0xff]   ;;  %v4676_v16 = vld [vmem:[%s6080_s3 + $0xf8] sm:$0xff]  }
 0x14b   :  { %3958 = vmatpush3.bf16.msra.mxu0 %v4616_v24  ;;  %3980 = vmatpush3.bf16.msra.mxu1 %v4618_v4  ;;  %v4678_v24 = vld [vmem:[%s6080_s3 + $0xb8] sm:$0xff]   ;;  %v523_v4 = vsub.s32 0, %v4862_v43 }
 0x14c   :  { %3959 = vmatprep.subr.bf16.mxu0 %v4619_v5  ;;  %3981 = vmatprep.subr.bf16.mxu1 %v4621_v34  ;;  %v531_v5 = vsub.s32 2, %v4862_v43  ;;  %v519_v34 = vld [vmem:[%s6079_s2] sm:$0x1f] }
 0x14f   :  { %3960 = vmatpush3.bf16.msra.mxu0 %v4620_v42  ;;  %3982 = vmatpush3.bf16.msra.mxu1 %v4622_v6  ;;  %v527_v42 = vsub.s32 1, %v4862_v43  ;;  %v535_v6 = vsub.s32 3, %v4862_v43 }
 0x150   :  { %3961 = vmatprep.subr.bf16.mxu0 %v4623_v7  ;;  %3983 = vmatprep.subr.bf16.mxu1 %v4625_v8  ;;  %v524_v7 = vrot.slane %v519_v34, %v523_v4  ;;  %v532_v8 = vrot.slane %v519_v34, %v531_v5 }
 0x153   :  { %3962 = vmatpush3.bf16.msra.mxu0 %v4624_v10  ;;  %3984 = vmatpush3.bf16.msra.mxu1 %v4626_v11  ;;  %v528_v10 = vrot.slane %v519_v34, %v527_v42  ;;  %v536_v11 = vrot.slane %v519_v34, %v535_v6 }
 0x154   :  { %3963 = vmatprep.subr.bf16.mxu0 %v4627_v12  ;;  %3985 = vmatprep.subr.bf16.mxu1 %v4629_v13 }
 0x157   :  { %3964 = vmatpush3.bf16.msra.mxu0 %v4628_v14  ;;  %3986 = vmatpush3.bf16.msra.mxu1 %v4630_v15 }
 0x158   :  { %3965 = vmatprep.subr.bf16.mxu0 %v4631_v17  ;;  %3987 = vmatprep.subr.bf16.mxu1 %v4633_v18 }
 0x15b   :  { %3966 = vmatpush3.bf16.msra.mxu0 %v4632_v19  ;;  %3988 = vmatpush3.bf16.msra.mxu1 %v4634_v21 }
 0x15c   :  { %3967 = vmatprep.subr.bf16.mxu0 %v4635_v22  ;;  %3989 = vmatprep.subr.bf16.mxu1 %v4637_v23 }
 0x15f   :  { %3968 = vmatpush3.bf16.msra.mxu0 %v4636_v27  ;;  %3990 = vmatpush3.bf16.msra.mxu1 %v4638_v9 }
 0x160   :  { %4059 = vmatprep.subr.bf16.mxu0 %v4712_v26  ;;  %4006 = vmatprep.subr.bf16.mxu1 %v4647_v29 }
 0x162   :  { %2941 = vmatmul.mubr.bf16.vlgmr.msra.gmra.mrb[8].mxu0 %v5383_v37  ;;  %2981 = vmatmul.mubr.bf16.vlgmr.msra.gmra.mrb[8].mxu1 %v5591_v51  ;;  %v4655_v37 = vld [vmem:[%s6080_s3 + $0x50] sm:$0xff]  }
 0x163   :  { %4060 = vmatpush3.bf16.msra.mxu0 %v4639_v30  ;;  %4075 = vmatprep.mubr.msk.bf16.mxu0 %vm4713_vm0, %v4712_v26  ;;  %v4641_v51 = vld [vmem:[%s6078_s1 + $0xa60] ss:$20 sps:$4 sm:$0xff]  }
 0x164   :  { %4061 = vmatprep.subr.bf16.mxu0 %v4712_v26  ;;  %4007 = vmatpush3.bf16.msra.mxu1 %v4649_v32 }
 0x165   :  { %4008 = vmatprep.subr.bf16.mxu1 %v4651_v33 }
 0x167   :  { %4062 = vmatpush3.bf16.msra.mxu0 %v4640_v35 }
 0x168   :  { %4063 = vmatprep.subr.bf16.mxu0 %v4712_v26  ;;  %4009 = vmatpush3.bf16.msra.mxu1 %v4653_v49 }
 0x169   :  { %4010 = vmatprep.subr.bf16.mxu1 %v4655_v37  ;;  %v4679_v37 = vld [vmem:[%s6080_s3 + $0x100] sm:$0xff]  }
 0x16b   :  { %4064 = vmatpush3.bf16.msra.mxu0 %v4641_v51 }
 0x16c   :  { %4065 = vmatprep.subr.bf16.mxu0 %v4712_v26  ;;  %4011 = vmatpush3.bf16.msra.mxu1 %v4657_v36 }
 0x16d   :  { %4012 = vmatprep.subr.bf16.mxu1 %v4659_v38  ;;  %v4680_v38 = vld [vmem:[%s6080_s3 + $0x108] sm:$0xff]  }
 0x16f   :  { %4066 = vmatpush3.bf16.msra.mxu0 %v4642_v39  ;;  %v4681_v39 = vld [vmem:[%s6080_s3 + $0x110] sm:$0xff]  }
 0x170   :  { %4067 = vmatprep.subr.bf16.mxu0 %v4712_v26  ;;  %4013 = vmatpush3.bf16.msra.mxu1 %v4661_v60  ;;  %v4682_v60 = vld [vmem:[%s6080_s3 + $0x118] sm:$0xff]  }
 0x171   :  { %4014 = vmatprep.subr.bf16.mxu1 %v4663_v20  ;;  %v4683_v20 = vld [vmem:[%s6080_s3 + $0x120] sm:$0xff]  }
 0x173   :  { %4068 = vmatpush3.bf16.msra.mxu0 %v4643_v40  ;;  %v4684_v40 = vld [vmem:[%s6080_s3 + $0x128] sm:$0xff]  }
 0x174   :  { %4069 = vmatprep.subr.bf16.mxu0 %v4712_v26  ;;  %4015 = vmatpush3.bf16.msra.mxu1 %v4665_v28  ;;  %v539_v28 = vsub.s32 4, %v4862_v43 }
 0x175   :  { %4016 = vmatprep.subr.bf16.mxu1 %v4667_v41  ;;  %v4574_v41 = vld [vmem:[%s6080_s3 + $0x138] ss:$0 sps:$4 sm:$0x11]  }
 0x177   :  { %4070 = vmatpush3.bf16.msra.mxu0 %v4644_v44  ;;  %v4685_v44 = vld [vmem:[%s6080_s3 + $0x130] sm:$0xff]  }
 0x178   :  { %4071 = vmatprep.subr.bf16.mxu0 %v4712_v26  ;;  %4017 = vmatpush3.bf16.msra.mxu1 %v4669_v45  ;;  %v3367_v45 = vsel %vm3365_vm1, 65535, %v4711_v58 }
 0x179   :  { %4018 = vmatprep.subr.bf16.mxu1 %v4671_v46 }
 0x17b   :  { %4072 = vmatpush3.bf16.msra.mxu0 %v4645_v47  ;;  %v540_v47 = vrot.slane %v519_v34, %v539_v28 }
 0x17c   :  { %4073 = vmatprep.subr.bf16.mxu0 %v4712_v26  ;;  %4019 = vmatpush3.bf16.msra.mxu1 %v4673_v48 }
 0x17d   :  { %4020 = vmatprep.subr.bf16.mxu1 %v4675_v50 }
 0x17f   :  { %4074 = vmatpush3.bf16.msra.mxu0 %v4646_v52 }
 0x180   :  { %4028 = vmatprep.subr.bf16.mxu0 %v4648_v53  ;;  %4021 = vmatpush3.bf16.msra.mxu1 %v4677_v54  ;;  %v3369_v53 = vand.u32 %v4574_v41, %v3367_v45 }
 0x181   :  { %4079 = vmatprep.subr.bf16.mxu1 %v4712_v26 }
 0x182   :  { %4076 = vmatmul.mubr.bf16.vlgmr.msra.gmra.mrb[12].mxu0 %v5693_v25  ;;  %v4660_v25 = vld [vmem:[%s6080_s3 + $0xd8] sm:$0xff]  }
 0x183   :  { %4029 = vmatpush3.bf16.msra.mxu0 %v4650_v31 }
 0x184   :  { %4030 = vmatprep.subr.bf16.mxu0 %v4652_v55 }
 0x187   :  { %4031 = vmatpush3.bf16.msra.mxu0 %v4654_v56 }
 0x188   :  { %4032 = vmatprep.subr.bf16.mxu0 %v4656_v57 }
 0x18b   :  { %4033 = vmatpush3.bf16.msra.mxu0 %v4658_v59 }
 0x18c   :  { %4034 = vmatprep.subr.bf16.mxu0 %v4660_v25 }
 0x18f   :  { %4035 = vmatpush3.bf16.msra.mxu0 %v4662_v61 }
 0x190   :  { %4036 = vmatprep.subr.bf16.mxu0 %v4664_v62 }
 0x193   :  { %4037 = vmatpush3.bf16.msra.mxu0 %v4666_v63 }
 0x194   :  { %4038 = vmatprep.subr.bf16.mxu0 %v4668_v0 }
 0x197   :  { %4039 = vmatpush3.bf16.msra.mxu0 %v4670_v1 }
 0x198   :  { %4040 = vmatprep.subr.bf16.mxu0 %v4672_v2 }
 0x19b   :  { %4041 = vmatpush3.bf16.msra.mxu0 %v4674_v3 }
 0x19c   :  { %4042 = vmatprep.subr.bf16.mxu0 %v4676_v16 }
 0x19f   :  { %4043 = vmatpush3.bf16.msra.mxu0 %v4678_v24 }
 0x1f5   :  { %v2616_v12 = vpop.f32.mrb[0].mxu0  ;;  %v2821_v13 = vpop.f32.mrb[0].mxu1 }
 0x1f6   :  { %v4099_v14 = vadd.f32 %v2616_v12, %v524_v7  ;;  %v4101_v15 = vadd.f32 %v2821_v13, %v532_v8  ;;  %v2618_v17 = vpop.f32.mrb[1].mxu0  ;;  %v2823_v18 = vpop.f32.mrb[1].mxu1  ;;  %v3867_v13 = vld [vmem:[%s6081_s4] ss:$0 sm:$0xff]  ;;  %s4686_s4 = scalar_lea.vmem %s3499_s16, 32 }
 0x1f7   :  { %v4100_v19 = vadd.f32 %v2618_v17, %v528_v10  ;;  %v4102_v21 = vadd.f32 %v2823_v18, %v536_v11  ;;  %v2620_v22 = vpop.f32.mrb[2].mxu0  ;;  %v2825_v23 = vpop.f32.mrb[2].mxu1  ;;  %p4687_p0 = scmp.ne.s32.totalorder %s3499_s16, %s4686_s4  ;;  %p4692_p2 = scmp.lt.s32.totalorder %s4686_s4, %s4686_s4 }
 0x1f8   :  { %v3028_v27 = vmax.f32 %v4099_v14, 0.0  ;;  %v3030_v9 = vmax.f32 %v4101_v15, 0.0  ;;  %v2621_v29 = vpop.f32.mrb[3].mxu0  ;;  %v2826_v30 = vpop.f32.mrb[3].mxu1 }
 0x1f9   :  { %v3029_v32 = vmax.f32 %v4100_v19, 0.0  ;;  %v3031_v33 = vmax.f32 %v4102_v21, 0.0  ;;  %p4693_p3 = por %p4692_p2, %p4691_p1 }
 0x1fa   :  { %v3033_v51 = vpack.c.bf16 %v3028_v27, %v3028_v27  ;;  %v3035_v36 = vpack.c.bf16 %v3030_v9, %v3030_v9 }
 0x1fb   :  { %v3034_v35 = vpack.c.bf16 %v3029_v32, %v3029_v32  ;;  %v3036_v49 = vpack.c.bf16 %v3031_v33, %v3031_v33  ;;  %p4694_p4 = pnand %p4693_p3, %p4687_p0 }
 0x1fd   :  { %3403 = vmatprep.mubr.bf16.mxu1 %v3034_v35  ;;  %3443 = vmatprep.mubr.bf16.mxu0 %v3036_v49 }
 0x1fe   :  { %3404 = vmatmul.mubr.bf16.vlgmr.msra.gmra.mrb[12].mxu1 %v3033_v51  ;;  %3444 = vmatmul.mubr.bf16.vlgmr.msra.gmra.mrb[16].mxu0 %v3035_v36 }
 0x1ff   :  { %4080 = vmatpush3.bf16.msra.mxu1 %v4679_v37  ;;  %4095 = vmatprep.mubr.msk.bf16.mxu1 %vm4713_vm0, %v4712_v26 }
 0x200   :  { %4081 = vmatprep.subr.bf16.mxu1 %v4712_v26 }
 0x203   :  { %4082 = vmatpush3.bf16.msra.mxu1 %v4680_v38 }
 0x204   :  { %4083 = vmatprep.subr.bf16.mxu1 %v4712_v26 }
 0x207   :  { %4084 = vmatpush3.bf16.msra.mxu1 %v4681_v39 }
 0x208   :  { %4085 = vmatprep.subr.bf16.mxu1 %v4712_v26 }
 0x20b   :  { %4086 = vmatpush3.bf16.msra.mxu1 %v4682_v60 }
 0x20c   :  { %4087 = vmatprep.subr.bf16.mxu1 %v4712_v26 }
 0x20f   :  { %4088 = vmatpush3.bf16.msra.mxu1 %v4683_v20 }
 0x210   :  { %4089 = vmatprep.subr.bf16.mxu1 %v4712_v26 }
 0x213   :  { %4090 = vmatpush3.bf16.msra.mxu1 %v4684_v40 }
 0x214   :  { %4091 = vmatprep.subr.bf16.mxu1 %v4712_v26 }
 0x215   :  { %v3925_v46 = vpop.f32.mrb[4].mxu0  ;;  %v3947_v48 = vpop.f32.mrb[4].mxu1 }
 0x216   :  { %v3926_v50 = vpop.f32.mrb[5].mxu0  ;;  %v3948_v52 = vpop.f32.mrb[5].mxu1 }
 0x217   :  { %v3927_v43 = vadd.f32 %v3926_v50, %v3925_v46  ;;  %v3928_v54 = vpop.f32.mrb[6].mxu0  ;;  %v3949_v31 = vadd.f32 %v3948_v52, %v3947_v48  ;;  %v3950_v55 = vpop.f32.mrb[6].mxu1  ;;  %4092 = vmatpush3.bf16.msra.mxu1 %v4685_v44 }
 0x218   :  { %v3929_v56 = vpop.f32.mrb[7].mxu0  ;;  %v3951_v57 = vpop.f32.mrb[7].mxu1  ;;  %4093 = vmatprep.subr.bf16.mxu1 %v4712_v26 }
 0x219   :  { %v2863_v59 = vadd.f32 %v3927_v43, %v540_v47 }
 0x21b   :  { %v2903_v25 = vadd.f32 %v3949_v31, %v2863_v59  ;;  %4094 = vmatpush3.bf16.msra.mxu1 %v3369_v53 }
 0x235   :  { %v3969_v58 = vpop.f32.mrb[8].mxu0  ;;  %v3991_v61 = vpop.f32.mrb[8].mxu1 }
 0x236   :  { %v3970_v62 = vpop.f32.mrb[9].mxu0  ;;  %v3992_v63 = vpop.f32.mrb[9].mxu1 }
 0x237   :  { %v3971_v0 = vadd.f32 %v3970_v62, %v3969_v58  ;;  %v3972_v1 = vpop.f32.mrb[10].mxu0  ;;  %v3993_v2 = vadd.f32 %v3992_v63, %v3991_v61  ;;  %v3994_v3 = vpop.f32.mrb[10].mxu1 }
 0x238   :  { %v3973_v16 = vpop.f32.mrb[11].mxu0  ;;  %v3995_v24 = vpop.f32.mrb[11].mxu1 }
 0x239   :  { %v2943_v4 = vadd.f32 %v3971_v0, %v2903_v25 }
 0x23b   :  { %v2983_v5 = vadd.f32 %v3993_v2, %v2943_v4 }
 0x255   :  { %v3022_v34 = vpop.f32.mrb[12].mxu0 }
 0x256   :  { %v3023_v42 = vadd.f32 %v3022_v34, %v2983_v5  ;;  %v4077_v6 = vpop.f32.mrb[13].mxu0 }
 0x257   :  { %v3025_v7 = vpop.f32.mrb[14].mxu0 }
 0x258   :  { %v3032_v26 = vmax.f32 %v3023_v42, 0.0  ;;  %v4078_v8 = vpop.f32.mrb[15].mxu0 }
 0x25a   :  { %v3037_v10 = vpack.c.bf16 %v3032_v26, %v3032_v26 }
 0x25c   :  { %4096 = vmatmul.mubr.msk.bf16.vlgmr.msra.gmra.mrb[16].mxu1 %vm3361_vm2, %v3037_v10 }
 0x2d1   :  { %v4022_v11 = vpop.f32.mrb[12].mxu1  ;;  %v4044_v12 = vpop.f32.mrb[16].mxu0 }
 0x2d2   :  { %v4023_v14 = vpop.f32.mrb[13].mxu1  ;;  %v4045_v15 = vpop.f32.mrb[17].mxu0 }
 0x2d3   :  { %v4024_v17 = vadd.f32 %v4023_v14, %v4022_v11  ;;  %v4046_v18 = vadd.f32 %v4045_v15, %v4044_v12  ;;  %v4025_v19 = vpop.f32.mrb[14].mxu1  ;;  %v4047_v21 = vpop.f32.mrb[18].mxu0 }
 0x2d4   :  { %v4026_v22 = vpop.f32.mrb[15].mxu1  ;;  %v4048_v23 = vpop.f32.mrb[19].mxu0 }
 0x2d5   :  { %v3406_v27 = vadd.f32 %v4024_v17, %v3867_v13 }
 0x2d7   :  { %v3446_v9 = vadd.f32 %v4046_v18, %v3406_v27 }
 0x32f   :  { %v3485_v29 = vpop.f32.mrb[16].mxu1 }
 0x330   :  { %v3486_v30 = vadd.f32 %v3485_v29, %v3446_v9  ;;  %v4097_v32 = vpop.f32.mrb[17].mxu1 }
 0x331   :  { %v3488_v33 = vpop.f32.mrb[18].mxu1 }
 0x332   :  { %3491 = vst [vmem:[#allocation2] sm:$0x3] %v3486_v30  ;;  %v4098_v35 = vpop.f32.mrb[19].mxu1 }
 0x333   :  { %4697 = shalt.err (!%p4694_p4)
}
 0x334   :  { %s4698_s19 = scalar_lea.hbm %s6082_s5, 32 }
 0x335   :  { %p4699_p5 = scmp.ne.s32.totalorder %s6082_s5, %s4698_s19  ;;  %p4702_p6 = scmp.lt.u32.totalorder %s4698_s19, %s6082_s5 }
 0x337   :  { %p4704_p7 = pnand %p4702_p6, %p4699_p5 }
 0x339   :  { %4707 = shalt.err (!%p4704_p7)
}
 0x33a   :  { %3501 = dma.vmem_to_hbm [thread:$0]  %s3499_s16, 32, %s6082_s5, [#allocation3]  }
 0x33b   :  { %4708 = dma.done.wait [#allocation3], 32  }
 0x33c   :  { %4709 = vsyncadd [#allocation3], 4294967264 }
 0x33d   :  { %3505 = vsyncpa [#allocation3], 1 }

</bundles_post_ra>
